<compile_context>
chip_gen: v5e
topology: v5e:2x2
jax: 0.10.0
libtpu: 0.0.40
codegen_flags: <defaults>
</compile_context>

<pallas_src>
import functools

import jax
import jax.numpy as jnp
from jax.experimental import pallas as pl
from jax.experimental.pallas import tpu as pltpu

# ----------------------------------------------------------------------------
# VMEM budget: stay well under the physical capacity of the current generation
# (64 MiB on v7x, 128 MiB on v5e/v6e).
# ----------------------------------------------------------------------------
try:
    _VMEM_CAP = int(getattr(pltpu.get_tpu_info(), "vmem_capacity_bytes",
                            64 * 1024 * 1024))
except Exception:  # pragma: no cover - conservative fallback
    _VMEM_CAP = 64 * 1024 * 1024
_VMEM_LIMIT = max(32 * 1024 * 1024, min((_VMEM_CAP * 3) // 4, 96 * 1024 * 1024))

_VMEM_SPEC = pl.BlockSpec(memory_space=pltpu.MemorySpace.VMEM)
_SMALL_PARAMS = pltpu.CompilerParams(vmem_limit_bytes=_VMEM_LIMIT)


def _round_up(x, m):
    return ((x + m - 1) // m) * m


def _cpad(c):
    """Pad a channel count up to a multiple of 128 (lane-dense)."""
    return _round_up(c, 128)


# ----------------------------------------------------------------------------
# Fused conv GEMM kernel:  out = act( (A @ B) * scale + shift [+ residual] )
# Grid = (M tiles, N tiles, K tiles); K is the sequential reduction axis.
# ----------------------------------------------------------------------------
def _conv_gemm_kernel(a_ref, b_ref, scale_ref, shift_ref, *rest, relu, has_res):
    if has_res:
        res_ref, o_ref, acc_ref = rest
    else:
        o_ref, acc_ref = rest
        res_ref = None

    @pl.when(pl.program_id(2) == 0)
    def _():
        acc_ref[...] = jnp.zeros_like(acc_ref)

    acc_ref[...] += jnp.dot(a_ref[...], b_ref[...],
                            preferred_element_type=jnp.float32)

    @pl.when(pl.program_id(2) == pl.num_programs(2) - 1)
    def _():
        # Fused BN (+ residual add) (+ ReLU) epilogue, in f32 (v5e has no bf16 VPU).
        y = acc_ref[...] * scale_ref[...] + shift_ref[...]
        if has_res:
            y = y + res_ref[...].astype(jnp.float32)
        if relu:
            y = jnp.maximum(y, 0.0)
        o_ref[...] = y.astype(o_ref.dtype)


def _conv_gemm(col, wmat, scale, shift, res, relu):
    """col: [M, K] bf16, wmat: [K, N] bf16 (N multiple of 128),
    scale/shift: [1, N] f32, res: optional [M, N] bf16 -> [M, N] bf16."""
    M, K = col.shape
    _, N = wmat.shape

    Kp = _round_up(K, 128)
    if Kp != K:  # zero-pad K; padded columns/rows contribute nothing
        col = jnp.pad(col, ((0, 0), (0, Kp - K)))
        wmat = jnp.pad(wmat, ((0, Kp - K), (0, 0)))
    tk = 256 if Kp % 256 == 0 else 128
    # M: use 128 tiles when aligned; small M (late layers) -> full-extent block.
    tm = 128 if M % 128 == 0 else M
    tn = 128

    grid = (M // tm, N // tn, Kp // tk)

    in_specs = [
        pl.BlockSpec((tm, tk), lambda i, j, k: (i, k)),
        pl.BlockSpec((tk, tn), lambda i, j, k: (k, j)),
        pl.BlockSpec((1, tn), lambda i, j, k: (0, j)),
        pl.BlockSpec((1, tn), lambda i, j, k: (0, j)),
    ]
    args = [col, wmat, scale, shift]
    if res is not None:
        in_specs.append(pl.BlockSpec((tm, tn), lambda i, j, k: (i, j)))
        args.append(res)

    kern = functools.partial(_conv_gemm_kernel, relu=relu,
                             has_res=res is not None)
    return pl.pallas_call(
        kern,
        out_shape=jax.ShapeDtypeStruct((M, N), jnp.bfloat16),
        grid=grid,
        in_specs=in_specs,
        out_specs=pl.BlockSpec((tm, tn), lambda i, j, k: (i, j)),
        scratch_shapes=[pltpu.VMEM((tm, tn), jnp.float32)],
        compiler_params=pltpu.CompilerParams(
            dimension_semantics=("parallel", "parallel", "arbitrary"),
            vmem_limit_bytes=_VMEM_LIMIT),
    )(*args)


# ----------------------------------------------------------------------------
# Conv wrapper: NHWC im2col (glue) + fused GEMM/BN/ReLU/residual kernel.
# ----------------------------------------------------------------------------
def _im2col_nhwc(x, kh, kw, stride, pad):
    """x: [N, H, W, C] -> [N*Ho*Wo, kh*kw*C] (tap-major, channel-minor)."""
    N, H, W, C = x.shape
    xp = jnp.pad(x, ((0, 0), (pad, pad), (pad, pad), (0, 0)))
    Ho = (H + 2 * pad - kh) // stride + 1
    Wo = (W + 2 * pad - kw) // stride + 1
    taps = []
    for i in range(kh):
        for j in range(kw):
            taps.append(xp[:, i:i + stride * Ho:stride,
                           j:j + stride * Wo:stride, :])
    col = taps[0] if len(taps) == 1 else jnp.concatenate(taps, axis=-1)
    return col.reshape(N * Ho * Wo, kh * kw * C), Ho, Wo


def _conv_weight_matrix(w, cin_pad, cout_pad):
    """w: [Cout, Cin, kh, kw] (torch layout) -> [kh*kw*cin_pad, cout_pad] bf16."""
    O, C, kh, kw = w.shape
    w = jnp.pad(w, ((0, cout_pad - O), (0, cin_pad - C), (0, 0), (0, 0)))
    return w.transpose(2, 3, 1, 0).reshape(kh * kw * cin_pad,
                                           cout_pad).astype(jnp.bfloat16)


def _pad_vec(v, n):
    return jnp.pad(v, (0, n - v.shape[0]))


def conv2d_bn(x, w, scale, shift, *, stride, pad, relu=True, res=None):
    """x: [N, H, W, Cin_pad] bf16; w: [Cout, Cin_real, kh, kw] f32.
    Returns [N, Ho, Wo, Cout_pad] bf16 with BN(+res)(+ReLU) fused in."""
    N, H, W, Cp = x.shape
    O = w.shape[0]
    Op = _cpad(O)

    wmat = _conv_weight_matrix(w, Cp, Op)
    col, Ho, Wo = _im2col_nhwc(x, w.shape[2], w.shape[3], stride, pad)
    scale_p = _pad_vec(scale, Op).reshape(1, Op).astype(jnp.float32)
    shift_p = _pad_vec(shift, Op).reshape(1, Op).astype(jnp.float32)
    res2d = None if res is None else res.reshape(-1, Op)

    out = _conv_gemm(col, wmat, scale_p, shift_p, res2d, relu)
    return out.reshape(N, Ho, Wo, Op)


# ----------------------------------------------------------------------------
# Max-pool 3x3 / stride 2 / pad 1: single kernel folding 9 taps taken from the
# four even/odd phase views of the zero-padded input (input is post-ReLU >= 0,
# so zero padding is equivalent to -inf padding).
# ----------------------------------------------------------------------------
def _maxpool_kernel(p00_ref, p01_ref, p10_ref, p11_ref, o_ref):
    ph = {(0, 0): p00_ref[...], (0, 1): p01_ref[...],
          (1, 0): p10_ref[...], (1, 1): p11_ref[...]}
    Ho, Wo = o_ref.shape[1], o_ref.shape[2]
    taps = ((0, 0), (0, 1), (1, 0))  # (block offset a, phase r): di = 2a + r in {0,1,2}
    best = None
    for a, r in taps:
        for b, s in taps:
            v = ph[(r, s)][:, a:a + Ho, b:b + Wo, :]
            best = v if best is None else jnp.maximum(best, v)
    o_ref[...] = best


def maxpool2d_nhwc(x, k=3, stride=2, pad=1):
    N, H, W, C = x.shape
    assert k == 3 and stride == 2 and pad == 1 and H % 2 == 0 and W % 2 == 0
    Ho = (H + 2 * pad - k) // stride + 1
    Wo = (W + 2 * pad - k) // stride + 1
    xp = jnp.pad(x, ((0, 0), (pad, pad), (pad, pad), (0, 0)))
    phases = [xp[:, r::2, s::2, :] for r in (0, 1) for s in (0, 1)]
    return pl.pallas_call(
        _maxpool_kernel,
        out_shape=jax.ShapeDtypeStruct((N, Ho, Wo, C), x.dtype),
        in_specs=[_VMEM_SPEC] * 4,
        out_specs=_VMEM_SPEC,
        compiler_params=_SMALL_PARAMS,
    )(*phases)


# ----------------------------------------------------------------------------
# Global average pool (lane-dense [N, C] output) and fused classifier heads.
# ----------------------------------------------------------------------------
def _gap_kernel(x_ref, o_ref, *, inv_hw):
    o_ref[...] = jnp.sum(x_ref[...].astype(jnp.float32), axis=1) * inv_hw


def global_avgpool_nhwc(x):
    N, H, W, C = x.shape
    xr = x.reshape(N, H * W, C)
    return pl.pallas_call(
        functools.partial(_gap_kernel, inv_hw=1.0 / float(H * W)),
        out_shape=jax.ShapeDtypeStruct((N, C), jnp.float32),
        in_specs=[_VMEM_SPEC],
        out_specs=_VMEM_SPEC,
        compiler_params=_SMALL_PARAMS,
    )(xr)


def _linear_kernel(x_ref, w_ref, b_ref, o_ref):
    o_ref[...] = (jnp.dot(x_ref[...], w_ref[...],
                          preferred_element_type=jnp.float32) + b_ref[...])


def fused_heads(feat, params):
    """One lane-dense GEMM for l0/l1/l2 (N = 168+11+7 padded to 256)."""
    w = jnp.concatenate([params['l0_w'], params['l1_w'], params['l2_w']], axis=1)
    b = jnp.concatenate([params['l0_b'], params['l1_b'], params['l2_b']], axis=1)
    n_tot = w.shape[1]
    n_pad = _round_up(n_tot, 128)
    w = jnp.pad(w, ((0, 0), (0, n_pad - n_tot)))
    b = jnp.pad(b, ((0, 0), (0, n_pad - n_tot)))
    out = pl.pallas_call(
        _linear_kernel,
        out_shape=jax.ShapeDtypeStruct((feat.shape[0], n_pad), jnp.float32),
        in_specs=[_VMEM_SPEC] * 3,
        out_specs=_VMEM_SPEC,
        compiler_params=_SMALL_PARAMS,
    )(feat, w, b)
    return out[:, :168], out[:, 168:179], out[:, 179:186]


# ----------------------------------------------------------------------------
# ResNet-34 structure
# ----------------------------------------------------------------------------
LAYER_SPEC = [(64, 3, 1), (128, 4, 2), (256, 6, 2), (512, 3, 2)]


def block_configs():
    cfgs = []
    in_ch = 64
    for out_ch, n_blocks, first_stride in LAYER_SPEC:
        for b in range(n_blocks):
            stride = first_stride if b == 0 else 1
            cfgs.append((in_ch, out_ch, stride,
                         stride != 1 or in_ch != out_ch))
            in_ch = out_ch
    return cfgs


def init_resnet34_params(key):
    keys = iter(jax.random.split(key, 512))

    def nk():
        return next(keys)

    def conv_w(o, c, kh, kw):
        fan_in = c * kh * kw
        return jax.random.normal(nk(), (o, c, kh, kw), jnp.float32) * \
            (2.0 / fan_in) ** 0.5

    def bn(c):  # inference-mode BN folded into scale / shift
        gamma = 1.0 + 0.1 * jax.random.normal(nk(), (c,), jnp.float32)
        beta = 0.1 * jax.random.normal(nk(), (c,), jnp.float32)
        r_mean = 0.1 * jax.random.normal(nk(), (c,), jnp.float32)
        r_var = jnp.abs(1.0 + 0.1 * jax.random.normal(nk(), (c,), jnp.float32))
        scale = gamma / jnp.sqrt(r_var + 1e-5)
        shift = beta - r_mean * scale
        return scale, shift

    def linear(in_f, out_f):
        bound = 1.0 / (in_f ** 0.5)
        w = jax.random.uniform(nk(), (in_f, out_f), jnp.float32, -bound, bound)
        b = jax.random.uniform(nk(), (1, out_f), jnp.float32, -bound, bound)
        return w, b

    params = {'conv1_w': conv_w(64, 3, 7, 7)}
    params['bn1_scale'], params['bn1_shift'] = bn(64)

    blocks = []
    for in_ch, out_ch, stride, has_down in block_configs():
        bp = {'conv1_w': conv_w(out_ch, in_ch, 3, 3)}
        bp['bn1_scale'], bp['bn1_shift'] = bn(out_ch)
        bp['conv2_w'] = conv_w(out_ch, out_ch, 3, 3)
        bp['bn2_scale'], bp['bn2_shift'] = bn(out_ch)
        if has_down:
            bp['down_w'] = conv_w(out_ch, in_ch, 1, 1)
            bp['down_bn_scale'], bp['down_bn_shift'] = bn(out_ch)
        blocks.append(bp)
    params['blocks'] = blocks

    params['l0_w'], params['l0_b'] = linear(512, 168)
    params['l1_w'], params['l1_b'] = linear(512, 11)
    params['l2_w'], params['l2_b'] = linear(512, 7)
    return params


def basic_block(x, bp, stride, has_down):
    identity = x
    out = conv2d_bn(x, bp['conv1_w'], bp['bn1_scale'], bp['bn1_shift'],
                    stride=stride, pad=1, relu=True)
    if has_down:
        identity = conv2d_bn(x, bp['down_w'], bp['down_bn_scale'],
                             bp['down_bn_shift'], stride=stride, pad=0,
                             relu=False)
    # conv2 with BN + residual add + ReLU fused into the GEMM epilogue.
    return conv2d_bn(out, bp['conv2_w'], bp['bn2_scale'], bp['bn2_shift'],
                     stride=1, pad=1, relu=True, res=identity)


def resnet34_forward(params, x_nchw):
    # NCHW (PyTorch) -> NHWC bf16 once at the entry.
    x = jnp.transpose(x_nchw, (0, 2, 3, 1)).astype(jnp.bfloat16)

    # stem: conv7x7/s2 + BN + ReLU fused, then 3x3/s2 max-pool.
    x = conv2d_bn(x, params['conv1_w'], params['bn1_scale'],
                  params['bn1_shift'], stride=2, pad=3, relu=True)
    x = maxpool2d_nhwc(x)

    # residual layers
    for (in_ch, out_ch, stride, has_down), bp in zip(block_configs(),
                                                     params['blocks']):
        x = basic_block(x, bp, stride, has_down)

    # head: adaptive_avg_pool2d(x, 1).reshape(bs, -1) then the 3 linear heads
    feat = global_avgpool_nhwc(x)            # [bs, 512] f32 (lane-dense)
    return fused_heads(feat, params)         # (l0, l1, l2)


if __name__ == "__main__":
    key = jax.random.PRNGKey(0)
    pkey, xkey = jax.random.split(key)
    params = init_resnet34_params(pkey)
    x = jax.random.normal(xkey, (2, 3, 32, 32), jnp.float32)  # NCHW, 3 channels

    fwd = jax.jit(resnet34_forward)
    l0, l1, l2 = fwd(params, x)
    jax.block_until_ready((l0, l1, l2))

    assert l0.shape == (2, 168) and l0.dtype == jnp.float32
    assert l1.shape == (2, 11) and l1.dtype == jnp.float32
    assert l2.shape == (2, 7) and l2.dtype == jnp.float32
    assert bool(jnp.isfinite(l0).all() & jnp.isfinite(l1).all()
                & jnp.isfinite(l2).all())
    print("KERNEL_OK")
</pallas_src>

<mosaic_0001>
module attributes {stable_mosaic.version = 11 : i64} {
  func.func @_maxpool_kernel(%arg0: memref<2x9x9x128xbf16, #tpu.memory_space<vmem>>, %arg1: memref<2x9x9x128xbf16, #tpu.memory_space<vmem>>, %arg2: memref<2x9x9x128xbf16, #tpu.memory_space<vmem>>, %arg3: memref<2x9x9x128xbf16, #tpu.memory_space<vmem>>, %arg4: memref<2x8x8x128xbf16, #tpu.memory_space<vmem>>) attributes {dimension_semantics = [], scalar_prefetch = 0 : i64, scratch_operands = 0 : i64, tpu.core_type = #tpu.core_type<tc>} {
    %c0 = arith.constant 0 : index
    %c0_0 = arith.constant 0 : index
    %c0_1 = arith.constant 0 : index
    %c0_2 = arith.constant 0 : index
    %0 = vector.load %arg0[%c0, %c0_0, %c0_1, %c0_2] : memref<2x9x9x128xbf16, #tpu.memory_space<vmem>>, vector<2x9x9x128xbf16>
    %c0_3 = arith.constant 0 : index
    %c0_4 = arith.constant 0 : index
    %c0_5 = arith.constant 0 : index
    %c0_6 = arith.constant 0 : index
    %1 = vector.load %arg1[%c0_3, %c0_4, %c0_5, %c0_6] : memref<2x9x9x128xbf16, #tpu.memory_space<vmem>>, vector<2x9x9x128xbf16>
    %c0_7 = arith.constant 0 : index
    %c0_8 = arith.constant 0 : index
    %c0_9 = arith.constant 0 : index
    %c0_10 = arith.constant 0 : index
    %2 = vector.load %arg2[%c0_7, %c0_8, %c0_9, %c0_10] : memref<2x9x9x128xbf16, #tpu.memory_space<vmem>>, vector<2x9x9x128xbf16>
    %c0_11 = arith.constant 0 : index
    %c0_12 = arith.constant 0 : index
    %c0_13 = arith.constant 0 : index
    %c0_14 = arith.constant 0 : index
    %3 = vector.load %arg3[%c0_11, %c0_12, %c0_13, %c0_14] : memref<2x9x9x128xbf16, #tpu.memory_space<vmem>>, vector<2x9x9x128xbf16>
    %4 = vector.extract_strided_slice %0 {offsets = [0, 0, 0, 0], sizes = [2, 8, 8, 128], strides = [1, 1, 1, 1]} : vector<2x9x9x128xbf16> to vector<2x8x8x128xbf16>
    %5 = vector.extract_strided_slice %1 {offsets = [0, 0, 0, 0], sizes = [2, 8, 8, 128], strides = [1, 1, 1, 1]} : vector<2x9x9x128xbf16> to vector<2x8x8x128xbf16>
    %6 = arith.maximumf %4, %5 : vector<2x8x8x128xbf16>
    %7 = vector.extract_strided_slice %0 {offsets = [0, 0, 1, 0], sizes = [2, 8, 8, 128], strides = [1, 1, 1, 1]} : vector<2x9x9x128xbf16> to vector<2x8x8x128xbf16>
    %8 = arith.maximumf %6, %7 : vector<2x8x8x128xbf16>
    %9 = vector.extract_strided_slice %2 {offsets = [0, 0, 0, 0], sizes = [2, 8, 8, 128], strides = [1, 1, 1, 1]} : vector<2x9x9x128xbf16> to vector<2x8x8x128xbf16>
    %10 = arith.maximumf %8, %9 : vector<2x8x8x128xbf16>
    %11 = vector.extract_strided_slice %3 {offsets = [0, 0, 0, 0], sizes = [2, 8, 8, 128], strides = [1, 1, 1, 1]} : vector<2x9x9x128xbf16> to vector<2x8x8x128xbf16>
    %12 = arith.maximumf %10, %11 : vector<2x8x8x128xbf16>
    %13 = vector.extract_strided_slice %2 {offsets = [0, 0, 1, 0], sizes = [2, 8, 8, 128], strides = [1, 1, 1, 1]} : vector<2x9x9x128xbf16> to vector<2x8x8x128xbf16>
    %14 = arith.maximumf %12, %13 : vector<2x8x8x128xbf16>
    %15 = vector.extract_strided_slice %0 {offsets = [0, 1, 0, 0], sizes = [2, 8, 8, 128], strides = [1, 1, 1, 1]} : vector<2x9x9x128xbf16> to vector<2x8x8x128xbf16>
    %16 = arith.maximumf %14, %15 : vector<2x8x8x128xbf16>
    %17 = vector.extract_strided_slice %1 {offsets = [0, 1, 0, 0], sizes = [2, 8, 8, 128], strides = [1, 1, 1, 1]} : vector<2x9x9x128xbf16> to vector<2x8x8x128xbf16>
    %18 = arith.maximumf %16, %17 : vector<2x8x8x128xbf16>
    %19 = vector.extract_strided_slice %0 {offsets = [0, 1, 1, 0], sizes = [2, 8, 8, 128], strides = [1, 1, 1, 1]} : vector<2x9x9x128xbf16> to vector<2x8x8x128xbf16>
    %20 = arith.maximumf %18, %19 : vector<2x8x8x128xbf16>
    %c0_15 = arith.constant 0 : index
    %c0_16 = arith.constant 0 : index
    %c0_17 = arith.constant 0 : index
    %c0_18 = arith.constant 0 : index
    %21 = vector.load %arg4[%c0_15, %c0_16, %c0_17, %c0_18] : memref<2x8x8x128xbf16, #tpu.memory_space<vmem>>, vector<2x8x8x128xbf16>
    tpu.vector_store %arg4[%c0_15, %c0_16, %c0_17, %c0_18], %20 {strides = array<i32>} : memref<2x8x8x128xbf16, #tpu.memory_space<vmem>>, vector<2x8x8x128xbf16>,
    return
  }
}

module attributes {stable_mosaic.version = 11 : i64} {
  func.func @_conv_gemm_kernel(%arg0: i32, %arg1: i32, %arg2: i32, %arg3: memref<128x256xbf16, #tpu.memory_space<vmem>>, %arg4: memref<256x128xbf16, #tpu.memory_space<vmem>>, %arg5: memref<1x128xf32, #tpu.memory_space<vmem>>, %arg6: memref<1x128xf32, #tpu.memory_space<vmem>>, %arg7: memref<128x128xbf16, #tpu.memory_space<vmem>>, %arg8: memref<128x128xf32, #tpu.memory_space<vmem>>) attributes {dimension_semantics = [#tpu.dimension_semantics<parallel>, #tpu.dimension_semantics<parallel>, #tpu.dimension_semantics<arbitrary>], iteration_bounds = array<i64: 4, 1, 1>, scalar_prefetch = 0 : i64, scratch_operands = 1 : i64, tpu.core_type = #tpu.core_type<tc>, window_params = [{transform_indices = @transform_0, window_bounds = array<i64: 128, 256>}, {transform_indices = @transform_1, window_bounds = array<i64: 256, 128>}, {transform_indices = @transform_2, window_bounds = array<i64: 1, 128>}, {transform_indices = @transform_3, window_bounds = array<i64: 1, 128>}, {transform_indices = @transform_4, window_bounds = array<i64: 128, 128>}]} {
    %c0_i32 = arith.constant 0 : i32
    %0 = arith.cmpi eq, %arg2, %c0_i32 : i32
    %1 = arith.extui %0 : i1 to i32
    %c0_i32_0 = arith.constant 0 : i32
    %2 = arith.cmpi ne, %1, %c0_i32_0 : i32
    scf.if %2 {
      %cst_10 = arith.constant 0.000000e+00 : f32
      %12 = vector.broadcast %cst_10 : f32 to vector<128x128xf32>
      %c0_11 = arith.constant 0 : index
      %c0_12 = arith.constant 0 : index
      %13 = vector.load %arg8[%c0_11, %c0_12] : memref<128x128xf32, #tpu.memory_space<vmem>>, vector<128x128xf32>
      tpu.vector_store %arg8[%c0_11, %c0_12], %12 {strides = array<i32>} : memref<128x128xf32, #tpu.memory_space<vmem>>, vector<128x128xf32>,
    } else {
    }
    %c0 = arith.constant 0 : index
    %c0_1 = arith.constant 0 : index
    %3 = vector.load %arg8[%c0, %c0_1] : memref<128x128xf32, #tpu.memory_space<vmem>>, vector<128x128xf32>
    %c0_2 = arith.constant 0 : index
    %c0_3 = arith.constant 0 : index
    %4 = vector.load %arg3[%c0_2, %c0_3] : memref<128x256xbf16, #tpu.memory_space<vmem>>, vector<128x256xbf16>
    %c0_4 = arith.constant 0 : index
    %c0_5 = arith.constant 0 : index
    %5 = vector.load %arg4[%c0_4, %c0_5] : memref<256x128xbf16, #tpu.memory_space<vmem>>, vector<256x128xbf16>
    %cst = arith.constant dense<0.000000e+00> : vector<128x128xf32>
    %6 = tpu.matmul %4, %5, %cst {dimension_numbers = #tpu.dot_dimension_numbers<[1], [0], [0], [1], [0, 0, 1, 1], [], []>} : vector<128x256xbf16>, vector<256x128xbf16>, vector<128x128xf32> -> vector<128x128xf32>
    %7 = arith.addf %3, %6 : vector<128x128xf32>
    %c0_6 = arith.constant 0 : index
    %c0_7 = arith.constant 0 : index
    %8 = vector.load %arg8[%c0_6, %c0_7] : memref<128x128xf32, #tpu.memory_space<vmem>>, vector<128x128xf32>
    tpu.vector_store %arg8[%c0_6, %c0_7], %7 {strides = array<i32>} : memref<128x128xf32, #tpu.memory_space<vmem>>, vector<128x128xf32>,
    %c0_i32_8 = arith.constant 0 : i32
    %9 = arith.cmpi eq, %arg2, %c0_i32_8 : i32
    %10 = arith.extui %9 : i1 to i32
    %c0_i32_9 = arith.constant 0 : i32
    %11 = arith.cmpi ne, %10, %c0_i32_9 : i32
    scf.if %11 {
      %c0_10 = arith.constant 0 : index
      %c0_11 = arith.constant 0 : index
      %12 = vector.load %arg8[%c0_10, %c0_11] : memref<128x128xf32, #tpu.memory_space<vmem>>, vector<128x128xf32>
      %c0_12 = arith.constant 0 : index
      %c0_13 = arith.constant 0 : index
      %13 = vector.load %arg5[%c0_12, %c0_13] : memref<1x128xf32, #tpu.memory_space<vmem>>, vector<1x128xf32>
      %14 = vector.broadcast %13 : vector<1x128xf32> to vector<128x128xf32>
      %15 = arith.mulf %12, %14 : vector<128x128xf32>
      %c0_14 = arith.constant 0 : index
      %c0_15 = arith.constant 0 : index
      %16 = vector.load %arg6[%c0_14, %c0_15] : memref<1x128xf32, #tpu.memory_space<vmem>>, vector<1x128xf32>
      %17 = vector.broadcast %16 : vector<1x128xf32> to vector<128x128xf32>
      %18 = arith.addf %15, %17 : vector<128x128xf32>
      %cst_16 = arith.constant 0.000000e+00 : f32
      %19 = vector.broadcast %cst_16 : f32 to vector<128x128xf32>
      %20 = arith.maximumf %18, %19 : vector<128x128xf32>
      %21 = arith.truncf %20 : vector<128x128xf32> to vector<128x128xbf16>
      %c0_17 = arith.constant 0 : index
      %c0_18 = arith.constant 0 : index
      %22 = vector.load %arg7[%c0_17, %c0_18] : memref<128x128xbf16, #tpu.memory_space<vmem>>, vector<128x128xbf16>
      tpu.vector_store %arg7[%c0_17, %c0_18], %21 {strides = array<i32>} : memref<128x128xbf16, #tpu.memory_space<vmem>>, vector<128x128xbf16>,
    } else {
    }
    return
  }
  func.func @transform_0(%arg0: i32, %arg1: i32, %arg2: i32) -> (i32, i32) {
    %c0_i32 = arith.constant 0 : i32
    return %arg0, %arg2 : i32, i32
  }
  func.func @transform_1(%arg0: i32, %arg1: i32, %arg2: i32) -> (i32, i32) {
    %c0_i32 = arith.constant 0 : i32
    return %arg2, %arg1 : i32, i32
  }
  func.func @transform_2(%arg0: i32, %arg1: i32, %arg2: i32) -> (i32, i32) {
    %c0_i32 = arith.constant 0 : i32
    %c0_i32_0 = arith.constant 0 : i32
    return %c0_i32, %arg1 : i32, i32
  }
  func.func @transform_3(%arg0: i32, %arg1: i32, %arg2: i32) -> (i32, i32) {
    %c0_i32 = arith.constant 0 : i32
    %c0_i32_0 = arith.constant 0 : i32
    return %c0_i32, %arg1 : i32, i32
  }
  func.func @transform_4(%arg0: i32, %arg1: i32, %arg2: i32) -> (i32, i32) {
    %c0_i32 = arith.constant 0 : i32
    return %arg0, %arg1 : i32, i32
  }
}

module attributes {stable_mosaic.version = 11 : i64} {
  func.func @_conv_gemm_kernel(%arg0: i32, %arg1: i32, %arg2: i32, %arg3: memref<128x128xbf16, #tpu.memory_space<vmem>>, %arg4: memref<128x128xbf16, #tpu.memory_space<vmem>>, %arg5: memref<1x128xf32, #tpu.memory_space<vmem>>, %arg6: memref<1x128xf32, #tpu.memory_space<vmem>>, %arg7: memref<128x128xbf16, #tpu.memory_space<vmem>>, %arg8: memref<128x128xbf16, #tpu.memory_space<vmem>>, %arg9: memref<128x128xf32, #tpu.memory_space<vmem>>) attributes {dimension_semantics = [#tpu.dimension_semantics<parallel>, #tpu.dimension_semantics<parallel>, #tpu.dimension_semantics<arbitrary>], iteration_bounds = array<i64: 1, 1, 9>, scalar_prefetch = 0 : i64, scratch_operands = 1 : i64, tpu.core_type = #tpu.core_type<tc>, window_params = [{transform_indices = @transform_0, window_bounds = array<i64: 128, 128>}, {transform_indices = @transform_1, window_bounds = array<i64: 128, 128>}, {transform_indices = @transform_2, window_bounds = array<i64: 1, 128>}, {transform_indices = @transform_3, window_bounds = array<i64: 1, 128>}, {transform_indices = @transform_4, window_bounds = array<i64: 128, 128>}, {transform_indices = @transform_5, window_bounds = array<i64: 128, 128>}]} {
    %c0_i32 = arith.constant 0 : i32
    %0 = arith.cmpi eq, %arg2, %c0_i32 : i32
    %1 = arith.extui %0 : i1 to i32
    %c0_i32_0 = arith.constant 0 : i32
    %2 = arith.cmpi ne, %1, %c0_i32_0 : i32
    scf.if %2 {
      %cst_9 = arith.constant 0.000000e+00 : f32
      %12 = vector.broadcast %cst_9 : f32 to vector<128x128xf32>
      %c0_10 = arith.constant 0 : index
      %c0_11 = arith.constant 0 : index
      %13 = vector.load %arg9[%c0_10, %c0_11] : memref<128x128xf32, #tpu.memory_space<vmem>>, vector<128x128xf32>
      tpu.vector_store %arg9[%c0_10, %c0_11], %12 {strides = array<i32>} : memref<128x128xf32, #tpu.memory_space<vmem>>, vector<128x128xf32>,
    } else {
    }
    %c0 = arith.constant 0 : index
    %c0_1 = arith.constant 0 : index
    %3 = vector.load %arg9[%c0, %c0_1] : memref<128x128xf32, #tpu.memory_space<vmem>>, vector<128x128xf32>
    %c0_2 = arith.constant 0 : index
    %c0_3 = arith.constant 0 : index
    %4 = vector.load %arg3[%c0_2, %c0_3] : memref<128x128xbf16, #tpu.memory_space<vmem>>, vector<128x128xbf16>
    %c0_4 = arith.constant 0 : index
    %c0_5 = arith.constant 0 : index
    %5 = vector.load %arg4[%c0_4, %c0_5] : memref<128x128xbf16, #tpu.memory_space<vmem>>, vector<128x128xbf16>
    %cst = arith.constant dense<0.000000e+00> : vector<128x128xf32>
    %6 = tpu.matmul %4, %5, %cst {dimension_numbers = #tpu.dot_dimension_numbers<[1], [0], [0], [1], [0, 0, 1, 1], [], []>} : vector<128x128xbf16>, vector<128x128xbf16>, vector<128x128xf32> -> vector<128x128xf32>
    %7 = arith.addf %3, %6 : vector<128x128xf32>
    %c0_6 = arith.constant 0 : index
    %c0_7 = arith.constant 0 : index
    %8 = vector.load %arg9[%c0_6, %c0_7] : memref<128x128xf32, #tpu.memory_space<vmem>>, vector<128x128xf32>
    tpu.vector_store %arg9[%c0_6, %c0_7], %7 {strides = array<i32>} : memref<128x128xf32, #tpu.memory_space<vmem>>, vector<128x128xf32>,
    %c8_i32 = arith.constant 8 : i32
    %9 = arith.cmpi eq, %arg2, %c8_i32 : i32
    %10 = arith.extui %9 : i1 to i32
    %c0_i32_8 = arith.constant 0 : i32
    %11 = arith.cmpi ne, %10, %c0_i32_8 : i32
    scf.if %11 {
      %c0_9 = arith.constant 0 : index
      %c0_10 = arith.constant 0 : index
      %12 = vector.load %arg9[%c0_9, %c0_10] : memref<128x128xf32, #tpu.memory_space<vmem>>, vector<128x128xf32>
      %c0_11 = arith.constant 0 : index
      %c0_12 = arith.constant 0 : index
      %13 = vector.load %arg5[%c0_11, %c0_12] : memref<1x128xf32, #tpu.memory_space<vmem>>, vector<1x128xf32>
      %14 = vector.broadcast %13 : vector<1x128xf32> to vector<128x128xf32>
      %15 = arith.mulf %12, %14 : vector<128x128xf32>
      %c0_13 = arith.constant 0 : index
      %c0_14 = arith.constant 0 : index
      %16 = vector.load %arg6[%c0_13, %c0_14] : memref<1x128xf32, #tpu.memory_space<vmem>>, vector<1x128xf32>
      %17 = vector.broadcast %16 : vector<1x128xf32> to vector<128x128xf32>
      %18 = arith.addf %15, %17 : vector<128x128xf32>
      %c0_15 = arith.constant 0 : index
      %c0_16 = arith.constant 0 : index
      %19 = vector.load %arg7[%c0_15, %c0_16] : memref<128x128xbf16, #tpu.memory_space<vmem>>, vector<128x128xbf16>
      %20 = arith.extf %19 : vector<128x128xbf16> to vector<128x128xf32>
      %21 = arith.addf %18, %20 : vector<128x128xf32>
      %cst_17 = arith.constant 0.000000e+00 : f32
      %22 = vector.broadcast %cst_17 : f32 to vector<128x128xf32>
      %23 = arith.maximumf %21, %22 : vector<128x128xf32>
      %24 = arith.truncf %23 : vector<128x128xf32> to vector<128x128xbf16>
      %c0_18 = arith.constant 0 : index
      %c0_19 = arith.constant 0 : index
      %25 = vector.load %arg8[%c0_18, %c0_19] : memref<128x128xbf16, #tpu.memory_space<vmem>>, vector<128x128xbf16>
      tpu.vector_store %arg8[%c0_18, %c0_19], %24 {strides = array<i32>} : memref<128x128xbf16, #tpu.memory_space<vmem>>, vector<128x128xbf16>,
    } else {
    }
    return
  }
  func.func @transform_0(%arg0: i32, %arg1: i32, %arg2: i32) -> (i32, i32) {
    %c0_i32 = arith.constant 0 : i32
    return %arg0, %arg2 : i32, i32
  }
  func.func @transform_1(%arg0: i32, %arg1: i32, %arg2: i32) -> (i32, i32) {
    %c0_i32 = arith.constant 0 : i32
    return %arg2, %arg1 : i32, i32
  }
  func.func @transform_2(%arg0: i32, %arg1: i32, %arg2: i32) -> (i32, i32) {
    %c0_i32 = arith.constant 0 : i32
    %c0_i32_0 = arith.constant 0 : i32
    return %c0_i32, %arg1 : i32, i32
  }
  func.func @transform_3(%arg0: i32, %arg1: i32, %arg2: i32) -> (i32, i32) {
    %c0_i32 = arith.constant 0 : i32
    %c0_i32_0 = arith.constant 0 : i32
    return %c0_i32, %arg1 : i32, i32
  }
  func.func @transform_4(%arg0: i32, %arg1: i32, %arg2: i32) -> (i32, i32) {
    %c0_i32 = arith.constant 0 : i32
    return %arg0, %arg1 : i32, i32
  }
  func.func @transform_5(%arg0: i32, %arg1: i32, %arg2: i32) -> (i32, i32) {
    %c0_i32 = arith.constant 0 : i32
    return %arg0, %arg1 : i32, i32
  }
}

module attributes {stable_mosaic.version = 11 : i64} {
  func.func @_conv_gemm_kernel(%arg0: i32, %arg1: i32, %arg2: i32, %arg3: memref<128x128xbf16, #tpu.memory_space<vmem>>, %arg4: memref<128x128xbf16, #tpu.memory_space<vmem>>, %arg5: memref<1x128xf32, #tpu.memory_space<vmem>>, %arg6: memref<1x128xf32, #tpu.memory_space<vmem>>, %arg7: memref<128x128xbf16, #tpu.memory_space<vmem>>, %arg8: memref<128x128xf32, #tpu.memory_space<vmem>>) attributes {dimension_semantics = [#tpu.dimension_semantics<parallel>, #tpu.dimension_semantics<parallel>, #tpu.dimension_semantics<arbitrary>], iteration_bounds = array<i64: 1, 1, 9>, scalar_prefetch = 0 : i64, scratch_operands = 1 : i64, tpu.core_type = #tpu.core_type<tc>, window_params = [{transform_indices = @transform_0, window_bounds = array<i64: 128, 128>}, {transform_indices = @transform_1, window_bounds = array<i64: 128, 128>}, {transform_indices = @transform_2, window_bounds = array<i64: 1, 128>}, {transform_indices = @transform_3, window_bounds = array<i64: 1, 128>}, {transform_indices = @transform_4, window_bounds = array<i64: 128, 128>}]} {
    %c0_i32 = arith.constant 0 : i32
    %0 = arith.cmpi eq, %arg2, %c0_i32 : i32
    %1 = arith.extui %0 : i1 to i32
    %c0_i32_0 = arith.constant 0 : i32
    %2 = arith.cmpi ne, %1, %c0_i32_0 : i32
    scf.if %2 {
      %cst_9 = arith.constant 0.000000e+00 : f32
      %12 = vector.broadcast %cst_9 : f32 to vector<128x128xf32>
      %c0_10 = arith.constant 0 : index
      %c0_11 = arith.constant 0 : index
      %13 = vector.load %arg8[%c0_10, %c0_11] : memref<128x128xf32, #tpu.memory_space<vmem>>, vector<128x128xf32>
      tpu.vector_store %arg8[%c0_10, %c0_11], %12 {strides = array<i32>} : memref<128x128xf32, #tpu.memory_space<vmem>>, vector<128x128xf32>,
    } else {
    }
    %c0 = arith.constant 0 : index
    %c0_1 = arith.constant 0 : index
    %3 = vector.load %arg8[%c0, %c0_1] : memref<128x128xf32, #tpu.memory_space<vmem>>, vector<128x128xf32>
    %c0_2 = arith.constant 0 : index
    %c0_3 = arith.constant 0 : index
    %4 = vector.load %arg3[%c0_2, %c0_3] : memref<128x128xbf16, #tpu.memory_space<vmem>>, vector<128x128xbf16>
    %c0_4 = arith.constant 0 : index
    %c0_5 = arith.constant 0 : index
    %5 = vector.load %arg4[%c0_4, %c0_5] : memref<128x128xbf16, #tpu.memory_space<vmem>>, vector<128x128xbf16>
    %cst = arith.constant dense<0.000000e+00> : vector<128x128xf32>
    %6 = tpu.matmul %4, %5, %cst {dimension_numbers = #tpu.dot_dimension_numbers<[1], [0], [0], [1], [0, 0, 1, 1], [], []>} : vector<128x128xbf16>, vector<128x128xbf16>, vector<128x128xf32> -> vector<128x128xf32>
    %7 = arith.addf %3, %6 : vector<128x128xf32>
    %c0_6 = arith.constant 0 : index
    %c0_7 = arith.constant 0 : index
    %8 = vector.load %arg8[%c0_6, %c0_7] : memref<128x128xf32, #tpu.memory_space<vmem>>, vector<128x128xf32>
    tpu.vector_store %arg8[%c0_6, %c0_7], %7 {strides = array<i32>} : memref<128x128xf32, #tpu.memory_space<vmem>>, vector<128x128xf32>,
    %c8_i32 = arith.constant 8 : i32
    %9 = arith.cmpi eq, %arg2, %c8_i32 : i32
    %10 = arith.extui %9 : i1 to i32
    %c0_i32_8 = arith.constant 0 : i32
    %11 = arith.cmpi ne, %10, %c0_i32_8 : i32
    scf.if %11 {
      %c0_9 = arith.constant 0 : index
      %c0_10 = arith.constant 0 : index
      %12 = vector.load %arg8[%c0_9, %c0_10] : memref<128x128xf32, #tpu.memory_space<vmem>>, vector<128x128xf32>
      %c0_11 = arith.constant 0 : index
      %c0_12 = arith.constant 0 : index
      %13 = vector.load %arg5[%c0_11, %c0_12] : memref<1x128xf32, #tpu.memory_space<vmem>>, vector<1x128xf32>
      %14 = vector.broadcast %13 : vector<1x128xf32> to vector<128x128xf32>
      %15 = arith.mulf %12, %14 : vector<128x128xf32>
      %c0_13 = arith.constant 0 : index
      %c0_14 = arith.constant 0 : index
      %16 = vector.load %arg6[%c0_13, %c0_14] : memref<1x128xf32, #tpu.memory_space<vmem>>, vector<1x128xf32>
      %17 = vector.broadcast %16 : vector<1x128xf32> to vector<128x128xf32>
      %18 = arith.addf %15, %17 : vector<128x128xf32>
      %cst_15 = arith.constant 0.000000e+00 : f32
      %19 = vector.broadcast %cst_15 : f32 to vector<128x128xf32>
      %20 = arith.maximumf %18, %19 : vector<128x128xf32>
      %21 = arith.truncf %20 : vector<128x128xf32> to vector<128x128xbf16>
      %c0_16 = arith.constant 0 : index
      %c0_17 = arith.constant 0 : index
      %22 = vector.load %arg7[%c0_16, %c0_17] : memref<128x128xbf16, #tpu.memory_space<vmem>>, vector<128x128xbf16>
      tpu.vector_store %arg7[%c0_16, %c0_17], %21 {strides = array<i32>} : memref<128x128xbf16, #tpu.memory_space<vmem>>, vector<128x128xbf16>,
    } else {
    }
    return
  }
  func.func @transform_0(%arg0: i32, %arg1: i32, %arg2: i32) -> (i32, i32) {
    %c0_i32 = arith.constant 0 : i32
    return %arg0, %arg2 : i32, i32
  }
  func.func @transform_1(%arg0: i32, %arg1: i32, %arg2: i32) -> (i32, i32) {
    %c0_i32 = arith.constant 0 : i32
    return %arg2, %arg1 : i32, i32
  }
  func.func @transform_2(%arg0: i32, %arg1: i32, %arg2: i32) -> (i32, i32) {
    %c0_i32 = arith.constant 0 : i32
    %c0_i32_0 = arith.constant 0 : i32
    return %c0_i32, %arg1 : i32, i32
  }
  func.func @transform_3(%arg0: i32, %arg1: i32, %arg2: i32) -> (i32, i32) {
    %c0_i32 = arith.constant 0 : i32
    %c0_i32_0 = arith.constant 0 : i32
    return %c0_i32, %arg1 : i32, i32
  }
  func.func @transform_4(%arg0: i32, %arg1: i32, %arg2: i32) -> (i32, i32) {
    %c0_i32 = arith.constant 0 : i32
    return %arg0, %arg1 : i32, i32
  }
}

module attributes {stable_mosaic.version = 11 : i64} {
  func.func @_conv_gemm_kernel(%arg0: i32, %arg1: i32, %arg2: i32, %arg3: memref<32x128xbf16, #tpu.memory_space<vmem>>, %arg4: memref<128x128xbf16, #tpu.memory_space<vmem>>, %arg5: memref<1x128xf32, #tpu.memory_space<vmem>>, %arg6: memref<1x128xf32, #tpu.memory_space<vmem>>, %arg7: memref<32x128xbf16, #tpu.memory_space<vmem>>, %arg8: memref<32x128xf32, #tpu.memory_space<vmem>>) attributes {dimension_semantics = [#tpu.dimension_semantics<parallel>, #tpu.dimension_semantics<parallel>, #tpu.dimension_semantics<arbitrary>], iteration_bounds = array<i64: 1, 1, 9>, scalar_prefetch = 0 : i64, scratch_operands = 1 : i64, tpu.core_type = #tpu.core_type<tc>, window_params = [{transform_indices = @transform_0, window_bounds = array<i64: 32, 128>}, {transform_indices = @transform_1, window_bounds = array<i64: 128, 128>}, {transform_indices = @transform_2, window_bounds = array<i64: 1, 128>}, {transform_indices = @transform_3, window_bounds = array<i64: 1, 128>}, {transform_indices = @transform_4, window_bounds = array<i64: 32, 128>}]} {
    %c0_i32 = arith.constant 0 : i32
    %0 = arith.cmpi eq, %arg2, %c0_i32 : i32
    %1 = arith.extui %0 : i1 to i32
    %c0_i32_0 = arith.constant 0 : i32
    %2 = arith.cmpi ne, %1, %c0_i32_0 : i32
    scf.if %2 {
      %cst_9 = arith.constant 0.000000e+00 : f32
      %12 = vector.broadcast %cst_9 : f32 to vector<32x128xf32>
      %c0_10 = arith.constant 0 : index
      %c0_11 = arith.constant 0 : index
      %13 = vector.load %arg8[%c0_10, %c0_11] : memref<32x128xf32, #tpu.memory_space<vmem>>, vector<32x128xf32>
      tpu.vector_store %arg8[%c0_10, %c0_11], %12 {strides = array<i32>} : memref<32x128xf32, #tpu.memory_space<vmem>>, vector<32x128xf32>,
    } else {
    }
    %c0 = arith.constant 0 : index
    %c0_1 = arith.constant 0 : index
    %3 = vector.load %arg8[%c0, %c0_1] : memref<32x128xf32, #tpu.memory_space<vmem>>, vector<32x128xf32>
    %c0_2 = arith.constant 0 : index
    %c0_3 = arith.constant 0 : index
    %4 = vector.load %arg3[%c0_2, %c0_3] : memref<32x128xbf16, #tpu.memory_space<vmem>>, vector<32x128xbf16>
    %c0_4 = arith.constant 0 : index
    %c0_5 = arith.constant 0 : index
    %5 = vector.load %arg4[%c0_4, %c0_5] : memref<128x128xbf16, #tpu.memory_space<vmem>>, vector<128x128xbf16>
    %cst = arith.constant dense<0.000000e+00> : vector<32x128xf32>
    %6 = tpu.matmul %4, %5, %cst {dimension_numbers = #tpu.dot_dimension_numbers<[1], [0], [0], [1], [0, 0, 1, 1], [], []>} : vector<32x128xbf16>, vector<128x128xbf16>, vector<32x128xf32> -> vector<32x128xf32>
    %7 = arith.addf %3, %6 : vector<32x128xf32>
    %c0_6 = arith.constant 0 : index
    %c0_7 = arith.constant 0 : index
    %8 = vector.load %arg8[%c0_6, %c0_7] : memref<32x128xf32, #tpu.memory_space<vmem>>, vector<32x128xf32>
    tpu.vector_store %arg8[%c0_6, %c0_7], %7 {strides = array<i32>} : memref<32x128xf32, #tpu.memory_space<vmem>>, vector<32x128xf32>,
    %c8_i32 = arith.constant 8 : i32
    %9 = arith.cmpi eq, %arg2, %c8_i32 : i32
    %10 = arith.extui %9 : i1 to i32
    %c0_i32_8 = arith.constant 0 : i32
    %11 = arith.cmpi ne, %10, %c0_i32_8 : i32
    scf.if %11 {
      %c0_9 = arith.constant 0 : index
      %c0_10 = arith.constant 0 : index
      %12 = vector.load %arg8[%c0_9, %c0_10] : memref<32x128xf32, #tpu.memory_space<vmem>>, vector<32x128xf32>
      %c0_11 = arith.constant 0 : index
      %c0_12 = arith.constant 0 : index
      %13 = vector.load %arg5[%c0_11, %c0_12] : memref<1x128xf32, #tpu.memory_space<vmem>>, vector<1x128xf32>
      %14 = vector.broadcast %13 : vector<1x128xf32> to vector<32x128xf32>
      %15 = arith.mulf %12, %14 : vector<32x128xf32>
      %c0_13 = arith.constant 0 : index
      %c0_14 = arith.constant 0 : index
      %16 = vector.load %arg6[%c0_13, %c0_14] : memref<1x128xf32, #tpu.memory_space<vmem>>, vector<1x128xf32>
      %17 = vector.broadcast %16 : vector<1x128xf32> to vector<32x128xf32>
      %18 = arith.addf %15, %17 : vector<32x128xf32>
      %cst_15 = arith.constant 0.000000e+00 : f32
      %19 = vector.broadcast %cst_15 : f32 to vector<32x128xf32>
      %20 = arith.maximumf %18, %19 : vector<32x128xf32>
      %21 = arith.truncf %20 : vector<32x128xf32> to vector<32x128xbf16>
      %c0_16 = arith.constant 0 : index
      %c0_17 = arith.constant 0 : index
      %22 = vector.load %arg7[%c0_16, %c0_17] : memref<32x128xbf16, #tpu.memory_space<vmem>>, vector<32x128xbf16>
      tpu.vector_store %arg7[%c0_16, %c0_17], %21 {strides = array<i32>} : memref<32x128xbf16, #tpu.memory_space<vmem>>, vector<32x128xbf16>,
    } else {
    }
    return
  }
  func.func @transform_0(%arg0: i32, %arg1: i32, %arg2: i32) -> (i32, i32) {
    %c0_i32 = arith.constant 0 : i32
    return %arg0, %arg2 : i32, i32
  }
  func.func @transform_1(%arg0: i32, %arg1: i32, %arg2: i32) -> (i32, i32) {
    %c0_i32 = arith.constant 0 : i32
    return %arg2, %arg1 : i32, i32
  }
  func.func @transform_2(%arg0: i32, %arg1: i32, %arg2: i32) -> (i32, i32) {
    %c0_i32 = arith.constant 0 : i32
    %c0_i32_0 = arith.constant 0 : i32
    return %c0_i32, %arg1 : i32, i32
  }
  func.func @transform_3(%arg0: i32, %arg1: i32, %arg2: i32) -> (i32, i32) {
    %c0_i32 = arith.constant 0 : i32
    %c0_i32_0 = arith.constant 0 : i32
    return %c0_i32, %arg1 : i32, i32
  }
  func.func @transform_4(%arg0: i32, %arg1: i32, %arg2: i32) -> (i32, i32) {
    %c0_i32 = arith.constant 0 : i32
    return %arg0, %arg1 : i32, i32
  }
}

module attributes {stable_mosaic.version = 11 : i64} {
  func.func @_conv_gemm_kernel(%arg0: i32, %arg1: i32, %arg2: i32, %arg3: memref<32x128xbf16, #tpu.memory_space<vmem>>, %arg4: memref<128x128xbf16, #tpu.memory_space<vmem>>, %arg5: memref<1x128xf32, #tpu.memory_space<vmem>>, %arg6: memref<1x128xf32, #tpu.memory_space<vmem>>, %arg7: memref<32x128xbf16, #tpu.memory_space<vmem>>, %arg8: memref<32x128xbf16, #tpu.memory_space<vmem>>, %arg9: memref<32x128xf32, #tpu.memory_space<vmem>>) attributes {dimension_semantics = [#tpu.dimension_semantics<parallel>, #tpu.dimension_semantics<parallel>, #tpu.dimension_semantics<arbitrary>], iteration_bounds = array<i64: 1, 1, 9>, scalar_prefetch = 0 : i64, scratch_operands = 1 : i64, tpu.core_type = #tpu.core_type<tc>, window_params = [{transform_indices = @transform_0, window_bounds = array<i64: 32, 128>}, {transform_indices = @transform_1, window_bounds = array<i64: 128, 128>}, {transform_indices = @transform_2, window_bounds = array<i64: 1, 128>}, {transform_indices = @transform_3, window_bounds = array<i64: 1, 128>}, {transform_indices = @transform_4, window_bounds = array<i64: 32, 128>}, {transform_indices = @transform_5, window_bounds = array<i64: 32, 128>}]} {
    %c0_i32 = arith.constant 0 : i32
    %0 = arith.cmpi eq, %arg2, %c0_i32 : i32
    %1 = arith.extui %0 : i1 to i32
    %c0_i32_0 = arith.constant 0 : i32
    %2 = arith.cmpi ne, %1, %c0_i32_0 : i32
    scf.if %2 {
      %cst_9 = arith.constant 0.000000e+00 : f32
      %12 = vector.broadcast %cst_9 : f32 to vector<32x128xf32>
      %c0_10 = arith.constant 0 : index
      %c0_11 = arith.constant 0 : index
      %13 = vector.load %arg9[%c0_10, %c0_11] : memref<32x128xf32, #tpu.memory_space<vmem>>, vector<32x128xf32>
      tpu.vector_store %arg9[%c0_10, %c0_11], %12 {strides = array<i32>} : memref<32x128xf32, #tpu.memory_space<vmem>>, vector<32x128xf32>,
    } else {
    }
    %c0 = arith.constant 0 : index
    %c0_1 = arith.constant 0 : index
    %3 = vector.load %arg9[%c0, %c0_1] : memref<32x128xf32, #tpu.memory_space<vmem>>, vector<32x128xf32>
    %c0_2 = arith.constant 0 : index
    %c0_3 = arith.constant 0 : index
    %4 = vector.load %arg3[%c0_2, %c0_3] : memref<32x128xbf16, #tpu.memory_space<vmem>>, vector<32x128xbf16>
    %c0_4 = arith.constant 0 : index
    %c0_5 = arith.constant 0 : index
    %5 = vector.load %arg4[%c0_4, %c0_5] : memref<128x128xbf16, #tpu.memory_space<vmem>>, vector<128x128xbf16>
    %cst = arith.constant dense<0.000000e+00> : vector<32x128xf32>
    %6 = tpu.matmul %4, %5, %cst {dimension_numbers = #tpu.dot_dimension_numbers<[1], [0], [0], [1], [0, 0, 1, 1], [], []>} : vector<32x128xbf16>, vector<128x128xbf16>, vector<32x128xf32> -> vector<32x128xf32>
    %7 = arith.addf %3, %6 : vector<32x128xf32>
    %c0_6 = arith.constant 0 : index
    %c0_7 = arith.constant 0 : index
    %8 = vector.load %arg9[%c0_6, %c0_7] : memref<32x128xf32, #tpu.memory_space<vmem>>, vector<32x128xf32>
    tpu.vector_store %arg9[%c0_6, %c0_7], %7 {strides = array<i32>} : memref<32x128xf32, #tpu.memory_space<vmem>>, vector<32x128xf32>,
    %c8_i32 = arith.constant 8 : i32
    %9 = arith.cmpi eq, %arg2, %c8_i32 : i32
    %10 = arith.extui %9 : i1 to i32
    %c0_i32_8 = arith.constant 0 : i32
    %11 = arith.cmpi ne, %10, %c0_i32_8 : i32
    scf.if %11 {
      %c0_9 = arith.constant 0 : index
      %c0_10 = arith.constant 0 : index
      %12 = vector.load %arg9[%c0_9, %c0_10] : memref<32x128xf32, #tpu.memory_space<vmem>>, vector<32x128xf32>
      %c0_11 = arith.constant 0 : index
      %c0_12 = arith.constant 0 : index
      %13 = vector.load %arg5[%c0_11, %c0_12] : memref<1x128xf32, #tpu.memory_space<vmem>>, vector<1x128xf32>
      %14 = vector.broadcast %13 : vector<1x128xf32> to vector<32x128xf32>
      %15 = arith.mulf %12, %14 : vector<32x128xf32>
      %c0_13 = arith.constant 0 : index
      %c0_14 = arith.constant 0 : index
      %16 = vector.load %arg6[%c0_13, %c0_14] : memref<1x128xf32, #tpu.memory_space<vmem>>, vector<1x128xf32>
      %17 = vector.broadcast %16 : vector<1x128xf32> to vector<32x128xf32>
      %18 = arith.addf %15, %17 : vector<32x128xf32>
      %c0_15 = arith.constant 0 : index
      %c0_16 = arith.constant 0 : index
      %19 = vector.load %arg7[%c0_15, %c0_16] : memref<32x128xbf16, #tpu.memory_space<vmem>>, vector<32x128xbf16>
      %20 = arith.extf %19 : vector<32x128xbf16> to vector<32x128xf32>
      %21 = arith.addf %18, %20 : vector<32x128xf32>
      %cst_17 = arith.constant 0.000000e+00 : f32
      %22 = vector.broadcast %cst_17 : f32 to vector<32x128xf32>
      %23 = arith.maximumf %21, %22 : vector<32x128xf32>
      %24 = arith.truncf %23 : vector<32x128xf32> to vector<32x128xbf16>
      %c0_18 = arith.constant 0 : index
      %c0_19 = arith.constant 0 : index
      %25 = vector.load %arg8[%c0_18, %c0_19] : memref<32x128xbf16, #tpu.memory_space<vmem>>, vector<32x128xbf16>
      tpu.vector_store %arg8[%c0_18, %c0_19], %24 {strides = array<i32>} : memref<32x128xbf16, #tpu.memory_space<vmem>>, vector<32x128xbf16>,
    } else {
    }
    return
  }
  func.func @transform_0(%arg0: i32, %arg1: i32, %arg2: i32) -> (i32, i32) {
    %c0_i32 = arith.constant 0 : i32
    return %arg0, %arg2 : i32, i32
  }
  func.func @transform_1(%arg0: i32, %arg1: i32, %arg2: i32) -> (i32, i32) {
    %c0_i32 = arith.constant 0 : i32
    return %arg2, %arg1 : i32, i32
  }
  func.func @transform_2(%arg0: i32, %arg1: i32, %arg2: i32) -> (i32, i32) {
    %c0_i32 = arith.constant 0 : i32
    %c0_i32_0 = arith.constant 0 : i32
    return %c0_i32, %arg1 : i32, i32
  }
  func.func @transform_3(%arg0: i32, %arg1: i32, %arg2: i32) -> (i32, i32) {
    %c0_i32 = arith.constant 0 : i32
    %c0_i32_0 = arith.constant 0 : i32
    return %c0_i32, %arg1 : i32, i32
  }
  func.func @transform_4(%arg0: i32, %arg1: i32, %arg2: i32) -> (i32, i32) {
    %c0_i32 = arith.constant 0 : i32
    return %arg0, %arg1 : i32, i32
  }
  func.func @transform_5(%arg0: i32, %arg1: i32, %arg2: i32) -> (i32, i32) {
    %c0_i32 = arith.constant 0 : i32
    return %arg0, %arg1 : i32, i32
  }
}

module attributes {stable_mosaic.version = 11 : i64} {
  func.func @_conv_gemm_kernel(%arg0: i32, %arg1: i32, %arg2: i32, %arg3: memref<32x128xbf16, #tpu.memory_space<vmem>>, %arg4: memref<128x128xbf16, #tpu.memory_space<vmem>>, %arg5: memref<1x128xf32, #tpu.memory_space<vmem>>, %arg6: memref<1x128xf32, #tpu.memory_space<vmem>>, %arg7: memref<32x128xbf16, #tpu.memory_space<vmem>>, %arg8: memref<32x128xf32, #tpu.memory_space<vmem>>) attributes {dimension_semantics = [#tpu.dimension_semantics<parallel>, #tpu.dimension_semantics<parallel>, #tpu.dimension_semantics<arbitrary>], iteration_bounds = array<i64: 1, 1, 1>, scalar_prefetch = 0 : i64, scratch_operands = 1 : i64, tpu.core_type = #tpu.core_type<tc>, window_params = [{transform_indices = @transform_0, window_bounds = array<i64: 32, 128>}, {transform_indices = @transform_1, window_bounds = array<i64: 128, 128>}, {transform_indices = @transform_2, window_bounds = array<i64: 1, 128>}, {transform_indices = @transform_3, window_bounds = array<i64: 1, 128>}, {transform_indices = @transform_4, window_bounds = array<i64: 32, 128>}]} {
    %c0_i32 = arith.constant 0 : i32
    %0 = arith.cmpi eq, %arg2, %c0_i32 : i32
    %1 = arith.extui %0 : i1 to i32
    %c0_i32_0 = arith.constant 0 : i32
    %2 = arith.cmpi ne, %1, %c0_i32_0 : i32
    scf.if %2 {
      %cst_10 = arith.constant 0.000000e+00 : f32
      %12 = vector.broadcast %cst_10 : f32 to vector<32x128xf32>
      %c0_11 = arith.constant 0 : index
      %c0_12 = arith.constant 0 : index
      %13 = vector.load %arg8[%c0_11, %c0_12] : memref<32x128xf32, #tpu.memory_space<vmem>>, vector<32x128xf32>
      tpu.vector_store %arg8[%c0_11, %c0_12], %12 {strides = array<i32>} : memref<32x128xf32, #tpu.memory_space<vmem>>, vector<32x128xf32>,
    } else {
    }
    %c0 = arith.constant 0 : index
    %c0_1 = arith.constant 0 : index
    %3 = vector.load %arg8[%c0, %c0_1] : memref<32x128xf32, #tpu.memory_space<vmem>>, vector<32x128xf32>
    %c0_2 = arith.constant 0 : index
    %c0_3 = arith.constant 0 : index
    %4 = vector.load %arg3[%c0_2, %c0_3] : memref<32x128xbf16, #tpu.memory_space<vmem>>, vector<32x128xbf16>
    %c0_4 = arith.constant 0 : index
    %c0_5 = arith.constant 0 : index
    %5 = vector.load %arg4[%c0_4, %c0_5] : memref<128x128xbf16, #tpu.memory_space<vmem>>, vector<128x128xbf16>
    %cst = arith.constant dense<0.000000e+00> : vector<32x128xf32>
    %6 = tpu.matmul %4, %5, %cst {dimension_numbers = #tpu.dot_dimension_numbers<[1], [0], [0], [1], [0, 0, 1, 1], [], []>} : vector<32x128xbf16>, vector<128x128xbf16>, vector<32x128xf32> -> vector<32x128xf32>
    %7 = arith.addf %3, %6 : vector<32x128xf32>
    %c0_6 = arith.constant 0 : index
    %c0_7 = arith.constant 0 : index
    %8 = vector.load %arg8[%c0_6, %c0_7] : memref<32x128xf32, #tpu.memory_space<vmem>>, vector<32x128xf32>
    tpu.vector_store %arg8[%c0_6, %c0_7], %7 {strides = array<i32>} : memref<32x128xf32, #tpu.memory_space<vmem>>, vector<32x128xf32>,
    %c0_i32_8 = arith.constant 0 : i32
    %9 = arith.cmpi eq, %arg2, %c0_i32_8 : i32
    %10 = arith.extui %9 : i1 to i32
    %c0_i32_9 = arith.constant 0 : i32
    %11 = arith.cmpi ne, %10, %c0_i32_9 : i32
    scf.if %11 {
      %c0_10 = arith.constant 0 : index
      %c0_11 = arith.constant 0 : index
      %12 = vector.load %arg8[%c0_10, %c0_11] : memref<32x128xf32, #tpu.memory_space<vmem>>, vector<32x128xf32>
      %c0_12 = arith.constant 0 : index
      %c0_13 = arith.constant 0 : index
      %13 = vector.load %arg5[%c0_12, %c0_13] : memref<1x128xf32, #tpu.memory_space<vmem>>, vector<1x128xf32>
      %14 = vector.broadcast %13 : vector<1x128xf32> to vector<32x128xf32>
      %15 = arith.mulf %12, %14 : vector<32x128xf32>
      %c0_14 = arith.constant 0 : index
      %c0_15 = arith.constant 0 : index
      %16 = vector.load %arg6[%c0_14, %c0_15] : memref<1x128xf32, #tpu.memory_space<vmem>>, vector<1x128xf32>
      %17 = vector.broadcast %16 : vector<1x128xf32> to vector<32x128xf32>
      %18 = arith.addf %15, %17 : vector<32x128xf32>
      %19 = arith.truncf %18 : vector<32x128xf32> to vector<32x128xbf16>
      %c0_16 = arith.constant 0 : index
      %c0_17 = arith.constant 0 : index
      %20 = vector.load %arg7[%c0_16, %c0_17] : memref<32x128xbf16, #tpu.memory_space<vmem>>, vector<32x128xbf16>
      tpu.vector_store %arg7[%c0_16, %c0_17], %19 {strides = array<i32>} : memref<32x128xbf16, #tpu.memory_space<vmem>>, vector<32x128xbf16>,
    } else {
    }
    return
  }
  func.func @transform_0(%arg0: i32, %arg1: i32, %arg2: i32) -> (i32, i32) {
    %c0_i32 = arith.constant 0 : i32
    return %arg0, %arg2 : i32, i32
  }
  func.func @transform_1(%arg0: i32, %arg1: i32, %arg2: i32) -> (i32, i32) {
    %c0_i32 = arith.constant 0 : i32
    return %arg2, %arg1 : i32, i32
  }
  func.func @transform_2(%arg0: i32, %arg1: i32, %arg2: i32) -> (i32, i32) {
    %c0_i32 = arith.constant 0 : i32
    %c0_i32_0 = arith.constant 0 : i32
    return %c0_i32, %arg1 : i32, i32
  }
  func.func @transform_3(%arg0: i32, %arg1: i32, %arg2: i32) -> (i32, i32) {
    %c0_i32 = arith.constant 0 : i32
    %c0_i32_0 = arith.constant 0 : i32
    return %c0_i32, %arg1 : i32, i32
  }
  func.func @transform_4(%arg0: i32, %arg1: i32, %arg2: i32) -> (i32, i32) {
    %c0_i32 = arith.constant 0 : i32
    return %arg0, %arg1 : i32, i32
  }
}

module attributes {stable_mosaic.version = 11 : i64} {
  func.func @_conv_gemm_kernel(%arg0: i32, %arg1: i32, %arg2: i32, %arg3: memref<8x128xbf16, #tpu.memory_space<vmem>>, %arg4: memref<128x128xbf16, #tpu.memory_space<vmem>>, %arg5: memref<1x128xf32, #tpu.memory_space<vmem>>, %arg6: memref<1x128xf32, #tpu.memory_space<vmem>>, %arg7: memref<8x128xbf16, #tpu.memory_space<vmem>>, %arg8: memref<8x128xf32, #tpu.memory_space<vmem>>) attributes {dimension_semantics = [#tpu.dimension_semantics<parallel>, #tpu.dimension_semantics<parallel>, #tpu.dimension_semantics<arbitrary>], iteration_bounds = array<i64: 1, 2, 9>, scalar_prefetch = 0 : i64, scratch_operands = 1 : i64, tpu.core_type = #tpu.core_type<tc>, window_params = [{transform_indices = @transform_0, window_bounds = array<i64: 8, 128>}, {transform_indices = @transform_1, window_bounds = array<i64: 128, 128>}, {transform_indices = @transform_2, window_bounds = array<i64: 1, 128>}, {transform_indices = @transform_3, window_bounds = array<i64: 1, 128>}, {transform_indices = @transform_4, window_bounds = array<i64: 8, 128>}]} {
    %c0_i32 = arith.constant 0 : i32
    %0 = arith.cmpi eq, %arg2, %c0_i32 : i32
    %1 = arith.extui %0 : i1 to i32
    %c0_i32_0 = arith.constant 0 : i32
    %2 = arith.cmpi ne, %1, %c0_i32_0 : i32
    scf.if %2 {
      %cst_9 = arith.constant 0.000000e+00 : f32
      %12 = vector.broadcast %cst_9 : f32 to vector<8x128xf32>
      %c0_10 = arith.constant 0 : index
      %c0_11 = arith.constant 0 : index
      %13 = vector.load %arg8[%c0_10, %c0_11] : memref<8x128xf32, #tpu.memory_space<vmem>>, vector<8x128xf32>
      tpu.vector_store %arg8[%c0_10, %c0_11], %12 {strides = array<i32>} : memref<8x128xf32, #tpu.memory_space<vmem>>, vector<8x128xf32>,
    } else {
    }
    %c0 = arith.constant 0 : index
    %c0_1 = arith.constant 0 : index
    %3 = vector.load %arg8[%c0, %c0_1] : memref<8x128xf32, #tpu.memory_space<vmem>>, vector<8x128xf32>
    %c0_2 = arith.constant 0 : index
    %c0_3 = arith.constant 0 : index
    %4 = vector.load %arg3[%c0_2, %c0_3] : memref<8x128xbf16, #tpu.memory_space<vmem>>, vector<8x128xbf16>
    %c0_4 = arith.constant 0 : index
    %c0_5 = arith.constant 0 : index
    %5 = vector.load %arg4[%c0_4, %c0_5] : memref<128x128xbf16, #tpu.memory_space<vmem>>, vector<128x128xbf16>
    %cst = arith.constant dense<0.000000e+00> : vector<8x128xf32>
    %6 = tpu.matmul %4, %5, %cst {dimension_numbers = #tpu.dot_dimension_numbers<[1], [0], [0], [1], [0, 0, 1, 1], [], []>} : vector<8x128xbf16>, vector<128x128xbf16>, vector<8x128xf32> -> vector<8x128xf32>
    %7 = arith.addf %3, %6 : vector<8x128xf32>
    %c0_6 = arith.constant 0 : index
    %c0_7 = arith.constant 0 : index
    %8 = vector.load %arg8[%c0_6, %c0_7] : memref<8x128xf32, #tpu.memory_space<vmem>>, vector<8x128xf32>
    tpu.vector_store %arg8[%c0_6, %c0_7], %7 {strides = array<i32>} : memref<8x128xf32, #tpu.memory_space<vmem>>, vector<8x128xf32>,
    %c8_i32 = arith.constant 8 : i32
    %9 = arith.cmpi eq, %arg2, %c8_i32 : i32
    %10 = arith.extui %9 : i1 to i32
    %c0_i32_8 = arith.constant 0 : i32
    %11 = arith.cmpi ne, %10, %c0_i32_8 : i32
    scf.if %11 {
      %c0_9 = arith.constant 0 : index
      %c0_10 = arith.constant 0 : index
      %12 = vector.load %arg8[%c0_9, %c0_10] : memref<8x128xf32, #tpu.memory_space<vmem>>, vector<8x128xf32>
      %c0_11 = arith.constant 0 : index
      %c0_12 = arith.constant 0 : index
      %13 = vector.load %arg5[%c0_11, %c0_12] : memref<1x128xf32, #tpu.memory_space<vmem>>, vector<1x128xf32>
      %14 = vector.broadcast %13 : vector<1x128xf32> to vector<8x128xf32>
      %15 = arith.mulf %12, %14 : vector<8x128xf32>
      %c0_13 = arith.constant 0 : index
      %c0_14 = arith.constant 0 : index
      %16 = vector.load %arg6[%c0_13, %c0_14] : memref<1x128xf32, #tpu.memory_space<vmem>>, vector<1x128xf32>
      %17 = vector.broadcast %16 : vector<1x128xf32> to vector<8x128xf32>
      %18 = arith.addf %15, %17 : vector<8x128xf32>
      %cst_15 = arith.constant 0.000000e+00 : f32
      %19 = vector.broadcast %cst_15 : f32 to vector<8x128xf32>
      %20 = arith.maximumf %18, %19 : vector<8x128xf32>
      %21 = arith.truncf %20 : vector<8x128xf32> to vector<8x128xbf16>
      %c0_16 = arith.constant 0 : index
      %c0_17 = arith.constant 0 : index
      %22 = vector.load %arg7[%c0_16, %c0_17] : memref<8x128xbf16, #tpu.memory_space<vmem>>, vector<8x128xbf16>
      tpu.vector_store %arg7[%c0_16, %c0_17], %21 {strides = array<i32>} : memref<8x128xbf16, #tpu.memory_space<vmem>>, vector<8x128xbf16>,
    } else {
    }
    return
  }
  func.func @transform_0(%arg0: i32, %arg1: i32, %arg2: i32) -> (i32, i32) {
    %c0_i32 = arith.constant 0 : i32
    return %arg0, %arg2 : i32, i32
  }
  func.func @transform_1(%arg0: i32, %arg1: i32, %arg2: i32) -> (i32, i32) {
    %c0_i32 = arith.constant 0 : i32
    return %arg2, %arg1 : i32, i32
  }
  func.func @transform_2(%arg0: i32, %arg1: i32, %arg2: i32) -> (i32, i32) {
    %c0_i32 = arith.constant 0 : i32
    %c0_i32_0 = arith.constant 0 : i32
    return %c0_i32, %arg1 : i32, i32
  }
  func.func @transform_3(%arg0: i32, %arg1: i32, %arg2: i32) -> (i32, i32) {
    %c0_i32 = arith.constant 0 : i32
    %c0_i32_0 = arith.constant 0 : i32
    return %c0_i32, %arg1 : i32, i32
  }
  func.func @transform_4(%arg0: i32, %arg1: i32, %arg2: i32) -> (i32, i32) {
    %c0_i32 = arith.constant 0 : i32
    return %arg0, %arg1 : i32, i32
  }
}

module attributes {stable_mosaic.version = 11 : i64} {
  func.func @_conv_gemm_kernel(%arg0: i32, %arg1: i32, %arg2: i32, %arg3: memref<8x128xbf16, #tpu.memory_space<vmem>>, %arg4: memref<128x128xbf16, #tpu.memory_space<vmem>>, %arg5: memref<1x128xf32, #tpu.memory_space<vmem>>, %arg6: memref<1x128xf32, #tpu.memory_space<vmem>>, %arg7: memref<8x128xbf16, #tpu.memory_space<vmem>>, %arg8: memref<8x128xf32, #tpu.memory_space<vmem>>) attributes {dimension_semantics = [#tpu.dimension_semantics<parallel>, #tpu.dimension_semantics<parallel>, #tpu.dimension_semantics<arbitrary>], iteration_bounds = array<i64: 1, 2, 1>, scalar_prefetch = 0 : i64, scratch_operands = 1 : i64, tpu.core_type = #tpu.core_type<tc>, window_params = [{transform_indices = @transform_0, window_bounds = array<i64: 8, 128>}, {transform_indices = @transform_1, window_bounds = array<i64: 128, 128>}, {transform_indices = @transform_2, window_bounds = array<i64: 1, 128>}, {transform_indices = @transform_3, window_bounds = array<i64: 1, 128>}, {transform_indices = @transform_4, window_bounds = array<i64: 8, 128>}]} {
    %c0_i32 = arith.constant 0 : i32
    %0 = arith.cmpi eq, %arg2, %c0_i32 : i32
    %1 = arith.extui %0 : i1 to i32
    %c0_i32_0 = arith.constant 0 : i32
    %2 = arith.cmpi ne, %1, %c0_i32_0 : i32
    scf.if %2 {
      %cst_10 = arith.constant 0.000000e+00 : f32
      %12 = vector.broadcast %cst_10 : f32 to vector<8x128xf32>
      %c0_11 = arith.constant 0 : index
      %c0_12 = arith.constant 0 : index
      %13 = vector.load %arg8[%c0_11, %c0_12] : memref<8x128xf32, #tpu.memory_space<vmem>>, vector<8x128xf32>
      tpu.vector_store %arg8[%c0_11, %c0_12], %12 {strides = array<i32>} : memref<8x128xf32, #tpu.memory_space<vmem>>, vector<8x128xf32>,
    } else {
    }
    %c0 = arith.constant 0 : index
    %c0_1 = arith.constant 0 : index
    %3 = vector.load %arg8[%c0, %c0_1] : memref<8x128xf32, #tpu.memory_space<vmem>>, vector<8x128xf32>
    %c0_2 = arith.constant 0 : index
    %c0_3 = arith.constant 0 : index
    %4 = vector.load %arg3[%c0_2, %c0_3] : memref<8x128xbf16, #tpu.memory_space<vmem>>, vector<8x128xbf16>
    %c0_4 = arith.constant 0 : index
    %c0_5 = arith.constant 0 : index
    %5 = vector.load %arg4[%c0_4, %c0_5] : memref<128x128xbf16, #tpu.memory_space<vmem>>, vector<128x128xbf16>
    %cst = arith.constant dense<0.000000e+00> : vector<8x128xf32>
    %6 = tpu.matmul %4, %5, %cst {dimension_numbers = #tpu.dot_dimension_numbers<[1], [0], [0], [1], [0, 0, 1, 1], [], []>} : vector<8x128xbf16>, vector<128x128xbf16>, vector<8x128xf32> -> vector<8x128xf32>
    %7 = arith.addf %3, %6 : vector<8x128xf32>
    %c0_6 = arith.constant 0 : index
    %c0_7 = arith.constant 0 : index
    %8 = vector.load %arg8[%c0_6, %c0_7] : memref<8x128xf32, #tpu.memory_space<vmem>>, vector<8x128xf32>
    tpu.vector_store %arg8[%c0_6, %c0_7], %7 {strides = array<i32>} : memref<8x128xf32, #tpu.memory_space<vmem>>, vector<8x128xf32>,
    %c0_i32_8 = arith.constant 0 : i32
    %9 = arith.cmpi eq, %arg2, %c0_i32_8 : i32
    %10 = arith.extui %9 : i1 to i32
    %c0_i32_9 = arith.constant 0 : i32
    %11 = arith.cmpi ne, %10, %c0_i32_9 : i32
    scf.if %11 {
      %c0_10 = arith.constant 0 : index
      %c0_11 = arith.constant 0 : index
      %12 = vector.load %arg8[%c0_10, %c0_11] : memref<8x128xf32, #tpu.memory_space<vmem>>, vector<8x128xf32>
      %c0_12 = arith.constant 0 : index
      %c0_13 = arith.constant 0 : index
      %13 = vector.load %arg5[%c0_12, %c0_13] : memref<1x128xf32, #tpu.memory_space<vmem>>, vector<1x128xf32>
      %14 = vector.broadcast %13 : vector<1x128xf32> to vector<8x128xf32>
      %15 = arith.mulf %12, %14 : vector<8x128xf32>
      %c0_14 = arith.constant 0 : index
      %c0_15 = arith.constant 0 : index
      %16 = vector.load %arg6[%c0_14, %c0_15] : memref<1x128xf32, #tpu.memory_space<vmem>>, vector<1x128xf32>
      %17 = vector.broadcast %16 : vector<1x128xf32> to vector<8x128xf32>
      %18 = arith.addf %15, %17 : vector<8x128xf32>
      %19 = arith.truncf %18 : vector<8x128xf32> to vector<8x128xbf16>
      %c0_16 = arith.constant 0 : index
      %c0_17 = arith.constant 0 : index
      %20 = vector.load %arg7[%c0_16, %c0_17] : memref<8x128xbf16, #tpu.memory_space<vmem>>, vector<8x128xbf16>
      tpu.vector_store %arg7[%c0_16, %c0_17], %19 {strides = array<i32>} : memref<8x128xbf16, #tpu.memory_space<vmem>>, vector<8x128xbf16>,
    } else {
    }
    return
  }
  func.func @transform_0(%arg0: i32, %arg1: i32, %arg2: i32) -> (i32, i32) {
    %c0_i32 = arith.constant 0 : i32
    return %arg0, %arg2 : i32, i32
  }
  func.func @transform_1(%arg0: i32, %arg1: i32, %arg2: i32) -> (i32, i32) {
    %c0_i32 = arith.constant 0 : i32
    return %arg2, %arg1 : i32, i32
  }
  func.func @transform_2(%arg0: i32, %arg1: i32, %arg2: i32) -> (i32, i32) {
    %c0_i32 = arith.constant 0 : i32
    %c0_i32_0 = arith.constant 0 : i32
    return %c0_i32, %arg1 : i32, i32
  }
  func.func @transform_3(%arg0: i32, %arg1: i32, %arg2: i32) -> (i32, i32) {
    %c0_i32 = arith.constant 0 : i32
    %c0_i32_0 = arith.constant 0 : i32
    return %c0_i32, %arg1 : i32, i32
  }
  func.func @transform_4(%arg0: i32, %arg1: i32, %arg2: i32) -> (i32, i32) {
    %c0_i32 = arith.constant 0 : i32
    return %arg0, %arg1 : i32, i32
  }
}

module attributes {stable_mosaic.version = 11 : i64} {
  func.func @_conv_gemm_kernel(%arg0: i32, %arg1: i32, %arg2: i32, %arg3: memref<8x256xbf16, #tpu.memory_space<vmem>>, %arg4: memref<256x128xbf16, #tpu.memory_space<vmem>>, %arg5: memref<1x128xf32, #tpu.memory_space<vmem>>, %arg6: memref<1x128xf32, #tpu.memory_space<vmem>>, %arg7: memref<8x128xbf16, #tpu.memory_space<vmem>>, %arg8: memref<8x128xbf16, #tpu.memory_space<vmem>>, %arg9: memref<8x128xf32, #tpu.memory_space<vmem>>) attributes {dimension_semantics = [#tpu.dimension_semantics<parallel>, #tpu.dimension_semantics<parallel>, #tpu.dimension_semantics<arbitrary>], iteration_bounds = array<i64: 1, 2, 9>, scalar_prefetch = 0 : i64, scratch_operands = 1 : i64, tpu.core_type = #tpu.core_type<tc>, window_params = [{transform_indices = @transform_0, window_bounds = array<i64: 8, 256>}, {transform_indices = @transform_1, window_bounds = array<i64: 256, 128>}, {transform_indices = @transform_2, window_bounds = array<i64: 1, 128>}, {transform_indices = @transform_3, window_bounds = array<i64: 1, 128>}, {transform_indices = @transform_4, window_bounds = array<i64: 8, 128>}, {transform_indices = @transform_5, window_bounds = array<i64: 8, 128>}]} {
    %c0_i32 = arith.constant 0 : i32
    %0 = arith.cmpi eq, %arg2, %c0_i32 : i32
    %1 = arith.extui %0 : i1 to i32
    %c0_i32_0 = arith.constant 0 : i32
    %2 = arith.cmpi ne, %1, %c0_i32_0 : i32
    scf.if %2 {
      %cst_9 = arith.constant 0.000000e+00 : f32
      %12 = vector.broadcast %cst_9 : f32 to vector<8x128xf32>
      %c0_10 = arith.constant 0 : index
      %c0_11 = arith.constant 0 : index
      %13 = vector.load %arg9[%c0_10, %c0_11] : memref<8x128xf32, #tpu.memory_space<vmem>>, vector<8x128xf32>
      tpu.vector_store %arg9[%c0_10, %c0_11], %12 {strides = array<i32>} : memref<8x128xf32, #tpu.memory_space<vmem>>, vector<8x128xf32>,
    } else {
    }
    %c0 = arith.constant 0 : index
    %c0_1 = arith.constant 0 : index
    %3 = vector.load %arg9[%c0, %c0_1] : memref<8x128xf32, #tpu.memory_space<vmem>>, vector<8x128xf32>
    %c0_2 = arith.constant 0 : index
    %c0_3 = arith.constant 0 : index
    %4 = vector.load %arg3[%c0_2, %c0_3] : memref<8x256xbf16, #tpu.memory_space<vmem>>, vector<8x256xbf16>
    %c0_4 = arith.constant 0 : index
    %c0_5 = arith.constant 0 : index
    %5 = vector.load %arg4[%c0_4, %c0_5] : memref<256x128xbf16, #tpu.memory_space<vmem>>, vector<256x128xbf16>
    %cst = arith.constant dense<0.000000e+00> : vector<8x128xf32>
    %6 = tpu.matmul %4, %5, %cst {dimension_numbers = #tpu.dot_dimension_numbers<[1], [0], [0], [1], [0, 0, 1, 1], [], []>} : vector<8x256xbf16>, vector<256x128xbf16>, vector<8x128xf32> -> vector<8x128xf32>
    %7 = arith.addf %3, %6 : vector<8x128xf32>
    %c0_6 = arith.constant 0 : index
    %c0_7 = arith.constant 0 : index
    %8 = vector.load %arg9[%c0_6, %c0_7] : memref<8x128xf32, #tpu.memory_space<vmem>>, vector<8x128xf32>
    tpu.vector_store %arg9[%c0_6, %c0_7], %7 {strides = array<i32>} : memref<8x128xf32, #tpu.memory_space<vmem>>, vector<8x128xf32>,
    %c8_i32 = arith.constant 8 : i32
    %9 = arith.cmpi eq, %arg2, %c8_i32 : i32
    %10 = arith.extui %9 : i1 to i32
    %c0_i32_8 = arith.constant 0 : i32
    %11 = arith.cmpi ne, %10, %c0_i32_8 : i32
    scf.if %11 {
      %c0_9 = arith.constant 0 : index
      %c0_10 = arith.constant 0 : index
      %12 = vector.load %arg9[%c0_9, %c0_10] : memref<8x128xf32, #tpu.memory_space<vmem>>, vector<8x128xf32>
      %c0_11 = arith.constant 0 : index
      %c0_12 = arith.constant 0 : index
      %13 = vector.load %arg5[%c0_11, %c0_12] : memref<1x128xf32, #tpu.memory_space<vmem>>, vector<1x128xf32>
      %14 = vector.broadcast %13 : vector<1x128xf32> to vector<8x128xf32>
      %15 = arith.mulf %12, %14 : vector<8x128xf32>
      %c0_13 = arith.constant 0 : index
      %c0_14 = arith.constant 0 : index
      %16 = vector.load %arg6[%c0_13, %c0_14] : memref<1x128xf32, #tpu.memory_space<vmem>>, vector<1x128xf32>
      %17 = vector.broadcast %16 : vector<1x128xf32> to vector<8x128xf32>
      %18 = arith.addf %15, %17 : vector<8x128xf32>
      %c0_15 = arith.constant 0 : index
      %c0_16 = arith.constant 0 : index
      %19 = vector.load %arg7[%c0_15, %c0_16] : memref<8x128xbf16, #tpu.memory_space<vmem>>, vector<8x128xbf16>
      %20 = arith.extf %19 : vector<8x128xbf16> to vector<8x128xf32>
      %21 = arith.addf %18, %20 : vector<8x128xf32>
      %cst_17 = arith.constant 0.000000e+00 : f32
      %22 = vector.broadcast %cst_17 : f32 to vector<8x128xf32>
      %23 = arith.maximumf %21, %22 : vector<8x128xf32>
      %24 = arith.truncf %23 : vector<8x128xf32> to vector<8x128xbf16>
      %c0_18 = arith.constant 0 : index
      %c0_19 = arith.constant 0 : index
      %25 = vector.load %arg8[%c0_18, %c0_19] : memref<8x128xbf16, #tpu.memory_space<vmem>>, vector<8x128xbf16>
      tpu.vector_store %arg8[%c0_18, %c0_19], %24 {strides = array<i32>} : memref<8x128xbf16, #tpu.memory_space<vmem>>, vector<8x128xbf16>,
    } else {
    }
    return
  }
  func.func @transform_0(%arg0: i32, %arg1: i32, %arg2: i32) -> (i32, i32) {
    %c0_i32 = arith.constant 0 : i32
    return %arg0, %arg2 : i32, i32
  }
  func.func @transform_1(%arg0: i32, %arg1: i32, %arg2: i32) -> (i32, i32) {
    %c0_i32 = arith.constant 0 : i32
    return %arg2, %arg1 : i32, i32
  }
  func.func @transform_2(%arg0: i32, %arg1: i32, %arg2: i32) -> (i32, i32) {
    %c0_i32 = arith.constant 0 : i32
    %c0_i32_0 = arith.constant 0 : i32
    return %c0_i32, %arg1 : i32, i32
  }
  func.func @transform_3(%arg0: i32, %arg1: i32, %arg2: i32) -> (i32, i32) {
    %c0_i32 = arith.constant 0 : i32
    %c0_i32_0 = arith.constant 0 : i32
    return %c0_i32, %arg1 : i32, i32
  }
  func.func @transform_4(%arg0: i32, %arg1: i32, %arg2: i32) -> (i32, i32) {
    %c0_i32 = arith.constant 0 : i32
    return %arg0, %arg1 : i32, i32
  }
  func.func @transform_5(%arg0: i32, %arg1: i32, %arg2: i32) -> (i32, i32) {
    %c0_i32 = arith.constant 0 : i32
    return %arg0, %arg1 : i32, i32
  }
}

module attributes {stable_mosaic.version = 11 : i64} {
  func.func @_conv_gemm_kernel(%arg0: i32, %arg1: i32, %arg2: i32, %arg3: memref<8x256xbf16, #tpu.memory_space<vmem>>, %arg4: memref<256x128xbf16, #tpu.memory_space<vmem>>, %arg5: memref<1x128xf32, #tpu.memory_space<vmem>>, %arg6: memref<1x128xf32, #tpu.memory_space<vmem>>, %arg7: memref<8x128xbf16, #tpu.memory_space<vmem>>, %arg8: memref<8x128xf32, #tpu.memory_space<vmem>>) attributes {dimension_semantics = [#tpu.dimension_semantics<parallel>, #tpu.dimension_semantics<parallel>, #tpu.dimension_semantics<arbitrary>], iteration_bounds = array<i64: 1, 2, 9>, scalar_prefetch = 0 : i64, scratch_operands = 1 : i64, tpu.core_type = #tpu.core_type<tc>, window_params = [{transform_indices = @transform_0, window_bounds = array<i64: 8, 256>}, {transform_indices = @transform_1, window_bounds = array<i64: 256, 128>}, {transform_indices = @transform_2, window_bounds = array<i64: 1, 128>}, {transform_indices = @transform_3, window_bounds = array<i64: 1, 128>}, {transform_indices = @transform_4, window_bounds = array<i64: 8, 128>}]} {
    %c0_i32 = arith.constant 0 : i32
    %0 = arith.cmpi eq, %arg2, %c0_i32 : i32
    %1 = arith.extui %0 : i1 to i32
    %c0_i32_0 = arith.constant 0 : i32
    %2 = arith.cmpi ne, %1, %c0_i32_0 : i32
    scf.if %2 {
      %cst_9 = arith.constant 0.000000e+00 : f32
      %12 = vector.broadcast %cst_9 : f32 to vector<8x128xf32>
      %c0_10 = arith.constant 0 : index
      %c0_11 = arith.constant 0 : index
      %13 = vector.load %arg8[%c0_10, %c0_11] : memref<8x128xf32, #tpu.memory_space<vmem>>, vector<8x128xf32>
      tpu.vector_store %arg8[%c0_10, %c0_11], %12 {strides = array<i32>} : memref<8x128xf32, #tpu.memory_space<vmem>>, vector<8x128xf32>,
    } else {
    }
    %c0 = arith.constant 0 : index
    %c0_1 = arith.constant 0 : index
    %3 = vector.load %arg8[%c0, %c0_1] : memref<8x128xf32, #tpu.memory_space<vmem>>, vector<8x128xf32>
    %c0_2 = arith.constant 0 : index
    %c0_3 = arith.constant 0 : index
    %4 = vector.load %arg3[%c0_2, %c0_3] : memref<8x256xbf16, #tpu.memory_space<vmem>>, vector<8x256xbf16>
    %c0_4 = arith.constant 0 : index
    %c0_5 = arith.constant 0 : index
    %5 = vector.load %arg4[%c0_4, %c0_5] : memref<256x128xbf16, #tpu.memory_space<vmem>>, vector<256x128xbf16>
    %cst = arith.constant dense<0.000000e+00> : vector<8x128xf32>
    %6 = tpu.matmul %4, %5, %cst {dimension_numbers = #tpu.dot_dimension_numbers<[1], [0], [0], [1], [0, 0, 1, 1], [], []>} : vector<8x256xbf16>, vector<256x128xbf16>, vector<8x128xf32> -> vector<8x128xf32>
    %7 = arith.addf %3, %6 : vector<8x128xf32>
    %c0_6 = arith.constant 0 : index
    %c0_7 = arith.constant 0 : index
    %8 = vector.load %arg8[%c0_6, %c0_7] : memref<8x128xf32, #tpu.memory_space<vmem>>, vector<8x128xf32>
    tpu.vector_store %arg8[%c0_6, %c0_7], %7 {strides = array<i32>} : memref<8x128xf32, #tpu.memory_space<vmem>>, vector<8x128xf32>,
    %c8_i32 = arith.constant 8 : i32
    %9 = arith.cmpi eq, %arg2, %c8_i32 : i32
    %10 = arith.extui %9 : i1 to i32
    %c0_i32_8 = arith.constant 0 : i32
    %11 = arith.cmpi ne, %10, %c0_i32_8 : i32
    scf.if %11 {
      %c0_9 = arith.constant 0 : index
      %c0_10 = arith.constant 0 : index
      %12 = vector.load %arg8[%c0_9, %c0_10] : memref<8x128xf32, #tpu.memory_space<vmem>>, vector<8x128xf32>
      %c0_11 = arith.constant 0 : index
      %c0_12 = arith.constant 0 : index
      %13 = vector.load %arg5[%c0_11, %c0_12] : memref<1x128xf32, #tpu.memory_space<vmem>>, vector<1x128xf32>
      %14 = vector.broadcast %13 : vector<1x128xf32> to vector<8x128xf32>
      %15 = arith.mulf %12, %14 : vector<8x128xf32>
      %c0_13 = arith.constant 0 : index
      %c0_14 = arith.constant 0 : index
      %16 = vector.load %arg6[%c0_13, %c0_14] : memref<1x128xf32, #tpu.memory_space<vmem>>, vector<1x128xf32>
      %17 = vector.broadcast %16 : vector<1x128xf32> to vector<8x128xf32>
      %18 = arith.addf %15, %17 : vector<8x128xf32>
      %cst_15 = arith.constant 0.000000e+00 : f32
      %19 = vector.broadcast %cst_15 : f32 to vector<8x128xf32>
      %20 = arith.maximumf %18, %19 : vector<8x128xf32>
      %21 = arith.truncf %20 : vector<8x128xf32> to vector<8x128xbf16>
      %c0_16 = arith.constant 0 : index
      %c0_17 = arith.constant 0 : index
      %22 = vector.load %arg7[%c0_16, %c0_17] : memref<8x128xbf16, #tpu.memory_space<vmem>>, vector<8x128xbf16>
      tpu.vector_store %arg7[%c0_16, %c0_17], %21 {strides = array<i32>} : memref<8x128xbf16, #tpu.memory_space<vmem>>, vector<8x128xbf16>,
    } else {
    }
    return
  }
  func.func @transform_0(%arg0: i32, %arg1: i32, %arg2: i32) -> (i32, i32) {
    %c0_i32 = arith.constant 0 : i32
    return %arg0, %arg2 : i32, i32
  }
  func.func @transform_1(%arg0: i32, %arg1: i32, %arg2: i32) -> (i32, i32) {
    %c0_i32 = arith.constant 0 : i32
    return %arg2, %arg1 : i32, i32
  }
  func.func @transform_2(%arg0: i32, %arg1: i32, %arg2: i32) -> (i32, i32) {
    %c0_i32 = arith.constant 0 : i32
    %c0_i32_0 = arith.constant 0 : i32
    return %c0_i32, %arg1 : i32, i32
  }
  func.func @transform_3(%arg0: i32, %arg1: i32, %arg2: i32) -> (i32, i32) {
    %c0_i32 = arith.constant 0 : i32
    %c0_i32_0 = arith.constant 0 : i32
    return %c0_i32, %arg1 : i32, i32
  }
  func.func @transform_4(%arg0: i32, %arg1: i32, %arg2: i32) -> (i32, i32) {
    %c0_i32 = arith.constant 0 : i32
    return %arg0, %arg1 : i32, i32
  }
}

module attributes {stable_mosaic.version = 11 : i64} {
  func.func @_conv_gemm_kernel(%arg0: i32, %arg1: i32, %arg2: i32, %arg3: memref<2x256xbf16, #tpu.memory_space<vmem>>, %arg4: memref<256x128xbf16, #tpu.memory_space<vmem>>, %arg5: memref<1x128xf32, #tpu.memory_space<vmem>>, %arg6: memref<1x128xf32, #tpu.memory_space<vmem>>, %arg7: memref<2x128xbf16, #tpu.memory_space<vmem>>, %arg8: memref<2x128xf32, #tpu.memory_space<vmem>>) attributes {dimension_semantics = [#tpu.dimension_semantics<parallel>, #tpu.dimension_semantics<parallel>, #tpu.dimension_semantics<arbitrary>], iteration_bounds = array<i64: 1, 4, 9>, scalar_prefetch = 0 : i64, scratch_operands = 1 : i64, tpu.core_type = #tpu.core_type<tc>, window_params = [{transform_indices = @transform_0, window_bounds = array<i64: 2, 256>}, {transform_indices = @transform_1, window_bounds = array<i64: 256, 128>}, {transform_indices = @transform_2, window_bounds = array<i64: 1, 128>}, {transform_indices = @transform_3, window_bounds = array<i64: 1, 128>}, {transform_indices = @transform_4, window_bounds = array<i64: 2, 128>}]} {
    %c0_i32 = arith.constant 0 : i32
    %0 = arith.cmpi eq, %arg2, %c0_i32 : i32
    %1 = arith.extui %0 : i1 to i32
    %c0_i32_0 = arith.constant 0 : i32
    %2 = arith.cmpi ne, %1, %c0_i32_0 : i32
    scf.if %2 {
      %cst_9 = arith.constant 0.000000e+00 : f32
      %12 = vector.broadcast %cst_9 : f32 to vector<2x128xf32>
      %c0_10 = arith.constant 0 : index
      %c0_11 = arith.constant 0 : index
      %13 = vector.load %arg8[%c0_10, %c0_11] : memref<2x128xf32, #tpu.memory_space<vmem>>, vector<2x128xf32>
      tpu.vector_store %arg8[%c0_10, %c0_11], %12 {strides = array<i32>} : memref<2x128xf32, #tpu.memory_space<vmem>>, vector<2x128xf32>,
    } else {
    }
    %c0 = arith.constant 0 : index
    %c0_1 = arith.constant 0 : index
    %3 = vector.load %arg8[%c0, %c0_1] : memref<2x128xf32, #tpu.memory_space<vmem>>, vector<2x128xf32>
    %c0_2 = arith.constant 0 : index
    %c0_3 = arith.constant 0 : index
    %4 = vector.load %arg3[%c0_2, %c0_3] : memref<2x256xbf16, #tpu.memory_space<vmem>>, vector<2x256xbf16>
    %c0_4 = arith.constant 0 : index
    %c0_5 = arith.constant 0 : index
    %5 = vector.load %arg4[%c0_4, %c0_5] : memref<256x128xbf16, #tpu.memory_space<vmem>>, vector<256x128xbf16>
    %cst = arith.constant dense<0.000000e+00> : vector<2x128xf32>
    %6 = tpu.matmul %4, %5, %cst {dimension_numbers = #tpu.dot_dimension_numbers<[1], [0], [0], [1], [0, 0, 1, 1], [], []>} : vector<2x256xbf16>, vector<256x128xbf16>, vector<2x128xf32> -> vector<2x128xf32>
    %7 = arith.addf %3, %6 : vector<2x128xf32>
    %c0_6 = arith.constant 0 : index
    %c0_7 = arith.constant 0 : index
    %8 = vector.load %arg8[%c0_6, %c0_7] : memref<2x128xf32, #tpu.memory_space<vmem>>, vector<2x128xf32>
    tpu.vector_store %arg8[%c0_6, %c0_7], %7 {strides = array<i32>} : memref<2x128xf32, #tpu.memory_space<vmem>>, vector<2x128xf32>,
    %c8_i32 = arith.constant 8 : i32
    %9 = arith.cmpi eq, %arg2, %c8_i32 : i32
    %10 = arith.extui %9 : i1 to i32
    %c0_i32_8 = arith.constant 0 : i32
    %11 = arith.cmpi ne, %10, %c0_i32_8 : i32
    scf.if %11 {
      %c0_9 = arith.constant 0 : index
      %c0_10 = arith.constant 0 : index
      %12 = vector.load %arg8[%c0_9, %c0_10] : memref<2x128xf32, #tpu.memory_space<vmem>>, vector<2x128xf32>
      %c0_11 = arith.constant 0 : index
      %c0_12 = arith.constant 0 : index
      %13 = vector.load %arg5[%c0_11, %c0_12] : memref<1x128xf32, #tpu.memory_space<vmem>>, vector<1x128xf32>
      %14 = vector.broadcast %13 : vector<1x128xf32> to vector<2x128xf32>
      %15 = arith.mulf %12, %14 : vector<2x128xf32>
      %c0_13 = arith.constant 0 : index
      %c0_14 = arith.constant 0 : index
      %16 = vector.load %arg6[%c0_13, %c0_14] : memref<1x128xf32, #tpu.memory_space<vmem>>, vector<1x128xf32>
      %17 = vector.broadcast %16 : vector<1x128xf32> to vector<2x128xf32>
      %18 = arith.addf %15, %17 : vector<2x128xf32>
      %cst_15 = arith.constant 0.000000e+00 : f32
      %19 = vector.broadcast %cst_15 : f32 to vector<2x128xf32>
      %20 = arith.maximumf %18, %19 : vector<2x128xf32>
      %21 = arith.truncf %20 : vector<2x128xf32> to vector<2x128xbf16>
      %c0_16 = arith.constant 0 : index
      %c0_17 = arith.constant 0 : index
      %22 = vector.load %arg7[%c0_16, %c0_17] : memref<2x128xbf16, #tpu.memory_space<vmem>>, vector<2x128xbf16>
      tpu.vector_store %arg7[%c0_16, %c0_17], %21 {strides = array<i32>} : memref<2x128xbf16, #tpu.memory_space<vmem>>, vector<2x128xbf16>,
    } else {
    }
    return
  }
  func.func @transform_0(%arg0: i32, %arg1: i32, %arg2: i32) -> (i32, i32) {
    %c0_i32 = arith.constant 0 : i32
    return %arg0, %arg2 : i32, i32
  }
  func.func @transform_1(%arg0: i32, %arg1: i32, %arg2: i32) -> (i32, i32) {
    %c0_i32 = arith.constant 0 : i32
    return %arg2, %arg1 : i32, i32
  }
  func.func @transform_2(%arg0: i32, %arg1: i32, %arg2: i32) -> (i32, i32) {
    %c0_i32 = arith.constant 0 : i32
    %c0_i32_0 = arith.constant 0 : i32
    return %c0_i32, %arg1 : i32, i32
  }
  func.func @transform_3(%arg0: i32, %arg1: i32, %arg2: i32) -> (i32, i32) {
    %c0_i32 = arith.constant 0 : i32
    %c0_i32_0 = arith.constant 0 : i32
    return %c0_i32, %arg1 : i32, i32
  }
  func.func @transform_4(%arg0: i32, %arg1: i32, %arg2: i32) -> (i32, i32) {
    %c0_i32 = arith.constant 0 : i32
    return %arg0, %arg1 : i32, i32
  }
}

module attributes {stable_mosaic.version = 11 : i64} {
  func.func @_conv_gemm_kernel(%arg0: i32, %arg1: i32, %arg2: i32, %arg3: memref<2x256xbf16, #tpu.memory_space<vmem>>, %arg4: memref<256x128xbf16, #tpu.memory_space<vmem>>, %arg5: memref<1x128xf32, #tpu.memory_space<vmem>>, %arg6: memref<1x128xf32, #tpu.memory_space<vmem>>, %arg7: memref<2x128xbf16, #tpu.memory_space<vmem>>, %arg8: memref<2x128xf32, #tpu.memory_space<vmem>>) attributes {dimension_semantics = [#tpu.dimension_semantics<parallel>, #tpu.dimension_semantics<parallel>, #tpu.dimension_semantics<arbitrary>], iteration_bounds = array<i64: 1, 4, 1>, scalar_prefetch = 0 : i64, scratch_operands = 1 : i64, tpu.core_type = #tpu.core_type<tc>, window_params = [{transform_indices = @transform_0, window_bounds = array<i64: 2, 256>}, {transform_indices = @transform_1, window_bounds = array<i64: 256, 128>}, {transform_indices = @transform_2, window_bounds = array<i64: 1, 128>}, {transform_indices = @transform_3, window_bounds = array<i64: 1, 128>}, {transform_indices = @transform_4, window_bounds = array<i64: 2, 128>}]} {
    %c0_i32 = arith.constant 0 : i32
    %0 = arith.cmpi eq, %arg2, %c0_i32 : i32
    %1 = arith.extui %0 : i1 to i32
    %c0_i32_0 = arith.constant 0 : i32
    %2 = arith.cmpi ne, %1, %c0_i32_0 : i32
    scf.if %2 {
      %cst_10 = arith.constant 0.000000e+00 : f32
      %12 = vector.broadcast %cst_10 : f32 to vector<2x128xf32>
      %c0_11 = arith.constant 0 : index
      %c0_12 = arith.constant 0 : index
      %13 = vector.load %arg8[%c0_11, %c0_12] : memref<2x128xf32, #tpu.memory_space<vmem>>, vector<2x128xf32>
      tpu.vector_store %arg8[%c0_11, %c0_12], %12 {strides = array<i32>} : memref<2x128xf32, #tpu.memory_space<vmem>>, vector<2x128xf32>,
    } else {
    }
    %c0 = arith.constant 0 : index
    %c0_1 = arith.constant 0 : index
    %3 = vector.load %arg8[%c0, %c0_1] : memref<2x128xf32, #tpu.memory_space<vmem>>, vector<2x128xf32>
    %c0_2 = arith.constant 0 : index
    %c0_3 = arith.constant 0 : index
    %4 = vector.load %arg3[%c0_2, %c0_3] : memref<2x256xbf16, #tpu.memory_space<vmem>>, vector<2x256xbf16>
    %c0_4 = arith.constant 0 : index
    %c0_5 = arith.constant 0 : index
    %5 = vector.load %arg4[%c0_4, %c0_5] : memref<256x128xbf16, #tpu.memory_space<vmem>>, vector<256x128xbf16>
    %cst = arith.constant dense<0.000000e+00> : vector<2x128xf32>
    %6 = tpu.matmul %4, %5, %cst {dimension_numbers = #tpu.dot_dimension_numbers<[1], [0], [0], [1], [0, 0, 1, 1], [], []>} : vector<2x256xbf16>, vector<256x128xbf16>, vector<2x128xf32> -> vector<2x128xf32>
    %7 = arith.addf %3, %6 : vector<2x128xf32>
    %c0_6 = arith.constant 0 : index
    %c0_7 = arith.constant 0 : index
    %8 = vector.load %arg8[%c0_6, %c0_7] : memref<2x128xf32, #tpu.memory_space<vmem>>, vector<2x128xf32>
    tpu.vector_store %arg8[%c0_6, %c0_7], %7 {strides = array<i32>} : memref<2x128xf32, #tpu.memory_space<vmem>>, vector<2x128xf32>,
    %c0_i32_8 = arith.constant 0 : i32
    %9 = arith.cmpi eq, %arg2, %c0_i32_8 : i32
    %10 = arith.extui %9 : i1 to i32
    %c0_i32_9 = arith.constant 0 : i32
    %11 = arith.cmpi ne, %10, %c0_i32_9 : i32
    scf.if %11 {
      %c0_10 = arith.constant 0 : index
      %c0_11 = arith.constant 0 : index
      %12 = vector.load %arg8[%c0_10, %c0_11] : memref<2x128xf32, #tpu.memory_space<vmem>>, vector<2x128xf32>
      %c0_12 = arith.constant 0 : index
      %c0_13 = arith.constant 0 : index
      %13 = vector.load %arg5[%c0_12, %c0_13] : memref<1x128xf32, #tpu.memory_space<vmem>>, vector<1x128xf32>
      %14 = vector.broadcast %13 : vector<1x128xf32> to vector<2x128xf32>
      %15 = arith.mulf %12, %14 : vector<2x128xf32>
      %c0_14 = arith.constant 0 : index
      %c0_15 = arith.constant 0 : index
      %16 = vector.load %arg6[%c0_14, %c0_15] : memref<1x128xf32, #tpu.memory_space<vmem>>, vector<1x128xf32>
      %17 = vector.broadcast %16 : vector<1x128xf32> to vector<2x128xf32>
      %18 = arith.addf %15, %17 : vector<2x128xf32>
      %19 = arith.truncf %18 : vector<2x128xf32> to vector<2x128xbf16>
      %c0_16 = arith.constant 0 : index
      %c0_17 = arith.constant 0 : index
      %20 = vector.load %arg7[%c0_16, %c0_17] : memref<2x128xbf16, #tpu.memory_space<vmem>>, vector<2x128xbf16>
      tpu.vector_store %arg7[%c0_16, %c0_17], %19 {strides = array<i32>} : memref<2x128xbf16, #tpu.memory_space<vmem>>, vector<2x128xbf16>,
    } else {
    }
    return
  }
  func.func @transform_0(%arg0: i32, %arg1: i32, %arg2: i32) -> (i32, i32) {
    %c0_i32 = arith.constant 0 : i32
    return %arg0, %arg2 : i32, i32
  }
  func.func @transform_1(%arg0: i32, %arg1: i32, %arg2: i32) -> (i32, i32) {
    %c0_i32 = arith.constant 0 : i32
    return %arg2, %arg1 : i32, i32
  }
  func.func @transform_2(%arg0: i32, %arg1: i32, %arg2: i32) -> (i32, i32) {
    %c0_i32 = arith.constant 0 : i32
    %c0_i32_0 = arith.constant 0 : i32
    return %c0_i32, %arg1 : i32, i32
  }
  func.func @transform_3(%arg0: i32, %arg1: i32, %arg2: i32) -> (i32, i32) {
    %c0_i32 = arith.constant 0 : i32
    %c0_i32_0 = arith.constant 0 : i32
    return %c0_i32, %arg1 : i32, i32
  }
  func.func @transform_4(%arg0: i32, %arg1: i32, %arg2: i32) -> (i32, i32) {
    %c0_i32 = arith.constant 0 : i32
    return %arg0, %arg1 : i32, i32
  }
}

module attributes {stable_mosaic.version = 11 : i64} {
  func.func @_conv_gemm_kernel(%arg0: i32, %arg1: i32, %arg2: i32, %arg3: memref<2x256xbf16, #tpu.memory_space<vmem>>, %arg4: memref<256x128xbf16, #tpu.memory_space<vmem>>, %arg5: memref<1x128xf32, #tpu.memory_space<vmem>>, %arg6: memref<1x128xf32, #tpu.memory_space<vmem>>, %arg7: memref<2x128xbf16, #tpu.memory_space<vmem>>, %arg8: memref<2x128xf32, #tpu.memory_space<vmem>>) attributes {dimension_semantics = [#tpu.dimension_semantics<parallel>, #tpu.dimension_semantics<parallel>, #tpu.dimension_semantics<arbitrary>], iteration_bounds = array<i64: 1, 4, 18>, scalar_prefetch = 0 : i64, scratch_operands = 1 : i64, tpu.core_type = #tpu.core_type<tc>, window_params = [{transform_indices = @transform_0, window_bounds = array<i64: 2, 256>}, {transform_indices = @transform_1, window_bounds = array<i64: 256, 128>}, {transform_indices = @transform_2, window_bounds = array<i64: 1, 128>}, {transform_indices = @transform_3, window_bounds = array<i64: 1, 128>}, {transform_indices = @transform_4, window_bounds = array<i64: 2, 128>}]} {
    %c0_i32 = arith.constant 0 : i32
    %0 = arith.cmpi eq, %arg2, %c0_i32 : i32
    %1 = arith.extui %0 : i1 to i32
    %c0_i32_0 = arith.constant 0 : i32
    %2 = arith.cmpi ne, %1, %c0_i32_0 : i32
    scf.if %2 {
      %cst_9 = arith.constant 0.000000e+00 : f32
      %12 = vector.broadcast %cst_9 : f32 to vector<2x128xf32>
      %c0_10 = arith.constant 0 : index
      %c0_11 = arith.constant 0 : index
      %13 = vector.load %arg8[%c0_10, %c0_11] : memref<2x128xf32, #tpu.memory_space<vmem>>, vector<2x128xf32>
      tpu.vector_store %arg8[%c0_10, %c0_11], %12 {strides = array<i32>} : memref<2x128xf32, #tpu.memory_space<vmem>>, vector<2x128xf32>,
    } else {
    }
    %c0 = arith.constant 0 : index
    %c0_1 = arith.constant 0 : index
    %3 = vector.load %arg8[%c0, %c0_1] : memref<2x128xf32, #tpu.memory_space<vmem>>, vector<2x128xf32>
    %c0_2 = arith.constant 0 : index
    %c0_3 = arith.constant 0 : index
    %4 = vector.load %arg3[%c0_2, %c0_3] : memref<2x256xbf16, #tpu.memory_space<vmem>>, vector<2x256xbf16>
    %c0_4 = arith.constant 0 : index
    %c0_5 = arith.constant 0 : index
    %5 = vector.load %arg4[%c0_4, %c0_5] : memref<256x128xbf16, #tpu.memory_space<vmem>>, vector<256x128xbf16>
    %cst = arith.constant dense<0.000000e+00> : vector<2x128xf32>
    %6 = tpu.matmul %4, %5, %cst {dimension_numbers = #tpu.dot_dimension_numbers<[1], [0], [0], [1], [0, 0, 1, 1], [], []>} : vector<2x256xbf16>, vector<256x128xbf16>, vector<2x128xf32> -> vector<2x128xf32>
    %7 = arith.addf %3, %6 : vector<2x128xf32>
    %c0_6 = arith.constant 0 : index
    %c0_7 = arith.constant 0 : index
    %8 = vector.load %arg8[%c0_6, %c0_7] : memref<2x128xf32, #tpu.memory_space<vmem>>, vector<2x128xf32>
    tpu.vector_store %arg8[%c0_6, %c0_7], %7 {strides = array<i32>} : memref<2x128xf32, #tpu.memory_space<vmem>>, vector<2x128xf32>,
    %c17_i32 = arith.constant 17 : i32
    %9 = arith.cmpi eq, %arg2, %c17_i32 : i32
    %10 = arith.extui %9 : i1 to i32
    %c0_i32_8 = arith.constant 0 : i32
    %11 = arith.cmpi ne, %10, %c0_i32_8 : i32
    scf.if %11 {
      %c0_9 = arith.constant 0 : index
      %c0_10 = arith.constant 0 : index
      %12 = vector.load %arg8[%c0_9, %c0_10] : memref<2x128xf32, #tpu.memory_space<vmem>>, vector<2x128xf32>
      %c0_11 = arith.constant 0 : index
      %c0_12 = arith.constant 0 : index
      %13 = vector.load %arg5[%c0_11, %c0_12] : memref<1x128xf32, #tpu.memory_space<vmem>>, vector<1x128xf32>
      %14 = vector.broadcast %13 : vector<1x128xf32> to vector<2x128xf32>
      %15 = arith.mulf %12, %14 : vector<2x128xf32>
      %c0_13 = arith.constant 0 : index
      %c0_14 = arith.constant 0 : index
      %16 = vector.load %arg6[%c0_13, %c0_14] : memref<1x128xf32, #tpu.memory_space<vmem>>, vector<1x128xf32>
      %17 = vector.broadcast %16 : vector<1x128xf32> to vector<2x128xf32>
      %18 = arith.addf %15, %17 : vector<2x128xf32>
      %cst_15 = arith.constant 0.000000e+00 : f32
      %19 = vector.broadcast %cst_15 : f32 to vector<2x128xf32>
      %20 = arith.maximumf %18, %19 : vector<2x128xf32>
      %21 = arith.truncf %20 : vector<2x128xf32> to vector<2x128xbf16>
      %c0_16 = arith.constant 0 : index
      %c0_17 = arith.constant 0 : index
      %22 = vector.load %arg7[%c0_16, %c0_17] : memref<2x128xbf16, #tpu.memory_space<vmem>>, vector<2x128xbf16>
      tpu.vector_store %arg7[%c0_16, %c0_17], %21 {strides = array<i32>} : memref<2x128xbf16, #tpu.memory_space<vmem>>, vector<2x128xbf16>,
    } else {
    }
    return
  }
  func.func @transform_0(%arg0: i32, %arg1: i32, %arg2: i32) -> (i32, i32) {
    %c0_i32 = arith.constant 0 : i32
    return %arg0, %arg2 : i32, i32
  }
  func.func @transform_1(%arg0: i32, %arg1: i32, %arg2: i32) -> (i32, i32) {
    %c0_i32 = arith.constant 0 : i32
    return %arg2, %arg1 : i32, i32
  }
  func.func @transform_2(%arg0: i32, %arg1: i32, %arg2: i32) -> (i32, i32) {
    %c0_i32 = arith.constant 0 : i32
    %c0_i32_0 = arith.constant 0 : i32
    return %c0_i32, %arg1 : i32, i32
  }
  func.func @transform_3(%arg0: i32, %arg1: i32, %arg2: i32) -> (i32, i32) {
    %c0_i32 = arith.constant 0 : i32
    %c0_i32_0 = arith.constant 0 : i32
    return %c0_i32, %arg1 : i32, i32
  }
  func.func @transform_4(%arg0: i32, %arg1: i32, %arg2: i32) -> (i32, i32) {
    %c0_i32 = arith.constant 0 : i32
    return %arg0, %arg1 : i32, i32
  }
}

module attributes {stable_mosaic.version = 11 : i64} {
  func.func @_conv_gemm_kernel(%arg0: i32, %arg1: i32, %arg2: i32, %arg3: memref<2x256xbf16, #tpu.memory_space<vmem>>, %arg4: memref<256x128xbf16, #tpu.memory_space<vmem>>, %arg5: memref<1x128xf32, #tpu.memory_space<vmem>>, %arg6: memref<1x128xf32, #tpu.memory_space<vmem>>, %arg7: memref<2x128xbf16, #tpu.memory_space<vmem>>, %arg8: memref<2x128xbf16, #tpu.memory_space<vmem>>, %arg9: memref<2x128xf32, #tpu.memory_space<vmem>>) attributes {dimension_semantics = [#tpu.dimension_semantics<parallel>, #tpu.dimension_semantics<parallel>, #tpu.dimension_semantics<arbitrary>], iteration_bounds = array<i64: 1, 4, 18>, scalar_prefetch = 0 : i64, scratch_operands = 1 : i64, tpu.core_type = #tpu.core_type<tc>, window_params = [{transform_indices = @transform_0, window_bounds = array<i64: 2, 256>}, {transform_indices = @transform_1, window_bounds = array<i64: 256, 128>}, {transform_indices = @transform_2, window_bounds = array<i64: 1, 128>}, {transform_indices = @transform_3, window_bounds = array<i64: 1, 128>}, {transform_indices = @transform_4, window_bounds = array<i64: 2, 128>}, {transform_indices = @transform_5, window_bounds = array<i64: 2, 128>}]} {
    %c0_i32 = arith.constant 0 : i32
    %0 = arith.cmpi eq, %arg2, %c0_i32 : i32
    %1 = arith.extui %0 : i1 to i32
    %c0_i32_0 = arith.constant 0 : i32
    %2 = arith.cmpi ne, %1, %c0_i32_0 : i32
    scf.if %2 {
      %cst_9 = arith.constant 0.000000e+00 : f32
      %12 = vector.broadcast %cst_9 : f32 to vector<2x128xf32>
      %c0_10 = arith.constant 0 : index
      %c0_11 = arith.constant 0 : index
      %13 = vector.load %arg9[%c0_10, %c0_11] : memref<2x128xf32, #tpu.memory_space<vmem>>, vector<2x128xf32>
      tpu.vector_store %arg9[%c0_10, %c0_11], %12 {strides = array<i32>} : memref<2x128xf32, #tpu.memory_space<vmem>>, vector<2x128xf32>,
    } else {
    }
    %c0 = arith.constant 0 : index
    %c0_1 = arith.constant 0 : index
    %3 = vector.load %arg9[%c0, %c0_1] : memref<2x128xf32, #tpu.memory_space<vmem>>, vector<2x128xf32>
    %c0_2 = arith.constant 0 : index
    %c0_3 = arith.constant 0 : index
    %4 = vector.load %arg3[%c0_2, %c0_3] : memref<2x256xbf16, #tpu.memory_space<vmem>>, vector<2x256xbf16>
    %c0_4 = arith.constant 0 : index
    %c0_5 = arith.constant 0 : index
    %5 = vector.load %arg4[%c0_4, %c0_5] : memref<256x128xbf16, #tpu.memory_space<vmem>>, vector<256x128xbf16>
    %cst = arith.constant dense<0.000000e+00> : vector<2x128xf32>
    %6 = tpu.matmul %4, %5, %cst {dimension_numbers = #tpu.dot_dimension_numbers<[1], [0], [0], [1], [0, 0, 1, 1], [], []>} : vector<2x256xbf16>, vector<256x128xbf16>, vector<2x128xf32> -> vector<2x128xf32>
    %7 = arith.addf %3, %6 : vector<2x128xf32>
    %c0_6 = arith.constant 0 : index
    %c0_7 = arith.constant 0 : index
    %8 = vector.load %arg9[%c0_6, %c0_7] : memref<2x128xf32, #tpu.memory_space<vmem>>, vector<2x128xf32>
    tpu.vector_store %arg9[%c0_6, %c0_7], %7 {strides = array<i32>} : memref<2x128xf32, #tpu.memory_space<vmem>>, vector<2x128xf32>,
    %c17_i32 = arith.constant 17 : i32
    %9 = arith.cmpi eq, %arg2, %c17_i32 : i32
    %10 = arith.extui %9 : i1 to i32
    %c0_i32_8 = arith.constant 0 : i32
    %11 = arith.cmpi ne, %10, %c0_i32_8 : i32
    scf.if %11 {
      %c0_9 = arith.constant 0 : index
      %c0_10 = arith.constant 0 : index
      %12 = vector.load %arg9[%c0_9, %c0_10] : memref<2x128xf32, #tpu.memory_space<vmem>>, vector<2x128xf32>
      %c0_11 = arith.constant 0 : index
      %c0_12 = arith.constant 0 : index
      %13 = vector.load %arg5[%c0_11, %c0_12] : memref<1x128xf32, #tpu.memory_space<vmem>>, vector<1x128xf32>
      %14 = vector.broadcast %13 : vector<1x128xf32> to vector<2x128xf32>
      %15 = arith.mulf %12, %14 : vector<2x128xf32>
      %c0_13 = arith.constant 0 : index
      %c0_14 = arith.constant 0 : index
      %16 = vector.load %arg6[%c0_13, %c0_14] : memref<1x128xf32, #tpu.memory_space<vmem>>, vector<1x128xf32>
      %17 = vector.broadcast %16 : vector<1x128xf32> to vector<2x128xf32>
      %18 = arith.addf %15, %17 : vector<2x128xf32>
      %c0_15 = arith.constant 0 : index
      %c0_16 = arith.constant 0 : index
      %19 = vector.load %arg7[%c0_15, %c0_16] : memref<2x128xbf16, #tpu.memory_space<vmem>>, vector<2x128xbf16>
      %20 = arith.extf %19 : vector<2x128xbf16> to vector<2x128xf32>
      %21 = arith.addf %18, %20 : vector<2x128xf32>
      %cst_17 = arith.constant 0.000000e+00 : f32
      %22 = vector.broadcast %cst_17 : f32 to vector<2x128xf32>
      %23 = arith.maximumf %21, %22 : vector<2x128xf32>
      %24 = arith.truncf %23 : vector<2x128xf32> to vector<2x128xbf16>
      %c0_18 = arith.constant 0 : index
      %c0_19 = arith.constant 0 : index
      %25 = vector.load %arg8[%c0_18, %c0_19] : memref<2x128xbf16, #tpu.memory_space<vmem>>, vector<2x128xbf16>
      tpu.vector_store %arg8[%c0_18, %c0_19], %24 {strides = array<i32>} : memref<2x128xbf16, #tpu.memory_space<vmem>>, vector<2x128xbf16>,
    } else {
    }
    return
  }
  func.func @transform_0(%arg0: i32, %arg1: i32, %arg2: i32) -> (i32, i32) {
    %c0_i32 = arith.constant 0 : i32
    return %arg0, %arg2 : i32, i32
  }
  func.func @transform_1(%arg0: i32, %arg1: i32, %arg2: i32) -> (i32, i32) {
    %c0_i32 = arith.constant 0 : i32
    return %arg2, %arg1 : i32, i32
  }
  func.func @transform_2(%arg0: i32, %arg1: i32, %arg2: i32) -> (i32, i32) {
    %c0_i32 = arith.constant 0 : i32
    %c0_i32_0 = arith.constant 0 : i32
    return %c0_i32, %arg1 : i32, i32
  }
  func.func @transform_3(%arg0: i32, %arg1: i32, %arg2: i32) -> (i32, i32) {
    %c0_i32 = arith.constant 0 : i32
    %c0_i32_0 = arith.constant 0 : i32
    return %c0_i32, %arg1 : i32, i32
  }
  func.func @transform_4(%arg0: i32, %arg1: i32, %arg2: i32) -> (i32, i32) {
    %c0_i32 = arith.constant 0 : i32
    return %arg0, %arg1 : i32, i32
  }
  func.func @transform_5(%arg0: i32, %arg1: i32, %arg2: i32) -> (i32, i32) {
    %c0_i32 = arith.constant 0 : i32
    return %arg0, %arg1 : i32, i32
  }
}

module attributes {stable_mosaic.version = 11 : i64} {
  func.func @_gap_kernel(%arg0: memref<2x1x512xbf16, #tpu.memory_space<vmem>>, %arg1: memref<2x512xf32, #tpu.memory_space<vmem>>) attributes {dimension_semantics = [], scalar_prefetch = 0 : i64, scratch_operands = 0 : i64, tpu.core_type = #tpu.core_type<tc>} {
    %c0 = arith.constant 0 : index
    %c0_0 = arith.constant 0 : index
    %c0_1 = arith.constant 0 : index
    %0 = vector.load %arg0[%c0, %c0_0, %c0_1] : memref<2x1x512xbf16, #tpu.memory_space<vmem>>, vector<2x1x512xbf16>
    %1 = arith.extf %0 : vector<2x1x512xbf16> to vector<2x1x512xf32>
    %cst = arith.constant dense<0.000000e+00> : vector<2x512xf32>
    %2 = vector.multi_reduction <add>, %1, %cst [1] : vector<2x1x512xf32> to vector<2x512xf32>
    %cst_2 = arith.constant 1.000000e+00 : f32
    %3 = vector.broadcast %cst_2 : f32 to vector<2x512xf32>
    %4 = arith.mulf %2, %3 : vector<2x512xf32>
    %c0_3 = arith.constant 0 : index
    %c0_4 = arith.constant 0 : index
    %5 = vector.load %arg1[%c0_3, %c0_4] : memref<2x512xf32, #tpu.memory_space<vmem>>, vector<2x512xf32>
    tpu.vector_store %arg1[%c0_3, %c0_4], %4 {strides = array<i32>} : memref<2x512xf32, #tpu.memory_space<vmem>>, vector<2x512xf32>,
    return
  }
}

module attributes {stable_mosaic.version = 11 : i64} {
  func.func @_linear_kernel(%arg0: memref<2x512xf32, #tpu.memory_space<vmem>>, %arg1: memref<512x256xf32, #tpu.memory_space<vmem>>, %arg2: memref<1x256xf32, #tpu.memory_space<vmem>>, %arg3: memref<2x256xf32, #tpu.memory_space<vmem>>) attributes {dimension_semantics = [], scalar_prefetch = 0 : i64, scratch_operands = 0 : i64, tpu.core_type = #tpu.core_type<tc>} {
    %c0 = arith.constant 0 : index
    %c0_0 = arith.constant 0 : index
    %0 = vector.load %arg0[%c0, %c0_0] : memref<2x512xf32, #tpu.memory_space<vmem>>, vector<2x512xf32>
    %c0_1 = arith.constant 0 : index
    %c0_2 = arith.constant 0 : index
    %1 = vector.load %arg1[%c0_1, %c0_2] : memref<512x256xf32, #tpu.memory_space<vmem>>, vector<512x256xf32>
    %cst = arith.constant dense<0.000000e+00> : vector<2x256xf32>
    %2 = tpu.matmul %0, %1, %cst {dimension_numbers = #tpu.dot_dimension_numbers<[1], [0], [0], [1], [0, 0, 1, 1], [], []>} : vector<2x512xf32>, vector<512x256xf32>, vector<2x256xf32> -> vector<2x256xf32>
    %c0_3 = arith.constant 0 : index
    %c0_4 = arith.constant 0 : index
    %3 = vector.load %arg2[%c0_3, %c0_4] : memref<1x256xf32, #tpu.memory_space<vmem>>, vector<1x256xf32>
    %4 = vector.broadcast %3 : vector<1x256xf32> to vector<2x256xf32>
    %5 = arith.addf %2, %4 : vector<2x256xf32>
    %c0_5 = arith.constant 0 : index
    %c0_6 = arith.constant 0 : index
    %6 = vector.load %arg3[%c0_5, %c0_6] : memref<2x256xf32, #tpu.memory_space<vmem>>, vector<2x256xf32>
    tpu.vector_store %arg3[%c0_5, %c0_6], %5 {strides = array<i32>} : memref<2x256xf32, #tpu.memory_space<vmem>>, vector<2x256xf32>,
    return
  }
}

</mosaic_0001>

<bundles_post_ra>
// kernel: resnet34_forward.40
= control target key start
LH: loop header
LB: loop body
LE: loop exit
PB: predicated region body
PF: predicated region fallthrough
CT: control target
= control target key end

     0   :  { %vm247_vm0 = vcmask 1046528   ;;  %s1463_s0 = inlined_call_operand.vmem [shape: bf16[2,9,9,128], index: 0, kind: input, shape index: {}]   ;;  %s1464_s1 = inlined_call_operand.vmem [shape: bf16[2,9,9,128], index: 1, kind: input, shape index: {}]   ;;  %s1465_s2 = inlined_call_operand.vmem [shape: bf16[2,9,9,128], index: 2, kind: input, shape index: {}]   ;;  %s1466_s3 = inlined_call_operand.vmem [shape: bf16[2,9,9,128], index: 3, kind: input, shape index: {}]   ;;  %s1467_s4 = inlined_call_operand.vmem [shape: bf16[2,8,8,128], index: 4, kind: output, shape index: {}]  }
   0x1   :  { %v17_v0 = vld [vmem:[%s1463_s0] sm:$0xf]  ;;  %v18_v1 = vld [vmem:[%s1463_s0 + $0x4] sm:$0x1]  ;;  %v19_v2 = vld [vmem:[%s1463_s0 + $0x8] sm:$0xf] }
   0x2   :  { %v20_v3 = vld [vmem:[%s1463_s0 + $0xc] sm:$0x1]  ;;  %v21_v4 = vld [vmem:[%s1463_s0 + $0x10] sm:$0xf]  ;;  %v22_v5 = vld [vmem:[%s1463_s0 + $0x14] sm:$0x1]  ;;  %v119_v6 = vunpack.c.l.bf16 %v17_v0  ;;  %v904_v7 = vunpack.c.l.bf16 %v19_v2  ;;  %v199_v12 = vunpack.c.l.bf16 %v18_v1 }
   0x3   :  { %v53_v8 = vld [vmem:[%s1464_s1] sm:$0xf]  ;;  %v912_v9 = vld [vmem:[%s1464_s1 + $0x8] sm:$0xf]  ;;  %v917_v10 = vld [vmem:[%s1464_s1 + $0x10] sm:$0xf]  ;;  %v919_v11 = vunpack.c.l.bf16 %v21_v4  ;;  %v200_v13 = vunpack.c.l.bf16 %v20_v3  ;;  %v201_v20 = vunpack.c.l.bf16 %v22_v5 }
   0x4   :  { %v71_v14 = vld [vmem:[%s1465_s2] sm:$0xf]  ;;  %v72_v15 = vld [vmem:[%s1465_s2 + $0x4] sm:$0x1]  ;;  %v73_v16 = vld [vmem:[%s1465_s2 + $0x8] sm:$0xf]  ;;  %v135_v17 = vunpack.c.l.bf16 %v53_v8  ;;  %v136_v18 = vunpack.c.l.bf16 %v912_v9  ;;  %v137_v19 = vunpack.c.l.bf16 %v917_v10 }
   0x5   :  { %v74_v21 = vld [vmem:[%s1465_s2 + $0xc] sm:$0x1]  ;;  %v75_v22 = vld [vmem:[%s1465_s2 + $0x10] sm:$0xf]  ;;  %v103_v23 = vld [vmem:[%s1466_s3] sm:$0xf]  ;;  %v360_v24 = vunpack.c.l.bf16 %v71_v14  ;;  %v361_v25 = vunpack.c.l.bf16 %v73_v16  ;;  %v488_v26 = vunpack.c.l.bf16 %v72_v15 }
   0x6   :  { %v104_v27 = vld [vmem:[%s1466_s3 + $0x8] sm:$0xf]  ;;  %v105_v28 = vld [vmem:[%s1466_s3 + $0x10] sm:$0xf]  ;;  %v151_v29 = vmax.f32 %v119_v6, %v135_v17  ;;  %v152_v30 = vmax.f32 %v904_v7, %v136_v18  ;;  %v153_v31 = vmax.f32 %v919_v11, %v137_v19  ;;  %v248_v32 = vrot.slane %v119_v6, 1 }
   0x7   :  { %v249_v33 = vrot.slane %v199_v12, 1  ;;  %v251_v34 = vrot.slane %v904_v7, 1  ;;  %v252_v35 = vrot.slane %v200_v13, 1  ;;  %v254_v36 = vrot.slane %v919_v11, 1  ;;  %v23_v45 = vld [vmem:[%s1463_s0 + $0x18] sm:$0xf] }
   0x8   :  { %v255_v37 = vrot.slane %v201_v20, 1  ;;  %v362_v38 = vunpack.c.l.bf16 %v75_v22  ;;  %v424_v39 = vunpack.c.l.bf16 %v103_v23  ;;  %v425_v40 = vunpack.c.l.bf16 %v104_v27  ;;  %v25_v50 = vld [vmem:[%s1463_s0 + $0x20] sm:$0xf]  ;;  %v972_v51 = vld [vmem:[%s1464_s1 + $0x18] sm:$0xf] }
   0x9   :  { %v250_v41 = vsel %vm247_vm0, %v248_v32, %v249_v33  ;;  %v957_v42 = vsel %vm247_vm0, %v251_v34, %v252_v35  ;;  %v426_v43 = vunpack.c.l.bf16 %v105_v28  ;;  %v489_v44 = vunpack.c.l.bf16 %v74_v21  ;;  %v978_v56 = vld [vmem:[%s1464_s1 + $0x20] sm:$0xf]  ;;  %v24_v60 = vld [vmem:[%s1463_s0 + $0x1c] sm:$0x1]  ;;  %v26_v61 = vld [vmem:[%s1463_s0 + $0x24] sm:$0x1] }
   0xa   :  { %v963_v46 = vsel %vm247_vm0, %v254_v36, %v255_v37  ;;  %v312_v47 = vmax.f32 %v151_v29, %v250_v41  ;;  %v313_v48 = vmax.f32 %v152_v30, %v957_v42  ;;  %v536_v49 = vrot.slane %v360_v24, 1  ;;  %v77_v5 = vld [vmem:[%s1465_s2 + $0x18] sm:$0xf]  ;;  %v79_v13 = vld [vmem:[%s1465_s2 + $0x20] sm:$0xf] }
   0xb   :  { %v314_v52 = vmax.f32 %v153_v31, %v963_v46  ;;  %v537_v53 = vrot.slane %v488_v26, 1  ;;  %v539_v54 = vrot.slane %v361_v25, 1  ;;  %v540_v55 = vrot.slane %v489_v44, 1  ;;  %v106_v14 = vld [vmem:[%s1466_s3 + $0x18] sm:$0xf] }
   0xc   :  { %v376_v57 = vmax.f32 %v312_v47, %v360_v24  ;;  %v377_v58 = vmax.f32 %v313_v48, %v361_v25  ;;  %v542_v59 = vrot.slane %v362_v38, 1  ;;  %v986_v62 = vunpack.c.l.bf16 %v23_v45  ;;  %v76_v22 = vld [vmem:[%s1465_s2 + $0x14] sm:$0x1]  ;;  %v107_v23 = vld [vmem:[%s1466_s3 + $0x20] sm:$0xf] }
   0xd   :  { %v378_v63 = vmax.f32 %v314_v52, %v362_v38  ;;  %v538_v0 = vsel %vm247_vm0, %v536_v49, %v537_v53  ;;  %v541_v1 = vsel %vm247_vm0, %v539_v54, %v540_v55  ;;  %v990_v2 = vunpack.c.l.bf16 %v25_v50  ;;  %v78_v32 = vld [vmem:[%s1465_s2 + $0x1c] sm:$0x1]  ;;  %v27_v41 = vld [vmem:[%s1463_s0 + $0x28] sm:$0xf]  ;;  %v28_v49 = vld [vmem:[%s1463_s0 + $0x2c] sm:$0x1] }
   0xe   :  { %v440_v3 = vmax.f32 %v376_v57, %v424_v39  ;;  %v441_v4 = vmax.f32 %v377_v58, %v425_v40  ;;  %v138_v6 = vunpack.c.l.bf16 %v972_v51  ;;  %v139_v8 = vunpack.c.l.bf16 %v978_v56  ;;  %v1050_v50 = vld [vmem:[%s1464_s1 + $0x28] sm:$0xf]  ;;  %v1055_v52 = vld [vmem:[%s1464_s1 + $0x30] sm:$0xf]  ;;  %v31_v51 = vld [vmem:[%s1463_s0 + $0x38] sm:$0xf] }
   0xf   :  { %v442_v12 = vmax.f32 %v378_v63, %v426_v43  ;;  %v202_v15 = vunpack.c.l.bf16 %v24_v60  ;;  %v203_v16 = vunpack.c.l.bf16 %v26_v61  ;;  %v257_v17 = vrot.slane %v986_v62, 1  ;;  %v29_v43 = vld [vmem:[%s1463_s0 + $0x30] sm:$0xf]  ;;  %v32_v56 = vld [vmem:[%s1463_s0 + $0x3c] sm:$0x1] }
  0x10   :  { %v600_v20 = vmax.f32 %v440_v3, %v538_v0  ;;  %v601_v21 = vmax.f32 %v441_v4, %v541_v1  ;;  %v154_v24 = vmax.f32 %v986_v62, %v138_v6  ;;  %v155_v25 = vmax.f32 %v990_v2, %v139_v8  ;;  %v83_v0 = vld [vmem:[%s1465_s2 + $0x30] sm:$0xf] }
  0x11   :  { %v258_v26 = vrot.slane %v202_v15, 1  ;;  %v260_v27 = vrot.slane %v990_v2, 1  ;;  %v261_v28 = vrot.slane %v203_v16, 1  ;;  %v363_v29 = vunpack.c.l.bf16 %v77_v5 }
  0x12   :  { %v650_v30 = vmax.f32 %v600_v20, %v904_v7  ;;  %v651_v31 = vmax.f32 %v601_v21, %v919_v11  ;;  %v364_v33 = vunpack.c.l.bf16 %v79_v13  ;;  %v427_v34 = vunpack.c.l.bf16 %v106_v14  ;;  %v108_v13 = vld [vmem:[%s1466_s3 + $0x28] sm:$0xf]  ;;  %v109_v14 = vld [vmem:[%s1466_s3 + $0x30] sm:$0xf] }
  0x13   :  { %v1023_v35 = vsel %vm247_vm0, %v257_v17, %v258_v26  ;;  %v1026_v36 = vsel %vm247_vm0, %v260_v27, %v261_v28  ;;  %v428_v37 = vunpack.c.l.bf16 %v107_v23  ;;  %v490_v38 = vunpack.c.l.bf16 %v76_v22 }
  0x14   :  { %v700_v39 = vmax.f32 %v650_v30, %v136_v18  ;;  %v701_v7 = vmax.f32 %v651_v31, %v137_v19  ;;  %v315_v11 = vmax.f32 %v154_v24, %v1023_v35  ;;  %v316_v40 = vmax.f32 %v155_v25, %v1026_v36  ;;  %v80_v24 = vld [vmem:[%s1465_s2 + $0x24] sm:$0x1]  ;;  %v82_v25 = vld [vmem:[%s1465_s2 + $0x2c] sm:$0x1] }
  0x15   :  { %v491_v44 = vunpack.c.l.bf16 %v78_v32  ;;  %v543_v45 = vrot.slane %v490_v38, 1  ;;  %v545_v47 = vrot.slane %v363_v29, 1  ;;  %v1040_v9 = vrot.slane %v364_v33, 1 }
  0x16   :  { %v762_v10 = vmax.f32 %v700_v39, %v957_v42  ;;  %v763_v18 = vmax.f32 %v701_v7, %v963_v46  ;;  %v379_v19 = vmax.f32 %v315_v11, %v363_v29  ;;  %v380_v48 = vmax.f32 %v316_v40, %v364_v33  ;;  %v30_v46 = vld [vmem:[%s1463_s0 + $0x34] sm:$0x1]  ;;  %v1129_v40 = vld [vmem:[%s1463_s0 + $0x40] sm:$0xf] }
  0x17   :  { %v544_v42 = vsel %vm247_vm0, %v542_v59, %v543_v45  ;;  %v546_v53 = vrot.slane %v491_v44, 1  ;;  %v1061_v54 = vunpack.c.l.bf16 %v27_v41  ;;  %v1063_v55 = vunpack.c.l.bf16 %v29_v43  ;;  %v81_v59 = vld [vmem:[%s1465_s2 + $0x28] sm:$0xf] }
  0x18   :  { %v817_v57 = vpack.c.bf16 %v763_v18, %v762_v10  ;;  %v443_v58 = vmax.f32 %v379_v19, %v427_v34  ;;  %v1065_v60 = vmax.f32 %v380_v48, %v428_v37  ;;  %v602_v61 = vmax.f32 %v442_v12, %v544_v42  ;;  %v1119_v34 = vld [vmem:[%s1464_s1 + $0x38] sm:$0xf]  ;;  %v86_v48 = vld [vmem:[%s1465_s2 + $0x3c] sm:$0x1] }
  0x19   :  { %v547_v63 = vsel %vm247_vm0, %v545_v47, %v546_v53  ;;  %v140_v1 = vunpack.c.l.bf16 %v1050_v50  ;;  %v141_v3 = vunpack.c.l.bf16 %v1055_v52  ;;  %v204_v4 = vunpack.c.l.bf16 %v28_v49  ;;  %v84_v47 = vld [vmem:[%s1465_s2 + $0x34] sm:$0x1]  ;;  %v85_v10 = vld [vmem:[%s1465_s2 + $0x38] sm:$0xf]  ;;  %v1190_v50 = vld [vmem:[%s1464_s1 + $0x50] sm:$0xf] }
  0x1a   :  { %818 = vst [vmem:[%s1467_s4] sm:$0xff] %v817_v57   ;;  %v603_v5 = vmax.f32 %v443_v58, %v547_v63  ;;  %v652_v12 = vmax.f32 %v602_v61, %v986_v62  ;;  %v205_v15 = vunpack.c.l.bf16 %v30_v46  ;;  %v263_v16 = vrot.slane %v1061_v54, 1  ;;  %v110_v49 = vld [vmem:[%s1466_s3 + $0x38] sm:$0xf] }
  0x1b   :  { %v156_v17 = vmax.f32 %v1061_v54, %v140_v1  ;;  %v157_v20 = vmax.f32 %v1063_v55, %v141_v3  ;;  %v264_v62 = vrot.slane %v204_v4, 1  ;;  %v266_v21 = vrot.slane %v1063_v55, 1 }
  0x1c   :  { %v653_v22 = vmax.f32 %v603_v5, %v990_v2  ;;  %v702_v23 = vmax.f32 %v652_v12, %v138_v6  ;;  %v267_v26 = vrot.slane %v205_v15, 1  ;;  %v365_v27 = vunpack.c.l.bf16 %v81_v59 }
  0x1d   :  { %v1104_v28 = vsel %vm247_vm0, %v263_v16, %v264_v62  ;;  %v366_v29 = vunpack.c.l.bf16 %v83_v0  ;;  %v429_v30 = vunpack.c.l.bf16 %v108_v13  ;;  %v430_v31 = vunpack.c.l.bf16 %v109_v14  ;;  %v1156_v0 = vld [vmem:[%s1464_s1 + $0x40] sm:$0xf]  ;;  %v35_v62 = vld [vmem:[%s1463_s0 + $0x48] sm:$0xf] }
  0x1e   :  { %v703_v2 = vmax.f32 %v653_v22, %v139_v8  ;;  %v764_v6 = vmax.f32 %v702_v23, %v1023_v35  ;;  %v1113_v32 = vsel %vm247_vm0, %v266_v21, %v267_v26  ;;  %v317_v33 = vmax.f32 %v156_v17, %v1104_v28 }
  0x1f   :  { %v318_v37 = vmax.f32 %v157_v20, %v1113_v32  ;;  %v492_v38 = vunpack.c.l.bf16 %v80_v24  ;;  %v493_v39 = vunpack.c.l.bf16 %v82_v25  ;;  %v551_v7 = vrot.slane %v365_v27, 1 }
  0x20   :  { %v765_v8 = vmax.f32 %v703_v2, %v1026_v36  ;;  %v381_v35 = vmax.f32 %v317_v33, %v365_v27  ;;  %v554_v11 = vrot.slane %v366_v29, 1  ;;  %v126_v41 = vunpack.c.l.bf16 %v31_v51 }
  0x21   :  { %v382_v43 = vmax.f32 %v318_v37, %v366_v29  ;;  %v549_v44 = vrot.slane %v492_v38, 1  ;;  %v552_v45 = vrot.slane %v493_v39, 1  ;;  %v142_v36 = vunpack.c.l.bf16 %v1119_v34  ;;  %v39_v29 = vld [vmem:[%s1463_s0 + $0x58] sm:$0xf]  ;;  %v36_v37 = vld [vmem:[%s1463_s0 + $0x4c] sm:$0x1] }
  0x22   :  { %v822_v18 = vpack.c.bf16 %v765_v8, %v764_v6  ;;  %v445_v19 = vmax.f32 %v381_v35, %v429_v30  ;;  %v206_v42 = vunpack.c.l.bf16 %v32_v56  ;;  %v269_v53 = vrot.slane %v126_v41, 1  ;;  %v62_v30 = vld [vmem:[%s1464_s1 + $0x48] sm:$0xf]  ;;  %v1200_v38 = vld [vmem:[%s1464_s1 + $0x58] sm:$0xf] }
  0x23   :  { %v446_v46 = vmax.f32 %v382_v43, %v430_v31  ;;  %v550_v57 = vsel %vm247_vm0, %v1040_v9, %v549_v44  ;;  %v553_v58 = vsel %vm247_vm0, %v551_v7, %v552_v45  ;;  %v158_v61 = vmax.f32 %v126_v41, %v142_v36  ;;  %v34_v9 = vld [vmem:[%s1463_s0 + $0x44] sm:$0x1]  ;;  %v38_v7 = vld [vmem:[%s1463_s0 + $0x54] sm:$0x1]  ;;  %v91_v34 = vld [vmem:[%s1465_s2 + $0x58] sm:$0xf] }
  0x24   :  { %854 = vst [vmem:[%s1467_s4 + $0x8] sm:$0xff] %v822_v18   ;;  %v604_v63 = vmax.f32 %v1065_v60, %v550_v57  ;;  %v605_v59 = vmax.f32 %v445_v19, %v553_v58  ;;  %v270_v4 = vrot.slane %v206_v42, 1  ;;  %v367_v5 = vunpack.c.l.bf16 %v85_v10 }
  0x25   :  { %v431_v12 = vunpack.c.l.bf16 %v110_v49  ;;  %v494_v13 = vunpack.c.l.bf16 %v84_v47  ;;  %v495_v14 = vunpack.c.l.bf16 %v86_v48  ;;  %v648_v15 = vunpack.c.l.bf16 %v1129_v40 }
  0x26   :  { %v654_v16 = vmax.f32 %v604_v63, %v1061_v54  ;;  %v655_v60 = vmax.f32 %v605_v59, %v1063_v55  ;;  %v1165_v17 = vsel %vm247_vm0, %v269_v53, %v270_v4  ;;  %v557_v20 = vrot.slane %v367_v5, 1  ;;  %v37_v54 = vld [vmem:[%s1463_s0 + $0x50] sm:$0xf] }
  0x27   :  { %v319_v21 = vmax.f32 %v158_v61, %v1165_v17  ;;  %v555_v22 = vrot.slane %v494_v13, 1  ;;  %v558_v23 = vrot.slane %v495_v14, 1  ;;  %v698_v24 = vunpack.c.l.bf16 %v1156_v0  ;;  %v89_v53 = vld [vmem:[%s1465_s2 + $0x50] sm:$0xf]  ;;  %v111_v61 = vld [vmem:[%s1466_s3 + $0x48] sm:$0xf] }
  0x28   :  { %v704_v55 = vmax.f32 %v654_v16, %v140_v1  ;;  %v705_v25 = vmax.f32 %v655_v60, %v141_v3  ;;  %v748_v26 = vunpack.c.l.bf16 %v34_v9  ;;  %v754_v27 = vrot.slane %v648_v15, 1  ;;  %v113_v9 = vld [vmem:[%s1466_s3 + $0x58] sm:$0xf]  ;;  %v90_v16 = vld [vmem:[%s1465_s2 + $0x54] sm:$0x1] }
  0x29   :  { %v383_v31 = vmax.f32 %v319_v21, %v367_v5  ;;  %v556_v51 = vsel %vm247_vm0, %v554_v11, %v555_v22  ;;  %v559_v2 = vsel %vm247_vm0, %v557_v20, %v558_v23  ;;  %v127_v52 = vunpack.c.l.bf16 %v35_v62  ;;  %v112_v5 = vld [vmem:[%s1466_s3 + $0x50] sm:$0xf] }
  0x2a   :  { %v766_v1 = vmax.f32 %v704_v55, %v1104_v28  ;;  %v767_v3 = vmax.f32 %v705_v25, %v1113_v32  ;;  %v606_v6 = vmax.f32 %v446_v46, %v556_v51  ;;  %v755_v33 = vrot.slane %v748_v26, 1  ;;  %v40_v28 = vld [vmem:[%s1463_s0 + $0x5c] sm:$0x1]  ;;  %v41_v51 = vld [vmem:[%s1463_s0 + $0x60] sm:$0xf] }
  0x2b   :  { %v447_v39 = vmax.f32 %v383_v31, %v431_v12  ;;  %v1208_v32 = vunpack.c.l.bf16 %v37_v54  ;;  %v1210_v56 = vunpack.c.l.bf16 %v39_v29  ;;  %v143_v8 = vunpack.c.l.bf16 %v62_v30 }
  0x2c   :  { %v827_v35 = vpack.c.bf16 %v767_v3, %v766_v1  ;;  %v656_v11 = vmax.f32 %v606_v6, %v126_v41  ;;  %v756_v40 = vsel %vm247_vm0, %v754_v27, %v755_v33  ;;  %v144_v43 = vunpack.c.l.bf16 %v1190_v50  ;;  %v87_v41 = vld [vmem:[%s1465_s2 + $0x48] sm:$0xf]  ;;  %v47_v50 = vld [vmem:[%s1463_s0 + $0x78] sm:$0xf] }
  0x2d   :  { %v607_v44 = vmax.f32 %v447_v39, %v559_v2  ;;  %v145_v45 = vunpack.c.l.bf16 %v1200_v38  ;;  %v159_v47 = vmax.f32 %v127_v52, %v143_v8  ;;  %v207_v10 = vunpack.c.l.bf16 %v36_v37  ;;  %v43_v2 = vld [vmem:[%s1463_s0 + $0x68] sm:$0xf]  ;;  %v42_v37 = vld [vmem:[%s1463_s0 + $0x64] sm:$0x1]  ;;  %v1346_v38 = vld [vmem:[%s1464_s1 + $0x70] sm:$0xf] }
  0x2e   :  { %855 = vst [vmem:[%s1467_s4 + $0x10] sm:$0xff] %v827_v35   ;;  %v706_v18 = vmax.f32 %v656_v11, %v142_v36  ;;  %v160_v19 = vmax.f32 %v1208_v32, %v144_v43  ;;  %v208_v48 = vunpack.c.l.bf16 %v38_v7  ;;  %v209_v49 = vunpack.c.l.bf16 %v40_v28  ;;  %v1279_v39 = vld [vmem:[%s1464_s1 + $0x68] sm:$0xf]  ;;  %v44_v11 = vld [vmem:[%s1463_s0 + $0x6c] sm:$0x1] }
  0x2f   :  { %v657_v42 = vmax.f32 %v607_v44, %v648_v15  ;;  %v161_v36 = vmax.f32 %v1210_v56, %v145_v45  ;;  %v272_v46 = vrot.slane %v127_v52, 1  ;;  %v273_v57 = vrot.slane %v207_v10, 1  ;;  %v88_v15 = vld [vmem:[%s1465_s2 + $0x4c] sm:$0x1]  ;;  %v1271_v52 = vld [vmem:[%s1464_s1 + $0x60] sm:$0xf] }
  0x30   :  { %v768_v58 = vmax.f32 %v706_v18, %v1165_v17  ;;  %v275_v63 = vrot.slane %v1208_v32, 1  ;;  %v276_v59 = vrot.slane %v208_v48, 1  ;;  %v278_v0 = vrot.slane %v1210_v56, 1 }
  0x31   :  { %v707_v4 = vmax.f32 %v657_v42, %v698_v24  ;;  %v274_v12 = vsel %vm247_vm0, %v272_v46, %v273_v57  ;;  %v279_v13 = vrot.slane %v209_v49, 1  ;;  %v368_v14 = vunpack.c.l.bf16 %v87_v41  ;;  %v115_v46 = vld [vmem:[%s1466_s3 + $0x68] sm:$0xf] }
  0x32   :  { %v1255_v60 = vsel %vm247_vm0, %v275_v63, %v276_v59  ;;  %v320_v17 = vmax.f32 %v159_v47, %v274_v12  ;;  %v369_v20 = vunpack.c.l.bf16 %v89_v53  ;;  %v370_v62 = vunpack.c.l.bf16 %v91_v34  ;;  %v95_v34 = vld [vmem:[%s1465_s2 + $0x68] sm:$0xf]  ;;  %v94_v12 = vld [vmem:[%s1465_s2 + $0x64] sm:$0x1] }
  0x33   :  { %v769_v21 = vmax.f32 %v707_v4, %v756_v40  ;;  %v1258_v22 = vsel %vm247_vm0, %v278_v0, %v279_v13  ;;  %v321_v23 = vmax.f32 %v160_v19, %v1255_v60  ;;  %v432_v24 = vunpack.c.l.bf16 %v111_v61  ;;  %v93_v19 = vld [vmem:[%s1465_s2 + $0x60] sm:$0xf] }
  0x34   :  { %v322_v54 = vmax.f32 %v161_v36, %v1258_v22  ;;  %v384_v55 = vmax.f32 %v320_v17, %v368_v14  ;;  %v433_v25 = vunpack.c.l.bf16 %v112_v5  ;;  %v434_v26 = vunpack.c.l.bf16 %v113_v9  ;;  %v114_v36 = vld [vmem:[%s1466_s3 + $0x60] sm:$0xf]  ;;  %v92_v9 = vld [vmem:[%s1465_s2 + $0x5c] sm:$0x1] }
  0x35   :  { %v832_v27 = vpack.c.bf16 %v769_v21, %v768_v58  ;;  %v385_v29 = vmax.f32 %v321_v23, %v369_v20  ;;  %v496_v30 = vunpack.c.l.bf16 %v88_v15  ;;  %v497_v31 = vunpack.c.l.bf16 %v90_v16  ;;  %v45_v23 = vld [vmem:[%s1463_s0 + $0x70] sm:$0xf] }
  0x36   :  { %v386_v1 = vmax.f32 %v322_v54, %v370_v62  ;;  %v448_v3 = vmax.f32 %v384_v55, %v432_v24  ;;  %v560_v6 = vrot.slane %v368_v14, 1  ;;  %v563_v33 = vrot.slane %v369_v20, 1 }
  0x37   :  { %856 = vst [vmem:[%s1467_s4 + $0x18] sm:$0xff] %v832_v27   ;;  %v449_v7 = vmax.f32 %v385_v29, %v433_v25  ;;  %v561_v28 = vrot.slane %v496_v30, 1  ;;  %v564_v8 = vrot.slane %v497_v31, 1  ;;  %v566_v35 = vrot.slane %v370_v62, 1  ;;  %v1353_v29 = vld [vmem:[%s1464_s1 + $0x78] sm:$0xf] }
  0x38   :  { %v1287_v40 = vmax.f32 %v386_v1, %v434_v26  ;;  %v1289_v44 = vunpack.c.l.bf16 %v41_v51  ;;  %v1291_v47 = vunpack.c.l.bf16 %v43_v2  ;;  %v146_v10 = vunpack.c.l.bf16 %v1271_v52  ;;  %v46_v2 = vld [vmem:[%s1463_s0 + $0x74] sm:$0x1]  ;;  %v69_v52 = vld [vmem:[%s1464_s1 + $0x80] sm:$0xf] }
  0x39   :  { %v562_v18 = vsel %vm247_vm0, %v560_v6, %v561_v28  ;;  %v565_v41 = vsel %vm247_vm0, %v563_v33, %v564_v8  ;;  %v147_v48 = vunpack.c.l.bf16 %v1279_v39  ;;  %v210_v49 = vunpack.c.l.bf16 %v42_v37  ;;  %v97_v8 = vld [vmem:[%s1465_s2 + $0x70] sm:$0xf] }
  0x3a   :  { %v608_v42 = vmax.f32 %v448_v3, %v562_v18  ;;  %v609_v53 = vmax.f32 %v449_v7, %v565_v41  ;;  %v162_v57 = vmax.f32 %v1289_v44, %v146_v10  ;;  %v211_v58 = vunpack.c.l.bf16 %v44_v11  ;;  %v99_v11 = vld [vmem:[%s1465_s2 + $0x78] sm:$0xf] }
  0x3b   :  { %v163_v61 = vmax.f32 %v1291_v47, %v147_v48  ;;  %v281_v63 = vrot.slane %v1289_v44, 1  ;;  %v282_v59 = vrot.slane %v210_v49, 1  ;;  %v284_v0 = vrot.slane %v1291_v47, 1  ;;  %v117_v49 = vld [vmem:[%s1466_s3 + $0x78] sm:$0xf] }
  0x3c   :  { %v658_v4 = vmax.f32 %v608_v42, %v1208_v32  ;;  %v659_v5 = vmax.f32 %v609_v53, %v1210_v56  ;;  %v285_v13 = vrot.slane %v211_v58, 1  ;;  %v371_v14 = vunpack.c.l.bf16 %v93_v19 }
  0x3d   :  { %v1326_v15 = vsel %vm247_vm0, %v281_v63, %v282_v59  ;;  %v372_v16 = vunpack.c.l.bf16 %v95_v34  ;;  %v435_v17 = vunpack.c.l.bf16 %v114_v36  ;;  %v436_v20 = vunpack.c.l.bf16 %v115_v46  ;;  %v96_v34 = vld [vmem:[%s1465_s2 + $0x6c] sm:$0x1]  ;;  %v98_v63 = vld [vmem:[%s1465_s2 + $0x74] sm:$0x1] }
  0x3e   :  { %v708_v32 = vmax.f32 %v658_v4, %v144_v43  ;;  %v709_v56 = vmax.f32 %v659_v5, %v145_v45  ;;  %v1333_v62 = vsel %vm247_vm0, %v284_v0, %v285_v13  ;;  %v323_v21 = vmax.f32 %v162_v57, %v1326_v15 }
  0x3f   :  { %v324_v24 = vmax.f32 %v163_v61, %v1333_v62  ;;  %v498_v54 = vunpack.c.l.bf16 %v92_v9  ;;  %v499_v55 = vunpack.c.l.bf16 %v94_v12  ;;  %v569_v25 = vrot.slane %v371_v14, 1 }
  0x40   :  { %v770_v43 = vmax.f32 %v708_v32, %v1255_v60  ;;  %v771_v45 = vmax.f32 %v709_v56, %v1258_v22  ;;  %v387_v26 = vmax.f32 %v323_v21, %v371_v14  ;;  %v572_v27 = vrot.slane %v372_v16, 1  ;;  %v48_v22 = vld [vmem:[%s1463_s0 + $0x7c] sm:$0x1] }
  0x41   :  { %v388_v30 = vmax.f32 %v324_v24, %v372_v16  ;;  %v567_v31 = vrot.slane %v498_v54, 1  ;;  %v570_v51 = vrot.slane %v499_v55, 1  ;;  %v1358_v1 = vunpack.c.l.bf16 %v45_v23  ;;  %v50_v23 = vld [vmem:[%s1463_s0 + $0x84] sm:$0x1]  ;;  %v101_v55 = vld [vmem:[%s1465_s2 + $0x80] sm:$0xf] }
  0x42   :  { %v837_v3 = vpack.c.bf16 %v771_v45, %v770_v43  ;;  %v451_v60 = vmax.f32 %v387_v26, %v435_v17  ;;  %v1363_v6 = vunpack.c.l.bf16 %v47_v50  ;;  %v148_v33 = vunpack.c.l.bf16 %v1346_v38  ;;  %v70_v38 = vld [vmem:[%s1464_s1 + $0x88] sm:$0xf] }
  0x43   :  { %v1366_v37 = vmax.f32 %v388_v30, %v436_v20  ;;  %v568_v7 = vsel %vm247_vm0, %v566_v35, %v567_v31  ;;  %v571_v28 = vsel %vm247_vm0, %v569_v25, %v570_v51  ;;  %v149_v18 = vunpack.c.l.bf16 %v1353_v29  ;;  %v116_v35 = vld [vmem:[%s1466_s3 + $0x70] sm:$0xf]  ;;  %v100_v31 = vld [vmem:[%s1465_s2 + $0x7c] sm:$0x1]  ;;  %v102_v51 = vld [vmem:[%s1465_s2 + $0x84] sm:$0x1] }
  0x44   :  { %857 = vst [vmem:[%s1467_s4 + $0x20] sm:$0xff] %v837_v3   ;;  %v610_v41 = vmax.f32 %v1287_v40, %v568_v7  ;;  %v611_v19 = vmax.f32 %v451_v60, %v571_v28  ;;  %v164_v42 = vmax.f32 %v1358_v1, %v148_v33  ;;  %v212_v53 = vunpack.c.l.bf16 %v46_v2  ;;  %v118_v28 = vld [vmem:[%s1466_s3 + $0x80] sm:$0xf] }
  0x45   :  { %v165_v40 = vmax.f32 %v1363_v6, %v149_v18  ;;  %v213_v36 = vunpack.c.l.bf16 %v48_v22  ;;  %v287_v46 = vrot.slane %v1358_v1, 1  ;;  %v290_v57 = vrot.slane %v1363_v6, 1 }
  0x46   :  { %v660_v58 = vmax.f32 %v610_v41, %v1289_v44  ;;  %v661_v61 = vmax.f32 %v611_v19, %v1291_v47  ;;  %v288_v59 = vrot.slane %v212_v53, 1  ;;  %v373_v0 = vunpack.c.l.bf16 %v97_v8  ;;  %v49_v47 = vld [vmem:[%s1463_s0 + $0x80] sm:$0xf]  ;;  %v51_v41 = vld [vmem:[%s1463_s0 + $0x88] sm:$0xf] }
  0x47   :  { %v291_v4 = vrot.slane %v213_v36, 1  ;;  %v374_v5 = vunpack.c.l.bf16 %v99_v11  ;;  %v437_v9 = vunpack.c.l.bf16 %v116_v35  ;;  %v438_v12 = vunpack.c.l.bf16 %v117_v49  ;;  %v52_v19 = vld [vmem:[%s1463_s0 + $0x8c] sm:$0x1] }
  0x48   :  { %v710_v13 = vmax.f32 %v660_v58, %v146_v10  ;;  %v711_v14 = vmax.f32 %v661_v61, %v147_v48  ;;  %v289_v44 = vsel %vm247_vm0, %v287_v46, %v288_v59  ;;  %v500_v16 = vunpack.c.l.bf16 %v96_v34 }
  0x49   :  { %v292_v17 = vsel %vm247_vm0, %v290_v57, %v291_v4  ;;  %v325_v20 = vmax.f32 %v164_v42, %v289_v44  ;;  %v501_v32 = vunpack.c.l.bf16 %v98_v63  ;;  %v575_v56 = vrot.slane %v373_v0, 1 }
  0x4a   :  { %v772_v10 = vmax.f32 %v710_v13, %v1326_v15  ;;  %v773_v39 = vmax.f32 %v711_v14, %v1333_v62  ;;  %v326_v48 = vmax.f32 %v165_v40, %v292_v17  ;;  %v573_v21 = vrot.slane %v500_v16, 1 }
  0x4b   :  { %v389_v24 = vmax.f32 %v325_v20, %v373_v0  ;;  %v576_v54 = vrot.slane %v501_v32, 1  ;;  %v134_v25 = vunpack.c.l.bf16 %v49_v47  ;;  %v150_v15 = vunpack.c.l.bf16 %v69_v52 }
  0x4c   :  { %v842_v50 = vpack.c.bf16 %v773_v39, %v772_v10  ;;  %v390_v43 = vmax.f32 %v326_v48, %v374_v5  ;;  %v574_v45 = vsel %vm247_vm0, %v572_v27, %v573_v21  ;;  %v214_v2 = vunpack.c.l.bf16 %v50_v23 }
  0x4d   :  { %v453_v26 = vmax.f32 %v389_v24, %v437_v9  ;;  %v577_v62 = vsel %vm247_vm0, %v575_v56, %v576_v54  ;;  %v612_v30 = vmax.f32 %v1366_v37, %v574_v45  ;;  %v166_v3 = vmax.f32 %v134_v25, %v150_v15 }
  0x4e   :  { %858 = vst [vmem:[%s1467_s4 + $0x28] sm:$0xff] %v842_v50   ;;  %v454_v27 = vmax.f32 %v390_v43, %v438_v12  ;;  %v293_v60 = vrot.slane %v134_v25, 1  ;;  %v375_v22 = vunpack.c.l.bf16 %v101_v55  ;;  %v294_v8 = vrot.slane %v214_v2, 1 }
  0x4f   :  { %v613_v7 = vmax.f32 %v453_v26, %v577_v62  ;;  %v662_v37 = vmax.f32 %v612_v30, %v1358_v1  ;;  %v578_v11 = vrot.slane %v374_v5, 1  ;;  %v502_v35 = vunpack.c.l.bf16 %v100_v31 }
  0x50   :  { %v503_v49 = vunpack.c.l.bf16 %v102_v51  ;;  %v295_v53 = vsel %vm247_vm0, %v293_v60, %v294_v8  ;;  %v581_v34 = vrot.slane %v375_v22, 1  ;;  %v439_v36 = vunpack.c.l.bf16 %v118_v28 }
  0x51   :  { %v663_v42 = vmax.f32 %v613_v7, %v1363_v6  ;;  %v712_v1 = vmax.f32 %v662_v37, %v148_v33  ;;  %v327_v40 = vmax.f32 %v166_v3, %v295_v53  ;;  %v579_v46 = vrot.slane %v502_v35, 1 }
  0x52   :  { %v582_v57 = vrot.slane %v503_v49, 1  ;;  %v649_v63 = vunpack.c.l.bf16 %v51_v41  ;;  %v749_v59 = vunpack.c.l.bf16 %v52_v19 }
  0x53   :  { %v713_v58 = vmax.f32 %v663_v42, %v149_v18  ;;  %v774_v61 = vmax.f32 %v712_v1, %v289_v44  ;;  %v391_v0 = vmax.f32 %v327_v40, %v375_v22  ;;  %v580_v4 = vsel %vm247_vm0, %v578_v11, %v579_v46 }
  0x54   :  { %v583_v33 = vsel %vm247_vm0, %v581_v34, %v582_v57  ;;  %v614_v5 = vmax.f32 %v454_v27, %v580_v4  ;;  %v757_v14 = vrot.slane %v649_v63, 1  ;;  %v758_v29 = vrot.slane %v749_v59, 1 }
  0x55   :  { %v775_v6 = vmax.f32 %v713_v58, %v292_v17  ;;  %v455_v9 = vmax.f32 %v391_v0, %v439_v36  ;;  %v699_v44 = vunpack.c.l.bf16 %v70_v38 }
  0x56   :  { %v664_v13 = vmax.f32 %v614_v5, %v134_v25  ;;  %v759_v17 = vsel %vm247_vm0, %v757_v14, %v758_v29 }
  0x57   :  { %v847_v12 = vpack.c.bf16 %v775_v6, %v774_v61  ;;  %v615_v18 = vmax.f32 %v455_v9, %v583_v33 }
  0x58   :  { %v714_v16 = vmax.f32 %v664_v13, %v150_v15 }
  0x59   :  { %859 = vst [vmem:[%s1467_s4 + $0x30] sm:$0xff] %v847_v12   ;;  %v665_v47 = vmax.f32 %v615_v18, %v649_v63 }
  0x5a   :  { %v776_v20 = vmax.f32 %v714_v16, %v295_v53 }
  0x5b   :  { %v715_v32 = vmax.f32 %v665_v47, %v699_v44 }
  0x5d   :  { %v777_v56 = vmax.f32 %v715_v32, %v759_v17 }
  0x5f   :  { %v852_v52 = vpack.c.bf16 %v777_v56, %v776_v20 }
  0x61   :  { %860 = vst [vmem:[%s1467_s4 + $0x38] sm:$0xff] %v852_v52  }

// kernel: resnet34_forward.39
= control target key start
LH: loop header
LB: loop body
LE: loop exit
PB: predicated region body
PF: predicated region fallthrough
CT: control target
= control target key end

     0   :  { %s1245_s15 = smov 0   ;;  %s1247_s16 = smov 0   ;;  %s1419_s0 = inlined_call_operand.vmem [shape: bf16[512,256], index: 0, kind: input, shape index: {}]   ;;  %s1420_s1 = inlined_call_operand.vmem [shape: bf16[256,128], index: 1, kind: input, shape index: {}]   ;;  %s1421_s2 = inlined_call_operand.vmem [shape: f32[1,128], index: 2, kind: input, shape index: {}]   ;;  %s1422_s3 = inlined_call_operand.vmem [shape: f32[1,128], index: 3, kind: input, shape index: {}]   ;;  %s1423_s4 = inlined_call_operand.vmem [shape: bf16[512,128], index: 4, kind: output, shape index: {}]  }
   0x1   :  { %s1249_s17 = smov 0  }
   0x2 LB: > { %s33_s18 = sadd.s32 1, %s1214_s16  ;;  %p938_p0 = scmp.ge.s32.totalorder %s1218_s17, 1  ;;  %s1218_s17 = sphi %s1249_s17, %s14_s17   ;;  %s1214_s16 = sphi %s1247_s16, %s1425_s16   ;;  %s1210_s15 = sphi %s1245_s15, %s1424_s15  }
   0x3   : > { %p35_p1 = scmp.ge.s32.totalorder %s33_s18, 4  ;;  %p224_p2 = scmp.lt.s32.totalorder %s1218_s17, 5 }
   0x5   : > { %s1427_s18 = smov (%p35_p1, %s33_s18), 0  ;;  %p225_p3 = pnand %p938_p0, %p224_p2 }
   0x6   : > { %s939_s5 = sshll.u32 (!%p225_p3), %s1210_s15, 4 }
   0x7   : > { %228 = sbr.rel (%p225_p3) target bundleno = 244 (0xf4), region = 36  ;;  %p274_p4 = scmp.lt.s32.totalorder (!%p225_p3), %s939_s5, 63 }
   0xc   : > { %v1098_v0 = vld [vmem:[%s1420_s1 + $0x38] sm:$0xff]  ;;  %v1097_v2 = vld [vmem:[%s1420_s1 + $0x30] sm:$0xff]  ;;  %v1096_v4 = vld [vmem:[%s1420_s1 + $0x28] sm:$0xff]  ;;  %s1429_s5 = smov (!%p274_p4, %s939_s5), 63 }
   0xd   : > { %v1106_v1 = vld [vmem:[%s1420_s1 + $0x78] sm:$0xff]  ;;  %568 = vmatpush.bf16.msra.mxu0 %v1098_v0  ;;  %1154 = vmatpush.bf16.msra.mxu2 %v1098_v0  ;;  %v1105_v3 = vld [vmem:[%s1420_s1 + $0x70] sm:$0xff]  ;;  %v1104_v5 = vld [vmem:[%s1420_s1 + $0x68] sm:$0xff]  ;;  %s1074_s21 = sshll.u32 %s1429_s5, 3  ;;  %s943_s12 = sshll.u32 %s1429_s5, 2 }
   0xe   : > { %617 = vmatpush.bf16.msra.mxu1 %v1106_v1  ;;  %1162 = vmatpush.bf16.msra.mxu3 %v1106_v1  ;;  %v1095_v6 = vld [vmem:[%s1420_s1 + $0x20] sm:$0xff]  ;;  %v1094_v8 = vld [vmem:[%s1420_s1 + $0x18] sm:$0xff]  ;;  %v1093_v10 = vld [vmem:[%s1420_s1 + $0x10] sm:$0xff]  ;;  %s1311_s26 = scalar_lea.vmem %s1419_s0, %s1074_s21  ;;  %s1373_s15 = scalar_lea.vmem %s1423_s4, %s943_s12 }
   0xf   : > { %v1103_v7 = vld [vmem:[%s1420_s1 + $0x60] sm:$0xff]  ;;  %v1102_v9 = vld [vmem:[%s1420_s1 + $0x58] sm:$0xff]  ;;  %v1101_v11 = vld [vmem:[%s1420_s1 + $0x50] sm:$0xff] }
  0x10   : > { %v1092_v12 = vld [vmem:[%s1420_s1 + $0x8] sm:$0xff]  ;;  %v1091_v14 = vld [vmem:[%s1420_s1] sm:$0xff]  ;;  %v954_v28 = vld [vmem:[%s1311_s26 + $0x10] sm:$0xf] }
  0x11   : > { %569 = vmatpush.bf16.msra.mxu0 %v1097_v2  ;;  %1155 = vmatpush.bf16.msra.mxu2 %v1097_v2  ;;  %v1100_v13 = vld [vmem:[%s1420_s1 + $0x48] sm:$0xff]  ;;  %v1099_v15 = vld [vmem:[%s1420_s1 + $0x40] sm:$0xff]  ;;  %v1078_v29 = vld [vmem:[%s1311_s26 + $0x14] sm:$0xf0] }
  0x12   : > { %618 = vmatpush.bf16.msra.mxu1 %v1105_v3  ;;  %1163 = vmatpush.bf16.msra.mxu3 %v1105_v3  ;;  %v946_v16 = vld [vmem:[%s1311_s26] sm:$0xf]  ;;  %v1076_v17 = vld [vmem:[%s1311_s26 + $0x4] sm:$0xf0]  ;;  %v1075_v20 = vld [vmem:[%s1311_s26 + $0x4] sm:$0xf]  ;;  %v955_v36 = vor.u32 %v1078_v29, %v954_v28 }
  0x13   : > { %v978_v18 = vld [vmem:[%s1311_s26 + $0x40] sm:$0xf]  ;;  %v1084_v19 = vld [vmem:[%s1311_s26 + $0x44] sm:$0xf0]  ;;  %v948_v21 = vld [vmem:[%s1311_s26 + $0x8] sm:$0xf0]  ;;  %v947_v24 = vor.u32 %v1076_v17, %v946_v16 }
  0x14   : > { %v1083_v22 = vld [vmem:[%s1311_s26 + $0x44] sm:$0xf]  ;;  %v980_v23 = vld [vmem:[%s1311_s26 + $0x48] sm:$0xf0]  ;;  %v979_v25 = vor.u32 %v1084_v19, %v978_v18  ;;  %v951_v26 = vor.u32 %v1075_v20, %v948_v21  ;;  %v986_v30 = vld [vmem:[%s1311_s26 + $0x50] sm:$0xf] }
  0x15   : > { %570 = vmatpush.bf16.msra.mxu0 %v1096_v4  ;;  %1156 = vmatpush.bf16.msra.mxu2 %v1096_v4  ;;  %v983_v27 = vor.u32 %v1083_v22, %v980_v23  ;;  %v1086_v31 = vld [vmem:[%s1311_s26 + $0x54] sm:$0xf0]  ;;  %v1077_v32 = vld [vmem:[%s1311_s26 + $0x14] sm:$0xf]  ;;  %v956_v33 = vld [vmem:[%s1311_s26 + $0x18] sm:$0xf0] }
  0x16   : > { %619 = vmatpush.bf16.msra.mxu1 %v1104_v5  ;;  %1164 = vmatpush.bf16.msra.mxu3 %v1104_v5  ;;  %v1085_v34 = vld [vmem:[%s1311_s26 + $0x54] sm:$0xf]  ;;  %v988_v35 = vld [vmem:[%s1311_s26 + $0x58] sm:$0xf0]  ;;  %v987_v37 = vor.u32 %v1086_v31, %v986_v30  ;;  %v959_v38 = vor.u32 %v1077_v32, %v956_v33  ;;  %v962_v40 = vld [vmem:[%s1311_s26 + $0x20] sm:$0xf] }
  0x17   : > { %v991_v39 = vor.u32 %v1085_v34, %v988_v35  ;;  %v1080_v41 = vld [vmem:[%s1311_s26 + $0x24] sm:$0xf0]  ;;  %v994_v42 = vld [vmem:[%s1311_s26 + $0x60] sm:$0xf]  ;;  %v1079_v44 = vld [vmem:[%s1311_s26 + $0x24] sm:$0xf] }
  0x18   : > { %v1088_v43 = vld [vmem:[%s1311_s26 + $0x64] sm:$0xf0]  ;;  %v964_v45 = vld [vmem:[%s1311_s26 + $0x28] sm:$0xf0]  ;;  %v1087_v46 = vld [vmem:[%s1311_s26 + $0x64] sm:$0xf]  ;;  %v963_v48 = vor.u32 %v1080_v41, %v962_v40 }
  0x19   : > { %571 = vmatpush.bf16.msra.mxu0 %v1095_v6  ;;  %1157 = vmatpush.bf16.msra.mxu2 %v1095_v6  ;;  %v996_v47 = vld [vmem:[%s1311_s26 + $0x68] sm:$0xf0]  ;;  %v995_v49 = vor.u32 %v1088_v43, %v994_v42  ;;  %v967_v50 = vor.u32 %v1079_v44, %v964_v45  ;;  %v970_v52 = vld [vmem:[%s1311_s26 + $0x30] sm:$0xf]  ;;  %v1082_v53 = vld [vmem:[%s1311_s26 + $0x34] sm:$0xf0] }
  0x1a   : > { %620 = vmatpush.bf16.msra.mxu1 %v1103_v7  ;;  %1165 = vmatpush.bf16.msra.mxu3 %v1103_v7  ;;  %v999_v51 = vor.u32 %v1087_v46, %v996_v47  ;;  %v1002_v54 = vld [vmem:[%s1311_s26 + $0x70] sm:$0xf]  ;;  %v1090_v55 = vld [vmem:[%s1311_s26 + $0x74] sm:$0xf0]  ;;  %v1081_v56 = vld [vmem:[%s1311_s26 + $0x34] sm:$0xf]  ;;  %v971_v60 = vor.u32 %v1082_v53, %v970_v52 }
  0x1b   : > { %v972_v57 = vld [vmem:[%s1311_s26 + $0x38] sm:$0xf0]  ;;  %v1089_v58 = vld [vmem:[%s1311_s26 + $0x74] sm:$0xf]  ;;  %v1003_v61 = vor.u32 %v1090_v55, %v1002_v54  ;;  %v1357_v3 = vld [vmem:[%s1421_s2] ss:$0 sm:$0xff] }
  0x1c   : > { %v1004_v59 = vld [vmem:[%s1311_s26 + $0x78] sm:$0xf0]  ;;  %v975_v62 = vor.u32 %v1081_v56, %v972_v57  ;;  %v1363_v7 = vld [vmem:[%s1422_s3] ss:$0 sm:$0xff] }
  0x1d   : > { %572 = vmatpush.bf16.msra.mxu0 %v1094_v8  ;;  %1158 = vmatpush.bf16.msra.mxu2 %v1094_v8  ;;  %v1007_v63 = vor.u32 %v1089_v58, %v1004_v59 }
  0x1e   : > { %621 = vmatpush.bf16.msra.mxu1 %v1102_v9  ;;  %1166 = vmatpush.bf16.msra.mxu3 %v1102_v9 }
  0x21   : > { %573 = vmatpush.bf16.msra.mxu0 %v1093_v10  ;;  %1159 = vmatpush.bf16.msra.mxu2 %v1093_v10 }
  0x22   : > { %622 = vmatpush.bf16.msra.mxu1 %v1101_v11  ;;  %1167 = vmatpush.bf16.msra.mxu3 %v1101_v11 }
  0x25   : > { %574 = vmatpush.bf16.msra.mxu0 %v1092_v12  ;;  %1160 = vmatpush.bf16.msra.mxu2 %v1092_v12 }
  0x26   : > { %623 = vmatpush.bf16.msra.mxu1 %v1100_v13  ;;  %1168 = vmatpush.bf16.msra.mxu3 %v1100_v13 }
  0x29   : > { %575 = vmatpush.bf16.msra.mxu0 %v1091_v14  ;;  %1161 = vmatpush.bf16.msra.mxu2 %v1091_v14 }
  0x2a   : > { %624 = vmatpush.bf16.msra.mxu1 %v1099_v15  ;;  %1169 = vmatpush.bf16.msra.mxu3 %v1099_v15 }
  0x2c   : > { %576 = vmatmul.bf16.vlgmr.msra.gmra.mxu0 %v947_v24  ;;  %596 = vmatmul.bf16.vlgmr.msra.gmra.mxu2 %v979_v25 }
  0x2d   : > { %625 = vmatmul.bf16.vlgmr.msra.gmra.mxu1 %v951_v26  ;;  %645 = vmatmul.bf16.vlgmr.msra.gmra.mxu3 %v983_v27 }
  0x3c   : > { %581 = vmatmul.bf16.gmra.mxu0 %v955_v36  ;;  %601 = vmatmul.bf16.gmra.mxu2 %v987_v37 }
  0x3d   : > { %630 = vmatmul.bf16.gmra.mxu1 %v959_v38  ;;  %650 = vmatmul.bf16.gmra.mxu3 %v991_v39 }
  0x4c   : > { %586 = vmatmul.bf16.gmra.mxu0 %v963_v48  ;;  %606 = vmatmul.bf16.gmra.mxu2 %v995_v49 }
  0x4d   : > { %635 = vmatmul.bf16.gmra.mxu1 %v967_v50  ;;  %655 = vmatmul.bf16.gmra.mxu3 %v999_v51 }
  0x5c   : > { %591 = vmatmul.bf16.gmra.mxu0 %v971_v60  ;;  %611 = vmatmul.bf16.gmra.mxu2 %v1003_v61 }
  0x5d   : > { %640 = vmatmul.bf16.gmra.mxu1 %v975_v62  ;;  %660 = vmatmul.bf16.gmra.mxu3 %v1007_v63 }
  0xa9   : > { %v577_v0 = vpop.f32.mrf.mxu0 }
  0xaa   : > { %v626_v1 = vpop.f32.mrf.mxu1 }
  0xab   : > { %v627_v2 = vadd.f32 %v626_v1, %v577_v0 }
  0xad   : > { %v721_v6 = vmul.f32 %v1357_v3, %v627_v2 }
  0xaf   : > { %v597_v4 = vpop.f32.mrf.mxu2  ;;  %v741_v12 = vadd.f32 %v1363_v7, %v721_v6 }
  0xb0   : > { %v646_v5 = vpop.f32.mrf.mxu3 }
  0xb1   : > { %v579_v8 = vpop.f32.mrf.mxu0  ;;  %v647_v10 = vadd.f32 %v646_v5, %v597_v4  ;;  %v757_v18 = vmax.f32 %v741_v12, 0.0 }
  0xb2   : > { %v628_v9 = vpop.f32.mrf.mxu1 }
  0xb3   : > { %v629_v11 = vadd.f32 %v628_v9, %v579_v8  ;;  %v729_v14 = vmul.f32 %v1357_v3, %v647_v10 }
  0xb5   : > { %v722_v13 = vmul.f32 %v1357_v3, %v629_v11  ;;  %v749_v23 = vadd.f32 %v1363_v7, %v729_v14 }
  0xb7   : > { %v742_v15 = vadd.f32 %v1363_v7, %v722_v13  ;;  %v599_v16 = vpop.f32.mrf.mxu2  ;;  %v765_v28 = vmax.f32 %v749_v23, 0.0 }
  0xb8   : > { %v648_v17 = vpop.f32.mrf.mxu3 }
  0xb9   : > { %v758_v19 = vmax.f32 %v742_v15, 0.0  ;;  %v649_v20 = vadd.f32 %v648_v17, %v599_v16  ;;  %v582_v21 = vpop.f32.mrf.mxu0 }
  0xba   : > { %v631_v22 = vpop.f32.mrf.mxu1 }
  0xbb   : > { %v1110_v24 = vpack.c.bf16 %v758_v19, %v757_v18  ;;  %v730_v25 = vmul.f32 %v1357_v3, %v649_v20  ;;  %v632_v27 = vadd.f32 %v631_v22, %v582_v21 }
  0xbd   : > { %1111 = vst [vmem:[%s1373_s15] sm:$0xff] %v1110_v24   ;;  %v750_v26 = vadd.f32 %v1363_v7, %v730_v25  ;;  %v723_v33 = vmul.f32 %v1357_v3, %v632_v27 }
  0xbf   : > { %v766_v29 = vmax.f32 %v750_v26, 0.0  ;;  %v602_v30 = vpop.f32.mrf.mxu2  ;;  %v743_v38 = vadd.f32 %v1363_v7, %v723_v33 }
  0xc0   : > { %v651_v31 = vpop.f32.mrf.mxu3 }
  0xc1   : > { %v1130_v32 = vpack.c.bf16 %v766_v29, %v765_v28  ;;  %v584_v34 = vpop.f32.mrf.mxu0  ;;  %v652_v36 = vadd.f32 %v651_v31, %v602_v30  ;;  %v759_v44 = vmax.f32 %v743_v38, 0.0 }
  0xc2   : > { %v633_v35 = vpop.f32.mrf.mxu1 }
  0xc3   : > { %1150 = vst [vmem:[%s1373_s15 + $0x20] sm:$0xff] %v1130_v32   ;;  %v634_v37 = vadd.f32 %v633_v35, %v584_v34  ;;  %v731_v40 = vmul.f32 %v1357_v3, %v652_v36 }
  0xc5   : > { %v724_v39 = vmul.f32 %v1357_v3, %v634_v37  ;;  %v751_v49 = vadd.f32 %v1363_v7, %v731_v40 }
  0xc7   : > { %v744_v41 = vadd.f32 %v1363_v7, %v724_v39  ;;  %v604_v42 = vpop.f32.mrf.mxu2  ;;  %v767_v54 = vmax.f32 %v751_v49, 0.0 }
  0xc8   : > { %v653_v43 = vpop.f32.mrf.mxu3 }
  0xc9   : > { %v760_v45 = vmax.f32 %v744_v41, 0.0  ;;  %v654_v46 = vadd.f32 %v653_v43, %v604_v42  ;;  %v587_v47 = vpop.f32.mrf.mxu0 }
  0xca   : > { %v636_v48 = vpop.f32.mrf.mxu1 }
  0xcb   : > { %v1115_v50 = vpack.c.bf16 %v760_v45, %v759_v44  ;;  %v732_v51 = vmul.f32 %v1357_v3, %v654_v46  ;;  %v637_v53 = vadd.f32 %v636_v48, %v587_v47 }
  0xcd   : > { %1147 = vst [vmem:[%s1373_s15 + $0x8] sm:$0xff] %v1115_v50   ;;  %v752_v52 = vadd.f32 %v1363_v7, %v732_v51  ;;  %v725_v59 = vmul.f32 %v1357_v3, %v637_v53 }
  0xcf   : > { %v768_v55 = vmax.f32 %v752_v52, 0.0  ;;  %v607_v56 = vpop.f32.mrf.mxu2  ;;  %v745_v0 = vadd.f32 %v1363_v7, %v725_v59 }
  0xd0   : > { %v656_v57 = vpop.f32.mrf.mxu3 }
  0xd1   : > { %v1135_v58 = vpack.c.bf16 %v768_v55, %v767_v54  ;;  %v589_v60 = vpop.f32.mrf.mxu0  ;;  %v657_v62 = vadd.f32 %v656_v57, %v607_v56  ;;  %v761_v8 = vmax.f32 %v745_v0, 0.0 }
  0xd2   : > { %v638_v61 = vpop.f32.mrf.mxu1 }
  0xd3   : > { %1151 = vst [vmem:[%s1373_s15 + $0x28] sm:$0xff] %v1135_v58   ;;  %v639_v63 = vadd.f32 %v638_v61, %v589_v60  ;;  %v733_v2 = vmul.f32 %v1357_v3, %v657_v62 }
  0xd5   : > { %v726_v1 = vmul.f32 %v1357_v3, %v639_v63  ;;  %v753_v13 = vadd.f32 %v1363_v7, %v733_v2 }
  0xd7   : > { %v746_v4 = vadd.f32 %v1363_v7, %v726_v1  ;;  %v609_v5 = vpop.f32.mrf.mxu2  ;;  %v769_v18 = vmax.f32 %v753_v13, 0.0 }
  0xd8   : > { %v658_v6 = vpop.f32.mrf.mxu3 }
  0xd9   : > { %v762_v9 = vmax.f32 %v746_v4, 0.0  ;;  %v659_v10 = vadd.f32 %v658_v6, %v609_v5  ;;  %v592_v11 = vpop.f32.mrf.mxu0 }
  0xda   : > { %v641_v12 = vpop.f32.mrf.mxu1 }
  0xdb   : > { %v1120_v14 = vpack.c.bf16 %v762_v9, %v761_v8  ;;  %v734_v15 = vmul.f32 %v1357_v3, %v659_v10  ;;  %v642_v17 = vadd.f32 %v641_v12, %v592_v11 }
  0xdd   : > { %1148 = vst [vmem:[%s1373_s15 + $0x10] sm:$0xff] %v1120_v14   ;;  %v754_v16 = vadd.f32 %v1363_v7, %v734_v15  ;;  %v727_v23 = vmul.f32 %v1357_v3, %v642_v17 }
  0xdf   : > { %v770_v19 = vmax.f32 %v754_v16, 0.0  ;;  %v612_v20 = vpop.f32.mrf.mxu2  ;;  %v747_v28 = vadd.f32 %v1363_v7, %v727_v23 }
  0xe0   : > { %v661_v21 = vpop.f32.mrf.mxu3 }
  0xe1   : > { %v1140_v22 = vpack.c.bf16 %v770_v19, %v769_v18  ;;  %v594_v24 = vpop.f32.mrf.mxu0  ;;  %v662_v26 = vadd.f32 %v661_v21, %v612_v20  ;;  %v763_v34 = vmax.f32 %v747_v28, 0.0 }
  0xe2   : > { %v643_v25 = vpop.f32.mrf.mxu1 }
  0xe3   : > { %1152 = vst [vmem:[%s1373_s15 + $0x30] sm:$0xff] %v1140_v22   ;;  %v644_v27 = vadd.f32 %v643_v25, %v594_v24  ;;  %v735_v30 = vmul.f32 %v1357_v3, %v662_v26 }
  0xe5   : > { %v728_v29 = vmul.f32 %v1357_v3, %v644_v27  ;;  %v755_v37 = vadd.f32 %v1363_v7, %v735_v30 }
  0xe7   : > { %v748_v31 = vadd.f32 %v1363_v7, %v728_v29  ;;  %v614_v32 = vpop.f32.mrf.mxu2  ;;  %v771_v41 = vmax.f32 %v755_v37, 0.0 }
  0xe8   : > { %v663_v33 = vpop.f32.mrf.mxu3 }
  0xe9   : > { %v764_v35 = vmax.f32 %v748_v31, 0.0  ;;  %v664_v36 = vadd.f32 %v663_v33, %v614_v32 }
  0xeb   : > { %v1125_v38 = vpack.c.bf16 %v764_v35, %v763_v34  ;;  %v736_v39 = vmul.f32 %v1357_v3, %v664_v36 }
  0xed   : > { %1149 = vst [vmem:[%s1373_s15 + $0x18] sm:$0xff] %v1125_v38   ;;  %v756_v40 = vadd.f32 %v1363_v7, %v736_v39 }
  0xef   : > { %v772_v42 = vmax.f32 %v756_v40, 0.0 }
  0xf1   : > { %v1145_v43 = vpack.c.bf16 %v772_v42, %v771_v41 }
  0xf3   : > { %1153 = vst [vmem:[%s1373_s15 + $0x38] sm:$0xff] %v1145_v43  }
  0xf4 PF: > { %s14_s17 = sadd.s32 1, %s1218_s17   ;;  %s1424_s15 = smov %s1214_s16 }
  0xf5   : > { %p11_p5 = scmp.ge.s32.totalorder %s14_s17, 6   ;;  %s1425_s16 = smov %s1427_s18 }
  0xf7   :  { %13 = sbr.rel (!%p11_p5) target bundleno = 2 (0x2), region = 83 }

// kernel: resnet34_forward.42
= control target key start
LH: loop header
LB: loop body
LE: loop exit
PB: predicated region body
PF: predicated region fallthrough
CT: control target
= control target key end

     0   :  { %s1319_s18 = smov 0   ;;  %s1321_s19 = smov 0   ;;  %s1514_s0 = inlined_call_operand.vmem [shape: bf16[128,1152], index: 0, kind: input, shape index: {}]   ;;  %s1515_s1 = inlined_call_operand.vmem [shape: bf16[1152,128], index: 1, kind: input, shape index: {}]   ;;  %s1516_s2 = inlined_call_operand.vmem [shape: f32[1,128], index: 2, kind: input, shape index: {}]   ;;  %s1517_s3 = inlined_call_operand.vmem [shape: f32[1,128], index: 3, kind: input, shape index: {}]   ;;  %s1518_s4 = inlined_call_operand.vmem [shape: bf16[128,128], index: 4, kind: input, shape index: {}]   ;;  %s1519_s5 = inlined_call_operand.vmem [shape: bf16[128,128], index: 5, kind: output, shape index: {}]  }
   0x1   :  { %s1323_s20 = smov 0   ;;  %s1325_s21 = smov 0  }
   0x2   :  { %s1327_s22 = smov 0  }
   0x3 LB: > { %s27_s23 = sadd.s32 1, %s1282_s21  ;;  %p50_p1 = scmp.ne.s32.totalorder %s1274_s19, %s1270_s18  ;;  %s1286_s22 = sphi %s1327_s22, %s15_s22   ;;  %s1282_s21 = sphi %s1325_s21, %s1523_s21   ;;  %s1278_s20 = sphi %s1323_s20, %s1522_s20   ;;  %s1274_s19 = sphi %s1321_s19, %s1521_s19   ;;  %s1270_s18 = sphi %s1319_s18, %s1520_s18  }
   0x4   : > { %p28_p0 = scmp.ge.s32.totalorder %s27_s23, 9  ;;  %p51_p2 = scmp.eq.s32.totalorder %s1286_s22, 0 }
   0x5   : > { %s43_s25 = sadd.s32 1, %s1274_s19  ;;  %p1002_p5 = scmp.ge.s32.totalorder %s1286_s22, 9 }
   0x6   : > { %s1525_s23 = smov (%p28_p0, %s27_s23), 0  ;;  %p52_p3 = por %p51_p2, %p50_p1 }
   0x7   : > { %s39_s24 = ssub.s32 %s1282_s21, %s1525_s23  ;;  %236 = sbr.rel (%p1002_p5) target bundleno = 32 (0x20), region = 28 }
   0x8   : > { %p41_p4 = scmp.eq.s32.totalorder %s39_s24, 0 }
   0xa   : > { %s1354_s26 = scalar_select %p41_p4, %s1274_s19, %s43_s25  }
   0xc   : > { %239 = sbr.rel (!%p52_p3) target bundleno = 32 (0x20), region = 32  ;;  %s241_s27 = sand.u32 (%p52_p3), 1, %s1274_s19  }
   0xd   : > { %s1004_s28 = sshll.u32 (%p52_p3), %s1282_s21, 2  ;;  %s1003_s29 = sshll.u32 (%p52_p3), %s241_s27, 6 }
   0xe   : > { %s1362_s7 = scalar_lea.vmem (%p52_p3), %s1514_s0, %s1004_s28  ;;  %s243_s8 = scalar_lea.vmem (%p52_p3), [#allocation3], %s1003_s29 }
   0xf   : > { %v265_v0 = vld [vmem:[%s1362_s7] sm:$0xf] (%p52_p3)  ;;  %v267_v1 = vld [vmem:[%s1362_s7 + $0x24] sm:$0xf] (%p52_p3)  ;;  %v269_v2 = vld [vmem:[%s1362_s7 + $0x48] sm:$0xf] (%p52_p3) }
  0x10   : > { %266 = vst [vmem:[%s243_s8] sm:$0xf] (%p52_p3), %v265_v0  ;;  %v271_v3 = vld [vmem:[%s1362_s7 + $0x6c] sm:$0xf] (%p52_p3)  ;;  %v273_v4 = vld [vmem:[%s1362_s7 + $0x90] sm:$0xf] (%p52_p3) }
  0x11   : > { %268 = vst [vmem:[%s243_s8 + $0x4] sm:$0xf] %v267_v1  ;;  %v275_v5 = vld [vmem:[%s1362_s7 + $0xb4] sm:$0xf]  ;;  %v277_v6 = vld [vmem:[%s1362_s7 + $0xd8] sm:$0xf] }
  0x12   : > { %270 = vst [vmem:[%s243_s8 + $0x8] sm:$0xf] %v269_v2  ;;  %v279_v7 = vld [vmem:[%s1362_s7 + $0xfc] sm:$0xf]  ;;  %v281_v8 = vld [vmem:[%s1362_s7 + $0x120] sm:$0xf] }
  0x13   : > { %272 = vst [vmem:[%s243_s8 + $0xc] sm:$0xf] %v271_v3  ;;  %v283_v9 = vld [vmem:[%s1362_s7 + $0x144] sm:$0xf]  ;;  %v285_v10 = vld [vmem:[%s1362_s7 + $0x168] sm:$0xf] }
  0x14   : > { %274 = vst [vmem:[%s243_s8 + $0x10] sm:$0xf] %v273_v4  ;;  %v287_v11 = vld [vmem:[%s1362_s7 + $0x18c] sm:$0xf]  ;;  %v289_v12 = vld [vmem:[%s1362_s7 + $0x1b0] sm:$0xf] }
  0x15   : > { %276 = vst [vmem:[%s243_s8 + $0x14] sm:$0xf] %v275_v5  ;;  %v291_v13 = vld [vmem:[%s1362_s7 + $0x1d4] sm:$0xf]  ;;  %v293_v14 = vld [vmem:[%s1362_s7 + $0x1f8] sm:$0xf] }
  0x16   : > { %278 = vst [vmem:[%s243_s8 + $0x18] sm:$0xf] %v277_v6  ;;  %v295_v15 = vld [vmem:[%s1362_s7 + $0x21c] sm:$0xf] }
  0x17   : > { %280 = vst [vmem:[%s243_s8 + $0x1c] sm:$0xf] %v279_v7 }
  0x18   : > { %282 = vst [vmem:[%s243_s8 + $0x20] sm:$0xf] %v281_v8 }
  0x19   : > { %284 = vst [vmem:[%s243_s8 + $0x24] sm:$0xf] %v283_v9 }
  0x1a   : > { %286 = vst [vmem:[%s243_s8 + $0x28] sm:$0xf] %v285_v10 }
  0x1b   : > { %288 = vst [vmem:[%s243_s8 + $0x2c] sm:$0xf] %v287_v11 }
  0x1c   : > { %290 = vst [vmem:[%s243_s8 + $0x30] sm:$0xf] %v289_v12 }
  0x1d   : > { %292 = vst [vmem:[%s243_s8 + $0x34] sm:$0xf] %v291_v13 }
  0x1e   : > { %294 = vst [vmem:[%s243_s8 + $0x38] sm:$0xf] %v293_v14 }
  0x1f   : > { %296 = vst [vmem:[%s243_s8 + $0x3c] sm:$0xf] %v295_v15 }
  0x20 PF: > { %p1005_p6 = scmp.ge.s32.totalorder %s1286_s22, 1  ;;  %p363_p7 = scmp.lt.s32.totalorder %s1286_s22, 10 }
  0x22   : > { %p364_p8 = pnand %p1005_p6, %p363_p7 }
  0x23   : > { %s370_s9 = sand.u32 (!%p364_p8), 1, %s1270_s18   ;;  %s1007_s10 = sshll.u32 (!%p364_p8), %s1278_s20, 4 }
  0x24   : > { %367 = sbr.rel (%p364_p8) target bundleno = 286 (0x11e), region = 77  ;;  %s1006_s11 = sshll.u32 (!%p364_p8), %s370_s9, 6 }
  0x25   : > { %p424_p9 = scmp.lt.s32.totalorder (!%p364_p8), %s1007_s10, 143  ;;  %s1389_s16 = scalar_lea.vmem (!%p364_p8), [#allocation3], %s1006_s11 }
  0x26   : > { %p1009_p10 = scmp.ne.s32.totalorder (!%p364_p8), %s1278_s20, 0 }
  0x29   : > { %s1527_s10 = smov (!%p424_p9, %s1007_s10), 143  ;;  %459 = sbr.rel (%p1009_p10) target bundleno = 63 (0x3f), region = 85 }
  0x2a   : > { %s1008_s12 = sshll.u32 %s1527_s10, 2 }
  0x2b   : > { %s1387_s15 = scalar_lea.vmem %s1515_s1, %s1008_s12 }
  0x2e   : > { %v1288_v16 = vmov 0.0  }
  0x2f   : > { %460 = vst [vmem:[#allocation2 + $0x30] sm:$0xff] %v1288_v16 }
  0x30   : > { %461 = vst [vmem:[#allocation2] sm:$0xff] %v1288_v16 }
  0x31   : > { %462 = vst [vmem:[#allocation2 + $0x58] sm:$0xff] %v1288_v16 }
  0x32   : > { %463 = vst [vmem:[#allocation2 + $0x18] sm:$0xff] %v1288_v16 }
  0x33   : > { %464 = vst [vmem:[#allocation2 + $0x50] sm:$0xff] %v1288_v16 }
  0x34   : > { %465 = vst [vmem:[#allocation2 + $0x68] sm:$0xff] %v1288_v16 }
  0x35   : > { %466 = vst [vmem:[#allocation2 + $0x8] sm:$0xff] %v1288_v16 }
  0x36   : > { %467 = vst [vmem:[#allocation2 + $0x48] sm:$0xff] %v1288_v16 }
  0x37   : > { %468 = vst [vmem:[#allocation2 + $0x40] sm:$0xff] %v1288_v16 }
  0x38   : > { %469 = vst [vmem:[#allocation2 + $0x20] sm:$0xff] %v1288_v16 }
  0x39   : > { %470 = vst [vmem:[#allocation2 + $0x10] sm:$0xff] %v1288_v16 }
  0x3a   : > { %471 = vst [vmem:[#allocation2 + $0x38] sm:$0xff] %v1288_v16 }
  0x3b   : > { %472 = vst [vmem:[#allocation2 + $0x60] sm:$0xff] %v1288_v16 }
  0x3c   : > { %473 = vst [vmem:[#allocation2 + $0x70] sm:$0xff] %v1288_v16 }
  0x3d   : > { %474 = vst [vmem:[#allocation2 + $0x78] sm:$0xff] %v1288_v16 }
  0x3e   : > { %475 = vst [vmem:[#allocation2 + $0x28] sm:$0xff] %v1288_v16 }
  0x3f PF: > { %v1094_v17 = vld [vmem:[%s1387_s15 + $0x38] sm:$0xff]  ;;  %v1093_v18 = vld [vmem:[%s1387_s15 + $0x30] sm:$0xff]  ;;  %v1092_v19 = vld [vmem:[%s1387_s15 + $0x28] sm:$0xff]  ;;  %p1074_p11 = scmp.ne.s32.totalorder %s1278_s20, 8 }
  0x40   : > { %620 = vmatpush.bf16.msra.mxu0 %v1094_v17  ;;  %1181 = vmatpush.bf16.msra.mxu1 %v1094_v17  ;;  %v1091_v20 = vld [vmem:[%s1387_s15 + $0x20] sm:$0xff]  ;;  %v1090_v21 = vld [vmem:[%s1387_s15 + $0x18] sm:$0xff]  ;;  %v1089_v22 = vld [vmem:[%s1387_s15 + $0x10] sm:$0xff] }
  0x41   : > { %1182 = vmatpush.bf16.msra.mxu2 %v1094_v17  ;;  %1183 = vmatpush.bf16.msra.mxu3 %v1094_v17  ;;  %v1088_v23 = vld [vmem:[%s1387_s15 + $0x8] sm:$0xff]  ;;  %v1087_v24 = vld [vmem:[%s1387_s15] sm:$0xff]  ;;  %v1081_v26 = vld [vmem:[%s1389_s16 + $0x10] sm:$0xff] }
  0x42   : > { %v1079_v25 = vld [vmem:[%s1389_s16] sm:$0xff]  ;;  %v1085_v28 = vld [vmem:[%s1389_s16 + $0x30] sm:$0xff]  ;;  %v1080_v29 = vld [vmem:[%s1389_s16 + $0x8] sm:$0xff] }
  0x43   : > { %v1083_v27 = vld [vmem:[%s1389_s16 + $0x20] sm:$0xff]  ;;  %v1082_v30 = vld [vmem:[%s1389_s16 + $0x18] sm:$0xff]  ;;  %v1084_v31 = vld [vmem:[%s1389_s16 + $0x28] sm:$0xff] }
  0x44   : > { %621 = vmatpush.bf16.msra.mxu0 %v1093_v18  ;;  %1184 = vmatpush.bf16.msra.mxu1 %v1093_v18  ;;  %v1086_v32 = vld [vmem:[%s1389_s16 + $0x38] sm:$0xff]  ;;  %v476_v33 = vld [vmem:[#allocation2 + $0x30] sm:$0xff]  ;;  %v484_v39 = vld [vmem:[#allocation2 + $0x40] sm:$0xff] }
  0x45   : > { %1185 = vmatpush.bf16.msra.mxu2 %v1093_v18  ;;  %1186 = vmatpush.bf16.msra.mxu3 %v1093_v18  ;;  %v480_v34 = vld [vmem:[#allocation2 + $0x50] sm:$0xff]  ;;  %v488_v40 = vld [vmem:[#allocation2 + $0x60] sm:$0xff]  ;;  %v481_v42 = vld [vmem:[#allocation2 + $0x68] sm:$0xff] }
  0x46   : > { %v477_v41 = vld [vmem:[#allocation2] sm:$0xff]  ;;  %v489_v52 = vld [vmem:[#allocation2 + $0x70] sm:$0xff]  ;;  %v478_v53 = vld [vmem:[#allocation2 + $0x58] sm:$0xff] }
  0x47   : > { %v485_v51 = vld [vmem:[#allocation2 + $0x20] sm:$0xff]  ;;  %v482_v54 = vld [vmem:[#allocation2 + $0x8] sm:$0xff]  ;;  %v486_v63 = vld [vmem:[#allocation2 + $0x10] sm:$0xff] }
  0x48   : > { %622 = vmatpush.bf16.msra.mxu0 %v1092_v19  ;;  %1187 = vmatpush.bf16.msra.mxu1 %v1092_v19  ;;  %v490_v0 = vld [vmem:[#allocation2 + $0x78] sm:$0xff]  ;;  %v483_v2 = vld [vmem:[#allocation2 + $0x48] sm:$0xff] }
  0x49   : > { %1188 = vmatpush.bf16.msra.mxu2 %v1092_v19  ;;  %1189 = vmatpush.bf16.msra.mxu3 %v1092_v19  ;;  %v479_v1 = vld [vmem:[#allocation2 + $0x18] sm:$0xff]  ;;  %v491_v12 = vld [vmem:[#allocation2 + $0x28] sm:$0xff] }
  0x4a   : > { %v487_v11 = vld [vmem:[#allocation2 + $0x38] sm:$0xff] }
  0x4c   : > { %623 = vmatpush.bf16.msra.mxu0 %v1091_v20  ;;  %1190 = vmatpush.bf16.msra.mxu1 %v1091_v20 }
  0x4d   : > { %1191 = vmatpush.bf16.msra.mxu2 %v1091_v20  ;;  %1192 = vmatpush.bf16.msra.mxu3 %v1091_v20 }
  0x50   : > { %624 = vmatpush.bf16.msra.mxu0 %v1090_v21  ;;  %1193 = vmatpush.bf16.msra.mxu1 %v1090_v21 }
  0x51   : > { %1194 = vmatpush.bf16.msra.mxu2 %v1090_v21  ;;  %1195 = vmatpush.bf16.msra.mxu3 %v1090_v21 }
  0x54   : > { %625 = vmatpush.bf16.msra.mxu0 %v1089_v22  ;;  %1196 = vmatpush.bf16.msra.mxu1 %v1089_v22 }
  0x55   : > { %1197 = vmatpush.bf16.msra.mxu2 %v1089_v22  ;;  %1198 = vmatpush.bf16.msra.mxu3 %v1089_v22 }
  0x58   : > { %626 = vmatpush.bf16.msra.mxu0 %v1088_v23  ;;  %1199 = vmatpush.bf16.msra.mxu1 %v1088_v23 }
  0x59   : > { %1200 = vmatpush.bf16.msra.mxu2 %v1088_v23  ;;  %1201 = vmatpush.bf16.msra.mxu3 %v1088_v23 }
  0x5c   : > { %627 = vmatpush.bf16.msra.mxu0 %v1087_v24  ;;  %1202 = vmatpush.bf16.msra.mxu1 %v1087_v24 }
  0x5d   : > { %1203 = vmatpush.bf16.msra.mxu2 %v1087_v24  ;;  %1204 = vmatpush.bf16.msra.mxu3 %v1087_v24 }
  0x5f   : > { %628 = vmatmul.bf16.vlgmr.msra.gmra.mxu0 %v1079_v25  ;;  %638 = vmatmul.bf16.vlgmr.msra.gmra.mxu1 %v1081_v26 }
  0x60   : > { %648 = vmatmul.bf16.vlgmr.msra.gmra.mxu2 %v1083_v27  ;;  %658 = vmatmul.bf16.vlgmr.msra.gmra.mxu3 %v1085_v28 }
  0x6f   : > { %633 = vmatmul.bf16.gmra.mxu0 %v1080_v29  ;;  %643 = vmatmul.bf16.gmra.mxu1 %v1082_v30 }
  0x70   : > { %653 = vmatmul.bf16.gmra.mxu2 %v1084_v31  ;;  %663 = vmatmul.bf16.gmra.mxu3 %v1086_v32 }
  0xdc   : > { %v629_v35 = vpop.f32.mrf.mxu0  ;;  %v639_v36 = vpop.f32.mrf.mxu1 }
  0xdd   : > { %v669_v37 = vadd.f32 %v629_v35, %v476_v33  ;;  %v673_v38 = vadd.f32 %v639_v36, %v480_v34 }
  0xdf   : > { %685 = vst [vmem:[#allocation2 + $0x30] sm:$0xff] %v669_v37 }
  0xe0   : > { %689 = vst [vmem:[#allocation2 + $0x50] sm:$0xff] %v673_v38 }
  0xe3   : > { %v649_v43 = vpop.f32.mrf.mxu2  ;;  %v659_v44 = vpop.f32.mrf.mxu3 }
  0xe4   : > { %v677_v45 = vadd.f32 %v649_v43, %v484_v39  ;;  %v681_v46 = vadd.f32 %v659_v44, %v488_v40  ;;  %v631_v47 = vpop.f32.mrf.mxu0  ;;  %v641_v48 = vpop.f32.mrf.mxu1 }
  0xe5   : > { %v670_v49 = vadd.f32 %v631_v47, %v477_v41  ;;  %v674_v50 = vadd.f32 %v641_v48, %v481_v42 }
  0xe6   : > { %693 = vst [vmem:[#allocation2 + $0x40] sm:$0xff] %v677_v45 }
  0xe7   : > { %697 = vst [vmem:[#allocation2 + $0x60] sm:$0xff] %v681_v46 }
  0xe8   : > { %686 = vst [vmem:[#allocation2] sm:$0xff] %v670_v49 }
  0xe9   : > { %690 = vst [vmem:[#allocation2 + $0x68] sm:$0xff] %v674_v50 }
  0xeb   : > { %v651_v55 = vpop.f32.mrf.mxu2  ;;  %v661_v56 = vpop.f32.mrf.mxu3 }
  0xec   : > { %v678_v57 = vadd.f32 %v651_v55, %v485_v51  ;;  %v682_v58 = vadd.f32 %v661_v56, %v489_v52  ;;  %v634_v59 = vpop.f32.mrf.mxu0  ;;  %v644_v60 = vpop.f32.mrf.mxu1 }
  0xed   : > { %v671_v61 = vadd.f32 %v634_v59, %v478_v53  ;;  %v675_v62 = vadd.f32 %v644_v60, %v482_v54 }
  0xee   : > { %694 = vst [vmem:[#allocation2 + $0x20] sm:$0xff] %v678_v57 }
  0xef   : > { %698 = vst [vmem:[#allocation2 + $0x70] sm:$0xff] %v682_v58 }
  0xf0   : > { %687 = vst [vmem:[#allocation2 + $0x58] sm:$0xff] %v671_v61 }
  0xf1   : > { %691 = vst [vmem:[#allocation2 + $0x8] sm:$0xff] %v675_v62 }
  0xf3   : > { %v654_v3 = vpop.f32.mrf.mxu2  ;;  %v664_v4 = vpop.f32.mrf.mxu3 }
  0xf4   : > { %v679_v5 = vadd.f32 %v654_v3, %v486_v63  ;;  %v683_v6 = vadd.f32 %v664_v4, %v490_v0  ;;  %v636_v7 = vpop.f32.mrf.mxu0  ;;  %v646_v8 = vpop.f32.mrf.mxu1 }
  0xf5   : > { %v672_v9 = vadd.f32 %v636_v7, %v479_v1  ;;  %v676_v10 = vadd.f32 %v646_v8, %v483_v2 }
  0xf6   : > { %695 = vst [vmem:[#allocation2 + $0x10] sm:$0xff] %v679_v5 }
  0xf7   : > { %699 = vst [vmem:[#allocation2 + $0x78] sm:$0xff] %v683_v6 }
  0xf8   : > { %688 = vst [vmem:[#allocation2 + $0x18] sm:$0xff] %v672_v9 }
  0xf9   : > { %692 = vst [vmem:[#allocation2 + $0x48] sm:$0xff] %v676_v10 }
  0xfb   : > { %v656_v13 = vpop.f32.mrf.mxu2  ;;  %v666_v14 = vpop.f32.mrf.mxu3  ;;  %704 = sbr.rel (%p1074_p11) target bundleno = 286 (0x11e), region = 89 }
  0xfc   : > { %v680_v15 = vadd.f32 %v656_v13, %v487_v11  ;;  %v684_v16 = vadd.f32 %v666_v14, %v491_v12 }
  0xfe   : > { %696 = vst [vmem:[#allocation2 + $0x38] sm:$0xff] %v680_v15 }
  0xff   : > { %700 = vst [vmem:[#allocation2 + $0x28] sm:$0xff] %v684_v16 }
 0x100   : > { %v705_v17 = vld [vmem:[#allocation2 + $0x30] sm:$0xff]  ;;  %v706_v18 = vld [vmem:[#allocation2] sm:$0xff]  ;;  %v707_v22 = vld [vmem:[#allocation2 + $0x58] sm:$0xff] }
 0x101   : > { %v1412_v19 = vld [vmem:[%s1516_s2] ss:$0 sm:$0xff]  ;;  %v708_v23 = vld [vmem:[#allocation2 + $0x18] sm:$0xff]  ;;  %v1167_v28 = vld [vmem:[%s1518_s4 + $0x8] sm:$0xff]  }
 0x102   : > { %v1417_v20 = vld [vmem:[%s1517_s3] ss:$0 sm:$0xff]  ;;  %v725_v24 = vmul.f32 %v1412_v19, %v705_v17  ;;  %v726_v25 = vmul.f32 %v1412_v19, %v706_v18  ;;  %v709_v29 = vld [vmem:[#allocation2 + $0x50] sm:$0xff]  ;;  %v710_v30 = vld [vmem:[#allocation2 + $0x68] sm:$0xff]  ;;  %v727_v31 = vmul.f32 %v1412_v19, %v707_v22  ;;  %v728_v32 = vmul.f32 %v1412_v19, %v708_v23 }
 0x103   : > { %v1096_v21 = vld [vmem:[%s1518_s4] sm:$0xff]   ;;  %v1101_v33 = vunpack.c.l.bf16 %v1167_v28  ;;  %v1102_v34 = vunpack.c.h.bf16 %v1167_v28  ;;  %v1168_v35 = vld [vmem:[%s1518_s4 + $0x10] sm:$0xff]   ;;  %v729_v38 = vmul.f32 %v1412_v19, %v709_v29  ;;  %v730_v39 = vmul.f32 %v1412_v19, %v710_v30  ;;  %v711_v40 = vld [vmem:[#allocation2 + $0x8] sm:$0xff] }
 0x104   : > { %v1097_v26 = vunpack.c.l.bf16 %v1096_v21  ;;  %v1098_v27 = vunpack.c.h.bf16 %v1096_v21  ;;  %v745_v36 = vadd.f32 %v1417_v20, %v725_v24  ;;  %v746_v37 = vadd.f32 %v1417_v20, %v726_v25  ;;  %v712_v41 = vld [vmem:[#allocation2 + $0x48] sm:$0xff]  ;;  %v1169_v54 = vld [vmem:[%s1518_s4 + $0x18] sm:$0xff]   ;;  %v713_v59 = vld [vmem:[#allocation2 + $0x40] sm:$0xff] }
 0x105   : > { %v747_v42 = vadd.f32 %v1417_v20, %v727_v31  ;;  %v748_v43 = vadd.f32 %v1417_v20, %v728_v32  ;;  %v1105_v44 = vunpack.c.l.bf16 %v1168_v35  ;;  %v1106_v45 = vunpack.c.h.bf16 %v1168_v35  ;;  %v714_v60 = vld [vmem:[#allocation2 + $0x20] sm:$0xff]  ;;  %v715_v6 = vld [vmem:[#allocation2 + $0x10] sm:$0xff]  ;;  %v716_v11 = vld [vmem:[#allocation2 + $0x38] sm:$0xff] }
 0x106   : > { %v793_v46 = vadd.f32 %v1097_v26, %v745_v36  ;;  %v794_v47 = vadd.f32 %v1098_v27, %v746_v37  ;;  %v749_v48 = vadd.f32 %v1417_v20, %v729_v38  ;;  %v750_v49 = vadd.f32 %v1417_v20, %v730_v39  ;;  %v1170_v1 = vld [vmem:[%s1518_s4 + $0x20] sm:$0xff]   ;;  %v1171_v12 = vld [vmem:[%s1518_s4 + $0x28] sm:$0xff]   ;;  %v718_v24 = vld [vmem:[#allocation2 + $0x70] sm:$0xff] }
 0x107   : > { %v795_v50 = vadd.f32 %v1101_v33, %v747_v42  ;;  %v796_v51 = vadd.f32 %v1102_v34, %v748_v43  ;;  %v731_v52 = vmul.f32 %v1412_v19, %v711_v40  ;;  %v732_v53 = vmul.f32 %v1412_v19, %v712_v41  ;;  %v717_v23 = vld [vmem:[#allocation2 + $0x60] sm:$0xff]  ;;  %v1172_v25 = vld [vmem:[%s1518_s4 + $0x30] sm:$0xff]   ;;  %v719_v38 = vld [vmem:[#allocation2 + $0x78] sm:$0xff] }
 0x108   : > { %v809_v55 = vmax.f32 %v793_v46, 0.0  ;;  %v810_v56 = vmax.f32 %v794_v47, 0.0  ;;  %v797_v57 = vadd.f32 %v1105_v44, %v749_v48  ;;  %v798_v58 = vadd.f32 %v1106_v45, %v750_v49  ;;  %v720_v39 = vld [vmem:[#allocation2 + $0x28] sm:$0xff]  ;;  %v1173_v44 = vld [vmem:[%s1518_s4 + $0x38] sm:$0xff]  }
 0x109   : > { %v811_v61 = vmax.f32 %v795_v50, 0.0  ;;  %v812_v62 = vmax.f32 %v796_v51, 0.0  ;;  %v751_v63 = vadd.f32 %v1417_v20, %v731_v52  ;;  %v752_v0 = vadd.f32 %v1417_v20, %v732_v53 }
 0x10a   : > { %v1130_v2 = vpack.c.bf16 %v810_v56, %v809_v55  ;;  %v813_v3 = vmax.f32 %v797_v57, 0.0  ;;  %v814_v4 = vmax.f32 %v798_v58, 0.0  ;;  %v1109_v5 = vunpack.c.l.bf16 %v1169_v54 }
 0x10b   : > { %v1135_v7 = vpack.c.bf16 %v812_v62, %v811_v61  ;;  %v1110_v8 = vunpack.c.h.bf16 %v1169_v54  ;;  %v733_v9 = vmul.f32 %v1412_v19, %v713_v59  ;;  %v734_v10 = vmul.f32 %v1412_v19, %v714_v60 }
 0x10c   : > { %1131 = vst [vmem:[%s1519_s5] sm:$0xff] %v1130_v2   ;;  %v1140_v13 = vpack.c.bf16 %v814_v4, %v813_v3  ;;  %v799_v14 = vadd.f32 %v1109_v5, %v751_v63  ;;  %v1113_v15 = vunpack.c.l.bf16 %v1170_v1  ;;  %v1114_v16 = vunpack.c.h.bf16 %v1170_v1 }
 0x10d   : > { %1174 = vst [vmem:[%s1519_s5 + $0x8] sm:$0xff] %v1135_v7   ;;  %v800_v17 = vadd.f32 %v1110_v8, %v752_v0  ;;  %v753_v18 = vadd.f32 %v1417_v20, %v733_v9  ;;  %v754_v21 = vadd.f32 %v1417_v20, %v734_v10  ;;  %v735_v22 = vmul.f32 %v1412_v19, %v715_v6 }
 0x10e   : > { %1175 = vst [vmem:[%s1519_s5 + $0x10] sm:$0xff] %v1140_v13   ;;  %v815_v26 = vmax.f32 %v799_v14, 0.0  ;;  %v736_v27 = vmul.f32 %v1412_v19, %v716_v11  ;;  %v1117_v28 = vunpack.c.l.bf16 %v1171_v12  ;;  %v1118_v29 = vunpack.c.h.bf16 %v1171_v12 }
 0x10f   : > { %v816_v30 = vmax.f32 %v800_v17, 0.0  ;;  %v801_v31 = vadd.f32 %v1113_v15, %v753_v18  ;;  %v802_v32 = vadd.f32 %v1114_v16, %v754_v21  ;;  %v755_v33 = vadd.f32 %v1417_v20, %v735_v22 }
 0x110   : > { %v756_v34 = vadd.f32 %v1417_v20, %v736_v27  ;;  %v737_v35 = vmul.f32 %v1412_v19, %v717_v23  ;;  %v738_v36 = vmul.f32 %v1412_v19, %v718_v24  ;;  %v1121_v37 = vunpack.c.l.bf16 %v1172_v25 }
 0x111   : > { %v1145_v40 = vpack.c.bf16 %v816_v30, %v815_v26  ;;  %v817_v41 = vmax.f32 %v801_v31, 0.0  ;;  %v818_v42 = vmax.f32 %v802_v32, 0.0  ;;  %v803_v43 = vadd.f32 %v1117_v28, %v755_v33 }
 0x112   : > { %v804_v45 = vadd.f32 %v1118_v29, %v756_v34  ;;  %v757_v46 = vadd.f32 %v1417_v20, %v737_v35  ;;  %v758_v47 = vadd.f32 %v1417_v20, %v738_v36  ;;  %v1122_v48 = vunpack.c.h.bf16 %v1172_v25 }
 0x113   : > { %1176 = vst [vmem:[%s1519_s5 + $0x18] sm:$0xff] %v1145_v40   ;;  %v1150_v49 = vpack.c.bf16 %v818_v42, %v817_v41  ;;  %v819_v50 = vmax.f32 %v803_v43, 0.0  ;;  %v739_v51 = vmul.f32 %v1412_v19, %v719_v38  ;;  %v740_v52 = vmul.f32 %v1412_v19, %v720_v39 }
 0x114   : > { %v820_v53 = vmax.f32 %v804_v45, 0.0  ;;  %v805_v54 = vadd.f32 %v1121_v37, %v757_v46  ;;  %v806_v55 = vadd.f32 %v1122_v48, %v758_v47  ;;  %v1125_v56 = vunpack.c.l.bf16 %v1173_v44 }
 0x115   : > { %1177 = vst [vmem:[%s1519_s5 + $0x20] sm:$0xff] %v1150_v49   ;;  %v759_v57 = vadd.f32 %v1417_v20, %v739_v51  ;;  %v760_v58 = vadd.f32 %v1417_v20, %v740_v52  ;;  %v1126_v59 = vunpack.c.h.bf16 %v1173_v44 }
 0x116   : > { %v1155_v60 = vpack.c.bf16 %v820_v53, %v819_v50  ;;  %v821_v61 = vmax.f32 %v805_v54, 0.0  ;;  %v822_v62 = vmax.f32 %v806_v55, 0.0 }
 0x117   : > { %v807_v63 = vadd.f32 %v1125_v56, %v759_v57  ;;  %v808_v0 = vadd.f32 %v1126_v59, %v760_v58 }
 0x118   : > { %1178 = vst [vmem:[%s1519_s5 + $0x28] sm:$0xff] %v1155_v60   ;;  %v1160_v19 = vpack.c.bf16 %v822_v62, %v821_v61 }
 0x119   : > { %v823_v1 = vmax.f32 %v807_v63, 0.0  ;;  %v824_v2 = vmax.f32 %v808_v0, 0.0 }
 0x11a   : > { %1179 = vst [vmem:[%s1519_s5 + $0x30] sm:$0xff] %v1160_v19  }
 0x11b   : > { %v1165_v3 = vpack.c.bf16 %v824_v2, %v823_v1 }
 0x11d   : > { %1180 = vst [vmem:[%s1519_s5 + $0x38] sm:$0xff] %v1165_v3  }
 0x11e PF: > { %s15_s22 = sadd.s32 1, %s1286_s22   ;;  %s1520_s18 = smov %s1274_s19 }
 0x11f   : > { %p12_p12 = scmp.ge.s32.totalorder %s15_s22, 11   ;;  %s1521_s19 = smov %s1354_s26 }
 0x120   : > { %s1522_s20 = smov %s1282_s21  ;;  %s1523_s21 = smov %s1525_s23 }
 0x121   :  { %14 = sbr.rel (!%p12_p12) target bundleno = 3 (0x3), region = 136 }

// kernel: resnet34_forward.41
= control target key start
LH: loop header
LB: loop body
LE: loop exit
PB: predicated region body
PF: predicated region fallthrough
CT: control target
= control target key end

     0   :  { %s1148_s15 = smov 0   ;;  %s1150_s16 = smov 0   ;;  %s1301_s0 = inlined_call_operand.vmem [shape: bf16[128,1152], index: 0, kind: input, shape index: {}]   ;;  %s1302_s1 = inlined_call_operand.vmem [shape: bf16[1152,128], index: 1, kind: input, shape index: {}]   ;;  %s1303_s2 = inlined_call_operand.vmem [shape: f32[1,128], index: 2, kind: input, shape index: {}]   ;;  %s1304_s3 = inlined_call_operand.vmem [shape: f32[1,128], index: 3, kind: input, shape index: {}]   ;;  %s1305_s4 = inlined_call_operand.vmem [shape: bf16[128,128], index: 4, kind: output, shape index: {}]  }
   0x1   :  { %s1152_s17 = smov 0   ;;  %s1154_s18 = smov 0  }
   0x2   :  { %s1156_s19 = smov 0  }
   0x3 LB: > { %s26_s20 = sadd.s32 1, %s1116_s18  ;;  %p49_p1 = scmp.ne.s32.totalorder %s1108_s16, %s1104_s15  ;;  %s1120_s19 = sphi %s1156_s19, %s14_s19   ;;  %s1116_s18 = sphi %s1154_s18, %s1309_s18   ;;  %s1112_s17 = sphi %s1152_s17, %s1308_s17   ;;  %s1108_s16 = sphi %s1150_s16, %s1307_s16   ;;  %s1104_s15 = sphi %s1148_s15, %s1306_s15  }
   0x4   : > { %p27_p0 = scmp.ge.s32.totalorder %s26_s20, 9  ;;  %p50_p2 = scmp.eq.s32.totalorder %s1120_s19, 0 }
   0x5   : > { %s42_s22 = sadd.s32 1, %s1108_s16  ;;  %p875_p5 = scmp.ge.s32.totalorder %s1120_s19, 9 }
   0x6   : > { %s1311_s20 = smov (%p27_p0, %s26_s20), 0  ;;  %p51_p3 = por %p50_p2, %p49_p1 }
   0x7   : > { %s38_s21 = ssub.s32 %s1116_s18, %s1311_s20  ;;  %195 = sbr.rel (%p875_p5) target bundleno = 32 (0x20), region = 24 }
   0x8   : > { %p40_p4 = scmp.eq.s32.totalorder %s38_s21, 0 }
   0xa   : > { %s1183_s23 = scalar_select %p40_p4, %s1108_s16, %s42_s22  }
   0xc   : > { %198 = sbr.rel (!%p51_p3) target bundleno = 32 (0x20), region = 28  ;;  %s200_s24 = sand.u32 (%p51_p3), 1, %s1108_s16  }
   0xd   : > { %s877_s25 = sshll.u32 (%p51_p3), %s1116_s18, 2  ;;  %s876_s26 = sshll.u32 (%p51_p3), %s200_s24, 6 }
   0xe   : > { %s1191_s29 = scalar_lea.vmem (%p51_p3), %s1301_s0, %s877_s25  ;;  %s202_s30 = scalar_lea.vmem (%p51_p3), [#allocation3], %s876_s26 }
   0xf   : > { %v224_v0 = vld [vmem:[%s1191_s29] sm:$0xf] (%p51_p3)  ;;  %v226_v1 = vld [vmem:[%s1191_s29 + $0x24] sm:$0xf] (%p51_p3)  ;;  %v228_v2 = vld [vmem:[%s1191_s29 + $0x48] sm:$0xf] (%p51_p3) }
  0x10   : > { %225 = vst [vmem:[%s202_s30] sm:$0xf] (%p51_p3), %v224_v0  ;;  %v230_v3 = vld [vmem:[%s1191_s29 + $0x6c] sm:$0xf] (%p51_p3)  ;;  %v232_v4 = vld [vmem:[%s1191_s29 + $0x90] sm:$0xf] (%p51_p3) }
  0x11   : > { %227 = vst [vmem:[%s202_s30 + $0x4] sm:$0xf] %v226_v1  ;;  %v234_v5 = vld [vmem:[%s1191_s29 + $0xb4] sm:$0xf]  ;;  %v236_v6 = vld [vmem:[%s1191_s29 + $0xd8] sm:$0xf] }
  0x12   : > { %229 = vst [vmem:[%s202_s30 + $0x8] sm:$0xf] %v228_v2  ;;  %v238_v7 = vld [vmem:[%s1191_s29 + $0xfc] sm:$0xf]  ;;  %v240_v8 = vld [vmem:[%s1191_s29 + $0x120] sm:$0xf] }
  0x13   : > { %231 = vst [vmem:[%s202_s30 + $0xc] sm:$0xf] %v230_v3  ;;  %v242_v9 = vld [vmem:[%s1191_s29 + $0x144] sm:$0xf]  ;;  %v244_v10 = vld [vmem:[%s1191_s29 + $0x168] sm:$0xf] }
  0x14   : > { %233 = vst [vmem:[%s202_s30 + $0x10] sm:$0xf] %v232_v4  ;;  %v246_v11 = vld [vmem:[%s1191_s29 + $0x18c] sm:$0xf]  ;;  %v248_v12 = vld [vmem:[%s1191_s29 + $0x1b0] sm:$0xf] }
  0x15   : > { %235 = vst [vmem:[%s202_s30 + $0x14] sm:$0xf] %v234_v5  ;;  %v250_v13 = vld [vmem:[%s1191_s29 + $0x1d4] sm:$0xf]  ;;  %v252_v14 = vld [vmem:[%s1191_s29 + $0x1f8] sm:$0xf] }
  0x16   : > { %237 = vst [vmem:[%s202_s30 + $0x18] sm:$0xf] %v236_v6  ;;  %v254_v15 = vld [vmem:[%s1191_s29 + $0x21c] sm:$0xf] }
  0x17   : > { %239 = vst [vmem:[%s202_s30 + $0x1c] sm:$0xf] %v238_v7 }
  0x18   : > { %241 = vst [vmem:[%s202_s30 + $0x20] sm:$0xf] %v240_v8 }
  0x19   : > { %243 = vst [vmem:[%s202_s30 + $0x24] sm:$0xf] %v242_v9 }
  0x1a   : > { %245 = vst [vmem:[%s202_s30 + $0x28] sm:$0xf] %v244_v10 }
  0x1b   : > { %247 = vst [vmem:[%s202_s30 + $0x2c] sm:$0xf] %v246_v11 }
  0x1c   : > { %249 = vst [vmem:[%s202_s30 + $0x30] sm:$0xf] %v248_v12 }
  0x1d   : > { %251 = vst [vmem:[%s202_s30 + $0x34] sm:$0xf] %v250_v13 }
  0x1e   : > { %253 = vst [vmem:[%s202_s30 + $0x38] sm:$0xf] %v252_v14 }
  0x1f   : > { %255 = vst [vmem:[%s202_s30 + $0x3c] sm:$0xf] %v254_v15 }
  0x20 PF: > { %p878_p6 = scmp.ge.s32.totalorder %s1120_s19, 1  ;;  %p322_p7 = scmp.lt.s32.totalorder %s1120_s19, 10 }
  0x22   : > { %p323_p8 = pnand %p878_p6, %p322_p7 }
  0x23   : > { %s329_s5 = sand.u32 (!%p323_p8), 1, %s1104_s15   ;;  %s880_s6 = sshll.u32 (!%p323_p8), %s1112_s17, 4 }
  0x24   : > { %326 = sbr.rel (%p323_p8) target bundleno = 277 (0x115), region = 73  ;;  %s879_s7 = sshll.u32 (!%p323_p8), %s329_s5, 6 }
  0x25   : > { %p373_p9 = scmp.lt.s32.totalorder (!%p323_p8), %s880_s6, 143  ;;  %s1218_s12 = scalar_lea.vmem (!%p323_p8), [#allocation3], %s879_s7 }
  0x26   : > { %p882_p10 = scmp.ne.s32.totalorder (!%p323_p8), %s1112_s17, 0 }
  0x29   : > { %s1313_s6 = smov (!%p373_p9, %s880_s6), 143  ;;  %399 = sbr.rel (%p882_p10) target bundleno = 63 (0x3f), region = 81 }
  0x2a   : > { %s881_s8 = sshll.u32 %s1313_s6, 2 }
  0x2b   : > { %s1216_s11 = scalar_lea.vmem %s1302_s1, %s881_s8 }
  0x2e   : > { %v1122_v16 = vmov 0.0  }
  0x2f   : > { %400 = vst [vmem:[#allocation2 + $0x30] sm:$0xff] %v1122_v16 }
  0x30   : > { %401 = vst [vmem:[#allocation2] sm:$0xff] %v1122_v16 }
  0x31   : > { %402 = vst [vmem:[#allocation2 + $0x58] sm:$0xff] %v1122_v16 }
  0x32   : > { %403 = vst [vmem:[#allocation2 + $0x18] sm:$0xff] %v1122_v16 }
  0x33   : > { %404 = vst [vmem:[#allocation2 + $0x50] sm:$0xff] %v1122_v16 }
  0x34   : > { %405 = vst [vmem:[#allocation2 + $0x68] sm:$0xff] %v1122_v16 }
  0x35   : > { %406 = vst [vmem:[#allocation2 + $0x8] sm:$0xff] %v1122_v16 }
  0x36   : > { %407 = vst [vmem:[#allocation2 + $0x48] sm:$0xff] %v1122_v16 }
  0x37   : > { %408 = vst [vmem:[#allocation2 + $0x40] sm:$0xff] %v1122_v16 }
  0x38   : > { %409 = vst [vmem:[#allocation2 + $0x20] sm:$0xff] %v1122_v16 }
  0x39   : > { %410 = vst [vmem:[#allocation2 + $0x10] sm:$0xff] %v1122_v16 }
  0x3a   : > { %411 = vst [vmem:[#allocation2 + $0x38] sm:$0xff] %v1122_v16 }
  0x3b   : > { %412 = vst [vmem:[#allocation2 + $0x60] sm:$0xff] %v1122_v16 }
  0x3c   : > { %413 = vst [vmem:[#allocation2 + $0x70] sm:$0xff] %v1122_v16 }
  0x3d   : > { %414 = vst [vmem:[#allocation2 + $0x78] sm:$0xff] %v1122_v16 }
  0x3e   : > { %415 = vst [vmem:[#allocation2 + $0x28] sm:$0xff] %v1122_v16 }
  0x3f PF: > { %v967_v17 = vld [vmem:[%s1216_s11 + $0x38] sm:$0xff]  ;;  %v966_v18 = vld [vmem:[%s1216_s11 + $0x30] sm:$0xff]  ;;  %v965_v19 = vld [vmem:[%s1216_s11 + $0x28] sm:$0xff]  ;;  %p947_p11 = scmp.ne.s32.totalorder %s1112_s17, 8 }
  0x40   : > { %560 = vmatpush.bf16.msra.mxu0 %v967_v17  ;;  %1015 = vmatpush.bf16.msra.mxu1 %v967_v17  ;;  %v964_v20 = vld [vmem:[%s1216_s11 + $0x20] sm:$0xff]  ;;  %v963_v21 = vld [vmem:[%s1216_s11 + $0x18] sm:$0xff]  ;;  %v962_v22 = vld [vmem:[%s1216_s11 + $0x10] sm:$0xff] }
  0x41   : > { %1016 = vmatpush.bf16.msra.mxu2 %v967_v17  ;;  %1017 = vmatpush.bf16.msra.mxu3 %v967_v17  ;;  %v961_v23 = vld [vmem:[%s1216_s11 + $0x8] sm:$0xff]  ;;  %v960_v24 = vld [vmem:[%s1216_s11] sm:$0xff]  ;;  %v954_v26 = vld [vmem:[%s1218_s12 + $0x10] sm:$0xff] }
  0x42   : > { %v952_v25 = vld [vmem:[%s1218_s12] sm:$0xff]  ;;  %v958_v28 = vld [vmem:[%s1218_s12 + $0x30] sm:$0xff]  ;;  %v953_v29 = vld [vmem:[%s1218_s12 + $0x8] sm:$0xff] }
  0x43   : > { %v956_v27 = vld [vmem:[%s1218_s12 + $0x20] sm:$0xff]  ;;  %v955_v30 = vld [vmem:[%s1218_s12 + $0x18] sm:$0xff]  ;;  %v957_v31 = vld [vmem:[%s1218_s12 + $0x28] sm:$0xff] }
  0x44   : > { %561 = vmatpush.bf16.msra.mxu0 %v966_v18  ;;  %1018 = vmatpush.bf16.msra.mxu1 %v966_v18  ;;  %v959_v32 = vld [vmem:[%s1218_s12 + $0x38] sm:$0xff]  ;;  %v416_v33 = vld [vmem:[#allocation2 + $0x30] sm:$0xff]  ;;  %v424_v39 = vld [vmem:[#allocation2 + $0x40] sm:$0xff] }
  0x45   : > { %1019 = vmatpush.bf16.msra.mxu2 %v966_v18  ;;  %1020 = vmatpush.bf16.msra.mxu3 %v966_v18  ;;  %v420_v34 = vld [vmem:[#allocation2 + $0x50] sm:$0xff]  ;;  %v428_v40 = vld [vmem:[#allocation2 + $0x60] sm:$0xff]  ;;  %v421_v42 = vld [vmem:[#allocation2 + $0x68] sm:$0xff] }
  0x46   : > { %v417_v41 = vld [vmem:[#allocation2] sm:$0xff]  ;;  %v429_v52 = vld [vmem:[#allocation2 + $0x70] sm:$0xff]  ;;  %v418_v53 = vld [vmem:[#allocation2 + $0x58] sm:$0xff] }
  0x47   : > { %v425_v51 = vld [vmem:[#allocation2 + $0x20] sm:$0xff]  ;;  %v422_v54 = vld [vmem:[#allocation2 + $0x8] sm:$0xff]  ;;  %v426_v63 = vld [vmem:[#allocation2 + $0x10] sm:$0xff] }
  0x48   : > { %562 = vmatpush.bf16.msra.mxu0 %v965_v19  ;;  %1021 = vmatpush.bf16.msra.mxu1 %v965_v19  ;;  %v430_v0 = vld [vmem:[#allocation2 + $0x78] sm:$0xff]  ;;  %v423_v2 = vld [vmem:[#allocation2 + $0x48] sm:$0xff] }
  0x49   : > { %1022 = vmatpush.bf16.msra.mxu2 %v965_v19  ;;  %1023 = vmatpush.bf16.msra.mxu3 %v965_v19  ;;  %v419_v1 = vld [vmem:[#allocation2 + $0x18] sm:$0xff]  ;;  %v431_v12 = vld [vmem:[#allocation2 + $0x28] sm:$0xff] }
  0x4a   : > { %v427_v11 = vld [vmem:[#allocation2 + $0x38] sm:$0xff] }
  0x4c   : > { %563 = vmatpush.bf16.msra.mxu0 %v964_v20  ;;  %1024 = vmatpush.bf16.msra.mxu1 %v964_v20 }
  0x4d   : > { %1025 = vmatpush.bf16.msra.mxu2 %v964_v20  ;;  %1026 = vmatpush.bf16.msra.mxu3 %v964_v20 }
  0x50   : > { %564 = vmatpush.bf16.msra.mxu0 %v963_v21  ;;  %1027 = vmatpush.bf16.msra.mxu1 %v963_v21 }
  0x51   : > { %1028 = vmatpush.bf16.msra.mxu2 %v963_v21  ;;  %1029 = vmatpush.bf16.msra.mxu3 %v963_v21 }
  0x54   : > { %565 = vmatpush.bf16.msra.mxu0 %v962_v22  ;;  %1030 = vmatpush.bf16.msra.mxu1 %v962_v22 }
  0x55   : > { %1031 = vmatpush.bf16.msra.mxu2 %v962_v22  ;;  %1032 = vmatpush.bf16.msra.mxu3 %v962_v22 }
  0x58   : > { %566 = vmatpush.bf16.msra.mxu0 %v961_v23  ;;  %1033 = vmatpush.bf16.msra.mxu1 %v961_v23 }
  0x59   : > { %1034 = vmatpush.bf16.msra.mxu2 %v961_v23  ;;  %1035 = vmatpush.bf16.msra.mxu3 %v961_v23 }
  0x5c   : > { %567 = vmatpush.bf16.msra.mxu0 %v960_v24  ;;  %1036 = vmatpush.bf16.msra.mxu1 %v960_v24 }
  0x5d   : > { %1037 = vmatpush.bf16.msra.mxu2 %v960_v24  ;;  %1038 = vmatpush.bf16.msra.mxu3 %v960_v24 }
  0x5f   : > { %568 = vmatmul.bf16.vlgmr.msra.gmra.mxu0 %v952_v25  ;;  %578 = vmatmul.bf16.vlgmr.msra.gmra.mxu1 %v954_v26 }
  0x60   : > { %588 = vmatmul.bf16.vlgmr.msra.gmra.mxu2 %v956_v27  ;;  %598 = vmatmul.bf16.vlgmr.msra.gmra.mxu3 %v958_v28 }
  0x6f   : > { %573 = vmatmul.bf16.gmra.mxu0 %v953_v29  ;;  %583 = vmatmul.bf16.gmra.mxu1 %v955_v30 }
  0x70   : > { %593 = vmatmul.bf16.gmra.mxu2 %v957_v31  ;;  %603 = vmatmul.bf16.gmra.mxu3 %v959_v32 }
  0xdc   : > { %v569_v35 = vpop.f32.mrf.mxu0  ;;  %v579_v36 = vpop.f32.mrf.mxu1 }
  0xdd   : > { %v609_v37 = vadd.f32 %v569_v35, %v416_v33  ;;  %v613_v38 = vadd.f32 %v579_v36, %v420_v34 }
  0xdf   : > { %625 = vst [vmem:[#allocation2 + $0x30] sm:$0xff] %v609_v37 }
  0xe0   : > { %629 = vst [vmem:[#allocation2 + $0x50] sm:$0xff] %v613_v38 }
  0xe3   : > { %v589_v43 = vpop.f32.mrf.mxu2  ;;  %v599_v44 = vpop.f32.mrf.mxu3 }
  0xe4   : > { %v617_v45 = vadd.f32 %v589_v43, %v424_v39  ;;  %v621_v46 = vadd.f32 %v599_v44, %v428_v40  ;;  %v571_v47 = vpop.f32.mrf.mxu0  ;;  %v581_v48 = vpop.f32.mrf.mxu1 }
  0xe5   : > { %v610_v49 = vadd.f32 %v571_v47, %v417_v41  ;;  %v614_v50 = vadd.f32 %v581_v48, %v421_v42 }
  0xe6   : > { %633 = vst [vmem:[#allocation2 + $0x40] sm:$0xff] %v617_v45 }
  0xe7   : > { %637 = vst [vmem:[#allocation2 + $0x60] sm:$0xff] %v621_v46 }
  0xe8   : > { %626 = vst [vmem:[#allocation2] sm:$0xff] %v610_v49 }
  0xe9   : > { %630 = vst [vmem:[#allocation2 + $0x68] sm:$0xff] %v614_v50 }
  0xeb   : > { %v591_v55 = vpop.f32.mrf.mxu2  ;;  %v601_v56 = vpop.f32.mrf.mxu3 }
  0xec   : > { %v618_v57 = vadd.f32 %v591_v55, %v425_v51  ;;  %v622_v58 = vadd.f32 %v601_v56, %v429_v52  ;;  %v574_v59 = vpop.f32.mrf.mxu0  ;;  %v584_v60 = vpop.f32.mrf.mxu1 }
  0xed   : > { %v611_v61 = vadd.f32 %v574_v59, %v418_v53  ;;  %v615_v62 = vadd.f32 %v584_v60, %v422_v54 }
  0xee   : > { %634 = vst [vmem:[#allocation2 + $0x20] sm:$0xff] %v618_v57 }
  0xef   : > { %638 = vst [vmem:[#allocation2 + $0x70] sm:$0xff] %v622_v58 }
  0xf0   : > { %627 = vst [vmem:[#allocation2 + $0x58] sm:$0xff] %v611_v61 }
  0xf1   : > { %631 = vst [vmem:[#allocation2 + $0x8] sm:$0xff] %v615_v62 }
  0xf3   : > { %v594_v3 = vpop.f32.mrf.mxu2  ;;  %v604_v4 = vpop.f32.mrf.mxu3 }
  0xf4   : > { %v619_v5 = vadd.f32 %v594_v3, %v426_v63  ;;  %v623_v6 = vadd.f32 %v604_v4, %v430_v0  ;;  %v576_v7 = vpop.f32.mrf.mxu0  ;;  %v586_v8 = vpop.f32.mrf.mxu1 }
  0xf5   : > { %v612_v9 = vadd.f32 %v576_v7, %v419_v1  ;;  %v616_v10 = vadd.f32 %v586_v8, %v423_v2 }
  0xf6   : > { %635 = vst [vmem:[#allocation2 + $0x10] sm:$0xff] %v619_v5 }
  0xf7   : > { %639 = vst [vmem:[#allocation2 + $0x78] sm:$0xff] %v623_v6 }
  0xf8   : > { %628 = vst [vmem:[#allocation2 + $0x18] sm:$0xff] %v612_v9 }
  0xf9   : > { %632 = vst [vmem:[#allocation2 + $0x48] sm:$0xff] %v616_v10 }
  0xfb   : > { %v596_v13 = vpop.f32.mrf.mxu2  ;;  %v606_v14 = vpop.f32.mrf.mxu3  ;;  %644 = sbr.rel (%p947_p11) target bundleno = 277 (0x115), region = 85 }
  0xfc   : > { %v620_v15 = vadd.f32 %v596_v13, %v427_v11  ;;  %v624_v16 = vadd.f32 %v606_v14, %v431_v12 }
  0xfe   : > { %636 = vst [vmem:[#allocation2 + $0x38] sm:$0xff] %v620_v15 }
  0xff   : > { %640 = vst [vmem:[#allocation2 + $0x28] sm:$0xff] %v624_v16 }
 0x100   : > { %v645_v17 = vld [vmem:[#allocation2 + $0x30] sm:$0xff]  ;;  %v646_v18 = vld [vmem:[#allocation2] sm:$0xff]  ;;  %v647_v21 = vld [vmem:[#allocation2 + $0x58] sm:$0xff] }
 0x101   : > { %v1080_v19 = vld [vmem:[%s1303_s2] ss:$0 sm:$0xff]  ;;  %v648_v22 = vld [vmem:[#allocation2 + $0x18] sm:$0xff]  ;;  %v649_v23 = vld [vmem:[#allocation2 + $0x50] sm:$0xff] }
 0x102   : > { %v1244_v20 = vld [vmem:[%s1304_s3] ss:$0 sm:$0xff]  ;;  %v665_v24 = vmul.f32 %v1080_v19, %v645_v17  ;;  %v666_v25 = vmul.f32 %v1080_v19, %v646_v18  ;;  %v667_v26 = vmul.f32 %v1080_v19, %v647_v21  ;;  %v668_v27 = vmul.f32 %v1080_v19, %v648_v22  ;;  %v650_v28 = vld [vmem:[#allocation2 + $0x68] sm:$0xff]  ;;  %v655_v49 = vld [vmem:[#allocation2 + $0x10] sm:$0xff] }
 0x103   : > { %v651_v29 = vld [vmem:[#allocation2 + $0x8] sm:$0xff]  ;;  %v669_v31 = vmul.f32 %v1080_v19, %v649_v23  ;;  %v670_v32 = vmul.f32 %v1080_v19, %v650_v28  ;;  %v653_v43 = vld [vmem:[#allocation2 + $0x40] sm:$0xff]  ;;  %v658_v56 = vld [vmem:[#allocation2 + $0x70] sm:$0xff]  ;;  %v675_v1 = vmul.f32 %v1080_v19, %v655_v49 }
 0x104   : > { %v652_v30 = vld [vmem:[#allocation2 + $0x48] sm:$0xff]  ;;  %v671_v33 = vmul.f32 %v1080_v19, %v651_v29  ;;  %v685_v35 = vadd.f32 %v1244_v20, %v665_v24  ;;  %v686_v36 = vadd.f32 %v1244_v20, %v666_v25  ;;  %v687_v37 = vadd.f32 %v1244_v20, %v667_v26  ;;  %v654_v44 = vld [vmem:[#allocation2 + $0x20] sm:$0xff]  ;;  %v659_v61 = vld [vmem:[#allocation2 + $0x78] sm:$0xff] }
 0x105   : > { %v672_v34 = vmul.f32 %v1080_v19, %v652_v30  ;;  %v688_v38 = vadd.f32 %v1244_v20, %v668_v27  ;;  %v689_v39 = vadd.f32 %v1244_v20, %v669_v31  ;;  %v690_v40 = vadd.f32 %v1244_v20, %v670_v32  ;;  %v656_v50 = vld [vmem:[#allocation2 + $0x38] sm:$0xff]  ;;  %v657_v55 = vld [vmem:[#allocation2 + $0x60] sm:$0xff] }
 0x106   : > { %v691_v41 = vadd.f32 %v1244_v20, %v671_v33  ;;  %v701_v45 = vmax.f32 %v685_v35, 0.0  ;;  %v702_v46 = vmax.f32 %v686_v36, 0.0  ;;  %v703_v47 = vmax.f32 %v687_v37, 0.0  ;;  %v660_v62 = vld [vmem:[#allocation2 + $0x28] sm:$0xff] }
 0x107   : > { %v692_v42 = vadd.f32 %v1244_v20, %v672_v34  ;;  %v704_v48 = vmax.f32 %v688_v38, 0.0  ;;  %v705_v51 = vmax.f32 %v689_v39, 0.0  ;;  %v706_v52 = vmax.f32 %v690_v40, 0.0 }
 0x108   : > { %v707_v53 = vmax.f32 %v691_v41, 0.0  ;;  %v971_v57 = vpack.c.bf16 %v702_v46, %v701_v45  ;;  %v673_v59 = vmul.f32 %v1080_v19, %v653_v43  ;;  %v674_v60 = vmul.f32 %v1080_v19, %v654_v44 }
 0x109   : > { %v708_v54 = vmax.f32 %v692_v42, 0.0  ;;  %v976_v58 = vpack.c.bf16 %v704_v48, %v703_v47  ;;  %v981_v63 = vpack.c.bf16 %v706_v52, %v705_v51  ;;  %v676_v2 = vmul.f32 %v1080_v19, %v656_v50 }
 0x10a   : > { %972 = vst [vmem:[%s1305_s4] sm:$0xff] %v971_v57   ;;  %v693_v3 = vadd.f32 %v1244_v20, %v673_v59  ;;  %v694_v4 = vadd.f32 %v1244_v20, %v674_v60  ;;  %v677_v5 = vmul.f32 %v1080_v19, %v657_v55  ;;  %v678_v6 = vmul.f32 %v1080_v19, %v658_v56 }
 0x10b   : > { %v986_v0 = vpack.c.bf16 %v708_v54, %v707_v53  ;;  %1008 = vst [vmem:[%s1305_s4 + $0x8] sm:$0xff] %v976_v58   ;;  %v695_v7 = vadd.f32 %v1244_v20, %v675_v1  ;;  %v696_v8 = vadd.f32 %v1244_v20, %v676_v2  ;;  %v679_v9 = vmul.f32 %v1080_v19, %v659_v61 }
 0x10c   : > { %v680_v10 = vmul.f32 %v1080_v19, %v660_v62  ;;  %1009 = vst [vmem:[%s1305_s4 + $0x10] sm:$0xff] %v981_v63   ;;  %v709_v11 = vmax.f32 %v693_v3, 0.0  ;;  %v710_v12 = vmax.f32 %v694_v4, 0.0  ;;  %v697_v13 = vadd.f32 %v1244_v20, %v677_v5 }
 0x10d   : > { %v698_v14 = vadd.f32 %v1244_v20, %v678_v6  ;;  %1010 = vst [vmem:[%s1305_s4 + $0x18] sm:$0xff] %v986_v0   ;;  %v711_v15 = vmax.f32 %v695_v7, 0.0  ;;  %v712_v16 = vmax.f32 %v696_v8, 0.0  ;;  %v699_v17 = vadd.f32 %v1244_v20, %v679_v9 }
 0x10e   : > { %v700_v18 = vadd.f32 %v1244_v20, %v680_v10  ;;  %v991_v19 = vpack.c.bf16 %v710_v12, %v709_v11  ;;  %v713_v21 = vmax.f32 %v697_v13, 0.0 }
 0x10f   : > { %v714_v22 = vmax.f32 %v698_v14, 0.0  ;;  %v996_v23 = vpack.c.bf16 %v712_v16, %v711_v15  ;;  %v715_v24 = vmax.f32 %v699_v17, 0.0 }
 0x110   : > { %v716_v25 = vmax.f32 %v700_v18, 0.0  ;;  %1011 = vst [vmem:[%s1305_s4 + $0x20] sm:$0xff] %v991_v19  }
 0x111   : > { %v1001_v26 = vpack.c.bf16 %v714_v22, %v713_v21  ;;  %1012 = vst [vmem:[%s1305_s4 + $0x28] sm:$0xff] %v996_v23  }
 0x112   : > { %v1006_v27 = vpack.c.bf16 %v716_v25, %v715_v24 }
 0x113   : > { %1013 = vst [vmem:[%s1305_s4 + $0x30] sm:$0xff] %v1001_v26  }
 0x114   : > { %1014 = vst [vmem:[%s1305_s4 + $0x38] sm:$0xff] %v1006_v27  }
 0x115 PF: > { %s14_s19 = sadd.s32 1, %s1120_s19   ;;  %s1306_s15 = smov %s1108_s16 }
 0x116   : > { %p11_p12 = scmp.ge.s32.totalorder %s14_s19, 11   ;;  %s1307_s16 = smov %s1183_s23 }
 0x117   : > { %s1308_s17 = smov %s1116_s18  ;;  %s1309_s18 = smov %s1311_s20 }
 0x118   :  { %13 = sbr.rel (!%p11_p12) target bundleno = 3 (0x3), region = 129 }

// kernel: resnet34_forward.47
= control target key start
LH: loop header
LB: loop body
LE: loop exit
PB: predicated region body
PF: predicated region fallthrough
CT: control target
= control target key end

     0   :  { %s820_s15 = smov 0   ;;  %s822_s16 = smov 0   ;;  %s916_s0 = inlined_call_operand.vmem [shape: bf16[32,1152], index: 0, kind: input, shape index: {}]   ;;  %s917_s1 = inlined_call_operand.vmem [shape: bf16[1152,128], index: 1, kind: input, shape index: {}]   ;;  %s918_s2 = inlined_call_operand.vmem [shape: f32[1,128], index: 2, kind: input, shape index: {}]   ;;  %s919_s3 = inlined_call_operand.vmem [shape: f32[1,128], index: 3, kind: input, shape index: {}]   ;;  %s920_s4 = inlined_call_operand.vmem [shape: bf16[32,128], index: 4, kind: output, shape index: {}]  }
   0x1   :  { %s824_s17 = smov 0   ;;  %s826_s18 = smov 0  }
   0x2   :  { %s828_s19 = smov 0  }
   0x3 LB: > { %s26_s20 = sadd.s32 1, %s788_s18  ;;  %p49_p1 = scmp.ne.s32.totalorder %s780_s16, %s776_s15  ;;  %s792_s19 = sphi %s828_s19, %s14_s19   ;;  %s788_s18 = sphi %s826_s18, %s924_s18   ;;  %s784_s17 = sphi %s824_s17, %s923_s17   ;;  %s780_s16 = sphi %s822_s16, %s922_s16   ;;  %s776_s15 = sphi %s820_s15, %s921_s15  }
   0x4   : > { %p27_p0 = scmp.ge.s32.totalorder %s26_s20, 9  ;;  %p50_p2 = scmp.eq.s32.totalorder %s792_s19, 0 }
   0x5   : > { %s42_s22 = sadd.s32 1, %s780_s16  ;;  %p629_p5 = scmp.ge.s32.totalorder %s792_s19, 9 }
   0x6   : > { %s926_s20 = smov (%p27_p0, %s26_s20), 0  ;;  %p51_p3 = por %p50_p2, %p49_p1 }
   0x7   : > { %s38_s21 = ssub.s32 %s788_s18, %s926_s20  ;;  %195 = sbr.rel (%p629_p5) target bundleno = 20 (0x14), region = 24 }
   0x8   : > { %p40_p4 = scmp.eq.s32.totalorder %s38_s21, 0 }
   0xa   : > { %s855_s23 = scalar_select %p40_p4, %s780_s16, %s42_s22  }
   0xc   : > { %198 = sbr.rel (!%p51_p3) target bundleno = 20 (0x14), region = 28  ;;  %s200_s24 = sand.u32 (%p51_p3), 1, %s780_s16  }
   0xd   : > { %s631_s25 = sshll.u32 (%p51_p3), %s788_s18, 2  ;;  %s630_s26 = sshll.u32 (%p51_p3), %s200_s24, 4 }
   0xe   : > { %s207_s29 = scalar_lea.vmem (%p51_p3), %s916_s0, %s631_s25  ;;  %s202_s30 = scalar_lea.vmem (%p51_p3), [#allocation3], %s630_s26 }
   0xf   : > { %v224_v0 = vld [vmem:[%s207_s29] sm:$0xf] (%p51_p3)  ;;  %v226_v1 = vld [vmem:[%s207_s29 + $0x24] sm:$0xf] (%p51_p3)  ;;  %v228_v2 = vld [vmem:[%s207_s29 + $0x48] sm:$0xf] (%p51_p3) }
  0x10   : > { %225 = vst [vmem:[%s202_s30] sm:$0xf] (%p51_p3), %v224_v0  ;;  %v230_v3 = vld [vmem:[%s207_s29 + $0x6c] sm:$0xf] (%p51_p3) }
  0x11   : > { %227 = vst [vmem:[%s202_s30 + $0x4] sm:$0xf] %v226_v1 }
  0x12   : > { %229 = vst [vmem:[%s202_s30 + $0x8] sm:$0xf] %v228_v2 }
  0x13   : > { %231 = vst [vmem:[%s202_s30 + $0xc] sm:$0xf] %v230_v3 }
  0x14 PF: > { %p632_p6 = scmp.ge.s32.totalorder %s792_s19, 1  ;;  %p274_p7 = scmp.lt.s32.totalorder %s792_s19, 10 }
  0x16   : > { %p275_p8 = pnand %p632_p6, %p274_p7 }
  0x17   : > { %s281_s5 = sand.u32 (!%p275_p8), 1, %s776_s15   ;;  %s634_s6 = sshll.u32 (!%p275_p8), %s784_s17, 4 }
  0x18   : > { %278 = sbr.rel (%p275_p8) target bundleno = 225 (0xe1), region = 73  ;;  %s867_s7 = sshll.u32 (!%p275_p8), %s281_s5, 4 }
  0x19   : > { %p325_p9 = scmp.lt.s32.totalorder (!%p275_p8), %s634_s6, 143  ;;  %s283_s12 = scalar_lea.vmem (!%p275_p8), [#allocation3], %s867_s7 }
  0x1a   : > { %p636_p10 = scmp.ne.s32.totalorder (!%p275_p8), %s784_s17, 0 }
  0x1d   : > { %s928_s6 = smov (!%p325_p9, %s634_s6), 143  ;;  %351 = sbr.rel (%p636_p10) target bundleno = 39 (0x27), region = 81 }
  0x1e   : > { %s635_s8 = sshll.u32 %s928_s6, 2 }
  0x1f   : > { %s872_s11 = scalar_lea.vmem %s917_s1, %s635_s8 }
  0x22   : > { %v794_v4 = vmov 0.0  }
  0x23   : > { %352 = vst [vmem:[#allocation2 + $0x10] sm:$0xff] %v794_v4 }
  0x24   : > { %353 = vst [vmem:[#allocation2] sm:$0xff] %v794_v4 }
  0x25   : > { %354 = vst [vmem:[#allocation2 + $0x18] sm:$0xff] %v794_v4 }
  0x26   : > { %355 = vst [vmem:[#allocation2 + $0x8] sm:$0xff] %v794_v4 }
  0x27 PF: > { %v691_v5 = vld [vmem:[%s872_s11 + $0x38] sm:$0xff]  ;;  %v690_v6 = vld [vmem:[%s872_s11 + $0x30] sm:$0xff]  ;;  %v689_v7 = vld [vmem:[%s872_s11 + $0x28] sm:$0xff]  ;;  %p677_p11 = scmp.ne.s32.totalorder %s784_s17, 8 }
  0x28   : > { %440 = vmatpush.bf16.msra.mxu0 %v691_v5  ;;  %703 = vmatpush.bf16.msra.mxu1 %v691_v5  ;;  %v688_v8 = vld [vmem:[%s872_s11 + $0x20] sm:$0xff]  ;;  %v687_v9 = vld [vmem:[%s872_s11 + $0x18] sm:$0xff]  ;;  %v686_v10 = vld [vmem:[%s872_s11 + $0x10] sm:$0xff] }
  0x29   : > { %v685_v11 = vld [vmem:[%s872_s11 + $0x8] sm:$0xff]  ;;  %v684_v12 = vld [vmem:[%s872_s11] sm:$0xff] }
  0x2a   : > { %v682_v13 = vld [vmem:[%s283_s12] sm:$0xff]  ;;  %v683_v14 = vld [vmem:[%s283_s12 + $0x8] sm:$0xff] }
  0x2b   : > { %v356_v15 = vld [vmem:[#allocation2 + $0x10] sm:$0xff]  ;;  %v357_v21 = vld [vmem:[#allocation2] sm:$0xff] }
  0x2c   : > { %441 = vmatpush.bf16.msra.mxu0 %v690_v6  ;;  %704 = vmatpush.bf16.msra.mxu1 %v690_v6  ;;  %v358_v16 = vld [vmem:[#allocation2 + $0x18] sm:$0xff] }
  0x2d   : > { %v359_v22 = vld [vmem:[#allocation2 + $0x8] sm:$0xff] }
  0x30   : > { %442 = vmatpush.bf16.msra.mxu0 %v689_v7  ;;  %705 = vmatpush.bf16.msra.mxu1 %v689_v7 }
  0x34   : > { %443 = vmatpush.bf16.msra.mxu0 %v688_v8  ;;  %706 = vmatpush.bf16.msra.mxu1 %v688_v8 }
  0x38   : > { %444 = vmatpush.bf16.msra.mxu0 %v687_v9  ;;  %707 = vmatpush.bf16.msra.mxu1 %v687_v9 }
  0x3c   : > { %445 = vmatpush.bf16.msra.mxu0 %v686_v10  ;;  %708 = vmatpush.bf16.msra.mxu1 %v686_v10 }
  0x40   : > { %446 = vmatpush.bf16.msra.mxu0 %v685_v11  ;;  %709 = vmatpush.bf16.msra.mxu1 %v685_v11 }
  0x44   : > { %447 = vmatpush.bf16.msra.mxu0 %v684_v12  ;;  %710 = vmatpush.bf16.msra.mxu1 %v684_v12 }
  0x47   : > { %448 = vmatmul.bf16.vlgmr.msra.gmra.mxu0 %v682_v13  ;;  %453 = vmatmul.bf16.vlgmr.msra.gmra.mxu1 %v683_v14 }
  0xc4   : > { %v449_v17 = vpop.f32.mrf.mxu0  ;;  %v454_v18 = vpop.f32.mrf.mxu1 }
  0xc5   : > { %v459_v19 = vadd.f32 %v449_v17, %v356_v15  ;;  %v461_v20 = vadd.f32 %v454_v18, %v358_v16 }
  0xc7   : > { %463 = vst [vmem:[#allocation2 + $0x10] sm:$0xff] %v459_v19 }
  0xc8   : > { %465 = vst [vmem:[#allocation2 + $0x18] sm:$0xff] %v461_v20 }
  0xcc   : > { %v451_v23 = vpop.f32.mrf.mxu0  ;;  %v456_v24 = vpop.f32.mrf.mxu1  ;;  %470 = sbr.rel (%p677_p11) target bundleno = 225 (0xe1), region = 85 }
  0xcd   : > { %v460_v25 = vadd.f32 %v451_v23, %v357_v21  ;;  %v462_v26 = vadd.f32 %v456_v24, %v359_v22 }
  0xcf   : > { %464 = vst [vmem:[#allocation2] sm:$0xff] %v460_v25 }
  0xd0   : > { %466 = vst [vmem:[#allocation2 + $0x8] sm:$0xff] %v462_v26 }
  0xd1   : > { %v471_v27 = vld [vmem:[#allocation2 + $0x10] sm:$0xff]  ;;  %v752_v29 = vld [vmem:[%s918_s2] ss:$0 sm:$0xff]  ;;  %v473_v31 = vld [vmem:[#allocation2 + $0x18] sm:$0xff] }
  0xd2   : > { %v753_v30 = vld [vmem:[%s919_s3] ss:$0 sm:$0xff]  ;;  %v479_v33 = vmul.f32 %v752_v29, %v471_v27  ;;  %v481_v35 = vmul.f32 %v752_v29, %v473_v31 }
  0xd4   : > { %v487_v37 = vadd.f32 %v753_v30, %v479_v33  ;;  %v489_v39 = vadd.f32 %v753_v30, %v481_v35 }
  0xd6   : > { %v472_v28 = vld [vmem:[#allocation2] sm:$0xff]  ;;  %v491_v41 = vmax.f32 %v487_v37, 0.0  ;;  %v493_v43 = vmax.f32 %v489_v39, 0.0 }
  0xd7   : > { %v474_v32 = vld [vmem:[#allocation2 + $0x8] sm:$0xff]  ;;  %v480_v34 = vmul.f32 %v752_v29, %v472_v28 }
  0xd8   : > { %v482_v36 = vmul.f32 %v752_v29, %v474_v32 }
  0xd9   : > { %v488_v38 = vadd.f32 %v753_v30, %v480_v34 }
  0xda   : > { %v490_v40 = vadd.f32 %v753_v30, %v482_v36 }
  0xdb   : > { %v492_v42 = vmax.f32 %v488_v38, 0.0 }
  0xdc   : > { %v494_v44 = vmax.f32 %v490_v40, 0.0 }
  0xdd   : > { %v695_v45 = vpack.c.bf16 %v492_v42, %v491_v41 }
  0xde   : > { %v700_v46 = vpack.c.bf16 %v494_v44, %v493_v43 }
  0xdf   : > { %696 = vst [vmem:[%s920_s4] sm:$0xff] %v695_v45  }
  0xe0   : > { %702 = vst [vmem:[%s920_s4 + $0x8] sm:$0xff] %v700_v46  }
  0xe1 PF: > { %s14_s19 = sadd.s32 1, %s792_s19   ;;  %s921_s15 = smov %s780_s16 }
  0xe2   : > { %p11_p12 = scmp.ge.s32.totalorder %s14_s19, 11   ;;  %s922_s16 = smov %s855_s23 }
  0xe3   : > { %s923_s17 = smov %s788_s18  ;;  %s924_s18 = smov %s926_s20 }
  0xe4   :  { %13 = sbr.rel (!%p11_p12) target bundleno = 3 (0x3), region = 129 }

// kernel: resnet34_forward.49
= control target key start
LH: loop header
LB: loop body
LE: loop exit
PB: predicated region body
PF: predicated region fallthrough
CT: control target
= control target key end

     0   :  { %s925_s18 = smov 0   ;;  %s927_s19 = smov 0   ;;  %s1027_s0 = inlined_call_operand.vmem [shape: bf16[32,1152], index: 0, kind: input, shape index: {}]   ;;  %s1028_s1 = inlined_call_operand.vmem [shape: bf16[1152,128], index: 1, kind: input, shape index: {}]   ;;  %s1029_s2 = inlined_call_operand.vmem [shape: f32[1,128], index: 2, kind: input, shape index: {}]   ;;  %s1030_s3 = inlined_call_operand.vmem [shape: f32[1,128], index: 3, kind: input, shape index: {}]   ;;  %s1031_s4 = inlined_call_operand.vmem [shape: bf16[32,128], index: 4, kind: input, shape index: {}]   ;;  %s1032_s5 = inlined_call_operand.vmem [shape: bf16[32,128], index: 5, kind: output, shape index: {}]  }
   0x1   :  { %s929_s20 = smov 0   ;;  %s931_s21 = smov 0  }
   0x2   :  { %s933_s22 = smov 0  }
   0x3 LB: > { %s27_s23 = sadd.s32 1, %s888_s21  ;;  %p50_p1 = scmp.ne.s32.totalorder %s880_s19, %s876_s18  ;;  %s892_s22 = sphi %s933_s22, %s15_s22   ;;  %s888_s21 = sphi %s931_s21, %s1036_s21   ;;  %s884_s20 = sphi %s929_s20, %s1035_s20   ;;  %s880_s19 = sphi %s927_s19, %s1034_s19   ;;  %s876_s18 = sphi %s925_s18, %s1033_s18  }
   0x4   : > { %p28_p0 = scmp.ge.s32.totalorder %s27_s23, 9  ;;  %p51_p2 = scmp.eq.s32.totalorder %s892_s22, 0 }
   0x5   : > { %s43_s25 = sadd.s32 1, %s880_s19  ;;  %p720_p5 = scmp.ge.s32.totalorder %s892_s22, 9 }
   0x6   : > { %s1038_s23 = smov (%p28_p0, %s27_s23), 0  ;;  %p52_p3 = por %p51_p2, %p50_p1 }
   0x7   : > { %s39_s24 = ssub.s32 %s888_s21, %s1038_s23  ;;  %236 = sbr.rel (%p720_p5) target bundleno = 20 (0x14), region = 28 }
   0x8   : > { %p41_p4 = scmp.eq.s32.totalorder %s39_s24, 0 }
   0xa   : > { %s960_s26 = scalar_select %p41_p4, %s880_s19, %s43_s25  }
   0xc   : > { %239 = sbr.rel (!%p52_p3) target bundleno = 20 (0x14), region = 32  ;;  %s241_s27 = sand.u32 (%p52_p3), 1, %s880_s19  }
   0xd   : > { %s722_s28 = sshll.u32 (%p52_p3), %s888_s21, 2  ;;  %s721_s29 = sshll.u32 (%p52_p3), %s241_s27, 4 }
   0xe   : > { %s248_s7 = scalar_lea.vmem (%p52_p3), %s1027_s0, %s722_s28  ;;  %s243_s8 = scalar_lea.vmem (%p52_p3), [#allocation3], %s721_s29 }
   0xf   : > { %v265_v0 = vld [vmem:[%s248_s7] sm:$0xf] (%p52_p3)  ;;  %v267_v1 = vld [vmem:[%s248_s7 + $0x24] sm:$0xf] (%p52_p3)  ;;  %v269_v2 = vld [vmem:[%s248_s7 + $0x48] sm:$0xf] (%p52_p3) }
  0x10   : > { %266 = vst [vmem:[%s243_s8] sm:$0xf] (%p52_p3), %v265_v0  ;;  %v271_v3 = vld [vmem:[%s248_s7 + $0x6c] sm:$0xf] (%p52_p3) }
  0x11   : > { %268 = vst [vmem:[%s243_s8 + $0x4] sm:$0xf] %v267_v1 }
  0x12   : > { %270 = vst [vmem:[%s243_s8 + $0x8] sm:$0xf] %v269_v2 }
  0x13   : > { %272 = vst [vmem:[%s243_s8 + $0xc] sm:$0xf] %v271_v3 }
  0x14 PF: > { %p723_p6 = scmp.ge.s32.totalorder %s892_s22, 1  ;;  %p315_p7 = scmp.lt.s32.totalorder %s892_s22, 10 }
  0x16   : > { %p316_p8 = pnand %p723_p6, %p315_p7 }
  0x17   : > { %s322_s9 = sand.u32 (!%p316_p8), 1, %s876_s18   ;;  %s725_s10 = sshll.u32 (!%p316_p8), %s884_s20, 4 }
  0x18   : > { %319 = sbr.rel (%p316_p8) target bundleno = 227 (0xe3), region = 77  ;;  %s972_s11 = sshll.u32 (!%p316_p8), %s322_s9, 4 }
  0x19   : > { %p376_p9 = scmp.lt.s32.totalorder (!%p316_p8), %s725_s10, 143  ;;  %s324_s16 = scalar_lea.vmem (!%p316_p8), [#allocation3], %s972_s11 }
  0x1a   : > { %p727_p10 = scmp.ne.s32.totalorder (!%p316_p8), %s884_s20, 0 }
  0x1d   : > { %s1040_s10 = smov (!%p376_p9, %s725_s10), 143  ;;  %411 = sbr.rel (%p727_p10) target bundleno = 39 (0x27), region = 85 }
  0x1e   : > { %s726_s12 = sshll.u32 %s1040_s10, 2 }
  0x1f   : > { %s977_s15 = scalar_lea.vmem %s1028_s1, %s726_s12 }
  0x22   : > { %v894_v4 = vmov 0.0  }
  0x23   : > { %412 = vst [vmem:[#allocation2 + $0x10] sm:$0xff] %v894_v4 }
  0x24   : > { %413 = vst [vmem:[#allocation2] sm:$0xff] %v894_v4 }
  0x25   : > { %414 = vst [vmem:[#allocation2 + $0x18] sm:$0xff] %v894_v4 }
  0x26   : > { %415 = vst [vmem:[#allocation2 + $0x8] sm:$0xff] %v894_v4 }
  0x27 PF: > { %v782_v5 = vld [vmem:[%s977_s15 + $0x38] sm:$0xff]  ;;  %v781_v6 = vld [vmem:[%s977_s15 + $0x30] sm:$0xff]  ;;  %v780_v7 = vld [vmem:[%s977_s15 + $0x28] sm:$0xff]  ;;  %p768_p11 = scmp.ne.s32.totalorder %s884_s20, 8 }
  0x28   : > { %500 = vmatpush.bf16.msra.mxu0 %v782_v5  ;;  %803 = vmatpush.bf16.msra.mxu1 %v782_v5  ;;  %v779_v8 = vld [vmem:[%s977_s15 + $0x20] sm:$0xff]  ;;  %v778_v9 = vld [vmem:[%s977_s15 + $0x18] sm:$0xff]  ;;  %v777_v10 = vld [vmem:[%s977_s15 + $0x10] sm:$0xff] }
  0x29   : > { %v776_v11 = vld [vmem:[%s977_s15 + $0x8] sm:$0xff]  ;;  %v775_v12 = vld [vmem:[%s977_s15] sm:$0xff] }
  0x2a   : > { %v773_v13 = vld [vmem:[%s324_s16] sm:$0xff]  ;;  %v774_v14 = vld [vmem:[%s324_s16 + $0x8] sm:$0xff] }
  0x2b   : > { %v416_v15 = vld [vmem:[#allocation2 + $0x10] sm:$0xff]  ;;  %v417_v21 = vld [vmem:[#allocation2] sm:$0xff] }
  0x2c   : > { %501 = vmatpush.bf16.msra.mxu0 %v781_v6  ;;  %804 = vmatpush.bf16.msra.mxu1 %v781_v6  ;;  %v418_v16 = vld [vmem:[#allocation2 + $0x18] sm:$0xff] }
  0x2d   : > { %v419_v22 = vld [vmem:[#allocation2 + $0x8] sm:$0xff] }
  0x30   : > { %502 = vmatpush.bf16.msra.mxu0 %v780_v7  ;;  %805 = vmatpush.bf16.msra.mxu1 %v780_v7 }
  0x34   : > { %503 = vmatpush.bf16.msra.mxu0 %v779_v8  ;;  %806 = vmatpush.bf16.msra.mxu1 %v779_v8 }
  0x38   : > { %504 = vmatpush.bf16.msra.mxu0 %v778_v9  ;;  %807 = vmatpush.bf16.msra.mxu1 %v778_v9 }
  0x3c   : > { %505 = vmatpush.bf16.msra.mxu0 %v777_v10  ;;  %808 = vmatpush.bf16.msra.mxu1 %v777_v10 }
  0x40   : > { %506 = vmatpush.bf16.msra.mxu0 %v776_v11  ;;  %809 = vmatpush.bf16.msra.mxu1 %v776_v11 }
  0x44   : > { %507 = vmatpush.bf16.msra.mxu0 %v775_v12  ;;  %810 = vmatpush.bf16.msra.mxu1 %v775_v12 }
  0x47   : > { %508 = vmatmul.bf16.vlgmr.msra.gmra.mxu0 %v773_v13  ;;  %513 = vmatmul.bf16.vlgmr.msra.gmra.mxu1 %v774_v14 }
  0xc4   : > { %v509_v17 = vpop.f32.mrf.mxu0  ;;  %v514_v18 = vpop.f32.mrf.mxu1 }
  0xc5   : > { %v519_v19 = vadd.f32 %v509_v17, %v416_v15  ;;  %v521_v20 = vadd.f32 %v514_v18, %v418_v16 }
  0xc7   : > { %523 = vst [vmem:[#allocation2 + $0x10] sm:$0xff] %v519_v19 }
  0xc8   : > { %525 = vst [vmem:[#allocation2 + $0x18] sm:$0xff] %v521_v20 }
  0xcc   : > { %v511_v23 = vpop.f32.mrf.mxu0  ;;  %v516_v24 = vpop.f32.mrf.mxu1  ;;  %530 = sbr.rel (%p768_p11) target bundleno = 227 (0xe3), region = 89 }
  0xcd   : > { %v520_v25 = vadd.f32 %v511_v23, %v417_v21  ;;  %v522_v26 = vadd.f32 %v516_v24, %v419_v22 }
  0xcf   : > { %524 = vst [vmem:[#allocation2] sm:$0xff] %v520_v25 }
  0xd0   : > { %526 = vst [vmem:[#allocation2 + $0x8] sm:$0xff] %v522_v26 }
  0xd1   : > { %v531_v27 = vld [vmem:[#allocation2 + $0x10] sm:$0xff]  ;;  %v852_v29 = vld [vmem:[%s1029_s2] ss:$0 sm:$0xff]  ;;  %v533_v32 = vld [vmem:[#allocation2 + $0x18] sm:$0xff] }
  0xd2   : > { %v853_v30 = vld [vmem:[%s1030_s3] ss:$0 sm:$0xff]  ;;  %v539_v34 = vmul.f32 %v852_v29, %v531_v27  ;;  %v801_v38 = vld [vmem:[%s1031_s4 + $0x8] sm:$0xff]   ;;  %v541_v39 = vmul.f32 %v852_v29, %v533_v32 }
  0xd3   : > { %v784_v31 = vld [vmem:[%s1031_s4] sm:$0xff]   ;;  %v789_v41 = vunpack.c.l.bf16 %v801_v38  ;;  %v790_v42 = vunpack.c.h.bf16 %v801_v38 }
  0xd4   : > { %v785_v36 = vunpack.c.l.bf16 %v784_v31  ;;  %v786_v37 = vunpack.c.h.bf16 %v784_v31  ;;  %v547_v43 = vadd.f32 %v853_v30, %v539_v34  ;;  %v549_v45 = vadd.f32 %v853_v30, %v541_v39 }
  0xd6   : > { %v532_v28 = vld [vmem:[#allocation2] sm:$0xff]  ;;  %v559_v47 = vadd.f32 %v785_v36, %v547_v43  ;;  %v561_v49 = vadd.f32 %v789_v41, %v549_v45 }
  0xd7   : > { %v534_v33 = vld [vmem:[#allocation2 + $0x8] sm:$0xff]  ;;  %v540_v35 = vmul.f32 %v852_v29, %v532_v28 }
  0xd8   : > { %v542_v40 = vmul.f32 %v852_v29, %v534_v33  ;;  %v563_v51 = vmax.f32 %v559_v47, 0.0  ;;  %v565_v53 = vmax.f32 %v561_v49, 0.0 }
  0xd9   : > { %v548_v44 = vadd.f32 %v853_v30, %v540_v35 }
  0xda   : > { %v550_v46 = vadd.f32 %v853_v30, %v542_v40 }
  0xdb   : > { %v560_v48 = vadd.f32 %v786_v37, %v548_v44 }
  0xdc   : > { %v562_v50 = vadd.f32 %v790_v42, %v550_v46 }
  0xdd   : > { %v564_v52 = vmax.f32 %v560_v48, 0.0 }
  0xde   : > { %v566_v54 = vmax.f32 %v562_v50, 0.0 }
  0xdf   : > { %v794_v55 = vpack.c.bf16 %v564_v52, %v563_v51 }
  0xe0   : > { %v799_v56 = vpack.c.bf16 %v566_v54, %v565_v53 }
  0xe1   : > { %795 = vst [vmem:[%s1032_s5] sm:$0xff] %v794_v55  }
  0xe2   : > { %802 = vst [vmem:[%s1032_s5 + $0x8] sm:$0xff] %v799_v56  }
  0xe3 PF: > { %s15_s22 = sadd.s32 1, %s892_s22   ;;  %s1033_s18 = smov %s880_s19 }
  0xe4   : > { %p12_p12 = scmp.ge.s32.totalorder %s15_s22, 11   ;;  %s1034_s19 = smov %s960_s26 }
  0xe5   : > { %s1035_s20 = smov %s888_s21  ;;  %s1036_s21 = smov %s1038_s23 }
  0xe6   :  { %14 = sbr.rel (!%p12_p12) target bundleno = 3 (0x3), region = 136 }

// kernel: resnet34_forward.48
= control target key start
LH: loop header
LB: loop body
LE: loop exit
PB: predicated region body
PF: predicated region fallthrough
CT: control target
= control target key end

     0   :  { %s309_s1 = inlined_call_operand.vmem [shape: bf16[128,128], index: 1, kind: input, shape index: {}]   ;;  %s310_s2 = inlined_call_operand.vmem [shape: f32[1,128], index: 2, kind: input, shape index: {}]   ;;  %s311_s3 = inlined_call_operand.vmem [shape: f32[1,128], index: 3, kind: input, shape index: {}]   ;;  %s312_s0 = inlined_call_operand.vmem [shape: bf16[32,128], index: 0, kind: input, shape index: {}]   ;;  %s313_s4 = inlined_call_operand.vmem [shape: bf16[32,128], index: 4, kind: output, shape index: {}]  }
   0x1   :  { %v220_v0 = vld [vmem:[%s309_s1 + $0x38] sm:$0xff]  ;;  %v219_v1 = vld [vmem:[%s309_s1 + $0x30] sm:$0xff]  ;;  %v218_v2 = vld [vmem:[%s309_s1 + $0x28] sm:$0xff] }
   0x2   :  { %109 = vmatpush.bf16.msra.mxu0 %v220_v0  ;;  %232 = vmatpush.bf16.msra.mxu1 %v220_v0  ;;  %v217_v3 = vld [vmem:[%s309_s1 + $0x20] sm:$0xff]  ;;  %v216_v4 = vld [vmem:[%s309_s1 + $0x18] sm:$0xff]  ;;  %v215_v5 = vld [vmem:[%s309_s1 + $0x10] sm:$0xff] }
   0x3   :  { %v214_v6 = vld [vmem:[%s309_s1 + $0x8] sm:$0xff]  ;;  %v213_v7 = vld [vmem:[%s309_s1] sm:$0xff] }
   0x4   :  { %v211_v8 = vld [vmem:[%s312_s0] sm:$0xff]  ;;  %v212_v9 = vld [vmem:[%s312_s0 + $0x8] sm:$0xff] }
   0x5   :  { %v240_v12 = vld [vmem:[%s310_s2] ss:$0 sm:$0xff] }
   0x6   :  { %110 = vmatpush.bf16.msra.mxu0 %v219_v1  ;;  %233 = vmatpush.bf16.msra.mxu1 %v219_v1  ;;  %v241_v14 = vld [vmem:[%s311_s3] ss:$0 sm:$0xff] }
   0xa   :  { %111 = vmatpush.bf16.msra.mxu0 %v218_v2  ;;  %234 = vmatpush.bf16.msra.mxu1 %v218_v2 }
   0xe   :  { %112 = vmatpush.bf16.msra.mxu0 %v217_v3  ;;  %235 = vmatpush.bf16.msra.mxu1 %v217_v3 }
  0x12   :  { %113 = vmatpush.bf16.msra.mxu0 %v216_v4  ;;  %236 = vmatpush.bf16.msra.mxu1 %v216_v4 }
  0x16   :  { %114 = vmatpush.bf16.msra.mxu0 %v215_v5  ;;  %237 = vmatpush.bf16.msra.mxu1 %v215_v5 }
  0x1a   :  { %115 = vmatpush.bf16.msra.mxu0 %v214_v6  ;;  %238 = vmatpush.bf16.msra.mxu1 %v214_v6 }
  0x1e   :  { %116 = vmatpush.bf16.msra.mxu0 %v213_v7  ;;  %239 = vmatpush.bf16.msra.mxu1 %v213_v7 }
  0x21   :  { %117 = vmatmul.bf16.vlgmr.msra.gmra.mxu0 %v211_v8  ;;  %122 = vmatmul.bf16.vlgmr.msra.gmra.mxu1 %v212_v9 }
  0x9e   :  { %v118_v10 = vpop.f32.mrf.mxu0  ;;  %v123_v11 = vpop.f32.mrf.mxu1 }
  0x9f   :  { %v147_v13 = vmul.f32 %v240_v12, %v118_v10  ;;  %v149_v15 = vmul.f32 %v240_v12, %v123_v11 }
  0xa1   :  { %v155_v20 = vadd.f32 %v241_v14, %v147_v13  ;;  %v157_v21 = vadd.f32 %v241_v14, %v149_v15 }
  0xa6   :  { %v120_v16 = vpop.f32.mrf.mxu0  ;;  %v125_v17 = vpop.f32.mrf.mxu1 }
  0xa7   :  { %v148_v18 = vmul.f32 %v240_v12, %v120_v16  ;;  %v150_v19 = vmul.f32 %v240_v12, %v125_v17 }
  0xa9   :  { %v156_v22 = vadd.f32 %v241_v14, %v148_v18  ;;  %v158_v23 = vadd.f32 %v241_v14, %v150_v19 }
  0xab   :  { %v224_v24 = vpack.c.bf16 %v156_v22, %v155_v20  ;;  %v229_v25 = vpack.c.bf16 %v158_v23, %v157_v21 }
  0xad   :  { %225 = vst [vmem:[%s313_s4] sm:$0xff] %v224_v24  }
  0xae   :  { %231 = vst [vmem:[%s313_s4 + $0x8] sm:$0xff] %v229_v25  }

// kernel: resnet34_forward.56
= control target key start
LH: loop header
LB: loop body
LE: loop exit
PB: predicated region body
PF: predicated region fallthrough
CT: control target
= control target key end

     0   :  { %s822_s15 = smov 0   ;;  %s824_s16 = smov 0   ;;  %s960_s0 = inlined_call_operand.vmem [shape: bf16[8,1152], index: 0, kind: input, shape index: {}]   ;;  %s961_s1 = inlined_call_operand.vmem [shape: bf16[1152,256], index: 1, kind: input, shape index: {}]   ;;  %s962_s2 = inlined_call_operand.vmem [shape: f32[1,256], index: 2, kind: input, shape index: {}]   ;;  %s963_s3 = inlined_call_operand.vmem [shape: f32[1,256], index: 3, kind: input, shape index: {}]   ;;  %s964_s4 = inlined_call_operand.vmem [shape: bf16[8,256], index: 4, kind: output, shape index: {}]  }
   0x1   :  { %s826_s17 = smov 0   ;;  %s828_s18 = smov 0  }
   0x2   :  { %s830_s19 = smov 0   ;;  %s832_s20 = smov 0  }
   0x3   :  { %s834_s21 = smov 0  }
   0x4 LB: > { %s26_s22 = sadd.s32 1, %s786_s19  ;;  %s29_s23 = sadd.s32 1, %s790_s20  ;;  %s794_s21 = sphi %s834_s21, %s14_s21   ;;  %s790_s20 = sphi %s832_s20, %s970_s20   ;;  %s786_s19 = sphi %s830_s19, %s969_s19   ;;  %s782_s18 = sphi %s828_s18, %s968_s18   ;;  %s778_s17 = sphi %s826_s17, %s967_s17   ;;  %s774_s16 = sphi %s824_s16, %s966_s16   ;;  %s770_s15 = sphi %s822_s15, %s965_s15  }
   0x5   : > { %p27_p0 = scmp.ge.s32.totalorder %s26_s22, 9  ;;  %p77_p1 = scmp.ne.s32.totalorder %s774_s16, %s770_s15 }
   0x6   : > { %p78_p2 = scmp.eq.s32.totalorder %s794_s21, 0  ;;  %s70_s27 = sadd.s32 1, %s774_s16 }
   0x7   : > { %s972_s22 = smov (%p27_p0, %s26_s22), 0  ;;  %s974_s23 = smov (!%p27_p0, %s29_s23), %s790_s20 }
   0x8   : > { %p79_p3 = por %p78_p2, %p77_p1  ;;  %p31_p4 = scmp.ge.s32.totalorder %s974_s23, 2 }
   0x9   : > { %s65_s24 = ssub.s32 %s786_s19, %s972_s22  ;;  %p627_p6 = scmp.ge.s32.totalorder %s794_s21, 18 }
   0xa   : > { %s976_s23 = smov (%p31_p4, %s974_s23), 0 }
   0xb   : > { %s66_s25 = ssub.s32 %s790_s20, %s976_s23  ;;  %183 = sbr.rel (%p627_p6) target bundleno = 38 (0x26), region = 16 }
   0xc   : > { %s67_s26 = sor.u32 %s66_s25, %s65_s24 }
   0xd   : > { %p68_p5 = scmp.eq.s32.totalorder %s67_s26, 0 }
   0xf   : > { %s873_s28 = scalar_select %p68_p5, %s774_s16, %s70_s27  }
  0x10   : > { %197 = sbr.rel (!%p79_p3) target bundleno = 38 (0x26), region = 24  ;;  %s199_s29 = sand.u32 (%p79_p3), 1, %s774_s16  }
  0x11   : > { %s672_s30 = sshll.u32 (%p79_p3), %s786_s19, 5  ;;  %s628_s5 = sshll.u32 (%p79_p3), %s199_s29, 6 }
  0x12   : > { %s204_s6 = sadd.s32 (%p79_p3), %s790_s20, %s672_s30  ;;  %s201_s11 = scalar_lea.vmem (%p79_p3), [#allocation3], %s628_s5 }
  0x13   : > { %s631_s7 = sshll.u32 (%p79_p3), %s204_s6, 2 }
  0x14   : > { %s882_s10 = scalar_lea.vmem (%p79_p3), %s961_s1, %s631_s7 }
  0x15   : > { %v223_v0 = vld [vmem:[%s882_s10] sm:$0xf]  ;;  %v225_v1 = vld [vmem:[%s882_s10 + $0x8] sm:$0xf]  ;;  %v227_v2 = vld [vmem:[%s882_s10 + $0x10] sm:$0xf] }
  0x16   : > { %224 = vst [vmem:[%s201_s11] sm:$0xf] %v223_v0  ;;  %v229_v3 = vld [vmem:[%s882_s10 + $0x18] sm:$0xf]  ;;  %v231_v4 = vld [vmem:[%s882_s10 + $0x20] sm:$0xf] }
  0x17   : > { %226 = vst [vmem:[%s201_s11 + $0x4] sm:$0xf] %v225_v1  ;;  %v233_v5 = vld [vmem:[%s882_s10 + $0x28] sm:$0xf]  ;;  %v235_v6 = vld [vmem:[%s882_s10 + $0x30] sm:$0xf] }
  0x18   : > { %228 = vst [vmem:[%s201_s11 + $0x8] sm:$0xf] %v227_v2  ;;  %v237_v7 = vld [vmem:[%s882_s10 + $0x38] sm:$0xf]  ;;  %v239_v8 = vld [vmem:[%s882_s10 + $0x40] sm:$0xf] }
  0x19   : > { %230 = vst [vmem:[%s201_s11 + $0xc] sm:$0xf] %v229_v3  ;;  %v241_v9 = vld [vmem:[%s882_s10 + $0x48] sm:$0xf]  ;;  %v243_v10 = vld [vmem:[%s882_s10 + $0x50] sm:$0xf] }
  0x1a   : > { %232 = vst [vmem:[%s201_s11 + $0x10] sm:$0xf] %v231_v4  ;;  %v245_v11 = vld [vmem:[%s882_s10 + $0x58] sm:$0xf]  ;;  %v247_v12 = vld [vmem:[%s882_s10 + $0x60] sm:$0xf] }
  0x1b   : > { %234 = vst [vmem:[%s201_s11 + $0x14] sm:$0xf] %v233_v5  ;;  %v249_v13 = vld [vmem:[%s882_s10 + $0x68] sm:$0xf]  ;;  %v251_v14 = vld [vmem:[%s882_s10 + $0x70] sm:$0xf] }
  0x1c   : > { %236 = vst [vmem:[%s201_s11 + $0x18] sm:$0xf] %v235_v6  ;;  %v253_v15 = vld [vmem:[%s882_s10 + $0x78] sm:$0xf] }
  0x1d   : > { %238 = vst [vmem:[%s201_s11 + $0x1c] sm:$0xf] %v237_v7 }
  0x1e   : > { %240 = vst [vmem:[%s201_s11 + $0x20] sm:$0xf] %v239_v8 }
  0x1f   : > { %242 = vst [vmem:[%s201_s11 + $0x24] sm:$0xf] %v241_v9 }
  0x20   : > { %244 = vst [vmem:[%s201_s11 + $0x28] sm:$0xf] %v243_v10 }
  0x21   : > { %246 = vst [vmem:[%s201_s11 + $0x2c] sm:$0xf] %v245_v11 }
  0x22   : > { %248 = vst [vmem:[%s201_s11 + $0x30] sm:$0xf] %v247_v12 }
  0x23   : > { %250 = vst [vmem:[%s201_s11 + $0x34] sm:$0xf] %v249_v13 }
  0x24   : > { %252 = vst [vmem:[%s201_s11 + $0x38] sm:$0xf] %v251_v14 }
  0x25   : > { %254 = vst [vmem:[%s201_s11 + $0x3c] sm:$0xf] %v253_v15 }
  0x26 PF: > { %p632_p7 = scmp.ge.s32.totalorder %s794_s21, 1  ;;  %p321_p8 = scmp.lt.s32.totalorder %s794_s21, 19 }
  0x28   : > { %p322_p9 = pnand %p632_p7, %p321_p8 }
  0x29   : > { %s328_s12 = sand.u32 (!%p322_p9), 1, %s770_s15   ;;  %p372_p10 = scmp.lt.s32.totalorder (!%p322_p9), %s778_s17, 8 }
  0x2a   : > { %325 = sbr.rel (%p322_p9) target bundleno = 232 (0xe8), region = 73  ;;  %s633_s13 = sshll.u32 (!%p322_p9), %s328_s12, 6 }
  0x2b   : > { %p379_p11 = scmp.lt.s32.totalorder (!%p322_p9), %s782_s18, 1  ;;  %s330_s12 = scalar_lea.vmem (!%p322_p9), [#allocation3], %s633_s13 }
  0x2c   : > { %p636_p12 = scmp.ne.s32.totalorder (!%p322_p9), %s778_s17, 0 }
  0x2f   : > { %s373_s14 = scalar_select %p372_p10, %s778_s17, 8 }
  0x30   : > { %s978_s18 = smov (!%p379_p11, %s782_s18), 1  ;;  %396 = sbr.rel (%p636_p12) target bundleno = 55 (0x37), region = 81 }
  0x31   : > { %s634_s24 = sshll.u32 %s373_s14, 2  ;;  %s381_s5 = scalar_lea.vmem %s962_s2, %s978_s18 }
  0x32   : > { %s377_s27 = scalar_lea.vmem %s960_s0, %s634_s24  ;;  %s384_s7 = scalar_lea.vmem %s963_s3, %s978_s18 }
  0x33   : > { %s635_s8 = sshll.u32 %s978_s18, 2 }
  0x34   : > { %s924_s11 = scalar_lea.vmem %s964_s4, %s635_s8 }
  0x35   : > { %v796_v16 = vmov 0.0  }
  0x36   : > { %397 = vst [vmem:[#allocation2] sm:$0xff] %v796_v16 }
  0x37 PF: > { %v680_v17 = vld [vmem:[%s330_s12 + $0x38] sm:$0xff]  ;;  %v679_v18 = vld [vmem:[%s330_s12 + $0x30] sm:$0xff]  ;;  %v678_v19 = vld [vmem:[%s330_s12 + $0x28] sm:$0xff]  ;;  %p669_p13 = scmp.ne.s32.totalorder %s778_s17, 8 }
  0x38   : > { %464 = vmatpush.bf16.msra.mxu0 %v680_v17  ;;  %v677_v20 = vld [vmem:[%s330_s12 + $0x20] sm:$0xff]  ;;  %v676_v21 = vld [vmem:[%s330_s12 + $0x18] sm:$0xff]  ;;  %v675_v22 = vld [vmem:[%s330_s12 + $0x10] sm:$0xff] }
  0x39   : > { %v674_v23 = vld [vmem:[%s330_s12 + $0x8] sm:$0xff]  ;;  %v673_v24 = vld [vmem:[%s330_s12] sm:$0xff]  ;;  %v399_v25 = vld [vmem:[%s377_s27] sm:$0xf] }
  0x3c   : > { %465 = vmatpush.bf16.msra.mxu0 %v679_v18 }
  0x3d   : > { %v398_v26 = vld [vmem:[#allocation2] sm:$0xff] }
  0x40   : > { %466 = vmatpush.bf16.msra.mxu0 %v678_v19 }
  0x44   : > { %467 = vmatpush.bf16.msra.mxu0 %v677_v20 }
  0x48   : > { %468 = vmatpush.bf16.msra.mxu0 %v676_v21 }
  0x4c   : > { %469 = vmatpush.bf16.msra.mxu0 %v675_v22 }
  0x50   : > { %470 = vmatpush.bf16.msra.mxu0 %v674_v23 }
  0x54   : > { %471 = vmatpush.bf16.msra.mxu0 %v673_v24 }
  0x57   : > { %472 = vmatmul.bf16.vlgmr.msra.gmra.mxu0 %v399_v25 }
  0xd4   : > { %v473_v27 = vpop.f32.mrf.mxu0 }
  0xd5   : > { %v477_v28 = vadd.f32 %v473_v27, %v398_v26 }
  0xd7   : > { %478 = vst [vmem:[#allocation2] sm:$0xff] %v477_v28 }
  0xd8   : > { %482 = sbr.rel (%p669_p13) target bundleno = 232 (0xe8), region = 85 }
  0xdc   : > { %v475_v29 = vpop.f32.mrf.mxu0 }
  0xdd   : > { %v738_v31 = vld [vmem:[%s381_s5] ss:$0 sm:$0xff] }
  0xde   : > { %v483_v30 = vld [vmem:[#allocation2] sm:$0xff] }
  0xdf   : > { %v739_v32 = vld [vmem:[%s384_s7] ss:$0 sm:$0xff]  ;;  %v488_v33 = vmul.f32 %v738_v31, %v483_v30 }
  0xe1   : > { %v493_v34 = vadd.f32 %v739_v32, %v488_v33 }
  0xe3   : > { %v494_v35 = vmax.f32 %v493_v34, 0.0 }
  0xe5   : > { %v495_v36 = vpack.c.bf16 %v494_v35, %v494_v35 }
  0xe7   : > { %496 = vst [vmem:[%s924_s11] sm:$0xf] %v495_v36 }
  0xe8 PF: > { %s14_s21 = sadd.s32 1, %s794_s21   ;;  %s965_s15 = smov %s774_s16 }
  0xe9   : > { %p11_p0 = scmp.ge.s32.totalorder %s14_s21, 20   ;;  %s966_s16 = smov %s873_s28 }
  0xea   : > { %s967_s17 = smov %s786_s19  ;;  %s968_s18 = smov %s790_s20 }
  0xeb   : > { %s969_s19 = smov %s972_s22  ;;  %s970_s20 = smov %s976_s23 }
  0xec   :  { %13 = sbr.rel (!%p11_p0) target bundleno = 4 (0x4), region = 129 }

// kernel: resnet34_forward.57
= control target key start
LH: loop header
LB: loop body
LE: loop exit
PB: predicated region body
PF: predicated region fallthrough
CT: control target
= control target key end

     0   :  { %s776_s15 = smov 0   ;;  %s778_s16 = smov 0   ;;  %s869_s0 = inlined_call_operand.vmem [shape: bf16[8,128], index: 0, kind: input, shape index: {}]   ;;  %s870_s1 = inlined_call_operand.vmem [shape: bf16[128,256], index: 1, kind: input, shape index: {}]   ;;  %s871_s2 = inlined_call_operand.vmem [shape: f32[1,256], index: 2, kind: input, shape index: {}]   ;;  %s872_s3 = inlined_call_operand.vmem [shape: f32[1,256], index: 3, kind: input, shape index: {}]   ;;  %s873_s4 = inlined_call_operand.vmem [shape: bf16[8,256], index: 4, kind: output, shape index: {}]  }
   0x1   :  { %s780_s17 = smov 0   ;;  %s782_s18 = smov 0  }
   0x2   :  { %s784_s19 = smov 0  }
   0x3 LB: > { %s29_s20 = sadd.s32 1, %s745_s18  ;;  %p77_p1 = scmp.ne.s32.totalorder %s737_s16, %s733_s15  ;;  %s749_s19 = sphi %s784_s19, %s14_s19   ;;  %s745_s18 = sphi %s782_s18, %s877_s18   ;;  %s741_s17 = sphi %s780_s17, %s876_s17   ;;  %s737_s16 = sphi %s778_s16, %s875_s16   ;;  %s733_s15 = sphi %s776_s15, %s874_s15  }
   0x4   : > { %p31_p0 = scmp.ge.s32.totalorder %s29_s20, 2  ;;  %p78_p2 = scmp.eq.s32.totalorder %s749_s19, 0 }
   0x5   : > { %s70_s22 = sadd.s32 1, %s737_s16  ;;  %p621_p5 = scmp.ge.s32.totalorder %s749_s19, 2 }
   0x6   : > { %s879_s20 = smov (%p31_p0, %s29_s20), 0  ;;  %p79_p3 = por %p78_p2, %p77_p1 }
   0x7   : > { %s66_s21 = ssub.s32 %s745_s18, %s879_s20  ;;  %193 = sbr.rel (%p621_p5) target bundleno = 32 (0x20), region = 20 }
   0x8   : > { %p68_p4 = scmp.eq.s32.totalorder %s66_s21, 0 }
   0xa   : > { %s811_s23 = scalar_select %p68_p4, %s737_s16, %s70_s22  }
   0xc   : > { %196 = sbr.rel (!%p79_p3) target bundleno = 32 (0x20), region = 24  ;;  %s198_s24 = sand.u32 (%p79_p3), 1, %s737_s16  }
   0xd   : > { %s623_s25 = sshll.u32 (%p79_p3), %s745_s18, 2  ;;  %s622_s26 = sshll.u32 (%p79_p3), %s198_s24, 6 }
   0xe   : > { %s819_s29 = scalar_lea.vmem (%p79_p3), %s870_s1, %s623_s25  ;;  %s200_s30 = scalar_lea.vmem (%p79_p3), [#allocation3], %s622_s26 }
   0xf   : > { %v222_v0 = vld [vmem:[%s819_s29] sm:$0xf] (%p79_p3)  ;;  %v224_v1 = vld [vmem:[%s819_s29 + $0x8] sm:$0xf] (%p79_p3)  ;;  %v226_v2 = vld [vmem:[%s819_s29 + $0x10] sm:$0xf] (%p79_p3) }
  0x10   : > { %223 = vst [vmem:[%s200_s30] sm:$0xf] (%p79_p3), %v222_v0  ;;  %v228_v3 = vld [vmem:[%s819_s29 + $0x18] sm:$0xf] (%p79_p3)  ;;  %v230_v4 = vld [vmem:[%s819_s29 + $0x20] sm:$0xf] (%p79_p3) }
  0x11   : > { %225 = vst [vmem:[%s200_s30 + $0x4] sm:$0xf] %v224_v1  ;;  %v232_v5 = vld [vmem:[%s819_s29 + $0x28] sm:$0xf]  ;;  %v234_v6 = vld [vmem:[%s819_s29 + $0x30] sm:$0xf] }
  0x12   : > { %227 = vst [vmem:[%s200_s30 + $0x8] sm:$0xf] %v226_v2  ;;  %v236_v7 = vld [vmem:[%s819_s29 + $0x38] sm:$0xf]  ;;  %v238_v8 = vld [vmem:[%s819_s29 + $0x40] sm:$0xf] }
  0x13   : > { %229 = vst [vmem:[%s200_s30 + $0xc] sm:$0xf] %v228_v3  ;;  %v240_v9 = vld [vmem:[%s819_s29 + $0x48] sm:$0xf]  ;;  %v242_v10 = vld [vmem:[%s819_s29 + $0x50] sm:$0xf] }
  0x14   : > { %231 = vst [vmem:[%s200_s30 + $0x10] sm:$0xf] %v230_v4  ;;  %v244_v11 = vld [vmem:[%s819_s29 + $0x58] sm:$0xf]  ;;  %v246_v12 = vld [vmem:[%s819_s29 + $0x60] sm:$0xf] }
  0x15   : > { %233 = vst [vmem:[%s200_s30 + $0x14] sm:$0xf] %v232_v5  ;;  %v248_v13 = vld [vmem:[%s819_s29 + $0x68] sm:$0xf]  ;;  %v250_v14 = vld [vmem:[%s819_s29 + $0x70] sm:$0xf] }
  0x16   : > { %235 = vst [vmem:[%s200_s30 + $0x18] sm:$0xf] %v234_v6  ;;  %v252_v15 = vld [vmem:[%s819_s29 + $0x78] sm:$0xf] }
  0x17   : > { %237 = vst [vmem:[%s200_s30 + $0x1c] sm:$0xf] %v236_v7 }
  0x18   : > { %239 = vst [vmem:[%s200_s30 + $0x20] sm:$0xf] %v238_v8 }
  0x19   : > { %241 = vst [vmem:[%s200_s30 + $0x24] sm:$0xf] %v240_v9 }
  0x1a   : > { %243 = vst [vmem:[%s200_s30 + $0x28] sm:$0xf] %v242_v10 }
  0x1b   : > { %245 = vst [vmem:[%s200_s30 + $0x2c] sm:$0xf] %v244_v11 }
  0x1c   : > { %247 = vst [vmem:[%s200_s30 + $0x30] sm:$0xf] %v246_v12 }
  0x1d   : > { %249 = vst [vmem:[%s200_s30 + $0x34] sm:$0xf] %v248_v13 }
  0x1e   : > { %251 = vst [vmem:[%s200_s30 + $0x38] sm:$0xf] %v250_v14 }
  0x1f   : > { %253 = vst [vmem:[%s200_s30 + $0x3c] sm:$0xf] %v252_v15 }
  0x20 PF: > { %p624_p6 = scmp.ge.s32.totalorder %s749_s19, 1  ;;  %p320_p7 = scmp.lt.s32.totalorder %s749_s19, 3 }
  0x22   : > { %p321_p8 = pnand %p624_p6, %p320_p7 }
  0x23   : > { %s327_s5 = sand.u32 (!%p321_p8), 1, %s733_s15   ;;  %p376_p9 = scmp.lt.s32.totalorder (!%p321_p8), %s741_s17, 1 }
  0x24   : > { %324 = sbr.rel (%p321_p8) target bundleno = 207 (0xcf), region = 73  ;;  %s625_s6 = sshll.u32 (!%p321_p8), %s327_s5, 6 }
  0x25   : > { %s329_s7 = scalar_lea.vmem (!%p321_p8), [#allocation3], %s625_s6 }
  0x29   : > { %v668_v16 = vld [vmem:[%s329_s7 + $0x38] sm:$0xff]  ;;  %s881_s17 = smov (!%p376_p9, %s741_s17), 1  ;;  %v667_v17 = vld [vmem:[%s329_s7 + $0x30] sm:$0xff]  ;;  %v666_v18 = vld [vmem:[%s329_s7 + $0x28] sm:$0xff] }
  0x2a   : > { %461 = vmatpush.bf16.msra.mxu0 %v668_v16  ;;  %s378_s10 = scalar_lea.vmem %s871_s2, %s881_s17  ;;  %s381_s13 = scalar_lea.vmem %s872_s3, %s881_s17  ;;  %v665_v19 = vld [vmem:[%s329_s7 + $0x20] sm:$0xff]  ;;  %v664_v20 = vld [vmem:[%s329_s7 + $0x18] sm:$0xff]  ;;  %v663_v21 = vld [vmem:[%s329_s7 + $0x10] sm:$0xff] }
  0x2b   : > { %v662_v22 = vld [vmem:[%s329_s7 + $0x8] sm:$0xff]  ;;  %v661_v23 = vld [vmem:[%s329_s7] sm:$0xff]  ;;  %s626_s21 = sshll.u32 %s881_s17, 2 }
  0x2c   : > { %v396_v24 = vld [vmem:[%s869_s0] sm:$0xf]  ;;  %s389_s25 = scalar_lea.vmem %s873_s4, %s626_s21 }
  0x2d   : > { %v709_v25 = vld [vmem:[%s378_s10] ss:$0 sm:$0xff] }
  0x2e   : > { %462 = vmatpush.bf16.msra.mxu0 %v667_v17  ;;  %v710_v26 = vld [vmem:[%s381_s13] ss:$0 sm:$0xff] }
  0x32   : > { %463 = vmatpush.bf16.msra.mxu0 %v666_v18 }
  0x36   : > { %464 = vmatpush.bf16.msra.mxu0 %v665_v19 }
  0x3a   : > { %465 = vmatpush.bf16.msra.mxu0 %v664_v20 }
  0x3e   : > { %466 = vmatpush.bf16.msra.mxu0 %v663_v21 }
  0x42   : > { %467 = vmatpush.bf16.msra.mxu0 %v662_v22 }
  0x46   : > { %468 = vmatpush.bf16.msra.mxu0 %v661_v23 }
  0x49   : > { %469 = vmatmul.bf16.vlgmr.msra.gmra.mxu0 %v396_v24 }
  0xc6   : > { %v470_v27 = vpop.f32.mrf.mxu0 }
  0xc7   : > { %v484_v28 = vmul.f32 %v709_v25, %v470_v27 }
  0xc9   : > { %v489_v29 = vadd.f32 %v710_v26, %v484_v28 }
  0xcb   : > { %v490_v30 = vpack.c.bf16 %v489_v29, %v489_v29 }
  0xcd   : > { %491 = vst [vmem:[%s389_s25] sm:$0xf] %v490_v30 }
  0xce   : > { %v472_v31 = vpop.f32.mrf.mxu0 }
  0xcf PF: > { %s14_s19 = sadd.s32 1, %s749_s19   ;;  %s874_s15 = smov %s737_s16 }
  0xd0   : > { %p11_p10 = scmp.ge.s32.totalorder %s14_s19, 4   ;;  %s875_s16 = smov %s811_s23 }
  0xd1   : > { %s876_s17 = smov %s745_s18  ;;  %s877_s18 = smov %s879_s20 }
  0xd2   :  { %13 = sbr.rel (!%p11_p10) target bundleno = 3 (0x3), region = 129 }

// kernel: resnet34_forward.58
= control target key start
LH: loop header
LB: loop body
LE: loop exit
PB: predicated region body
PF: predicated region fallthrough
CT: control target
= control target key end

     0   :  { %s1315_s0 = inlined_call_operand.vmem [shape: bf16[8,2304], index: 0, kind: input, shape index: {}]   ;;  %s1316_s1 = inlined_call_operand.vmem [shape: bf16[2304,256], index: 1, kind: input, shape index: {}]   ;;  %s1317_s2 = inlined_call_operand.vmem [shape: f32[1,256], index: 2, kind: input, shape index: {}]   ;;  %s1318_s3 = inlined_call_operand.vmem [shape: f32[1,256], index: 3, kind: input, shape index: {}]   ;;  %s1319_s4 = inlined_call_operand.vmem [shape: bf16[8,256], index: 4, kind: input, shape index: {}]   ;;  %s1320_s5 = inlined_call_operand.vmem [shape: bf16[8,256], index: 5, kind: output, shape index: {}]  }
   0x1   :  { %1321 = sst [smem:[#allocation4_spill]] %s1316_s1 }
   0x2   :  { %s1101_s18 = smov 0   ;;  %s1103_s19 = smov 0  }
   0x3   :  { %s1105_s20 = smov 0   ;;  %s1107_s21 = smov 0  }
   0x4   :  { %s1109_s22 = smov 0   ;;  %s1111_s23 = smov 0  }
   0x5   :  { %s1113_s24 = smov 0  }
   0x6 LB: > { %s27_s25 = sadd.s32 1, %s1060_s22  ;;  %s30_s26 = sadd.s32 1, %s1064_s23  ;;  %s1068_s24 = sphi %s1113_s24, %s15_s24   ;;  %s1064_s23 = sphi %s1111_s23, %s1328_s23   ;;  %s1060_s22 = sphi %s1109_s22, %s1327_s22   ;;  %s1056_s21 = sphi %s1107_s21, %s1326_s21   ;;  %s1052_s20 = sphi %s1105_s20, %s1325_s20   ;;  %s1048_s19 = sphi %s1103_s19, %s1324_s19   ;;  %s1044_s18 = sphi %s1101_s18, %s1323_s18  }
   0x7   : > { %p28_p0 = scmp.ge.s32.totalorder %s27_s25, 9  ;;  %p78_p1 = scmp.ne.s32.totalorder %s1048_s19, %s1044_s18 }
   0x8   : > { %p79_p2 = scmp.eq.s32.totalorder %s1068_s24, 0  ;;  %s71_s30 = sadd.s32 1, %s1048_s19 }
   0x9   : > { %s1330_s25 = smov (%p28_p0, %s27_s25), 0  ;;  %s1332_s26 = smov (!%p28_p0, %s30_s26), %s1064_s23 }
   0xa   : > { %p80_p3 = por %p79_p2, %p78_p1  ;;  %p32_p4 = scmp.ge.s32.totalorder %s1332_s26, 2 }
   0xb   : > { %s66_s27 = ssub.s32 %s1060_s22, %s1330_s25  ;;  %p859_p6 = scmp.ge.s32.totalorder %s1068_s24, 18 }
   0xc   : > { %s1334_s26 = smov (%p32_p4, %s1332_s26), 0 }
   0xd   : > { %s67_s28 = ssub.s32 %s1064_s23, %s1334_s26  ;;  %212 = sbr.rel (%p859_p6) target bundleno = 60 (0x3c), region = 16 }
   0xe   : > { %s68_s29 = sor.u32 %s67_s28, %s66_s27 }
   0xf   : > { %p69_p5 = scmp.eq.s32.totalorder %s68_s29, 0 }
  0x11   : > { %s1152_s6 = scalar_select %p69_p5, %s1048_s19, %s71_s30  }
  0x12   : > { %228 = sbr.rel (!%p80_p3) target bundleno = 60 (0x3c), region = 24  ;;  %s230_s7 = sand.u32 (%p80_p3), 1, %s1048_s19  }
  0x13   : > { %s938_s8 = sshll.u32 (%p80_p3), %s1060_s22, 6  ;;  %s860_s9 = sshll.u32 (%p80_p3), %s230_s7, 7 }
  0x14   : > { %s235_s10 = sadd.s32 (%p80_p3), %s1064_s23, %s938_s8  ;;  %s1322_s1 = sld [smem:[#allocation4_spill]] (%p80_p3) }
  0x15   : > { %s863_s11 = sshll.u32 (%p80_p3), %s235_s10, 2  ;;  %s1166_s15 = scalar_lea.vmem (%p80_p3), [#allocation3], %s860_s9 }
  0x1a   : > { %s1161_s14 = scalar_lea.vmem %s1322_s1, %s863_s11 }
  0x1b   : > { %v254_v0 = vld [vmem:[%s1161_s14] sm:$0xf]  ;;  %v256_v1 = vld [vmem:[%s1161_s14 + $0x8] sm:$0xf]  ;;  %v258_v2 = vld [vmem:[%s1161_s14 + $0x10] sm:$0xf] }
  0x1c   : > { %255 = vst [vmem:[%s1166_s15] sm:$0xf] %v254_v0  ;;  %v260_v3 = vld [vmem:[%s1161_s14 + $0x18] sm:$0xf]  ;;  %v262_v4 = vld [vmem:[%s1161_s14 + $0x20] sm:$0xf] }
  0x1d   : > { %257 = vst [vmem:[%s1166_s15 + $0x4] sm:$0xf] %v256_v1  ;;  %v264_v5 = vld [vmem:[%s1161_s14 + $0x28] sm:$0xf]  ;;  %v266_v6 = vld [vmem:[%s1161_s14 + $0x30] sm:$0xf] }
  0x1e   : > { %259 = vst [vmem:[%s1166_s15 + $0x8] sm:$0xf] %v258_v2  ;;  %v268_v7 = vld [vmem:[%s1161_s14 + $0x38] sm:$0xf]  ;;  %v270_v8 = vld [vmem:[%s1161_s14 + $0x40] sm:$0xf] }
  0x1f   : > { %261 = vst [vmem:[%s1166_s15 + $0xc] sm:$0xf] %v260_v3  ;;  %v272_v9 = vld [vmem:[%s1161_s14 + $0x48] sm:$0xf]  ;;  %v274_v10 = vld [vmem:[%s1161_s14 + $0x50] sm:$0xf] }
  0x20   : > { %263 = vst [vmem:[%s1166_s15 + $0x10] sm:$0xf] %v262_v4  ;;  %v276_v11 = vld [vmem:[%s1161_s14 + $0x58] sm:$0xf]  ;;  %v278_v12 = vld [vmem:[%s1161_s14 + $0x60] sm:$0xf] }
  0x21   : > { %265 = vst [vmem:[%s1166_s15 + $0x14] sm:$0xf] %v264_v5  ;;  %v280_v13 = vld [vmem:[%s1161_s14 + $0x68] sm:$0xf]  ;;  %v282_v14 = vld [vmem:[%s1161_s14 + $0x70] sm:$0xf] }
  0x22   : > { %267 = vst [vmem:[%s1166_s15 + $0x18] sm:$0xf] %v266_v6  ;;  %v284_v15 = vld [vmem:[%s1161_s14 + $0x78] sm:$0xf]  ;;  %v286_v16 = vld [vmem:[%s1161_s14 + $0x80] sm:$0xf] }
  0x23   : > { %269 = vst [vmem:[%s1166_s15 + $0x1c] sm:$0xf] %v268_v7  ;;  %v288_v17 = vld [vmem:[%s1161_s14 + $0x88] sm:$0xf]  ;;  %v290_v18 = vld [vmem:[%s1161_s14 + $0x90] sm:$0xf] }
  0x24   : > { %271 = vst [vmem:[%s1166_s15 + $0x20] sm:$0xf] %v270_v8  ;;  %v292_v19 = vld [vmem:[%s1161_s14 + $0x98] sm:$0xf]  ;;  %v294_v20 = vld [vmem:[%s1161_s14 + $0xa0] sm:$0xf] }
  0x25   : > { %273 = vst [vmem:[%s1166_s15 + $0x24] sm:$0xf] %v272_v9  ;;  %v296_v21 = vld [vmem:[%s1161_s14 + $0xa8] sm:$0xf]  ;;  %v298_v22 = vld [vmem:[%s1161_s14 + $0xb0] sm:$0xf] }
  0x26   : > { %275 = vst [vmem:[%s1166_s15 + $0x28] sm:$0xf] %v274_v10  ;;  %v300_v23 = vld [vmem:[%s1161_s14 + $0xb8] sm:$0xf]  ;;  %v302_v24 = vld [vmem:[%s1161_s14 + $0xc0] sm:$0xf] }
  0x27   : > { %277 = vst [vmem:[%s1166_s15 + $0x2c] sm:$0xf] %v276_v11  ;;  %v304_v25 = vld [vmem:[%s1161_s14 + $0xc8] sm:$0xf]  ;;  %v306_v26 = vld [vmem:[%s1161_s14 + $0xd0] sm:$0xf] }
  0x28   : > { %279 = vst [vmem:[%s1166_s15 + $0x30] sm:$0xf] %v278_v12  ;;  %v308_v27 = vld [vmem:[%s1161_s14 + $0xd8] sm:$0xf]  ;;  %v310_v28 = vld [vmem:[%s1161_s14 + $0xe0] sm:$0xf] }
  0x29   : > { %281 = vst [vmem:[%s1166_s15 + $0x34] sm:$0xf] %v280_v13  ;;  %v312_v29 = vld [vmem:[%s1161_s14 + $0xe8] sm:$0xf]  ;;  %v314_v30 = vld [vmem:[%s1161_s14 + $0xf0] sm:$0xf] }
  0x2a   : > { %283 = vst [vmem:[%s1166_s15 + $0x38] sm:$0xf] %v282_v14  ;;  %v316_v31 = vld [vmem:[%s1161_s14 + $0xf8] sm:$0xf] }
  0x2b   : > { %285 = vst [vmem:[%s1166_s15 + $0x3c] sm:$0xf] %v284_v15 }
  0x2c   : > { %287 = vst [vmem:[%s1166_s15 + $0x40] sm:$0xf] %v286_v16 }
  0x2d   : > { %289 = vst [vmem:[%s1166_s15 + $0x44] sm:$0xf] %v288_v17 }
  0x2e   : > { %291 = vst [vmem:[%s1166_s15 + $0x48] sm:$0xf] %v290_v18 }
  0x2f   : > { %293 = vst [vmem:[%s1166_s15 + $0x4c] sm:$0xf] %v292_v19 }
  0x30   : > { %295 = vst [vmem:[%s1166_s15 + $0x50] sm:$0xf] %v294_v20 }
  0x31   : > { %297 = vst [vmem:[%s1166_s15 + $0x54] sm:$0xf] %v296_v21 }
  0x32   : > { %299 = vst [vmem:[%s1166_s15 + $0x58] sm:$0xf] %v298_v22 }
  0x33   : > { %301 = vst [vmem:[%s1166_s15 + $0x5c] sm:$0xf] %v300_v23 }
  0x34   : > { %303 = vst [vmem:[%s1166_s15 + $0x60] sm:$0xf] %v302_v24 }
  0x35   : > { %305 = vst [vmem:[%s1166_s15 + $0x64] sm:$0xf] %v304_v25 }
  0x36   : > { %307 = vst [vmem:[%s1166_s15 + $0x68] sm:$0xf] %v306_v26 }
  0x37   : > { %309 = vst [vmem:[%s1166_s15 + $0x6c] sm:$0xf] %v308_v27 }
  0x38   : > { %311 = vst [vmem:[%s1166_s15 + $0x70] sm:$0xf] %v310_v28 }
  0x39   : > { %313 = vst [vmem:[%s1166_s15 + $0x74] sm:$0xf] %v312_v29 }
  0x3a   : > { %315 = vst [vmem:[%s1166_s15 + $0x78] sm:$0xf] %v314_v30 }
  0x3b   : > { %317 = vst [vmem:[%s1166_s15 + $0x7c] sm:$0xf] %v316_v31 }
  0x3c PF: > { %p864_p7 = scmp.ge.s32.totalorder %s1068_s24, 1  ;;  %p427_p8 = scmp.lt.s32.totalorder %s1068_s24, 19 }
  0x3e   : > { %p428_p9 = pnand %p864_p7, %p427_p8 }
  0x3f   : > { %s434_s16 = sand.u32 (!%p428_p9), 1, %s1044_s18   ;;  %s866_s17 = sshll.u32 (!%p428_p9), %s1052_s20, 1 }
  0x40   : > { %431 = sbr.rel (%p428_p9) target bundleno = 263 (0x107), region = 77  ;;  %s865_s27 = sshll.u32 (!%p428_p9), %s434_s16, 7 }
  0x41   : > { %p490_p10 = scmp.lt.s32.totalorder (!%p428_p9), %s866_s17, 17  ;;  %p498_p11 = scmp.lt.s32.totalorder (!%p428_p9), %s1056_s21, 1 }
  0x42   : > { %p870_p12 = scmp.ne.s32.totalorder (!%p428_p9), %s1052_s20, 0 }
  0x45   : > { %s1336_s17 = smov (!%p490_p10, %s866_s17), 17  ;;  %s1338_s21 = smov (!%p498_p11, %s1056_s21), 1 }
  0x46   : > { %s867_s28 = sshll.u32 %s1336_s17, 2  ;;  %s500_s18 = scalar_lea.vmem %s1317_s2, %s1338_s21 }
  0x47   : > { %s1240_s7 = scalar_lea.vmem %s1315_s0, %s867_s28  ;;  %s503_s12 = scalar_lea.vmem %s1318_s3, %s1338_s21 }
  0x48   : > { %s868_s13 = sshll.u32 %s1338_s21, 2  ;;  %s1261_s28 = scalar_lea.vmem [#allocation3], %s865_s27 }
  0x49   : > { %s1254_s16 = scalar_lea.vmem %s1319_s4, %s868_s13  ;;  %s1259_s29 = scalar_lea.vmem %s1320_s5, %s868_s13 }
  0x4a   : > { %523 = sbr.rel (%p870_p12) target bundleno = 81 (0x51), region = 85 }
  0x4f   : > { %v1070_v32 = vmov 0.0  }
  0x50   : > { %524 = vst [vmem:[#allocation2] sm:$0xff] %v1070_v32 }
  0x51 PF: > { %v946_v33 = vld [vmem:[%s1261_s28 + $0x38] sm:$0xff]  ;;  %v945_v35 = vld [vmem:[%s1261_s28 + $0x30] sm:$0xff]  ;;  %v944_v37 = vld [vmem:[%s1261_s28 + $0x28] sm:$0xff]  ;;  %p935_p13 = scmp.ne.s32.totalorder %s1052_s20, 8 }
  0x52   : > { %v954_v34 = vld [vmem:[%s1261_s28 + $0x78] sm:$0xff]  ;;  %662 = vmatpush.bf16.msra.mxu0 %v946_v33  ;;  %v953_v36 = vld [vmem:[%s1261_s28 + $0x70] sm:$0xff]  ;;  %v952_v38 = vld [vmem:[%s1261_s28 + $0x68] sm:$0xff] }
  0x53   : > { %675 = vmatpush.bf16.msra.mxu1 %v954_v34  ;;  %v943_v39 = vld [vmem:[%s1261_s28 + $0x20] sm:$0xff]  ;;  %v942_v41 = vld [vmem:[%s1261_s28 + $0x18] sm:$0xff]  ;;  %v941_v43 = vld [vmem:[%s1261_s28 + $0x10] sm:$0xff] }
  0x54   : > { %v951_v40 = vld [vmem:[%s1261_s28 + $0x60] sm:$0xff]  ;;  %v950_v42 = vld [vmem:[%s1261_s28 + $0x58] sm:$0xff]  ;;  %v949_v44 = vld [vmem:[%s1261_s28 + $0x50] sm:$0xff] }
  0x55   : > { %v940_v45 = vld [vmem:[%s1261_s28 + $0x8] sm:$0xff]  ;;  %v526_v47 = vld [vmem:[%s1240_s7] sm:$0xff]  ;;  %v939_v50 = vld [vmem:[%s1261_s28] sm:$0xff] }
  0x56   : > { %663 = vmatpush.bf16.msra.mxu0 %v945_v35  ;;  %v948_v46 = vld [vmem:[%s1261_s28 + $0x48] sm:$0xff]  ;;  %v560_v48 = vunpack.c.l.b16 %v526_v47  ;;  %v561_v49 = vunpack.c.h.b16 %v526_v47  ;;  %v947_v51 = vld [vmem:[%s1261_s28 + $0x40] sm:$0xff] }
  0x57   : > { %676 = vmatpush.bf16.msra.mxu1 %v953_v36  ;;  %v525_v55 = vld [vmem:[#allocation2] sm:$0xff] }
  0x58   : > { %v562_v52 = vpack.c.b16 %v560_v48, %v560_v48  ;;  %v563_v53 = vpack.c.b16 %v561_v49, %v561_v49 }
  0x5a   : > { %664 = vmatpush.bf16.msra.mxu0 %v944_v37 }
  0x5b   : > { %677 = vmatpush.bf16.msra.mxu1 %v952_v38 }
  0x5e   : > { %665 = vmatpush.bf16.msra.mxu0 %v943_v39 }
  0x5f   : > { %678 = vmatpush.bf16.msra.mxu1 %v951_v40 }
  0x62   : > { %666 = vmatpush.bf16.msra.mxu0 %v942_v41 }
  0x63   : > { %679 = vmatpush.bf16.msra.mxu1 %v950_v42 }
  0x66   : > { %667 = vmatpush.bf16.msra.mxu0 %v941_v43 }
  0x67   : > { %680 = vmatpush.bf16.msra.mxu1 %v949_v44 }
  0x6a   : > { %668 = vmatpush.bf16.msra.mxu0 %v940_v45 }
  0x6b   : > { %681 = vmatpush.bf16.msra.mxu1 %v948_v46 }
  0x6e   : > { %669 = vmatpush.bf16.msra.mxu0 %v939_v50 }
  0x6f   : > { %682 = vmatpush.bf16.msra.mxu1 %v947_v51 }
  0x71   : > { %670 = vmatmul.bf16.vlgmr.msra.gmra.mxu0 %v562_v52 }
  0x72   : > { %683 = vmatmul.bf16.vlgmr.msra.gmra.mxu1 %v563_v53 }
  0xee   : > { %v671_v54 = vpop.f32.mrf.mxu0 }
  0xef   : > { %v684_v56 = vpop.f32.mrf.mxu1 }
  0xf0   : > { %v685_v57 = vadd.f32 %v684_v56, %v671_v54 }
  0xf2   : > { %v688_v58 = vadd.f32 %v685_v57, %v525_v55 }
  0xf3   : > { %693 = sbr.rel (%p935_p13) target bundleno = 263 (0x107), region = 89 }
  0xf4   : > { %689 = vst [vmem:[#allocation2] sm:$0xff] %v688_v58 }
  0xf6   : > { %v673_v59 = vpop.f32.mrf.mxu0 }
  0xf7   : > { %v686_v60 = vpop.f32.mrf.mxu1 }
  0xf8   : > { %v1012_v62 = vld [vmem:[%s500_s18] ss:$0 sm:$0xff] }
  0xf9   : > { %v1013_v63 = vld [vmem:[%s503_s12] ss:$0 sm:$0xff] }
  0xfa   : > { %v705_v0 = vld [vmem:[%s1254_s16] sm:$0xf] }
  0xfb   : > { %v694_v61 = vld [vmem:[#allocation2] sm:$0xff]  ;;  %v706_v2 = vunpack.c.l.bf16 %v705_v0 }
  0xfc   : > { %v699_v1 = vmul.f32 %v1012_v62, %v694_v61 }
  0xfe   : > { %v704_v3 = vadd.f32 %v1013_v63, %v699_v1 }
 0x100   : > { %v707_v4 = vadd.f32 %v706_v2, %v704_v3 }
 0x102   : > { %v708_v5 = vmax.f32 %v707_v4, 0.0 }
 0x104   : > { %v709_v6 = vpack.c.bf16 %v708_v5, %v708_v5 }
 0x106   : > { %710 = vst [vmem:[%s1259_s29] sm:$0xf] %v709_v6 }
 0x107 PF: > { %s15_s24 = sadd.s32 1, %s1068_s24   ;;  %s1323_s18 = smov %s1048_s19 }
 0x108   : > { %p12_p0 = scmp.ge.s32.totalorder %s15_s24, 20   ;;  %s1324_s19 = smov %s1152_s6 }
 0x109   : > { %s1325_s20 = smov %s1060_s22  ;;  %s1326_s21 = smov %s1064_s23 }
 0x10a   : > { %s1327_s22 = smov %s1330_s25  ;;  %s1328_s23 = smov %s1334_s26 }
 0x10b   :  { %14 = sbr.rel (!%p12_p0) target bundleno = 6 (0x6), region = 136 }

// kernel: resnet34_forward.59
= control target key start
LH: loop header
LB: loop body
LE: loop exit
PB: predicated region body
PF: predicated region fallthrough
CT: control target
= control target key end

     0   :  { %s1016_s15 = smov 0   ;;  %s1018_s16 = smov 0   ;;  %s1224_s0 = inlined_call_operand.vmem [shape: bf16[8,2304], index: 0, kind: input, shape index: {}]   ;;  %s1225_s1 = inlined_call_operand.vmem [shape: bf16[2304,256], index: 1, kind: input, shape index: {}]   ;;  %s1226_s2 = inlined_call_operand.vmem [shape: f32[1,256], index: 2, kind: input, shape index: {}]   ;;  %s1227_s3 = inlined_call_operand.vmem [shape: f32[1,256], index: 3, kind: input, shape index: {}]   ;;  %s1228_s4 = inlined_call_operand.vmem [shape: bf16[8,256], index: 4, kind: output, shape index: {}]  }
   0x1   :  { %s1020_s17 = smov 0   ;;  %s1022_s18 = smov 0  }
   0x2   :  { %s1024_s19 = smov 0   ;;  %s1026_s20 = smov 0  }
   0x3   :  { %s1028_s21 = smov 0  }
   0x4 LB: > { %s26_s22 = sadd.s32 1, %s980_s19  ;;  %s29_s23 = sadd.s32 1, %s984_s20  ;;  %s988_s21 = sphi %s1028_s21, %s14_s21   ;;  %s984_s20 = sphi %s1026_s20, %s1234_s20   ;;  %s980_s19 = sphi %s1024_s19, %s1233_s19   ;;  %s976_s18 = sphi %s1022_s18, %s1232_s18   ;;  %s972_s17 = sphi %s1020_s17, %s1231_s17   ;;  %s968_s16 = sphi %s1018_s16, %s1230_s16   ;;  %s964_s15 = sphi %s1016_s15, %s1229_s15  }
   0x5   : > { %p27_p0 = scmp.ge.s32.totalorder %s26_s22, 9  ;;  %p77_p1 = scmp.ne.s32.totalorder %s968_s16, %s964_s15 }
   0x6   : > { %p78_p2 = scmp.eq.s32.totalorder %s988_s21, 0  ;;  %s70_s27 = sadd.s32 1, %s968_s16 }
   0x7   : > { %s1236_s22 = smov (%p27_p0, %s26_s22), 0  ;;  %s1238_s23 = smov (!%p27_p0, %s29_s23), %s984_s20 }
   0x8   : > { %p79_p3 = por %p78_p2, %p77_p1  ;;  %p31_p4 = scmp.ge.s32.totalorder %s1238_s23, 2 }
   0x9   : > { %s65_s24 = ssub.s32 %s980_s19, %s1236_s22  ;;  %p780_p6 = scmp.ge.s32.totalorder %s988_s21, 18 }
   0xa   : > { %s1240_s23 = smov (%p31_p4, %s1238_s23), 0 }
   0xb   : > { %s66_s25 = ssub.s32 %s984_s20, %s1240_s23  ;;  %183 = sbr.rel (%p780_p6) target bundleno = 54 (0x36), region = 16 }
   0xc   : > { %s67_s26 = sor.u32 %s66_s25, %s65_s24 }
   0xd   : > { %p68_p5 = scmp.eq.s32.totalorder %s67_s26, 0 }
   0xf   : > { %s1067_s28 = scalar_select %p68_p5, %s968_s16, %s70_s27  }
  0x10   : > { %199 = sbr.rel (!%p79_p3) target bundleno = 54 (0x36), region = 24  ;;  %s201_s29 = sand.u32 (%p79_p3), 1, %s968_s16  }
  0x11   : > { %s858_s30 = sshll.u32 (%p79_p3), %s980_s19, 6  ;;  %s781_s5 = sshll.u32 (%p79_p3), %s201_s29, 7 }
  0x12   : > { %s206_s6 = sadd.s32 (%p79_p3), %s984_s20, %s858_s30  ;;  %s1081_s11 = scalar_lea.vmem (%p79_p3), [#allocation3], %s781_s5 }
  0x13   : > { %s784_s7 = sshll.u32 (%p79_p3), %s206_s6, 2 }
  0x14   : > { %s1076_s10 = scalar_lea.vmem (%p79_p3), %s1225_s1, %s784_s7 }
  0x15   : > { %v225_v0 = vld [vmem:[%s1076_s10] sm:$0xf]  ;;  %v227_v1 = vld [vmem:[%s1076_s10 + $0x8] sm:$0xf]  ;;  %v229_v2 = vld [vmem:[%s1076_s10 + $0x10] sm:$0xf] }
  0x16   : > { %226 = vst [vmem:[%s1081_s11] sm:$0xf] %v225_v0  ;;  %v231_v3 = vld [vmem:[%s1076_s10 + $0x18] sm:$0xf]  ;;  %v233_v4 = vld [vmem:[%s1076_s10 + $0x20] sm:$0xf] }
  0x17   : > { %228 = vst [vmem:[%s1081_s11 + $0x4] sm:$0xf] %v227_v1  ;;  %v235_v5 = vld [vmem:[%s1076_s10 + $0x28] sm:$0xf]  ;;  %v237_v6 = vld [vmem:[%s1076_s10 + $0x30] sm:$0xf] }
  0x18   : > { %230 = vst [vmem:[%s1081_s11 + $0x8] sm:$0xf] %v229_v2  ;;  %v239_v7 = vld [vmem:[%s1076_s10 + $0x38] sm:$0xf]  ;;  %v241_v8 = vld [vmem:[%s1076_s10 + $0x40] sm:$0xf] }
  0x19   : > { %232 = vst [vmem:[%s1081_s11 + $0xc] sm:$0xf] %v231_v3  ;;  %v243_v9 = vld [vmem:[%s1076_s10 + $0x48] sm:$0xf]  ;;  %v245_v10 = vld [vmem:[%s1076_s10 + $0x50] sm:$0xf] }
  0x1a   : > { %234 = vst [vmem:[%s1081_s11 + $0x10] sm:$0xf] %v233_v4  ;;  %v247_v11 = vld [vmem:[%s1076_s10 + $0x58] sm:$0xf]  ;;  %v249_v12 = vld [vmem:[%s1076_s10 + $0x60] sm:$0xf] }
  0x1b   : > { %236 = vst [vmem:[%s1081_s11 + $0x14] sm:$0xf] %v235_v5  ;;  %v251_v13 = vld [vmem:[%s1076_s10 + $0x68] sm:$0xf]  ;;  %v253_v14 = vld [vmem:[%s1076_s10 + $0x70] sm:$0xf] }
  0x1c   : > { %238 = vst [vmem:[%s1081_s11 + $0x18] sm:$0xf] %v237_v6  ;;  %v255_v15 = vld [vmem:[%s1076_s10 + $0x78] sm:$0xf]  ;;  %v257_v16 = vld [vmem:[%s1076_s10 + $0x80] sm:$0xf] }
  0x1d   : > { %240 = vst [vmem:[%s1081_s11 + $0x1c] sm:$0xf] %v239_v7  ;;  %v259_v17 = vld [vmem:[%s1076_s10 + $0x88] sm:$0xf]  ;;  %v261_v18 = vld [vmem:[%s1076_s10 + $0x90] sm:$0xf] }
  0x1e   : > { %242 = vst [vmem:[%s1081_s11 + $0x20] sm:$0xf] %v241_v8  ;;  %v263_v19 = vld [vmem:[%s1076_s10 + $0x98] sm:$0xf]  ;;  %v265_v20 = vld [vmem:[%s1076_s10 + $0xa0] sm:$0xf] }
  0x1f   : > { %244 = vst [vmem:[%s1081_s11 + $0x24] sm:$0xf] %v243_v9  ;;  %v267_v21 = vld [vmem:[%s1076_s10 + $0xa8] sm:$0xf]  ;;  %v269_v22 = vld [vmem:[%s1076_s10 + $0xb0] sm:$0xf] }
  0x20   : > { %246 = vst [vmem:[%s1081_s11 + $0x28] sm:$0xf] %v245_v10  ;;  %v271_v23 = vld [vmem:[%s1076_s10 + $0xb8] sm:$0xf]  ;;  %v273_v24 = vld [vmem:[%s1076_s10 + $0xc0] sm:$0xf] }
  0x21   : > { %248 = vst [vmem:[%s1081_s11 + $0x2c] sm:$0xf] %v247_v11  ;;  %v275_v25 = vld [vmem:[%s1076_s10 + $0xc8] sm:$0xf]  ;;  %v277_v26 = vld [vmem:[%s1076_s10 + $0xd0] sm:$0xf] }
  0x22   : > { %250 = vst [vmem:[%s1081_s11 + $0x30] sm:$0xf] %v249_v12  ;;  %v279_v27 = vld [vmem:[%s1076_s10 + $0xd8] sm:$0xf]  ;;  %v281_v28 = vld [vmem:[%s1076_s10 + $0xe0] sm:$0xf] }
  0x23   : > { %252 = vst [vmem:[%s1081_s11 + $0x34] sm:$0xf] %v251_v13  ;;  %v283_v29 = vld [vmem:[%s1076_s10 + $0xe8] sm:$0xf]  ;;  %v285_v30 = vld [vmem:[%s1076_s10 + $0xf0] sm:$0xf] }
  0x24   : > { %254 = vst [vmem:[%s1081_s11 + $0x38] sm:$0xf] %v253_v14  ;;  %v287_v31 = vld [vmem:[%s1076_s10 + $0xf8] sm:$0xf] }
  0x25   : > { %256 = vst [vmem:[%s1081_s11 + $0x3c] sm:$0xf] %v255_v15 }
  0x26   : > { %258 = vst [vmem:[%s1081_s11 + $0x40] sm:$0xf] %v257_v16 }
  0x27   : > { %260 = vst [vmem:[%s1081_s11 + $0x44] sm:$0xf] %v259_v17 }
  0x28   : > { %262 = vst [vmem:[%s1081_s11 + $0x48] sm:$0xf] %v261_v18 }
  0x29   : > { %264 = vst [vmem:[%s1081_s11 + $0x4c] sm:$0xf] %v263_v19 }
  0x2a   : > { %266 = vst [vmem:[%s1081_s11 + $0x50] sm:$0xf] %v265_v20 }
  0x2b   : > { %268 = vst [vmem:[%s1081_s11 + $0x54] sm:$0xf] %v267_v21 }
  0x2c   : > { %270 = vst [vmem:[%s1081_s11 + $0x58] sm:$0xf] %v269_v22 }
  0x2d   : > { %272 = vst [vmem:[%s1081_s11 + $0x5c] sm:$0xf] %v271_v23 }
  0x2e   : > { %274 = vst [vmem:[%s1081_s11 + $0x60] sm:$0xf] %v273_v24 }
  0x2f   : > { %276 = vst [vmem:[%s1081_s11 + $0x64] sm:$0xf] %v275_v25 }
  0x30   : > { %278 = vst [vmem:[%s1081_s11 + $0x68] sm:$0xf] %v277_v26 }
  0x31   : > { %280 = vst [vmem:[%s1081_s11 + $0x6c] sm:$0xf] %v279_v27 }
  0x32   : > { %282 = vst [vmem:[%s1081_s11 + $0x70] sm:$0xf] %v281_v28 }
  0x33   : > { %284 = vst [vmem:[%s1081_s11 + $0x74] sm:$0xf] %v283_v29 }
  0x34   : > { %286 = vst [vmem:[%s1081_s11 + $0x78] sm:$0xf] %v285_v30 }
  0x35   : > { %288 = vst [vmem:[%s1081_s11 + $0x7c] sm:$0xf] %v287_v31 }
  0x36 PF: > { %p785_p7 = scmp.ge.s32.totalorder %s988_s21, 1  ;;  %p387_p8 = scmp.lt.s32.totalorder %s988_s21, 19 }
  0x38   : > { %p388_p9 = pnand %p785_p7, %p387_p8 }
  0x39   : > { %s394_s12 = sand.u32 (!%p388_p9), 1, %s964_s15   ;;  %s787_s13 = sshll.u32 (!%p388_p9), %s972_s17, 1 }
  0x3a   : > { %391 = sbr.rel (%p388_p9) target bundleno = 253 (0xfd), region = 73  ;;  %s786_s14 = sshll.u32 (!%p388_p9), %s394_s12, 7 }
  0x3b   : > { %p440_p10 = scmp.lt.s32.totalorder (!%p388_p9), %s787_s13, 17  ;;  %p448_p11 = scmp.lt.s32.totalorder (!%p388_p9), %s976_s18, 1 }
  0x3c   : > { %s1171_s12 = scalar_lea.vmem (!%p388_p9), [#allocation3], %s786_s14  ;;  %p790_p12 = scmp.ne.s32.totalorder (!%p388_p9), %s972_s17, 0 }
  0x3f   : > { %s1242_s13 = smov (!%p440_p10, %s787_s13), 17  ;;  %s1244_s18 = smov (!%p448_p11, %s976_s18), 1 }
  0x40   : > { %s788_s24 = sshll.u32 %s1242_s13, 2  ;;  %s450_s15 = scalar_lea.vmem %s1226_s2, %s1244_s18 }
  0x41   : > { %s1155_s27 = scalar_lea.vmem %s1224_s0, %s788_s24  ;;  %s453_s7 = scalar_lea.vmem %s1227_s3, %s1244_s18 }
  0x42   : > { %s789_s8 = sshll.u32 %s1244_s18, 2  ;;  %465 = sbr.rel (%p790_p12) target bundleno = 73 (0x49), region = 81 }
  0x43   : > { %s1169_s11 = scalar_lea.vmem %s1228_s4, %s789_s8 }
  0x47   : > { %v990_v32 = vmov 0.0  }
  0x48   : > { %466 = vst [vmem:[#allocation2] sm:$0xff] %v990_v32 }
  0x49 PF: > { %v866_v33 = vld [vmem:[%s1171_s12 + $0x38] sm:$0xff]  ;;  %v865_v35 = vld [vmem:[%s1171_s12 + $0x30] sm:$0xff]  ;;  %v864_v37 = vld [vmem:[%s1171_s12 + $0x28] sm:$0xff]  ;;  %p855_p13 = scmp.ne.s32.totalorder %s972_s17, 8 }
  0x4a   : > { %v874_v34 = vld [vmem:[%s1171_s12 + $0x78] sm:$0xff]  ;;  %604 = vmatpush.bf16.msra.mxu0 %v866_v33  ;;  %v873_v36 = vld [vmem:[%s1171_s12 + $0x70] sm:$0xff]  ;;  %v872_v38 = vld [vmem:[%s1171_s12 + $0x68] sm:$0xff] }
  0x4b   : > { %617 = vmatpush.bf16.msra.mxu1 %v874_v34  ;;  %v863_v39 = vld [vmem:[%s1171_s12 + $0x20] sm:$0xff]  ;;  %v862_v41 = vld [vmem:[%s1171_s12 + $0x18] sm:$0xff]  ;;  %v861_v43 = vld [vmem:[%s1171_s12 + $0x10] sm:$0xff] }
  0x4c   : > { %v871_v40 = vld [vmem:[%s1171_s12 + $0x60] sm:$0xff]  ;;  %v870_v42 = vld [vmem:[%s1171_s12 + $0x58] sm:$0xff]  ;;  %v869_v44 = vld [vmem:[%s1171_s12 + $0x50] sm:$0xff] }
  0x4d   : > { %v860_v45 = vld [vmem:[%s1171_s12 + $0x8] sm:$0xff]  ;;  %v468_v47 = vld [vmem:[%s1155_s27] sm:$0xff]  ;;  %v859_v50 = vld [vmem:[%s1171_s12] sm:$0xff] }
  0x4e   : > { %605 = vmatpush.bf16.msra.mxu0 %v865_v35  ;;  %v868_v46 = vld [vmem:[%s1171_s12 + $0x48] sm:$0xff]  ;;  %v502_v48 = vunpack.c.l.b16 %v468_v47  ;;  %v503_v49 = vunpack.c.h.b16 %v468_v47  ;;  %v867_v51 = vld [vmem:[%s1171_s12 + $0x40] sm:$0xff] }
  0x4f   : > { %618 = vmatpush.bf16.msra.mxu1 %v873_v36  ;;  %v467_v55 = vld [vmem:[#allocation2] sm:$0xff] }
  0x50   : > { %v504_v52 = vpack.c.b16 %v502_v48, %v502_v48  ;;  %v505_v53 = vpack.c.b16 %v503_v49, %v503_v49 }
  0x52   : > { %606 = vmatpush.bf16.msra.mxu0 %v864_v37 }
  0x53   : > { %619 = vmatpush.bf16.msra.mxu1 %v872_v38 }
  0x56   : > { %607 = vmatpush.bf16.msra.mxu0 %v863_v39 }
  0x57   : > { %620 = vmatpush.bf16.msra.mxu1 %v871_v40 }
  0x5a   : > { %608 = vmatpush.bf16.msra.mxu0 %v862_v41 }
  0x5b   : > { %621 = vmatpush.bf16.msra.mxu1 %v870_v42 }
  0x5e   : > { %609 = vmatpush.bf16.msra.mxu0 %v861_v43 }
  0x5f   : > { %622 = vmatpush.bf16.msra.mxu1 %v869_v44 }
  0x62   : > { %610 = vmatpush.bf16.msra.mxu0 %v860_v45 }
  0x63   : > { %623 = vmatpush.bf16.msra.mxu1 %v868_v46 }
  0x66   : > { %611 = vmatpush.bf16.msra.mxu0 %v859_v50 }
  0x67   : > { %624 = vmatpush.bf16.msra.mxu1 %v867_v51 }
  0x69   : > { %612 = vmatmul.bf16.vlgmr.msra.gmra.mxu0 %v504_v52 }
  0x6a   : > { %625 = vmatmul.bf16.vlgmr.msra.gmra.mxu1 %v505_v53 }
  0xe6   : > { %v613_v54 = vpop.f32.mrf.mxu0 }
  0xe7   : > { %v626_v56 = vpop.f32.mrf.mxu1 }
  0xe8   : > { %v627_v57 = vadd.f32 %v626_v56, %v613_v54 }
  0xea   : > { %v630_v58 = vadd.f32 %v627_v57, %v467_v55 }
  0xeb   : > { %635 = sbr.rel (%p855_p13) target bundleno = 253 (0xfd), region = 85 }
  0xec   : > { %631 = vst [vmem:[#allocation2] sm:$0xff] %v630_v58 }
  0xee   : > { %v615_v59 = vpop.f32.mrf.mxu0 }
  0xef   : > { %v628_v60 = vpop.f32.mrf.mxu1 }
  0xf0   : > { %v932_v62 = vld [vmem:[%s450_s15] ss:$0 sm:$0xff] }
  0xf1   : > { %v933_v63 = vld [vmem:[%s453_s7] ss:$0 sm:$0xff] }
  0xf3   : > { %v636_v61 = vld [vmem:[#allocation2] sm:$0xff] }
  0xf4   : > { %v641_v0 = vmul.f32 %v932_v62, %v636_v61 }
  0xf6   : > { %v646_v1 = vadd.f32 %v933_v63, %v641_v0 }
  0xf8   : > { %v647_v2 = vmax.f32 %v646_v1, 0.0 }
  0xfa   : > { %v648_v3 = vpack.c.bf16 %v647_v2, %v647_v2 }
  0xfc   : > { %649 = vst [vmem:[%s1169_s11] sm:$0xf] %v648_v3 }
  0xfd PF: > { %s14_s21 = sadd.s32 1, %s988_s21   ;;  %s1229_s15 = smov %s968_s16 }
  0xfe   : > { %p11_p0 = scmp.ge.s32.totalorder %s14_s21, 20   ;;  %s1230_s16 = smov %s1067_s28 }
  0xff   : > { %s1231_s17 = smov %s980_s19  ;;  %s1232_s18 = smov %s984_s20 }
 0x100   : > { %s1233_s19 = smov %s1236_s22  ;;  %s1234_s20 = smov %s1240_s23 }
 0x101   :  { %13 = sbr.rel (!%p11_p0) target bundleno = 4 (0x4), region = 129 }

// kernel: resnet34_forward.69
= control target key start
LH: loop header
LB: loop body
LE: loop exit
PB: predicated region body
PF: predicated region fallthrough
CT: control target
= control target key end

     0   :  { %s999_s15 = smov 0   ;;  %s1001_s16 = smov 0   ;;  %s1206_s0 = inlined_call_operand.vmem [shape: bf16[2,2304], index: 0, kind: input, shape index: {}]   ;;  %s1207_s1 = inlined_call_operand.vmem [shape: bf16[2304,512], index: 1, kind: input, shape index: {}]   ;;  %s1208_s2 = inlined_call_operand.vmem [shape: f32[1,512], index: 2, kind: input, shape index: {}]   ;;  %s1209_s3 = inlined_call_operand.vmem [shape: f32[1,512], index: 3, kind: input, shape index: {}]   ;;  %s1210_s4 = inlined_call_operand.vmem [shape: bf16[2,512], index: 4, kind: output, shape index: {}]  }
   0x1   :  { %s1003_s17 = smov 0   ;;  %s1005_s18 = smov 0  }
   0x2   :  { %s1007_s19 = smov 0   ;;  %s1009_s20 = smov 0  }
   0x3   :  { %s1011_s21 = smov 0  }
   0x4 LB: > { %s26_s22 = sadd.s32 1, %s963_s19  ;;  %s29_s23 = sadd.s32 1, %s967_s20  ;;  %s971_s21 = sphi %s1011_s21, %s14_s21   ;;  %s967_s20 = sphi %s1009_s20, %s1216_s20   ;;  %s963_s19 = sphi %s1007_s19, %s1215_s19   ;;  %s959_s18 = sphi %s1005_s18, %s1214_s18   ;;  %s955_s17 = sphi %s1003_s17, %s1213_s17   ;;  %s951_s16 = sphi %s1001_s16, %s1212_s16   ;;  %s947_s15 = sphi %s999_s15, %s1211_s15  }
   0x5   : > { %p27_p0 = scmp.ge.s32.totalorder %s26_s22, 9  ;;  %p77_p1 = scmp.ne.s32.totalorder %s951_s16, %s947_s15 }
   0x6   : > { %p78_p2 = scmp.eq.s32.totalorder %s971_s21, 0  ;;  %s70_s27 = sadd.s32 1, %s951_s16 }
   0x7   : > { %s1218_s22 = smov (%p27_p0, %s26_s22), 0  ;;  %s1220_s23 = smov (!%p27_p0, %s29_s23), %s967_s20 }
   0x8   : > { %p79_p3 = por %p78_p2, %p77_p1  ;;  %p31_p4 = scmp.ge.s32.totalorder %s1220_s23, 4 }
   0x9   : > { %s65_s24 = ssub.s32 %s963_s19, %s1218_s22  ;;  %p765_p6 = scmp.ge.s32.totalorder %s971_s21, 36 }
   0xa   : > { %s1222_s23 = smov (%p31_p4, %s1220_s23), 0 }
   0xb   : > { %s66_s25 = ssub.s32 %s967_s20, %s1222_s23  ;;  %183 = sbr.rel (%p765_p6) target bundleno = 54 (0x36), region = 16 }
   0xc   : > { %s67_s26 = sor.u32 %s66_s25, %s65_s24 }
   0xd   : > { %p68_p5 = scmp.eq.s32.totalorder %s67_s26, 0 }
   0xf   : > { %s1050_s28 = scalar_select %p68_p5, %s951_s16, %s70_s27  }
  0x10   : > { %198 = sbr.rel (!%p79_p3) target bundleno = 54 (0x36), region = 24  ;;  %s200_s29 = sand.u32 (%p79_p3), 1, %s951_s16  }
  0x11   : > { %s841_s30 = sshll.u32 (%p79_p3), %s963_s19, 7  ;;  %s766_s5 = sshll.u32 (%p79_p3), %s200_s29, 7 }
  0x12   : > { %s205_s6 = sadd.s32 (%p79_p3), %s967_s20, %s841_s30  ;;  %s1064_s11 = scalar_lea.vmem (%p79_p3), [#allocation3], %s766_s5 }
  0x13   : > { %s769_s7 = sshll.u32 (%p79_p3), %s205_s6, 2 }
  0x14   : > { %s1059_s10 = scalar_lea.vmem (%p79_p3), %s1207_s1, %s769_s7 }
  0x15   : > { %v224_v0 = vld [vmem:[%s1059_s10] sm:$0xf]  ;;  %v226_v1 = vld [vmem:[%s1059_s10 + $0x10] sm:$0xf] }
  0x16   : > { %v228_v2 = vld [vmem:[%s1059_s10 + $0x20] sm:$0xf]  ;;  %225 = vst [vmem:[%s1064_s11] sm:$0xf] %v224_v0  ;;  %v230_v3 = vld [vmem:[%s1059_s10 + $0x30] sm:$0xf] }
  0x17   : > { %227 = vst [vmem:[%s1064_s11 + $0x4] sm:$0xf] %v226_v1  ;;  %v232_v4 = vld [vmem:[%s1059_s10 + $0x40] sm:$0xf]  ;;  %v234_v5 = vld [vmem:[%s1059_s10 + $0x50] sm:$0xf] }
  0x18   : > { %229 = vst [vmem:[%s1064_s11 + $0x8] sm:$0xf] %v228_v2  ;;  %v236_v6 = vld [vmem:[%s1059_s10 + $0x60] sm:$0xf]  ;;  %v238_v7 = vld [vmem:[%s1059_s10 + $0x70] sm:$0xf] }
  0x19   : > { %231 = vst [vmem:[%s1064_s11 + $0xc] sm:$0xf] %v230_v3  ;;  %v240_v8 = vld [vmem:[%s1059_s10 + $0x80] sm:$0xf]  ;;  %v242_v9 = vld [vmem:[%s1059_s10 + $0x90] sm:$0xf] }
  0x1a   : > { %233 = vst [vmem:[%s1064_s11 + $0x10] sm:$0xf] %v232_v4  ;;  %v244_v10 = vld [vmem:[%s1059_s10 + $0xa0] sm:$0xf]  ;;  %v246_v11 = vld [vmem:[%s1059_s10 + $0xb0] sm:$0xf] }
  0x1b   : > { %235 = vst [vmem:[%s1064_s11 + $0x14] sm:$0xf] %v234_v5  ;;  %v248_v12 = vld [vmem:[%s1059_s10 + $0xc0] sm:$0xf]  ;;  %v250_v13 = vld [vmem:[%s1059_s10 + $0xd0] sm:$0xf] }
  0x1c   : > { %237 = vst [vmem:[%s1064_s11 + $0x18] sm:$0xf] %v236_v6  ;;  %v252_v14 = vld [vmem:[%s1059_s10 + $0xe0] sm:$0xf]  ;;  %v254_v15 = vld [vmem:[%s1059_s10 + $0xf0] sm:$0xf] }
  0x1d   : > { %239 = vst [vmem:[%s1064_s11 + $0x1c] sm:$0xf] %v238_v7  ;;  %v256_v16 = vld [vmem:[%s1059_s10 + $0x100] sm:$0xf]  ;;  %v258_v17 = vld [vmem:[%s1059_s10 + $0x110] sm:$0xf] }
  0x1e   : > { %241 = vst [vmem:[%s1064_s11 + $0x20] sm:$0xf] %v240_v8  ;;  %v260_v18 = vld [vmem:[%s1059_s10 + $0x120] sm:$0xf]  ;;  %v262_v19 = vld [vmem:[%s1059_s10 + $0x130] sm:$0xf] }
  0x1f   : > { %243 = vst [vmem:[%s1064_s11 + $0x24] sm:$0xf] %v242_v9  ;;  %v264_v20 = vld [vmem:[%s1059_s10 + $0x140] sm:$0xf]  ;;  %v266_v21 = vld [vmem:[%s1059_s10 + $0x150] sm:$0xf] }
  0x20   : > { %245 = vst [vmem:[%s1064_s11 + $0x28] sm:$0xf] %v244_v10  ;;  %v268_v22 = vld [vmem:[%s1059_s10 + $0x160] sm:$0xf]  ;;  %v270_v23 = vld [vmem:[%s1059_s10 + $0x170] sm:$0xf] }
  0x21   : > { %247 = vst [vmem:[%s1064_s11 + $0x2c] sm:$0xf] %v246_v11  ;;  %v272_v24 = vld [vmem:[%s1059_s10 + $0x180] sm:$0xf]  ;;  %v274_v25 = vld [vmem:[%s1059_s10 + $0x190] sm:$0xf] }
  0x22   : > { %249 = vst [vmem:[%s1064_s11 + $0x30] sm:$0xf] %v248_v12  ;;  %v276_v26 = vld [vmem:[%s1059_s10 + $0x1a0] sm:$0xf]  ;;  %v278_v27 = vld [vmem:[%s1059_s10 + $0x1b0] sm:$0xf] }
  0x23   : > { %251 = vst [vmem:[%s1064_s11 + $0x34] sm:$0xf] %v250_v13  ;;  %v280_v28 = vld [vmem:[%s1059_s10 + $0x1c0] sm:$0xf]  ;;  %v282_v29 = vld [vmem:[%s1059_s10 + $0x1d0] sm:$0xf] }
  0x24   : > { %253 = vst [vmem:[%s1064_s11 + $0x38] sm:$0xf] %v252_v14  ;;  %v284_v30 = vld [vmem:[%s1059_s10 + $0x1e0] sm:$0xf]  ;;  %v286_v31 = vld [vmem:[%s1059_s10 + $0x1f0] sm:$0xf] }
  0x25   : > { %255 = vst [vmem:[%s1064_s11 + $0x3c] sm:$0xf] %v254_v15 }
  0x26   : > { %257 = vst [vmem:[%s1064_s11 + $0x40] sm:$0xf] %v256_v16 }
  0x27   : > { %259 = vst [vmem:[%s1064_s11 + $0x44] sm:$0xf] %v258_v17 }
  0x28   : > { %261 = vst [vmem:[%s1064_s11 + $0x48] sm:$0xf] %v260_v18 }
  0x29   : > { %263 = vst [vmem:[%s1064_s11 + $0x4c] sm:$0xf] %v262_v19 }
  0x2a   : > { %265 = vst [vmem:[%s1064_s11 + $0x50] sm:$0xf] %v264_v20 }
  0x2b   : > { %267 = vst [vmem:[%s1064_s11 + $0x54] sm:$0xf] %v266_v21 }
  0x2c   : > { %269 = vst [vmem:[%s1064_s11 + $0x58] sm:$0xf] %v268_v22 }
  0x2d   : > { %271 = vst [vmem:[%s1064_s11 + $0x5c] sm:$0xf] %v270_v23 }
  0x2e   : > { %273 = vst [vmem:[%s1064_s11 + $0x60] sm:$0xf] %v272_v24 }
  0x2f   : > { %275 = vst [vmem:[%s1064_s11 + $0x64] sm:$0xf] %v274_v25 }
  0x30   : > { %277 = vst [vmem:[%s1064_s11 + $0x68] sm:$0xf] %v276_v26 }
  0x31   : > { %279 = vst [vmem:[%s1064_s11 + $0x6c] sm:$0xf] %v278_v27 }
  0x32   : > { %281 = vst [vmem:[%s1064_s11 + $0x70] sm:$0xf] %v280_v28 }
  0x33   : > { %283 = vst [vmem:[%s1064_s11 + $0x74] sm:$0xf] %v282_v29 }
  0x34   : > { %285 = vst [vmem:[%s1064_s11 + $0x78] sm:$0xf] %v284_v30 }
  0x35   : > { %287 = vst [vmem:[%s1064_s11 + $0x7c] sm:$0xf] %v286_v31 }
  0x36 PF: > { %p770_p7 = scmp.ge.s32.totalorder %s971_s21, 1  ;;  %p386_p8 = scmp.lt.s32.totalorder %s971_s21, 37 }
  0x38   : > { %p387_p9 = pnand %p770_p7, %p386_p8 }
  0x39   : > { %s393_s12 = sand.u32 (!%p387_p9), 1, %s947_s15   ;;  %s772_s13 = sshll.u32 (!%p387_p9), %s955_s17, 1 }
  0x3a   : > { %390 = sbr.rel (%p387_p9) target bundleno = 253 (0xfd), region = 73  ;;  %s771_s14 = sshll.u32 (!%p387_p9), %s393_s12, 7 }
  0x3b   : > { %p437_p10 = scmp.lt.s32.totalorder (!%p387_p9), %s772_s13, 17  ;;  %p444_p11 = scmp.lt.s32.totalorder (!%p387_p9), %s959_s18, 3 }
  0x3c   : > { %s1150_s10 = scalar_lea.vmem (!%p387_p9), [#allocation3], %s771_s14  ;;  %p773_p12 = scmp.ne.s32.totalorder (!%p387_p9), %s955_s17, 0 }
  0x3f   : > { %s1224_s13 = smov (!%p437_p10, %s772_s13), 17  ;;  %s1226_s18 = smov (!%p444_p11, %s959_s18), 3 }
  0x40   : > { %s441_s26 = scalar_lea.vmem %s1206_s0, %s1224_s13  ;;  %s446_s30 = scalar_lea.vmem %s1208_s2, %s1226_s18 }
  0x41   : > { %s449_s6 = scalar_lea.vmem %s1209_s3, %s1226_s18  ;;  %s456_s9 = scalar_lea.vmem %s1210_s4, %s1226_s18 }
  0x42   : > { %460 = sbr.rel (%p773_p12) target bundleno = 73 (0x49), region = 81 }
  0x47   : > { %v973_v32 = vmov 0.0  }
  0x48   : > { %461 = vst [vmem:[#allocation2] sm:$0x3] %v973_v32 }
  0x49 PF: > { %v849_v33 = vld [vmem:[%s1150_s10 + $0x38] sm:$0xff]  ;;  %v848_v35 = vld [vmem:[%s1150_s10 + $0x30] sm:$0xff]  ;;  %v847_v38 = vld [vmem:[%s1150_s10 + $0x28] sm:$0xff]  ;;  %p838_p13 = scmp.ne.s32.totalorder %s955_s17, 8 }
  0x4a   : > { %v857_v34 = vld [vmem:[%s1150_s10 + $0x78] sm:$0xff]  ;;  %598 = vmatpush.bf16.msra.mxu0 %v849_v33  ;;  %v856_v36 = vld [vmem:[%s1150_s10 + $0x70] sm:$0xff]  ;;  %v855_v39 = vld [vmem:[%s1150_s10 + $0x68] sm:$0xff] }
  0x4b   : > { %611 = vmatpush.bf16.msra.mxu1 %v857_v34  ;;  %v463_v37 = vld [vmem:[%s441_s26] sm:$0x3]  ;;  %v846_v40 = vld [vmem:[%s1150_s10 + $0x20] sm:$0xff]  ;;  %v845_v42 = vld [vmem:[%s1150_s10 + $0x18] sm:$0xff] }
  0x4c   : > { %497 = vst [vmem:[#allocation1] ss:$9 sm:$0xff] %v463_v37  ;;  %v854_v41 = vld [vmem:[%s1150_s10 + $0x60] sm:$0xff]  ;;  %v853_v43 = vld [vmem:[%s1150_s10 + $0x58] sm:$0xff]  ;;  %v844_v44 = vld [vmem:[%s1150_s10 + $0x10] sm:$0xff] }
  0x4d   : > { %v852_v45 = vld [vmem:[%s1150_s10 + $0x50] sm:$0xff]  ;;  %v843_v46 = vld [vmem:[%s1150_s10 + $0x8] sm:$0xff]  ;;  %v842_v48 = vld [vmem:[%s1150_s10] sm:$0xff] }
  0x4e   : > { %599 = vmatpush.bf16.msra.mxu0 %v848_v35  ;;  %v851_v47 = vld [vmem:[%s1150_s10 + $0x48] sm:$0xff]  ;;  %v850_v49 = vld [vmem:[%s1150_s10 + $0x40] sm:$0xff] }
  0x4f   : > { %612 = vmatpush.bf16.msra.mxu1 %v856_v36  ;;  %v462_v53 = vld [vmem:[#allocation2] sm:$0x3] }
  0x52   : > { %600 = vmatpush.bf16.msra.mxu0 %v847_v38 }
  0x53   : > { %613 = vmatpush.bf16.msra.mxu1 %v855_v39  ;;  %v498_v50 = vld [vmem:[#allocation1] sm:$0xff]  ;;  %v499_v51 = vld [vmem:[#allocation1 + $0x9] sm:$0xff] }
  0x56   : > { %601 = vmatpush.bf16.msra.mxu0 %v846_v40 }
  0x57   : > { %614 = vmatpush.bf16.msra.mxu1 %v854_v41 }
  0x5a   : > { %602 = vmatpush.bf16.msra.mxu0 %v845_v42 }
  0x5b   : > { %615 = vmatpush.bf16.msra.mxu1 %v853_v43 }
  0x5e   : > { %603 = vmatpush.bf16.msra.mxu0 %v844_v44 }
  0x5f   : > { %616 = vmatpush.bf16.msra.mxu1 %v852_v45 }
  0x62   : > { %604 = vmatpush.bf16.msra.mxu0 %v843_v46 }
  0x63   : > { %617 = vmatpush.bf16.msra.mxu1 %v851_v47 }
  0x66   : > { %605 = vmatpush.bf16.msra.mxu0 %v842_v48 }
  0x67   : > { %618 = vmatpush.bf16.msra.mxu1 %v850_v49 }
  0x69   : > { %606 = vmatmul.bf16.vlgmr.msra.gmra.mxu0 %v498_v50 }
  0x6a   : > { %619 = vmatmul.bf16.vlgmr.msra.gmra.mxu1 %v499_v51 }
  0xe6   : > { %v607_v52 = vpop.f32.mrf.mxu0 }
  0xe7   : > { %v620_v54 = vpop.f32.mrf.mxu1 }
  0xe8   : > { %v621_v55 = vadd.f32 %v620_v54, %v607_v52 }
  0xea   : > { %v624_v56 = vadd.f32 %v621_v55, %v462_v53 }
  0xeb   : > { %629 = sbr.rel (%p838_p13) target bundleno = 253 (0xfd), region = 85 }
  0xec   : > { %625 = vst [vmem:[#allocation2] sm:$0x3] %v624_v56 }
  0xee   : > { %v609_v57 = vpop.f32.mrf.mxu0 }
  0xef   : > { %v622_v58 = vpop.f32.mrf.mxu1 }
  0xf0   : > { %v915_v60 = vld [vmem:[%s446_s30] ss:$0 sm:$0xff] }
  0xf1   : > { %v916_v61 = vld [vmem:[%s449_s6] ss:$0 sm:$0xff] }
  0xf3   : > { %v630_v59 = vld [vmem:[#allocation2] sm:$0x3] }
  0xf4   : > { %v635_v62 = vmul.f32 %v915_v60, %v630_v59 }
  0xf6   : > { %v640_v63 = vadd.f32 %v916_v61, %v635_v62 }
  0xf8   : > { %v641_v0 = vmax.f32 %v640_v63, 0.0 }
  0xfa   : > { %v642_v1 = vpack.c.bf16 %v641_v0, %v641_v0 }
  0xfc   : > { %643 = vst [vmem:[%s456_s9] sm:$0x1] %v642_v1 }
  0xfd PF: > { %s14_s21 = sadd.s32 1, %s971_s21   ;;  %s1211_s15 = smov %s951_s16 }
  0xfe   : > { %p11_p0 = scmp.ge.s32.totalorder %s14_s21, 38   ;;  %s1212_s16 = smov %s1050_s28 }
  0xff   : > { %s1213_s17 = smov %s963_s19  ;;  %s1214_s18 = smov %s967_s20 }
 0x100   : > { %s1215_s19 = smov %s1218_s22  ;;  %s1216_s20 = smov %s1222_s23 }
 0x101   :  { %13 = sbr.rel (!%p11_p0) target bundleno = 4 (0x4), region = 129 }

// kernel: resnet34_forward.70
= control target key start
LH: loop header
LB: loop body
LE: loop exit
PB: predicated region body
PF: predicated region fallthrough
CT: control target
= control target key end

     0   :  { %s961_s15 = smov 0   ;;  %s963_s16 = smov 0   ;;  %s1104_s0 = inlined_call_operand.vmem [shape: bf16[2,256], index: 0, kind: input, shape index: {}]   ;;  %s1105_s1 = inlined_call_operand.vmem [shape: bf16[256,512], index: 1, kind: input, shape index: {}]   ;;  %s1106_s2 = inlined_call_operand.vmem [shape: f32[1,512], index: 2, kind: input, shape index: {}]   ;;  %s1107_s3 = inlined_call_operand.vmem [shape: f32[1,512], index: 3, kind: input, shape index: {}]   ;;  %s1108_s4 = inlined_call_operand.vmem [shape: bf16[2,512], index: 4, kind: output, shape index: {}]  }
   0x1   :  { %s965_s17 = smov 0   ;;  %s967_s18 = smov 0  }
   0x2   :  { %s969_s19 = smov 0  }
   0x3 LB: > { %s29_s20 = sadd.s32 1, %s929_s18  ;;  %p77_p1 = scmp.ne.s32.totalorder %s921_s16, %s917_s15  ;;  %s933_s19 = sphi %s969_s19, %s14_s19   ;;  %s929_s18 = sphi %s967_s18, %s1112_s18   ;;  %s925_s17 = sphi %s965_s17, %s1111_s17   ;;  %s921_s16 = sphi %s963_s16, %s1110_s16   ;;  %s917_s15 = sphi %s961_s15, %s1109_s15  }
   0x4   : > { %p31_p0 = scmp.ge.s32.totalorder %s29_s20, 4  ;;  %p78_p2 = scmp.eq.s32.totalorder %s933_s19, 0 }
   0x5   : > { %s70_s22 = sadd.s32 1, %s921_s16  ;;  %p765_p5 = scmp.ge.s32.totalorder %s933_s19, 4 }
   0x6   : > { %s1114_s20 = smov (%p31_p0, %s29_s20), 0  ;;  %p79_p3 = por %p78_p2, %p77_p1 }
   0x7   : > { %s66_s21 = ssub.s32 %s929_s18, %s1114_s20  ;;  %195 = sbr.rel (%p765_p5) target bundleno = 48 (0x30), region = 20 }
   0x8   : > { %p68_p4 = scmp.eq.s32.totalorder %s66_s21, 0 }
   0xa   : > { %s996_s23 = scalar_select %p68_p4, %s921_s16, %s70_s22  }
   0xc   : > { %198 = sbr.rel (!%p79_p3) target bundleno = 48 (0x30), region = 24  ;;  %s200_s24 = sand.u32 (%p79_p3), 1, %s921_s16  }
   0xd   : > { %s767_s25 = sshll.u32 (%p79_p3), %s929_s18, 2  ;;  %s766_s26 = sshll.u32 (%p79_p3), %s200_s24, 7 }
   0xe   : > { %s1004_s29 = scalar_lea.vmem (%p79_p3), %s1105_s1, %s767_s25  ;;  %s1008_s30 = scalar_lea.vmem (%p79_p3), [#allocation3], %s766_s26 }
   0xf   : > { %v224_v0 = vld [vmem:[%s1004_s29] sm:$0xf] (%p79_p3)  ;;  %v226_v1 = vld [vmem:[%s1004_s29 + $0x10] sm:$0xf] (%p79_p3) }
  0x10   : > { %225 = vst [vmem:[%s1008_s30] sm:$0xf] (%p79_p3), %v224_v0  ;;  %v228_v2 = vld [vmem:[%s1004_s29 + $0x20] sm:$0xf] (%p79_p3)  ;;  %v230_v3 = vld [vmem:[%s1004_s29 + $0x30] sm:$0xf] (%p79_p3) }
  0x11   : > { %227 = vst [vmem:[%s1008_s30 + $0x4] sm:$0xf] %v226_v1  ;;  %v232_v4 = vld [vmem:[%s1004_s29 + $0x40] sm:$0xf]  ;;  %v234_v5 = vld [vmem:[%s1004_s29 + $0x50] sm:$0xf] }
  0x12   : > { %229 = vst [vmem:[%s1008_s30 + $0x8] sm:$0xf] %v228_v2  ;;  %v236_v6 = vld [vmem:[%s1004_s29 + $0x60] sm:$0xf]  ;;  %v238_v7 = vld [vmem:[%s1004_s29 + $0x70] sm:$0xf] }
  0x13   : > { %231 = vst [vmem:[%s1008_s30 + $0xc] sm:$0xf] %v230_v3  ;;  %v240_v8 = vld [vmem:[%s1004_s29 + $0x80] sm:$0xf]  ;;  %v242_v9 = vld [vmem:[%s1004_s29 + $0x90] sm:$0xf] }
  0x14   : > { %233 = vst [vmem:[%s1008_s30 + $0x10] sm:$0xf] %v232_v4  ;;  %v244_v10 = vld [vmem:[%s1004_s29 + $0xa0] sm:$0xf]  ;;  %v246_v11 = vld [vmem:[%s1004_s29 + $0xb0] sm:$0xf] }
  0x15   : > { %235 = vst [vmem:[%s1008_s30 + $0x14] sm:$0xf] %v234_v5  ;;  %v248_v12 = vld [vmem:[%s1004_s29 + $0xc0] sm:$0xf]  ;;  %v250_v13 = vld [vmem:[%s1004_s29 + $0xd0] sm:$0xf] }
  0x16   : > { %237 = vst [vmem:[%s1008_s30 + $0x18] sm:$0xf] %v236_v6  ;;  %v252_v14 = vld [vmem:[%s1004_s29 + $0xe0] sm:$0xf]  ;;  %v254_v15 = vld [vmem:[%s1004_s29 + $0xf0] sm:$0xf] }
  0x17   : > { %239 = vst [vmem:[%s1008_s30 + $0x1c] sm:$0xf] %v238_v7  ;;  %v256_v16 = vld [vmem:[%s1004_s29 + $0x100] sm:$0xf]  ;;  %v258_v17 = vld [vmem:[%s1004_s29 + $0x110] sm:$0xf] }
  0x18   : > { %241 = vst [vmem:[%s1008_s30 + $0x20] sm:$0xf] %v240_v8  ;;  %v260_v18 = vld [vmem:[%s1004_s29 + $0x120] sm:$0xf]  ;;  %v262_v19 = vld [vmem:[%s1004_s29 + $0x130] sm:$0xf] }
  0x19   : > { %243 = vst [vmem:[%s1008_s30 + $0x24] sm:$0xf] %v242_v9  ;;  %v264_v20 = vld [vmem:[%s1004_s29 + $0x140] sm:$0xf]  ;;  %v266_v21 = vld [vmem:[%s1004_s29 + $0x150] sm:$0xf] }
  0x1a   : > { %245 = vst [vmem:[%s1008_s30 + $0x28] sm:$0xf] %v244_v10  ;;  %v268_v22 = vld [vmem:[%s1004_s29 + $0x160] sm:$0xf]  ;;  %v270_v23 = vld [vmem:[%s1004_s29 + $0x170] sm:$0xf] }
  0x1b   : > { %247 = vst [vmem:[%s1008_s30 + $0x2c] sm:$0xf] %v246_v11  ;;  %v272_v24 = vld [vmem:[%s1004_s29 + $0x180] sm:$0xf]  ;;  %v274_v25 = vld [vmem:[%s1004_s29 + $0x190] sm:$0xf] }
  0x1c   : > { %249 = vst [vmem:[%s1008_s30 + $0x30] sm:$0xf] %v248_v12  ;;  %v276_v26 = vld [vmem:[%s1004_s29 + $0x1a0] sm:$0xf]  ;;  %v278_v27 = vld [vmem:[%s1004_s29 + $0x1b0] sm:$0xf] }
  0x1d   : > { %251 = vst [vmem:[%s1008_s30 + $0x34] sm:$0xf] %v250_v13  ;;  %v280_v28 = vld [vmem:[%s1004_s29 + $0x1c0] sm:$0xf]  ;;  %v282_v29 = vld [vmem:[%s1004_s29 + $0x1d0] sm:$0xf] }
  0x1e   : > { %253 = vst [vmem:[%s1008_s30 + $0x38] sm:$0xf] %v252_v14  ;;  %v284_v30 = vld [vmem:[%s1004_s29 + $0x1e0] sm:$0xf]  ;;  %v286_v31 = vld [vmem:[%s1004_s29 + $0x1f0] sm:$0xf] }
  0x1f   : > { %255 = vst [vmem:[%s1008_s30 + $0x3c] sm:$0xf] %v254_v15 }
  0x20   : > { %257 = vst [vmem:[%s1008_s30 + $0x40] sm:$0xf] %v256_v16 }
  0x21   : > { %259 = vst [vmem:[%s1008_s30 + $0x44] sm:$0xf] %v258_v17 }
  0x22   : > { %261 = vst [vmem:[%s1008_s30 + $0x48] sm:$0xf] %v260_v18 }
  0x23   : > { %263 = vst [vmem:[%s1008_s30 + $0x4c] sm:$0xf] %v262_v19 }
  0x24   : > { %265 = vst [vmem:[%s1008_s30 + $0x50] sm:$0xf] %v264_v20 }
  0x25   : > { %267 = vst [vmem:[%s1008_s30 + $0x54] sm:$0xf] %v266_v21 }
  0x26   : > { %269 = vst [vmem:[%s1008_s30 + $0x58] sm:$0xf] %v268_v22 }
  0x27   : > { %271 = vst [vmem:[%s1008_s30 + $0x5c] sm:$0xf] %v270_v23 }
  0x28   : > { %273 = vst [vmem:[%s1008_s30 + $0x60] sm:$0xf] %v272_v24 }
  0x29   : > { %275 = vst [vmem:[%s1008_s30 + $0x64] sm:$0xf] %v274_v25 }
  0x2a   : > { %277 = vst [vmem:[%s1008_s30 + $0x68] sm:$0xf] %v276_v26 }
  0x2b   : > { %279 = vst [vmem:[%s1008_s30 + $0x6c] sm:$0xf] %v278_v27 }
  0x2c   : > { %281 = vst [vmem:[%s1008_s30 + $0x70] sm:$0xf] %v280_v28 }
  0x2d   : > { %283 = vst [vmem:[%s1008_s30 + $0x74] sm:$0xf] %v282_v29 }
  0x2e   : > { %285 = vst [vmem:[%s1008_s30 + $0x78] sm:$0xf] %v284_v30 }
  0x2f   : > { %287 = vst [vmem:[%s1008_s30 + $0x7c] sm:$0xf] %v286_v31 }
  0x30 PF: > { %p768_p6 = scmp.ge.s32.totalorder %s933_s19, 1  ;;  %p386_p7 = scmp.lt.s32.totalorder %s933_s19, 5 }
  0x32   : > { %p387_p8 = pnand %p768_p6, %p386_p7 }
  0x33   : > { %s393_s5 = sand.u32 (!%p387_p8), 1, %s917_s15   ;;  %p444_p9 = scmp.lt.s32.totalorder (!%p387_p8), %s925_s17, 3 }
  0x34   : > { %390 = sbr.rel (%p387_p8) target bundleno = 235 (0xeb), region = 73  ;;  %s769_s8 = sshll.u32 (!%p387_p8), %s393_s5, 7 }
  0x35   : > { %s395_s9 = scalar_lea.vmem (!%p387_p8), [#allocation3], %s769_s8 }
  0x39   : > { %v463_v32 = vld [vmem:[%s1104_s0] sm:$0x3]  ;;  %v843_v33 = vld [vmem:[%s395_s9 + $0x38] sm:$0xff]  ;;  %v841_v37 = vld [vmem:[%s395_s9 + $0x28] sm:$0xff]  ;;  %s1116_s17 = smov (!%p444_p9, %s925_s17), 3  ;;  %v935_v51 = vmov 0.0  }
  0x3a   : > { %497 = vst [vmem:[#allocation1] ss:$9 sm:$0xff] %v463_v32  ;;  %v851_v34 = vld [vmem:[%s395_s9 + $0x78] sm:$0xff]  ;;  %598 = vmatpush.bf16.msra.mxu0 %v843_v33  ;;  %v842_v35 = vld [vmem:[%s395_s9 + $0x30] sm:$0xff]  ;;  %v849_v38 = vld [vmem:[%s395_s9 + $0x68] sm:$0xff]  ;;  %s446_s12 = scalar_lea.vmem %s1106_s2, %s1116_s17  ;;  %s449_s15 = scalar_lea.vmem %s1107_s3, %s1116_s17 }
  0x3b   : > { %611 = vmatpush.bf16.msra.mxu1 %v851_v34  ;;  %v850_v36 = vld [vmem:[%s395_s9 + $0x70] sm:$0xff]  ;;  %v840_v39 = vld [vmem:[%s395_s9 + $0x20] sm:$0xff]  ;;  %v839_v41 = vld [vmem:[%s395_s9 + $0x18] sm:$0xff]  ;;  %461 = vst [vmem:[#allocation2] sm:$0x3] %v935_v51  ;;  %s456_s24 = scalar_lea.vmem %s1108_s4, %s1116_s17 }
  0x3c   : > { %v848_v40 = vld [vmem:[%s395_s9 + $0x60] sm:$0xff]  ;;  %v847_v42 = vld [vmem:[%s395_s9 + $0x58] sm:$0xff]  ;;  %v838_v43 = vld [vmem:[%s395_s9 + $0x10] sm:$0xff] }
  0x3d   : > { %v846_v44 = vld [vmem:[%s395_s9 + $0x50] sm:$0xff]  ;;  %v837_v45 = vld [vmem:[%s395_s9 + $0x8] sm:$0xff]  ;;  %v836_v47 = vld [vmem:[%s395_s9] sm:$0xff] }
  0x3e   : > { %599 = vmatpush.bf16.msra.mxu0 %v842_v35  ;;  %v845_v46 = vld [vmem:[%s395_s9 + $0x48] sm:$0xff]  ;;  %v844_v48 = vld [vmem:[%s395_s9 + $0x40] sm:$0xff]  ;;  %v893_v59 = vld [vmem:[%s446_s12] ss:$0 sm:$0xff] }
  0x3f   : > { %612 = vmatpush.bf16.msra.mxu1 %v850_v36  ;;  %v894_v60 = vld [vmem:[%s449_s15] ss:$0 sm:$0xff] }
  0x41   : > { %v498_v49 = vld [vmem:[#allocation1] sm:$0xff]  ;;  %v499_v50 = vld [vmem:[#allocation1 + $0x9] sm:$0xff] }
  0x42   : > { %600 = vmatpush.bf16.msra.mxu0 %v841_v37  ;;  %v462_v53 = vld [vmem:[#allocation2] sm:$0x3] }
  0x43   : > { %613 = vmatpush.bf16.msra.mxu1 %v849_v38 }
  0x46   : > { %601 = vmatpush.bf16.msra.mxu0 %v840_v39 }
  0x47   : > { %614 = vmatpush.bf16.msra.mxu1 %v848_v40 }
  0x4a   : > { %602 = vmatpush.bf16.msra.mxu0 %v839_v41 }
  0x4b   : > { %615 = vmatpush.bf16.msra.mxu1 %v847_v42 }
  0x4e   : > { %603 = vmatpush.bf16.msra.mxu0 %v838_v43 }
  0x4f   : > { %616 = vmatpush.bf16.msra.mxu1 %v846_v44 }
  0x52   : > { %604 = vmatpush.bf16.msra.mxu0 %v837_v45 }
  0x53   : > { %617 = vmatpush.bf16.msra.mxu1 %v845_v46 }
  0x56   : > { %605 = vmatpush.bf16.msra.mxu0 %v836_v47 }
  0x57   : > { %618 = vmatpush.bf16.msra.mxu1 %v844_v48 }
  0x59   : > { %606 = vmatmul.bf16.vlgmr.msra.gmra.mxu0 %v498_v49 }
  0x5a   : > { %619 = vmatmul.bf16.vlgmr.msra.gmra.mxu1 %v499_v50 }
  0xd6   : > { %v607_v52 = vpop.f32.mrf.mxu0 }
  0xd7   : > { %v620_v54 = vpop.f32.mrf.mxu1 }
  0xd8   : > { %v621_v55 = vadd.f32 %v620_v54, %v607_v52 }
  0xda   : > { %v624_v56 = vadd.f32 %v621_v55, %v462_v53 }
  0xdc   : > { %625 = vst [vmem:[#allocation2] sm:$0x3] %v624_v56 }
  0xde   : > { %v609_v57 = vpop.f32.mrf.mxu0 }
  0xdf   : > { %v622_v58 = vpop.f32.mrf.mxu1 }
  0xe3   : > { %v629_v61 = vld [vmem:[#allocation2] sm:$0x3] }
  0xe4   : > { %v634_v62 = vmul.f32 %v893_v59, %v629_v61 }
  0xe6   : > { %v639_v63 = vadd.f32 %v894_v60, %v634_v62 }
  0xe8   : > { %v640_v0 = vpack.c.bf16 %v639_v63, %v639_v63 }
  0xea   : > { %641 = vst [vmem:[%s456_s24] sm:$0x1] %v640_v0 }
  0xeb PF: > { %s14_s19 = sadd.s32 1, %s933_s19   ;;  %s1109_s15 = smov %s921_s16 }
  0xec   : > { %p11_p10 = scmp.ge.s32.totalorder %s14_s19, 6   ;;  %s1110_s16 = smov %s996_s23 }
  0xed   : > { %s1111_s17 = smov %s929_s18  ;;  %s1112_s18 = smov %s1114_s20 }
  0xee   :  { %13 = sbr.rel (!%p11_p10) target bundleno = 3 (0x3), region = 129 }

// kernel: resnet34_forward.72
= control target key start
LH: loop header
LB: loop body
LE: loop exit
PB: predicated region body
PF: predicated region fallthrough
CT: control target
= control target key end

     0   :  { %s999_s15 = smov 0   ;;  %s1001_s16 = smov 0   ;;  %s1206_s0 = inlined_call_operand.vmem [shape: bf16[2,4608], index: 0, kind: input, shape index: {}]   ;;  %s1207_s1 = inlined_call_operand.vmem [shape: bf16[4608,512], index: 1, kind: input, shape index: {}]   ;;  %s1208_s2 = inlined_call_operand.vmem [shape: f32[1,512], index: 2, kind: input, shape index: {}]   ;;  %s1209_s3 = inlined_call_operand.vmem [shape: f32[1,512], index: 3, kind: input, shape index: {}]   ;;  %s1210_s4 = inlined_call_operand.vmem [shape: bf16[2,512], index: 4, kind: output, shape index: {}]  }
   0x1   :  { %s1003_s17 = smov 0   ;;  %s1005_s18 = smov 0  }
   0x2   :  { %s1007_s19 = smov 0   ;;  %s1009_s20 = smov 0  }
   0x3   :  { %s1011_s21 = smov 0  }
   0x4 LB: > { %s26_s22 = sadd.s32 1, %s963_s19  ;;  %s29_s23 = sadd.s32 1, %s967_s20  ;;  %s971_s21 = sphi %s1011_s21, %s14_s21   ;;  %s967_s20 = sphi %s1009_s20, %s1216_s20   ;;  %s963_s19 = sphi %s1007_s19, %s1215_s19   ;;  %s959_s18 = sphi %s1005_s18, %s1214_s18   ;;  %s955_s17 = sphi %s1003_s17, %s1213_s17   ;;  %s951_s16 = sphi %s1001_s16, %s1212_s16   ;;  %s947_s15 = sphi %s999_s15, %s1211_s15  }
   0x5   : > { %p27_p0 = scmp.ge.s32.totalorder %s26_s22, 18  ;;  %p77_p1 = scmp.ne.s32.totalorder %s951_s16, %s947_s15 }
   0x6   : > { %p78_p2 = scmp.eq.s32.totalorder %s971_s21, 0  ;;  %s70_s27 = sadd.s32 1, %s951_s16 }
   0x7   : > { %s1218_s22 = smov (%p27_p0, %s26_s22), 0  ;;  %s1220_s23 = smov (!%p27_p0, %s29_s23), %s967_s20 }
   0x8   : > { %p79_p3 = por %p78_p2, %p77_p1  ;;  %p31_p4 = scmp.ge.s32.totalorder %s1220_s23, 4 }
   0x9   : > { %s65_s24 = ssub.s32 %s963_s19, %s1218_s22  ;;  %p765_p6 = scmp.ge.s32.totalorder %s971_s21, 72 }
   0xa   : > { %s1222_s23 = smov (%p31_p4, %s1220_s23), 0 }
   0xb   : > { %s66_s25 = ssub.s32 %s967_s20, %s1222_s23  ;;  %183 = sbr.rel (%p765_p6) target bundleno = 54 (0x36), region = 16 }
   0xc   : > { %s67_s26 = sor.u32 %s66_s25, %s65_s24 }
   0xd   : > { %p68_p5 = scmp.eq.s32.totalorder %s67_s26, 0 }
   0xf   : > { %s1050_s28 = scalar_select %p68_p5, %s951_s16, %s70_s27  }
  0x10   : > { %198 = sbr.rel (!%p79_p3) target bundleno = 54 (0x36), region = 24  ;;  %s200_s29 = sand.u32 (%p79_p3), 1, %s951_s16  }
  0x11   : > { %s841_s30 = sshll.u32 (%p79_p3), %s963_s19, 7  ;;  %s766_s5 = sshll.u32 (%p79_p3), %s200_s29, 7 }
  0x12   : > { %s205_s6 = sadd.s32 (%p79_p3), %s967_s20, %s841_s30  ;;  %s1064_s11 = scalar_lea.vmem (%p79_p3), [#allocation3], %s766_s5 }
  0x13   : > { %s769_s7 = sshll.u32 (%p79_p3), %s205_s6, 2 }
  0x14   : > { %s1059_s10 = scalar_lea.vmem (%p79_p3), %s1207_s1, %s769_s7 }
  0x15   : > { %v224_v0 = vld [vmem:[%s1059_s10] sm:$0xf]  ;;  %v226_v1 = vld [vmem:[%s1059_s10 + $0x10] sm:$0xf] }
  0x16   : > { %v228_v2 = vld [vmem:[%s1059_s10 + $0x20] sm:$0xf]  ;;  %225 = vst [vmem:[%s1064_s11] sm:$0xf] %v224_v0  ;;  %v230_v3 = vld [vmem:[%s1059_s10 + $0x30] sm:$0xf] }
  0x17   : > { %227 = vst [vmem:[%s1064_s11 + $0x4] sm:$0xf] %v226_v1  ;;  %v232_v4 = vld [vmem:[%s1059_s10 + $0x40] sm:$0xf]  ;;  %v234_v5 = vld [vmem:[%s1059_s10 + $0x50] sm:$0xf] }
  0x18   : > { %229 = vst [vmem:[%s1064_s11 + $0x8] sm:$0xf] %v228_v2  ;;  %v236_v6 = vld [vmem:[%s1059_s10 + $0x60] sm:$0xf]  ;;  %v238_v7 = vld [vmem:[%s1059_s10 + $0x70] sm:$0xf] }
  0x19   : > { %231 = vst [vmem:[%s1064_s11 + $0xc] sm:$0xf] %v230_v3  ;;  %v240_v8 = vld [vmem:[%s1059_s10 + $0x80] sm:$0xf]  ;;  %v242_v9 = vld [vmem:[%s1059_s10 + $0x90] sm:$0xf] }
  0x1a   : > { %233 = vst [vmem:[%s1064_s11 + $0x10] sm:$0xf] %v232_v4  ;;  %v244_v10 = vld [vmem:[%s1059_s10 + $0xa0] sm:$0xf]  ;;  %v246_v11 = vld [vmem:[%s1059_s10 + $0xb0] sm:$0xf] }
  0x1b   : > { %235 = vst [vmem:[%s1064_s11 + $0x14] sm:$0xf] %v234_v5  ;;  %v248_v12 = vld [vmem:[%s1059_s10 + $0xc0] sm:$0xf]  ;;  %v250_v13 = vld [vmem:[%s1059_s10 + $0xd0] sm:$0xf] }
  0x1c   : > { %237 = vst [vmem:[%s1064_s11 + $0x18] sm:$0xf] %v236_v6  ;;  %v252_v14 = vld [vmem:[%s1059_s10 + $0xe0] sm:$0xf]  ;;  %v254_v15 = vld [vmem:[%s1059_s10 + $0xf0] sm:$0xf] }
  0x1d   : > { %239 = vst [vmem:[%s1064_s11 + $0x1c] sm:$0xf] %v238_v7  ;;  %v256_v16 = vld [vmem:[%s1059_s10 + $0x100] sm:$0xf]  ;;  %v258_v17 = vld [vmem:[%s1059_s10 + $0x110] sm:$0xf] }
  0x1e   : > { %241 = vst [vmem:[%s1064_s11 + $0x20] sm:$0xf] %v240_v8  ;;  %v260_v18 = vld [vmem:[%s1059_s10 + $0x120] sm:$0xf]  ;;  %v262_v19 = vld [vmem:[%s1059_s10 + $0x130] sm:$0xf] }
  0x1f   : > { %243 = vst [vmem:[%s1064_s11 + $0x24] sm:$0xf] %v242_v9  ;;  %v264_v20 = vld [vmem:[%s1059_s10 + $0x140] sm:$0xf]  ;;  %v266_v21 = vld [vmem:[%s1059_s10 + $0x150] sm:$0xf] }
  0x20   : > { %245 = vst [vmem:[%s1064_s11 + $0x28] sm:$0xf] %v244_v10  ;;  %v268_v22 = vld [vmem:[%s1059_s10 + $0x160] sm:$0xf]  ;;  %v270_v23 = vld [vmem:[%s1059_s10 + $0x170] sm:$0xf] }
  0x21   : > { %247 = vst [vmem:[%s1064_s11 + $0x2c] sm:$0xf] %v246_v11  ;;  %v272_v24 = vld [vmem:[%s1059_s10 + $0x180] sm:$0xf]  ;;  %v274_v25 = vld [vmem:[%s1059_s10 + $0x190] sm:$0xf] }
  0x22   : > { %249 = vst [vmem:[%s1064_s11 + $0x30] sm:$0xf] %v248_v12  ;;  %v276_v26 = vld [vmem:[%s1059_s10 + $0x1a0] sm:$0xf]  ;;  %v278_v27 = vld [vmem:[%s1059_s10 + $0x1b0] sm:$0xf] }
  0x23   : > { %251 = vst [vmem:[%s1064_s11 + $0x34] sm:$0xf] %v250_v13  ;;  %v280_v28 = vld [vmem:[%s1059_s10 + $0x1c0] sm:$0xf]  ;;  %v282_v29 = vld [vmem:[%s1059_s10 + $0x1d0] sm:$0xf] }
  0x24   : > { %253 = vst [vmem:[%s1064_s11 + $0x38] sm:$0xf] %v252_v14  ;;  %v284_v30 = vld [vmem:[%s1059_s10 + $0x1e0] sm:$0xf]  ;;  %v286_v31 = vld [vmem:[%s1059_s10 + $0x1f0] sm:$0xf] }
  0x25   : > { %255 = vst [vmem:[%s1064_s11 + $0x3c] sm:$0xf] %v254_v15 }
  0x26   : > { %257 = vst [vmem:[%s1064_s11 + $0x40] sm:$0xf] %v256_v16 }
  0x27   : > { %259 = vst [vmem:[%s1064_s11 + $0x44] sm:$0xf] %v258_v17 }
  0x28   : > { %261 = vst [vmem:[%s1064_s11 + $0x48] sm:$0xf] %v260_v18 }
  0x29   : > { %263 = vst [vmem:[%s1064_s11 + $0x4c] sm:$0xf] %v262_v19 }
  0x2a   : > { %265 = vst [vmem:[%s1064_s11 + $0x50] sm:$0xf] %v264_v20 }
  0x2b   : > { %267 = vst [vmem:[%s1064_s11 + $0x54] sm:$0xf] %v266_v21 }
  0x2c   : > { %269 = vst [vmem:[%s1064_s11 + $0x58] sm:$0xf] %v268_v22 }
  0x2d   : > { %271 = vst [vmem:[%s1064_s11 + $0x5c] sm:$0xf] %v270_v23 }
  0x2e   : > { %273 = vst [vmem:[%s1064_s11 + $0x60] sm:$0xf] %v272_v24 }
  0x2f   : > { %275 = vst [vmem:[%s1064_s11 + $0x64] sm:$0xf] %v274_v25 }
  0x30   : > { %277 = vst [vmem:[%s1064_s11 + $0x68] sm:$0xf] %v276_v26 }
  0x31   : > { %279 = vst [vmem:[%s1064_s11 + $0x6c] sm:$0xf] %v278_v27 }
  0x32   : > { %281 = vst [vmem:[%s1064_s11 + $0x70] sm:$0xf] %v280_v28 }
  0x33   : > { %283 = vst [vmem:[%s1064_s11 + $0x74] sm:$0xf] %v282_v29 }
  0x34   : > { %285 = vst [vmem:[%s1064_s11 + $0x78] sm:$0xf] %v284_v30 }
  0x35   : > { %287 = vst [vmem:[%s1064_s11 + $0x7c] sm:$0xf] %v286_v31 }
  0x36 PF: > { %p770_p7 = scmp.ge.s32.totalorder %s971_s21, 1  ;;  %p386_p8 = scmp.lt.s32.totalorder %s971_s21, 73 }
  0x38   : > { %p387_p9 = pnand %p770_p7, %p386_p8 }
  0x39   : > { %s393_s12 = sand.u32 (!%p387_p9), 1, %s947_s15   ;;  %s772_s13 = sshll.u32 (!%p387_p9), %s955_s17, 1 }
  0x3a   : > { %390 = sbr.rel (%p387_p9) target bundleno = 253 (0xfd), region = 73  ;;  %s771_s14 = sshll.u32 (!%p387_p9), %s393_s12, 7 }
  0x3b   : > { %p437_p10 = scmp.lt.s32.totalorder (!%p387_p9), %s772_s13, 35  ;;  %p444_p11 = scmp.lt.s32.totalorder (!%p387_p9), %s959_s18, 3 }
  0x3c   : > { %s1150_s10 = scalar_lea.vmem (!%p387_p9), [#allocation3], %s771_s14  ;;  %p773_p12 = scmp.ne.s32.totalorder (!%p387_p9), %s955_s17, 0 }
  0x3f   : > { %s1224_s13 = smov (!%p437_p10, %s772_s13), 35  ;;  %s1226_s18 = smov (!%p444_p11, %s959_s18), 3 }
  0x40   : > { %s441_s26 = scalar_lea.vmem %s1206_s0, %s1224_s13  ;;  %s446_s30 = scalar_lea.vmem %s1208_s2, %s1226_s18 }
  0x41   : > { %s449_s6 = scalar_lea.vmem %s1209_s3, %s1226_s18  ;;  %s456_s9 = scalar_lea.vmem %s1210_s4, %s1226_s18 }
  0x42   : > { %460 = sbr.rel (%p773_p12) target bundleno = 73 (0x49), region = 81 }
  0x47   : > { %v973_v32 = vmov 0.0  }
  0x48   : > { %461 = vst [vmem:[#allocation2] sm:$0x3] %v973_v32 }
  0x49 PF: > { %v849_v33 = vld [vmem:[%s1150_s10 + $0x38] sm:$0xff]  ;;  %v848_v35 = vld [vmem:[%s1150_s10 + $0x30] sm:$0xff]  ;;  %v847_v38 = vld [vmem:[%s1150_s10 + $0x28] sm:$0xff]  ;;  %p838_p13 = scmp.ne.s32.totalorder %s955_s17, 17 }
  0x4a   : > { %v857_v34 = vld [vmem:[%s1150_s10 + $0x78] sm:$0xff]  ;;  %598 = vmatpush.bf16.msra.mxu0 %v849_v33  ;;  %v856_v36 = vld [vmem:[%s1150_s10 + $0x70] sm:$0xff]  ;;  %v855_v39 = vld [vmem:[%s1150_s10 + $0x68] sm:$0xff] }
  0x4b   : > { %611 = vmatpush.bf16.msra.mxu1 %v857_v34  ;;  %v463_v37 = vld [vmem:[%s441_s26] sm:$0x3]  ;;  %v846_v40 = vld [vmem:[%s1150_s10 + $0x20] sm:$0xff]  ;;  %v845_v42 = vld [vmem:[%s1150_s10 + $0x18] sm:$0xff] }
  0x4c   : > { %497 = vst [vmem:[#allocation1] ss:$9 sm:$0xff] %v463_v37  ;;  %v854_v41 = vld [vmem:[%s1150_s10 + $0x60] sm:$0xff]  ;;  %v853_v43 = vld [vmem:[%s1150_s10 + $0x58] sm:$0xff]  ;;  %v844_v44 = vld [vmem:[%s1150_s10 + $0x10] sm:$0xff] }
  0x4d   : > { %v852_v45 = vld [vmem:[%s1150_s10 + $0x50] sm:$0xff]  ;;  %v843_v46 = vld [vmem:[%s1150_s10 + $0x8] sm:$0xff]  ;;  %v842_v48 = vld [vmem:[%s1150_s10] sm:$0xff] }
  0x4e   : > { %599 = vmatpush.bf16.msra.mxu0 %v848_v35  ;;  %v851_v47 = vld [vmem:[%s1150_s10 + $0x48] sm:$0xff]  ;;  %v850_v49 = vld [vmem:[%s1150_s10 + $0x40] sm:$0xff] }
  0x4f   : > { %612 = vmatpush.bf16.msra.mxu1 %v856_v36  ;;  %v462_v53 = vld [vmem:[#allocation2] sm:$0x3] }
  0x52   : > { %600 = vmatpush.bf16.msra.mxu0 %v847_v38 }
  0x53   : > { %613 = vmatpush.bf16.msra.mxu1 %v855_v39  ;;  %v498_v50 = vld [vmem:[#allocation1] sm:$0xff]  ;;  %v499_v51 = vld [vmem:[#allocation1 + $0x9] sm:$0xff] }
  0x56   : > { %601 = vmatpush.bf16.msra.mxu0 %v846_v40 }
  0x57   : > { %614 = vmatpush.bf16.msra.mxu1 %v854_v41 }
  0x5a   : > { %602 = vmatpush.bf16.msra.mxu0 %v845_v42 }
  0x5b   : > { %615 = vmatpush.bf16.msra.mxu1 %v853_v43 }
  0x5e   : > { %603 = vmatpush.bf16.msra.mxu0 %v844_v44 }
  0x5f   : > { %616 = vmatpush.bf16.msra.mxu1 %v852_v45 }
  0x62   : > { %604 = vmatpush.bf16.msra.mxu0 %v843_v46 }
  0x63   : > { %617 = vmatpush.bf16.msra.mxu1 %v851_v47 }
  0x66   : > { %605 = vmatpush.bf16.msra.mxu0 %v842_v48 }
  0x67   : > { %618 = vmatpush.bf16.msra.mxu1 %v850_v49 }
  0x69   : > { %606 = vmatmul.bf16.vlgmr.msra.gmra.mxu0 %v498_v50 }
  0x6a   : > { %619 = vmatmul.bf16.vlgmr.msra.gmra.mxu1 %v499_v51 }
  0xe6   : > { %v607_v52 = vpop.f32.mrf.mxu0 }
  0xe7   : > { %v620_v54 = vpop.f32.mrf.mxu1 }
  0xe8   : > { %v621_v55 = vadd.f32 %v620_v54, %v607_v52 }
  0xea   : > { %v624_v56 = vadd.f32 %v621_v55, %v462_v53 }
  0xeb   : > { %629 = sbr.rel (%p838_p13) target bundleno = 253 (0xfd), region = 85 }
  0xec   : > { %625 = vst [vmem:[#allocation2] sm:$0x3] %v624_v56 }
  0xee   : > { %v609_v57 = vpop.f32.mrf.mxu0 }
  0xef   : > { %v622_v58 = vpop.f32.mrf.mxu1 }
  0xf0   : > { %v915_v60 = vld [vmem:[%s446_s30] ss:$0 sm:$0xff] }
  0xf1   : > { %v916_v61 = vld [vmem:[%s449_s6] ss:$0 sm:$0xff] }
  0xf3   : > { %v630_v59 = vld [vmem:[#allocation2] sm:$0x3] }
  0xf4   : > { %v635_v62 = vmul.f32 %v915_v60, %v630_v59 }
  0xf6   : > { %v640_v63 = vadd.f32 %v916_v61, %v635_v62 }
  0xf8   : > { %v641_v0 = vmax.f32 %v640_v63, 0.0 }
  0xfa   : > { %v642_v1 = vpack.c.bf16 %v641_v0, %v641_v0 }
  0xfc   : > { %643 = vst [vmem:[%s456_s9] sm:$0x1] %v642_v1 }
  0xfd PF: > { %s14_s21 = sadd.s32 1, %s971_s21   ;;  %s1211_s15 = smov %s951_s16 }
  0xfe   : > { %p11_p0 = scmp.ge.s32.totalorder %s14_s21, 74   ;;  %s1212_s16 = smov %s1050_s28 }
  0xff   : > { %s1213_s17 = smov %s963_s19  ;;  %s1214_s18 = smov %s967_s20 }
 0x100   : > { %s1215_s19 = smov %s1218_s22  ;;  %s1216_s20 = smov %s1222_s23 }
 0x101   :  { %13 = sbr.rel (!%p11_p0) target bundleno = 4 (0x4), region = 129 }

// kernel: resnet34_forward.71
= control target key start
LH: loop header
LB: loop body
LE: loop exit
PB: predicated region body
PF: predicated region fallthrough
CT: control target
= control target key end

     0   :  { %s1077_s18 = smov 0   ;;  %s1079_s19 = smov 0   ;;  %s1293_s0 = inlined_call_operand.vmem [shape: bf16[2,4608], index: 0, kind: input, shape index: {}]   ;;  %s1294_s1 = inlined_call_operand.vmem [shape: bf16[4608,512], index: 1, kind: input, shape index: {}]   ;;  %s1295_s2 = inlined_call_operand.vmem [shape: f32[1,512], index: 2, kind: input, shape index: {}]   ;;  %s1296_s3 = inlined_call_operand.vmem [shape: f32[1,512], index: 3, kind: input, shape index: {}]   ;;  %s1297_s4 = inlined_call_operand.vmem [shape: bf16[2,512], index: 4, kind: input, shape index: {}]   ;;  %s1298_s5 = inlined_call_operand.vmem [shape: bf16[2,512], index: 5, kind: output, shape index: {}]  }
   0x1   :  { %s1081_s20 = smov 0   ;;  %s1083_s21 = smov 0  }
   0x2   :  { %s1085_s22 = smov 0   ;;  %s1087_s23 = smov 0  }
   0x3   :  { %s1089_s24 = smov 0  }
   0x4 LB: > { %s27_s25 = sadd.s32 1, %s1036_s22  ;;  %s30_s26 = sadd.s32 1, %s1040_s23  ;;  %s1044_s24 = sphi %s1089_s24, %s15_s24   ;;  %s1040_s23 = sphi %s1087_s23, %s1304_s23   ;;  %s1036_s22 = sphi %s1085_s22, %s1303_s22   ;;  %s1032_s21 = sphi %s1083_s21, %s1302_s21   ;;  %s1028_s20 = sphi %s1081_s20, %s1301_s20   ;;  %s1024_s19 = sphi %s1079_s19, %s1300_s19   ;;  %s1020_s18 = sphi %s1077_s18, %s1299_s18  }
   0x5   : > { %p28_p0 = scmp.ge.s32.totalorder %s27_s25, 18  ;;  %p78_p1 = scmp.ne.s32.totalorder %s1024_s19, %s1020_s18 }
   0x6   : > { %p79_p2 = scmp.eq.s32.totalorder %s1044_s24, 0  ;;  %s71_s30 = sadd.s32 1, %s1024_s19 }
   0x7   : > { %s1306_s25 = smov (%p28_p0, %s27_s25), 0  ;;  %s1308_s26 = smov (!%p28_p0, %s30_s26), %s1040_s23 }
   0x8   : > { %p80_p3 = por %p79_p2, %p78_p1  ;;  %p32_p4 = scmp.ge.s32.totalorder %s1308_s26, 4 }
   0x9   : > { %s66_s27 = ssub.s32 %s1036_s22, %s1306_s25  ;;  %p838_p6 = scmp.ge.s32.totalorder %s1044_s24, 72 }
   0xa   : > { %s1310_s26 = smov (%p32_p4, %s1308_s26), 0 }
   0xb   : > { %s67_s28 = ssub.s32 %s1040_s23, %s1310_s26  ;;  %212 = sbr.rel (%p838_p6) target bundleno = 54 (0x36), region = 16 }
   0xc   : > { %s68_s29 = sor.u32 %s67_s28, %s66_s27 }
   0xd   : > { %p69_p5 = scmp.eq.s32.totalorder %s68_s29, 0 }
   0xf   : > { %s1128_s6 = scalar_select %p69_p5, %s1024_s19, %s71_s30  }
  0x10   : > { %227 = sbr.rel (!%p80_p3) target bundleno = 54 (0x36), region = 24  ;;  %s229_s7 = sand.u32 (%p80_p3), 1, %s1024_s19  }
  0x11   : > { %s914_s8 = sshll.u32 (%p80_p3), %s1036_s22, 7  ;;  %s839_s9 = sshll.u32 (%p80_p3), %s229_s7, 7 }
  0x12   : > { %s234_s10 = sadd.s32 (%p80_p3), %s1040_s23, %s914_s8  ;;  %s1142_s15 = scalar_lea.vmem (%p80_p3), [#allocation3], %s839_s9 }
  0x13   : > { %s842_s11 = sshll.u32 (%p80_p3), %s234_s10, 2 }
  0x14   : > { %s1137_s14 = scalar_lea.vmem (%p80_p3), %s1294_s1, %s842_s11 }
  0x15   : > { %v253_v0 = vld [vmem:[%s1137_s14] sm:$0xf]  ;;  %v255_v1 = vld [vmem:[%s1137_s14 + $0x10] sm:$0xf] }
  0x16   : > { %v257_v2 = vld [vmem:[%s1137_s14 + $0x20] sm:$0xf]  ;;  %254 = vst [vmem:[%s1142_s15] sm:$0xf] %v253_v0  ;;  %v259_v3 = vld [vmem:[%s1137_s14 + $0x30] sm:$0xf] }
  0x17   : > { %256 = vst [vmem:[%s1142_s15 + $0x4] sm:$0xf] %v255_v1  ;;  %v261_v4 = vld [vmem:[%s1137_s14 + $0x40] sm:$0xf]  ;;  %v263_v5 = vld [vmem:[%s1137_s14 + $0x50] sm:$0xf] }
  0x18   : > { %258 = vst [vmem:[%s1142_s15 + $0x8] sm:$0xf] %v257_v2  ;;  %v265_v6 = vld [vmem:[%s1137_s14 + $0x60] sm:$0xf]  ;;  %v267_v7 = vld [vmem:[%s1137_s14 + $0x70] sm:$0xf] }
  0x19   : > { %260 = vst [vmem:[%s1142_s15 + $0xc] sm:$0xf] %v259_v3  ;;  %v269_v8 = vld [vmem:[%s1137_s14 + $0x80] sm:$0xf]  ;;  %v271_v9 = vld [vmem:[%s1137_s14 + $0x90] sm:$0xf] }
  0x1a   : > { %262 = vst [vmem:[%s1142_s15 + $0x10] sm:$0xf] %v261_v4  ;;  %v273_v10 = vld [vmem:[%s1137_s14 + $0xa0] sm:$0xf]  ;;  %v275_v11 = vld [vmem:[%s1137_s14 + $0xb0] sm:$0xf] }
  0x1b   : > { %264 = vst [vmem:[%s1142_s15 + $0x14] sm:$0xf] %v263_v5  ;;  %v277_v12 = vld [vmem:[%s1137_s14 + $0xc0] sm:$0xf]  ;;  %v279_v13 = vld [vmem:[%s1137_s14 + $0xd0] sm:$0xf] }
  0x1c   : > { %266 = vst [vmem:[%s1142_s15 + $0x18] sm:$0xf] %v265_v6  ;;  %v281_v14 = vld [vmem:[%s1137_s14 + $0xe0] sm:$0xf]  ;;  %v283_v15 = vld [vmem:[%s1137_s14 + $0xf0] sm:$0xf] }
  0x1d   : > { %268 = vst [vmem:[%s1142_s15 + $0x1c] sm:$0xf] %v267_v7  ;;  %v285_v16 = vld [vmem:[%s1137_s14 + $0x100] sm:$0xf]  ;;  %v287_v17 = vld [vmem:[%s1137_s14 + $0x110] sm:$0xf] }
  0x1e   : > { %270 = vst [vmem:[%s1142_s15 + $0x20] sm:$0xf] %v269_v8  ;;  %v289_v18 = vld [vmem:[%s1137_s14 + $0x120] sm:$0xf]  ;;  %v291_v19 = vld [vmem:[%s1137_s14 + $0x130] sm:$0xf] }
  0x1f   : > { %272 = vst [vmem:[%s1142_s15 + $0x24] sm:$0xf] %v271_v9  ;;  %v293_v20 = vld [vmem:[%s1137_s14 + $0x140] sm:$0xf]  ;;  %v295_v21 = vld [vmem:[%s1137_s14 + $0x150] sm:$0xf] }
  0x20   : > { %274 = vst [vmem:[%s1142_s15 + $0x28] sm:$0xf] %v273_v10  ;;  %v297_v22 = vld [vmem:[%s1137_s14 + $0x160] sm:$0xf]  ;;  %v299_v23 = vld [vmem:[%s1137_s14 + $0x170] sm:$0xf] }
  0x21   : > { %276 = vst [vmem:[%s1142_s15 + $0x2c] sm:$0xf] %v275_v11  ;;  %v301_v24 = vld [vmem:[%s1137_s14 + $0x180] sm:$0xf]  ;;  %v303_v25 = vld [vmem:[%s1137_s14 + $0x190] sm:$0xf] }
  0x22   : > { %278 = vst [vmem:[%s1142_s15 + $0x30] sm:$0xf] %v277_v12  ;;  %v305_v26 = vld [vmem:[%s1137_s14 + $0x1a0] sm:$0xf]  ;;  %v307_v27 = vld [vmem:[%s1137_s14 + $0x1b0] sm:$0xf] }
  0x23   : > { %280 = vst [vmem:[%s1142_s15 + $0x34] sm:$0xf] %v279_v13  ;;  %v309_v28 = vld [vmem:[%s1137_s14 + $0x1c0] sm:$0xf]  ;;  %v311_v29 = vld [vmem:[%s1137_s14 + $0x1d0] sm:$0xf] }
  0x24   : > { %282 = vst [vmem:[%s1142_s15 + $0x38] sm:$0xf] %v281_v14  ;;  %v313_v30 = vld [vmem:[%s1137_s14 + $0x1e0] sm:$0xf]  ;;  %v315_v31 = vld [vmem:[%s1137_s14 + $0x1f0] sm:$0xf] }
  0x25   : > { %284 = vst [vmem:[%s1142_s15 + $0x3c] sm:$0xf] %v283_v15 }
  0x26   : > { %286 = vst [vmem:[%s1142_s15 + $0x40] sm:$0xf] %v285_v16 }
  0x27   : > { %288 = vst [vmem:[%s1142_s15 + $0x44] sm:$0xf] %v287_v17 }
  0x28   : > { %290 = vst [vmem:[%s1142_s15 + $0x48] sm:$0xf] %v289_v18 }
  0x29   : > { %292 = vst [vmem:[%s1142_s15 + $0x4c] sm:$0xf] %v291_v19 }
  0x2a   : > { %294 = vst [vmem:[%s1142_s15 + $0x50] sm:$0xf] %v293_v20 }
  0x2b   : > { %296 = vst [vmem:[%s1142_s15 + $0x54] sm:$0xf] %v295_v21 }
  0x2c   : > { %298 = vst [vmem:[%s1142_s15 + $0x58] sm:$0xf] %v297_v22 }
  0x2d   : > { %300 = vst [vmem:[%s1142_s15 + $0x5c] sm:$0xf] %v299_v23 }
  0x2e   : > { %302 = vst [vmem:[%s1142_s15 + $0x60] sm:$0xf] %v301_v24 }
  0x2f   : > { %304 = vst [vmem:[%s1142_s15 + $0x64] sm:$0xf] %v303_v25 }
  0x30   : > { %306 = vst [vmem:[%s1142_s15 + $0x68] sm:$0xf] %v305_v26 }
  0x31   : > { %308 = vst [vmem:[%s1142_s15 + $0x6c] sm:$0xf] %v307_v27 }
  0x32   : > { %310 = vst [vmem:[%s1142_s15 + $0x70] sm:$0xf] %v309_v28 }
  0x33   : > { %312 = vst [vmem:[%s1142_s15 + $0x74] sm:$0xf] %v311_v29 }
  0x34   : > { %314 = vst [vmem:[%s1142_s15 + $0x78] sm:$0xf] %v313_v30 }
  0x35   : > { %316 = vst [vmem:[%s1142_s15 + $0x7c] sm:$0xf] %v315_v31 }
  0x36 PF: > { %p843_p7 = scmp.ge.s32.totalorder %s1044_s24, 1  ;;  %p425_p8 = scmp.lt.s32.totalorder %s1044_s24, 73 }
  0x38   : > { %p426_p9 = pnand %p843_p7, %p425_p8 }
  0x39   : > { %s432_s16 = sand.u32 (!%p426_p9), 1, %s1020_s18   ;;  %s845_s17 = sshll.u32 (!%p426_p9), %s1028_s20, 1 }
  0x3a   : > { %429 = sbr.rel (%p426_p9) target bundleno = 255 (0xff), region = 77  ;;  %s844_s27 = sshll.u32 (!%p426_p9), %s432_s16, 7 }
  0x3b   : > { %p485_p10 = scmp.lt.s32.totalorder (!%p426_p9), %s845_s17, 35  ;;  %p492_p11 = scmp.lt.s32.totalorder (!%p426_p9), %s1032_s21, 3 }
  0x3c   : > { %s1232_s29 = scalar_lea.vmem (!%p426_p9), [#allocation3], %s844_s27  ;;  %p846_p12 = scmp.ne.s32.totalorder (!%p426_p9), %s1028_s20, 0 }
  0x3f   : > { %s1312_s17 = smov (!%p485_p10, %s845_s17), 35  ;;  %s1314_s21 = smov (!%p492_p11, %s1032_s21), 3 }
  0x40   : > { %s489_s30 = scalar_lea.vmem %s1293_s0, %s1312_s17  ;;  %s494_s9 = scalar_lea.vmem %s1295_s2, %s1314_s21 }
  0x41   : > { %s497_s11 = scalar_lea.vmem %s1296_s3, %s1314_s21  ;;  %s504_s14 = scalar_lea.vmem %s1297_s4, %s1314_s21 }
  0x42   : > { %s511_s28 = scalar_lea.vmem %s1298_s5, %s1314_s21  ;;  %515 = sbr.rel (%p846_p12) target bundleno = 73 (0x49), region = 85 }
  0x47   : > { %v1046_v32 = vmov 0.0  }
  0x48   : > { %516 = vst [vmem:[#allocation2] sm:$0x3] %v1046_v32 }
  0x49 PF: > { %v922_v33 = vld [vmem:[%s1232_s29 + $0x38] sm:$0xff]  ;;  %v921_v35 = vld [vmem:[%s1232_s29 + $0x30] sm:$0xff]  ;;  %v920_v38 = vld [vmem:[%s1232_s29 + $0x28] sm:$0xff]  ;;  %p911_p13 = scmp.ne.s32.totalorder %s1028_s20, 17 }
  0x4a   : > { %v930_v34 = vld [vmem:[%s1232_s29 + $0x78] sm:$0xff]  ;;  %653 = vmatpush.bf16.msra.mxu0 %v922_v33  ;;  %v929_v36 = vld [vmem:[%s1232_s29 + $0x70] sm:$0xff]  ;;  %v928_v39 = vld [vmem:[%s1232_s29 + $0x68] sm:$0xff] }
  0x4b   : > { %666 = vmatpush.bf16.msra.mxu1 %v930_v34  ;;  %v518_v37 = vld [vmem:[%s489_s30] sm:$0x3]  ;;  %v919_v40 = vld [vmem:[%s1232_s29 + $0x20] sm:$0xff]  ;;  %v918_v42 = vld [vmem:[%s1232_s29 + $0x18] sm:$0xff] }
  0x4c   : > { %552 = vst [vmem:[#allocation1] ss:$9 sm:$0xff] %v518_v37  ;;  %v927_v41 = vld [vmem:[%s1232_s29 + $0x60] sm:$0xff]  ;;  %v926_v43 = vld [vmem:[%s1232_s29 + $0x58] sm:$0xff]  ;;  %v917_v44 = vld [vmem:[%s1232_s29 + $0x10] sm:$0xff] }
  0x4d   : > { %v925_v45 = vld [vmem:[%s1232_s29 + $0x50] sm:$0xff]  ;;  %v916_v46 = vld [vmem:[%s1232_s29 + $0x8] sm:$0xff]  ;;  %v915_v48 = vld [vmem:[%s1232_s29] sm:$0xff] }
  0x4e   : > { %654 = vmatpush.bf16.msra.mxu0 %v921_v35  ;;  %v924_v47 = vld [vmem:[%s1232_s29 + $0x48] sm:$0xff]  ;;  %v923_v49 = vld [vmem:[%s1232_s29 + $0x40] sm:$0xff] }
  0x4f   : > { %667 = vmatpush.bf16.msra.mxu1 %v929_v36  ;;  %v517_v53 = vld [vmem:[#allocation2] sm:$0x3] }
  0x52   : > { %655 = vmatpush.bf16.msra.mxu0 %v920_v38 }
  0x53   : > { %668 = vmatpush.bf16.msra.mxu1 %v928_v39  ;;  %v553_v50 = vld [vmem:[#allocation1] sm:$0xff]  ;;  %v554_v51 = vld [vmem:[#allocation1 + $0x9] sm:$0xff] }
  0x56   : > { %656 = vmatpush.bf16.msra.mxu0 %v919_v40 }
  0x57   : > { %669 = vmatpush.bf16.msra.mxu1 %v927_v41 }
  0x5a   : > { %657 = vmatpush.bf16.msra.mxu0 %v918_v42 }
  0x5b   : > { %670 = vmatpush.bf16.msra.mxu1 %v926_v43 }
  0x5e   : > { %658 = vmatpush.bf16.msra.mxu0 %v917_v44 }
  0x5f   : > { %671 = vmatpush.bf16.msra.mxu1 %v925_v45 }
  0x62   : > { %659 = vmatpush.bf16.msra.mxu0 %v916_v46 }
  0x63   : > { %672 = vmatpush.bf16.msra.mxu1 %v924_v47 }
  0x66   : > { %660 = vmatpush.bf16.msra.mxu0 %v915_v48 }
  0x67   : > { %673 = vmatpush.bf16.msra.mxu1 %v923_v49 }
  0x69   : > { %661 = vmatmul.bf16.vlgmr.msra.gmra.mxu0 %v553_v50 }
  0x6a   : > { %674 = vmatmul.bf16.vlgmr.msra.gmra.mxu1 %v554_v51 }
  0xe6   : > { %v662_v52 = vpop.f32.mrf.mxu0 }
  0xe7   : > { %v675_v54 = vpop.f32.mrf.mxu1 }
  0xe8   : > { %v676_v55 = vadd.f32 %v675_v54, %v662_v52 }
  0xea   : > { %v679_v56 = vadd.f32 %v676_v55, %v517_v53 }
  0xeb   : > { %684 = sbr.rel (%p911_p13) target bundleno = 255 (0xff), region = 89 }
  0xec   : > { %680 = vst [vmem:[#allocation2] sm:$0x3] %v679_v56 }
  0xee   : > { %v664_v57 = vpop.f32.mrf.mxu0 }
  0xef   : > { %v677_v58 = vpop.f32.mrf.mxu1 }
  0xf0   : > { %v988_v60 = vld [vmem:[%s494_s9] ss:$0 sm:$0xff] }
  0xf1   : > { %v989_v61 = vld [vmem:[%s497_s11] ss:$0 sm:$0xff] }
  0xf2   : > { %v696_v62 = vld [vmem:[%s504_s14] sm:$0x1] }
  0xf3   : > { %v685_v59 = vld [vmem:[#allocation2] sm:$0x3]  ;;  %v697_v0 = vunpack.c.l.bf16 %v696_v62 }
  0xf4   : > { %v690_v63 = vmul.f32 %v988_v60, %v685_v59 }
  0xf6   : > { %v695_v1 = vadd.f32 %v989_v61, %v690_v63 }
  0xf8   : > { %v698_v2 = vadd.f32 %v697_v0, %v695_v1 }
  0xfa   : > { %v699_v3 = vmax.f32 %v698_v2, 0.0 }
  0xfc   : > { %v700_v4 = vpack.c.bf16 %v699_v3, %v699_v3 }
  0xfe   : > { %701 = vst [vmem:[%s511_s28] sm:$0x1] %v700_v4 }
  0xff PF: > { %s15_s24 = sadd.s32 1, %s1044_s24   ;;  %s1299_s18 = smov %s1024_s19 }
 0x100   : > { %p12_p0 = scmp.ge.s32.totalorder %s15_s24, 74   ;;  %s1300_s19 = smov %s1128_s6 }
 0x101   : > { %s1301_s20 = smov %s1036_s22  ;;  %s1302_s21 = smov %s1040_s23 }
 0x102   : > { %s1303_s22 = smov %s1306_s25  ;;  %s1304_s23 = smov %s1310_s26 }
 0x103   :  { %14 = sbr.rel (!%p12_p0) target bundleno = 4 (0x4), region = 136 }

// kernel: resnet34_forward.76
= control target key start
LH: loop header
LB: loop body
LE: loop exit
PB: predicated region body
PF: predicated region fallthrough
CT: control target
= control target key end

     0   :  { %vm21_vm0 = vcmask 1041409   ;;  %vm23_vm1 = vcmask 1043459   ;;  %vm25_vm2 = vcmask 1045509   ;;  %vm27_vm3 = vcmask 1047559   ;;  %s55_s0 = inlined_call_operand.vmem [shape: bf16[2,1,512], index: 0, kind: input, shape index: {}]   ;;  %s56_s1 = inlined_call_operand.vmem [shape: f32[2,512], index: 1, kind: output, shape index: {}]  }
   0x1   :  { %v36_v0 = vld [vmem:[%s55_s0] sm:$0xff]  }
   0x2   :  { %v37_v1 = vunpack.c.l.bf16 %v36_v0  ;;  %v38_v2 = vunpack.c.h.bf16 %v36_v0 }
   0x4   :  { %v20_v3 = vrot.slane %v38_v2, 7 }
   0x6   :  { %v22_v4 = vsel %vm21_vm0, %v20_v3, %v37_v1 }
   0x7   :  { %v24_v5 = vsel %vm23_vm1, %v20_v3, %v22_v4 }
   0x8   :  { %v26_v6 = vsel %vm25_vm2, %v20_v3, %v24_v5 }
   0x9   :  { %v28_v7 = vsel %vm27_vm3, %v20_v3, %v26_v6 }
   0xa   :  { %30 = vst [vmem:[%s56_s1] sm:$0xff] %v28_v7 }

// kernel: resnet34_forward.77
= control target key start
LH: loop header
LB: loop body
LE: loop exit
PB: predicated region body
PF: predicated region fallthrough
CT: control target
= control target key end

     0   :  { %vm322_vm0 = vcmask 1041408   ;;  %s743_s1 = inlined_call_operand.vmem [shape: f32[512,256], index: 1, kind: input, shape index: {}]   ;;  %s744_s0 = inlined_call_operand.vmem [shape: f32[2,512], index: 0, kind: input, shape index: {}]   ;;  %s745_s2 = inlined_call_operand.vmem [shape: f32[1,256], index: 2, kind: input, shape index: {}]   ;;  %s746_s3 = inlined_call_operand.vmem [shape: f32[2,256], index: 3, kind: output, shape index: {}]  }
   0x1   :  { %v109_v0 = vld [vmem:[%s743_s1 + $0x2f0] sm:$0xff]  ;;  %v107_v2 = vld [vmem:[%s743_s1 + $0x2e0] sm:$0xff]  ;;  %v110_v62 = vld [vmem:[%s743_s1 + $0x2f8] sm:$0xff] }
   0x2   :  { %v45_v1 = vld [vmem:[%s743_s1 + $0xf0] sm:$0xff]  ;;  %199 = vmatpush.msra.mxu2 %v109_v0  ;;  %v43_v4 = vld [vmem:[%s743_s1 + $0xe0] sm:$0xff]  ;;  %v46_v0 = vld [vmem:[%s743_s1 + $0xf8] sm:$0xff] }
   0x3   :  { %159 = vmatpush.msra.mxu0 %v45_v1  ;;  %v141_v3 = vld [vmem:[%s743_s1 + $0x3f0] sm:$0xff]  ;;  %v139_v7 = vld [vmem:[%s743_s1 + $0x3e0] sm:$0xff]  ;;  %v142_v1 = vld [vmem:[%s743_s1 + $0x3f8] sm:$0xff] }
   0x4   :  { %v77_v5 = vld [vmem:[%s743_s1 + $0x1f0] sm:$0xff]  ;;  %219 = vmatpush.msra.mxu3 %v141_v3  ;;  %200 = vmatpush.msra.mxu2 %v107_v2  ;;  %v75_v9 = vld [vmem:[%s743_s1 + $0x1e0] sm:$0xff]  ;;  %v108_v2 = vld [vmem:[%s743_s1 + $0x2e8] sm:$0xff] }
   0x5   :  { %179 = vmatpush.msra.mxu1 %v77_v5  ;;  %v105_v6 = vld [vmem:[%s743_s1 + $0x2d0] sm:$0xff]  ;;  %160 = vmatpush.msra.mxu0 %v43_v4  ;;  %v103_v11 = vld [vmem:[%s743_s1 + $0x2c0] sm:$0xff]  ;;  %v44_v4 = vld [vmem:[%s743_s1 + $0xe8] sm:$0xff] }
   0x6   :  { %v41_v8 = vld [vmem:[%s743_s1 + $0xd0] sm:$0xff]  ;;  %220 = vmatpush.msra.mxu3 %v139_v7  ;;  %v39_v12 = vld [vmem:[%s743_s1 + $0xc0] sm:$0xff]  ;;  %201 = vmatpush.msra.mxu2 %v105_v6  ;;  %v78_v5 = vld [vmem:[%s743_s1 + $0x1f8] sm:$0xff] }
   0x7   :  { %v137_v10 = vld [vmem:[%s743_s1 + $0x3d0] sm:$0xff]  ;;  %180 = vmatpush.msra.mxu1 %v75_v9  ;;  %161 = vmatpush.msra.mxu0 %v41_v8  ;;  %v135_v14 = vld [vmem:[%s743_s1 + $0x3c0] sm:$0xff]  ;;  %v106_v6 = vld [vmem:[%s743_s1 + $0x2d8] sm:$0xff] }
   0x8   :  { %v73_v13 = vld [vmem:[%s743_s1 + $0x1d0] sm:$0xff]  ;;  %v71_v15 = vld [vmem:[%s743_s1 + $0x1c0] sm:$0xff]  ;;  %221 = vmatpush.msra.mxu3 %v137_v10  ;;  %202 = vmatpush.msra.mxu2 %v103_v11  ;;  %v140_v7 = vld [vmem:[%s743_s1 + $0x3e8] sm:$0xff] }
   0x9   :  { %181 = vmatpush.msra.mxu1 %v73_v13  ;;  %v101_v16 = vld [vmem:[%s743_s1 + $0x2b0] sm:$0xff]  ;;  %162 = vmatpush.msra.mxu0 %v39_v12  ;;  %v99_v20 = vld [vmem:[%s743_s1 + $0x2a0] sm:$0xff]  ;;  %v42_v8 = vld [vmem:[%s743_s1 + $0xd8] sm:$0xff] }
   0xa   :  { %v37_v17 = vld [vmem:[%s743_s1 + $0xb0] sm:$0xff]  ;;  %222 = vmatpush.msra.mxu3 %v135_v14  ;;  %v35_v21 = vld [vmem:[%s743_s1 + $0xa0] sm:$0xff]  ;;  %203 = vmatpush.msra.mxu2 %v101_v16  ;;  %v76_v9 = vld [vmem:[%s743_s1 + $0x1e8] sm:$0xff] }
   0xb   :  { %v133_v18 = vld [vmem:[%s743_s1 + $0x3b0] sm:$0xff]  ;;  %182 = vmatpush.msra.mxu1 %v71_v15  ;;  %163 = vmatpush.msra.mxu0 %v37_v17  ;;  %v131_v22 = vld [vmem:[%s743_s1 + $0x3a0] sm:$0xff]  ;;  %v104_v10 = vld [vmem:[%s743_s1 + $0x2c8] sm:$0xff] }
   0xc   :  { %v69_v19 = vld [vmem:[%s743_s1 + $0x1b0] sm:$0xff]  ;;  %v67_v23 = vld [vmem:[%s743_s1 + $0x1a0] sm:$0xff]  ;;  %223 = vmatpush.msra.mxu3 %v133_v18  ;;  %204 = vmatpush.msra.mxu2 %v99_v20  ;;  %v138_v11 = vld [vmem:[%s743_s1 + $0x3d8] sm:$0xff] }
   0xd   :  { %183 = vmatpush.msra.mxu1 %v69_v19  ;;  %v97_v24 = vld [vmem:[%s743_s1 + $0x290] sm:$0xff]  ;;  %164 = vmatpush.msra.mxu0 %v35_v21  ;;  %v95_v28 = vld [vmem:[%s743_s1 + $0x280] sm:$0xff]  ;;  %v40_v12 = vld [vmem:[%s743_s1 + $0xc8] sm:$0xff] }
   0xe   :  { %v33_v25 = vld [vmem:[%s743_s1 + $0x90] sm:$0xff]  ;;  %224 = vmatpush.msra.mxu3 %v131_v22  ;;  %v31_v29 = vld [vmem:[%s743_s1 + $0x80] sm:$0xff]  ;;  %205 = vmatpush.msra.mxu2 %v97_v24  ;;  %v74_v13 = vld [vmem:[%s743_s1 + $0x1d8] sm:$0xff] }
   0xf   :  { %v129_v26 = vld [vmem:[%s743_s1 + $0x390] sm:$0xff]  ;;  %184 = vmatpush.msra.mxu1 %v67_v23  ;;  %165 = vmatpush.msra.mxu0 %v33_v25  ;;  %v127_v30 = vld [vmem:[%s743_s1 + $0x380] sm:$0xff]  ;;  %v102_v15 = vld [vmem:[%s743_s1 + $0x2b8] sm:$0xff] }
  0x10   :  { %v65_v27 = vld [vmem:[%s743_s1 + $0x190] sm:$0xff]  ;;  %v63_v31 = vld [vmem:[%s743_s1 + $0x180] sm:$0xff]  ;;  %225 = vmatpush.msra.mxu3 %v129_v26  ;;  %206 = vmatpush.msra.mxu2 %v95_v28  ;;  %v136_v16 = vld [vmem:[%s743_s1 + $0x3c8] sm:$0xff] }
  0x11   :  { %185 = vmatpush.msra.mxu1 %v65_v27  ;;  %v93_v32 = vld [vmem:[%s743_s1 + $0x270] sm:$0xff]  ;;  %166 = vmatpush.msra.mxu0 %v31_v29  ;;  %v91_v36 = vld [vmem:[%s743_s1 + $0x260] sm:$0xff]  ;;  %v38_v17 = vld [vmem:[%s743_s1 + $0xb8] sm:$0xff] }
  0x12   :  { %v29_v33 = vld [vmem:[%s743_s1 + $0x70] sm:$0xff]  ;;  %226 = vmatpush.msra.mxu3 %v127_v30  ;;  %v27_v37 = vld [vmem:[%s743_s1 + $0x60] sm:$0xff]  ;;  %207 = vmatpush.msra.mxu2 %v93_v32  ;;  %v72_v18 = vld [vmem:[%s743_s1 + $0x1c8] sm:$0xff] }
  0x13   :  { %v125_v34 = vld [vmem:[%s743_s1 + $0x370] sm:$0xff]  ;;  %186 = vmatpush.msra.mxu1 %v63_v31  ;;  %167 = vmatpush.msra.mxu0 %v29_v33  ;;  %v123_v38 = vld [vmem:[%s743_s1 + $0x360] sm:$0xff]  ;;  %v100_v19 = vld [vmem:[%s743_s1 + $0x2a8] sm:$0xff] }
  0x14   :  { %v61_v35 = vld [vmem:[%s743_s1 + $0x170] sm:$0xff]  ;;  %v59_v39 = vld [vmem:[%s743_s1 + $0x160] sm:$0xff]  ;;  %227 = vmatpush.msra.mxu3 %v125_v34  ;;  %208 = vmatpush.msra.mxu2 %v91_v36  ;;  %v134_v20 = vld [vmem:[%s743_s1 + $0x3b8] sm:$0xff] }
  0x15   :  { %187 = vmatpush.msra.mxu1 %v61_v35  ;;  %v89_v40 = vld [vmem:[%s743_s1 + $0x250] sm:$0xff]  ;;  %168 = vmatpush.msra.mxu0 %v27_v37  ;;  %v87_v44 = vld [vmem:[%s743_s1 + $0x240] sm:$0xff]  ;;  %v36_v21 = vld [vmem:[%s743_s1 + $0xa8] sm:$0xff] }
  0x16   :  { %v25_v41 = vld [vmem:[%s743_s1 + $0x50] sm:$0xff]  ;;  %228 = vmatpush.msra.mxu3 %v123_v38  ;;  %v23_v45 = vld [vmem:[%s743_s1 + $0x40] sm:$0xff]  ;;  %209 = vmatpush.msra.mxu2 %v89_v40  ;;  %v70_v22 = vld [vmem:[%s743_s1 + $0x1b8] sm:$0xff] }
  0x17   :  { %v121_v42 = vld [vmem:[%s743_s1 + $0x350] sm:$0xff]  ;;  %188 = vmatpush.msra.mxu1 %v59_v39  ;;  %169 = vmatpush.msra.mxu0 %v25_v41  ;;  %v119_v46 = vld [vmem:[%s743_s1 + $0x340] sm:$0xff]  ;;  %v98_v23 = vld [vmem:[%s743_s1 + $0x298] sm:$0xff] }
  0x18   :  { %v57_v43 = vld [vmem:[%s743_s1 + $0x150] sm:$0xff]  ;;  %v55_v47 = vld [vmem:[%s743_s1 + $0x140] sm:$0xff]  ;;  %229 = vmatpush.msra.mxu3 %v121_v42  ;;  %210 = vmatpush.msra.mxu2 %v87_v44  ;;  %v132_v24 = vld [vmem:[%s743_s1 + $0x3a8] sm:$0xff] }
  0x19   :  { %189 = vmatpush.msra.mxu1 %v57_v43  ;;  %v85_v48 = vld [vmem:[%s743_s1 + $0x230] sm:$0xff]  ;;  %170 = vmatpush.msra.mxu0 %v23_v45  ;;  %v83_v52 = vld [vmem:[%s743_s1 + $0x220] sm:$0xff]  ;;  %v34_v25 = vld [vmem:[%s743_s1 + $0x98] sm:$0xff] }
  0x1a   :  { %v21_v49 = vld [vmem:[%s743_s1 + $0x30] sm:$0xff]  ;;  %230 = vmatpush.msra.mxu3 %v119_v46  ;;  %v19_v53 = vld [vmem:[%s743_s1 + $0x20] sm:$0xff]  ;;  %211 = vmatpush.msra.mxu2 %v85_v48  ;;  %v68_v26 = vld [vmem:[%s743_s1 + $0x1a8] sm:$0xff] }
  0x1b   :  { %v117_v50 = vld [vmem:[%s743_s1 + $0x330] sm:$0xff]  ;;  %190 = vmatpush.msra.mxu1 %v55_v47  ;;  %171 = vmatpush.msra.mxu0 %v21_v49  ;;  %v115_v54 = vld [vmem:[%s743_s1 + $0x320] sm:$0xff]  ;;  %v96_v27 = vld [vmem:[%s743_s1 + $0x288] sm:$0xff] }
  0x1c   :  { %v53_v51 = vld [vmem:[%s743_s1 + $0x130] sm:$0xff]  ;;  %v51_v55 = vld [vmem:[%s743_s1 + $0x120] sm:$0xff]  ;;  %231 = vmatpush.msra.mxu3 %v117_v50  ;;  %212 = vmatpush.msra.mxu2 %v83_v52  ;;  %v130_v28 = vld [vmem:[%s743_s1 + $0x398] sm:$0xff] }
  0x1d   :  { %191 = vmatpush.msra.mxu1 %v53_v51  ;;  %v81_v56 = vld [vmem:[%s743_s1 + $0x210] sm:$0xff]  ;;  %172 = vmatpush.msra.mxu0 %v19_v53  ;;  %v79_v60 = vld [vmem:[%s743_s1 + $0x200] sm:$0xff]  ;;  %v32_v29 = vld [vmem:[%s743_s1 + $0x88] sm:$0xff] }
  0x1e   :  { %v17_v57 = vld [vmem:[%s743_s1 + $0x10] sm:$0xff]  ;;  %232 = vmatpush.msra.mxu3 %v115_v54  ;;  %v15_v61 = vld [vmem:[%s743_s1] sm:$0xff]  ;;  %213 = vmatpush.msra.mxu2 %v81_v56  ;;  %v66_v30 = vld [vmem:[%s743_s1 + $0x198] sm:$0xff] }
  0x1f   :  { %v113_v58 = vld [vmem:[%s743_s1 + $0x310] sm:$0xff]  ;;  %192 = vmatpush.msra.mxu1 %v51_v55  ;;  %173 = vmatpush.msra.mxu0 %v17_v57  ;;  %v111_v63 = vld [vmem:[%s743_s1 + $0x300] sm:$0xff]  ;;  %v94_v31 = vld [vmem:[%s743_s1 + $0x278] sm:$0xff] }
  0x20   :  { %v49_v59 = vld [vmem:[%s743_s1 + $0x110] sm:$0xff]  ;;  %233 = vmatpush.msra.mxu3 %v113_v58  ;;  %214 = vmatpush.msra.mxu2 %v79_v60  ;;  %v47_v3 = vld [vmem:[%s743_s1 + $0x100] sm:$0xff]  ;;  %v128_v32 = vld [vmem:[%s743_s1 + $0x388] sm:$0xff] }
  0x21   :  { %193 = vmatpush.msra.mxu1 %v49_v59  ;;  %174 = vmatpush.msra.mxu0 %v15_v61  ;;  %v14_v14 = vld [vmem:[%s744_s0] sm:$0xff]  ;;  %v30_v33 = vld [vmem:[%s743_s1 + $0x78] sm:$0xff]  ;;  %v64_v34 = vld [vmem:[%s743_s1 + $0x188] sm:$0xff] }
  0x22   :  { %279 = vmatpush.msrb.mxu2 %v110_v62  ;;  %234 = vmatpush.msra.mxu3 %v111_v63  ;;  %150 = vst [vmem:[#allocation1] ss:$4 sm:$0xff] %v14_v14  ;;  %v92_v35 = vld [vmem:[%s743_s1 + $0x268] sm:$0xff]  ;;  %v126_v36 = vld [vmem:[%s743_s1 + $0x378] sm:$0xff] }
  0x23   :  { %239 = vmatpush.msrb.mxu0 %v46_v0  ;;  %194 = vmatpush.msra.mxu1 %v47_v3  ;;  %v28_v37 = vld [vmem:[%s743_s1 + $0x68] sm:$0xff]  ;;  %v62_v38 = vld [vmem:[%s743_s1 + $0x178] sm:$0xff] }
  0x24   :  { %299 = vmatpush.msrb.mxu3 %v142_v1  ;;  %280 = vmatpush.msrb.mxu2 %v108_v2  ;;  %v90_v39 = vld [vmem:[%s743_s1 + $0x258] sm:$0xff]  ;;  %v124_v40 = vld [vmem:[%s743_s1 + $0x368] sm:$0xff] }
  0x25   :  { %240 = vmatpush.msrb.mxu0 %v44_v4  ;;  %259 = vmatpush.msrb.mxu1 %v78_v5  ;;  %v26_v41 = vld [vmem:[%s743_s1 + $0x58] sm:$0xff]  ;;  %v60_v42 = vld [vmem:[%s743_s1 + $0x168] sm:$0xff]  ;;  %v143_v5 = vld [vmem:[%s745_s2] sm:$0x3] }
  0x26   :  { %281 = vmatpush.msrb.mxu2 %v106_v6  ;;  %300 = vmatpush.msrb.mxu3 %v140_v7  ;;  %v88_v43 = vld [vmem:[%s743_s1 + $0x248] sm:$0xff]  ;;  %v122_v44 = vld [vmem:[%s743_s1 + $0x358] sm:$0xff]  ;;  %v145_v7 = vperm.slane %v143_v5, 0 }
  0x27   :  { %241 = vmatpush.msrb.mxu0 %v42_v8  ;;  %260 = vmatpush.msrb.mxu1 %v76_v9  ;;  %v24_v46 = vld [vmem:[%s743_s1 + $0x48] sm:$0xff]  ;;  %v58_v47 = vld [vmem:[%s743_s1 + $0x158] sm:$0xff] }
  0x28   :  { %282 = vmatpush.msrb.mxu2 %v104_v10  ;;  %301 = vmatpush.msrb.mxu3 %v138_v11  ;;  %v86_v48 = vld [vmem:[%s743_s1 + $0x238] sm:$0xff]  ;;  %v120_v49 = vld [vmem:[%s743_s1 + $0x348] sm:$0xff] }
  0x29   :  { %242 = vmatpush.msrb.mxu0 %v40_v12  ;;  %261 = vmatpush.msrb.mxu1 %v74_v13  ;;  %v153_v45 = vld.sshfl [vmem:[#allocation1 + $0x10] sm:$0xff pattern:$0x73625140]  ;;  %v151_v50 = vld.sshfl [vmem:[#allocation1] sm:$0xff pattern:$0x73625140] }
  0x2a   :  { %283 = vmatpush.msrb.mxu2 %v102_v15  ;;  %302 = vmatpush.msrb.mxu3 %v136_v16  ;;  %v154_v51 = vld.sshfl [vmem:[#allocation1 + $0x18] sm:$0xff pattern:$0x73625140]  ;;  %v56_v53 = vld [vmem:[%s743_s1 + $0x148] sm:$0xff]  ;;  %v146_v12 = vperm.slane %v143_v5, 1 }
  0x2b   :  { %243 = vmatpush.msrb.mxu0 %v38_v17  ;;  %262 = vmatpush.msrb.mxu1 %v72_v18  ;;  %v22_v52 = vld [vmem:[%s743_s1 + $0x38] sm:$0xff]  ;;  %v84_v54 = vld [vmem:[%s743_s1 + $0x228] sm:$0xff] }
  0x2c   :  { %284 = vmatpush.msrb.mxu2 %v100_v19  ;;  %303 = vmatpush.msrb.mxu3 %v134_v20  ;;  %v118_v55 = vld [vmem:[%s743_s1 + $0x338] sm:$0xff]  ;;  %v152_v56 = vld.sshfl [vmem:[#allocation1 + $0x8] sm:$0xff pattern:$0x73625140] }
  0x2d   :  { %244 = vmatpush.msrb.mxu0 %v36_v21  ;;  %263 = vmatpush.msrb.mxu1 %v70_v22  ;;  %v20_v57 = vld [vmem:[%s743_s1 + $0x28] sm:$0xff]  ;;  %v54_v58 = vld [vmem:[%s743_s1 + $0x138] sm:$0xff] }
  0x2e   :  { %285 = vmatpush.msrb.mxu2 %v98_v23  ;;  %304 = vmatpush.msrb.mxu3 %v132_v24  ;;  %v82_v59 = vld [vmem:[%s743_s1 + $0x218] sm:$0xff]  ;;  %v116_v60 = vld [vmem:[%s743_s1 + $0x328] sm:$0xff] }
  0x2f   :  { %245 = vmatpush.msrb.mxu0 %v34_v25  ;;  %264 = vmatpush.msrb.mxu1 %v68_v26  ;;  %v18_v61 = vld [vmem:[%s743_s1 + $0x18] sm:$0xff]  ;;  %v52_v62 = vld [vmem:[%s743_s1 + $0x128] sm:$0xff] }
  0x30   :  { %286 = vmatpush.msrb.mxu2 %v96_v27  ;;  %305 = vmatpush.msrb.mxu3 %v130_v28  ;;  %v80_v63 = vld [vmem:[%s743_s1 + $0x208] sm:$0xff]  ;;  %v114_v0 = vld [vmem:[%s743_s1 + $0x318] sm:$0xff] }
  0x31   :  { %246 = vmatpush.msrb.mxu0 %v32_v29  ;;  %265 = vmatpush.msrb.mxu1 %v66_v30  ;;  %v16_v1 = vld [vmem:[%s743_s1 + $0x8] sm:$0xff]  ;;  %v50_v2 = vld [vmem:[%s743_s1 + $0x118] sm:$0xff] }
  0x32   :  { %287 = vmatpush.msrb.mxu2 %v94_v31  ;;  %306 = vmatpush.msrb.mxu3 %v128_v32  ;;  %v112_v3 = vld [vmem:[%s743_s1 + $0x308] sm:$0xff] }
  0x33   :  { %247 = vmatpush.msrb.mxu0 %v30_v33  ;;  %266 = vmatpush.msrb.mxu1 %v64_v34  ;;  %v48_v4 = vld [vmem:[%s743_s1 + $0x108] sm:$0xff] }
  0x34   :  { %288 = vmatpush.msrb.mxu2 %v92_v35  ;;  %307 = vmatpush.msrb.mxu3 %v126_v36 }
  0x35   :  { %248 = vmatpush.msrb.mxu0 %v28_v37  ;;  %267 = vmatpush.msrb.mxu1 %v62_v38 }
  0x36   :  { %289 = vmatpush.msrb.mxu2 %v90_v39  ;;  %308 = vmatpush.msrb.mxu3 %v124_v40 }
  0x37   :  { %249 = vmatpush.msrb.mxu0 %v26_v41  ;;  %268 = vmatpush.msrb.mxu1 %v60_v42 }
  0x38   :  { %290 = vmatpush.msrb.mxu2 %v88_v43  ;;  %309 = vmatpush.msrb.mxu3 %v122_v44 }
  0x39   :  { %215 = vmatmul.f32.vlgmr.msra.gmra.mxu2 %v153_v45  ;;  %250 = vmatpush.msrb.mxu0 %v24_v46 }
  0x3a   :  { %269 = vmatpush.msrb.mxu1 %v58_v47  ;;  %291 = vmatpush.msrb.mxu2 %v86_v48 }
  0x3b   :  { %310 = vmatpush.msrb.mxu3 %v120_v49  ;;  %175 = vmatmul.f32.vlgmr.msra.gmra.mxu0 %v151_v50 }
  0x3c   :  { %235 = vmatmul.f32.vlgmr.msra.gmra.mxu3 %v154_v51  ;;  %251 = vmatpush.msrb.mxu0 %v22_v52 }
  0x3d   :  { %270 = vmatpush.msrb.mxu1 %v56_v53  ;;  %292 = vmatpush.msrb.mxu2 %v84_v54 }
  0x3e   :  { %311 = vmatpush.msrb.mxu3 %v118_v55  ;;  %195 = vmatmul.f32.vlgmr.msra.gmra.mxu1 %v152_v56 }
  0x3f   :  { %252 = vmatpush.msrb.mxu0 %v20_v57  ;;  %271 = vmatpush.msrb.mxu1 %v54_v58 }
  0x40   :  { %293 = vmatpush.msrb.mxu2 %v82_v59  ;;  %312 = vmatpush.msrb.mxu3 %v116_v60 }
  0x41   :  { %253 = vmatpush.msrb.mxu0 %v18_v61  ;;  %272 = vmatpush.msrb.mxu1 %v52_v62 }
  0x42   :  { %294 = vmatpush.msrb.mxu2 %v80_v63  ;;  %313 = vmatpush.msrb.mxu3 %v114_v0 }
  0x43   :  { %295 = vmatmul.f32.vlgmr.msrb.gmra.mxu2 %v153_v45  ;;  %254 = vmatpush.msrb.mxu0 %v16_v1 }
  0x44   :  { %273 = vmatpush.msrb.mxu1 %v50_v2  ;;  %314 = vmatpush.msrb.mxu3 %v112_v3 }
  0x45   :  { %255 = vmatmul.f32.vlgmr.msrb.gmra.mxu0 %v151_v50  ;;  %315 = vmatmul.f32.vlgmr.msrb.gmra.mxu3 %v154_v51 }
  0x46   :  { %274 = vmatpush.msrb.mxu1 %v48_v4 }
  0x47   :  { %275 = vmatmul.f32.vlgmr.msrb.gmra.mxu1 %v152_v56 }
  0xb8   :  { %v176_v6 = vpop.f32.mrf.mxu0 }
  0xb9   :  { %v177_v10 = vadd.f32 %v176_v6, %v145_v7 }
  0xbb   :  { %v196_v8 = vpop.f32.mrf.mxu1 }
  0xbc   :  { %v216_v9 = vpop.f32.mrf.mxu2  ;;  %v197_v14 = vadd.f32 %v196_v8, %v177_v10 }
  0xbe   :  { %v217_v19 = vadd.f32 %v216_v9, %v197_v14 }
  0xbf   :  { %v236_v11 = vpop.f32.mrf.mxu3 }
  0xc0   :  { %v237_v23 = vadd.f32 %v236_v11, %v217_v19 }
  0xc2   :  { %v256_v13 = vpop.f32.mrf.mxu0 }
  0xc3   :  { %v257_v15 = vadd.f32 %v256_v13, %v146_v12 }
  0xc4   :  { %v276_v16 = vpop.f32.mrf.mxu1 }
  0xc5   :  { %v277_v17 = vadd.f32 %v276_v16, %v257_v15 }
  0xc6   :  { %v296_v18 = vpop.f32.mrf.mxu2 }
  0xc7   :  { %v297_v20 = vadd.f32 %v296_v18, %v277_v17 }
  0xc8   :  { %v316_v21 = vpop.f32.mrf.mxu3 }
  0xc9   :  { %v317_v22 = vadd.f32 %v316_v21, %v297_v20 }
  0xcb   :  { %v321_v24 = vrot.slane %v317_v22, 6 }
  0xcd   :  { %v323_v25 = vsel %vm322_vm0, %v237_v23, %v321_v24 }
  0xce   :  { %325 = vst [vmem:[%s746_s3] sm:$0xf] %v323_v25 }

</bundles_post_ra>
